<compile_context>
chip_gen: v6e
topology: v6e:2x2x1
jax: 0.10.0
libtpu: 0.0.40
codegen_flags: <defaults>
</compile_context>

<pallas_src>
import functools

import numpy as np
import jax
import jax.numpy as jnp
from jax import lax
from jax.experimental import pallas as pl
from jax.experimental.pallas import tpu as pltpu

TARGET = (224, 224)


def _interp_matrix(out_size, in_size):
    """1-D bilinear interpolation matrix, PyTorch align_corners=False semantics."""
    i = np.arange(out_size, dtype=np.float64)
    src = (i + 0.5) * (in_size / out_size) - 0.5
    src = np.maximum(src, 0.0)
    i0 = np.minimum(np.floor(src).astype(np.int64), in_size - 1)
    frac = src - i0
    i1 = np.minimum(i0 + 1, in_size - 1)
    w = np.zeros((out_size, in_size), dtype=np.float32)
    rows = np.arange(out_size)
    w[rows, i0] += (1.0 - frac).astype(np.float32)
    w[rows, i1] += frac.astype(np.float32)
    return w


def _block_diag(w, n):
    """n copies of w on the diagonal -> one wide MXU matmul instead of n small ones."""
    r, c = w.shape
    bd = np.zeros((n * r, n * c), dtype=np.float32)
    for i in range(n):
        bd[i * r:(i + 1) * r, i * c:(i + 1) * c] = w
    return bd


# ---------------------------------------------------------------------------
# Kernel 1: fused resize (2 wide matmuls) + global stats + normalization.
# ---------------------------------------------------------------------------
def _resize_norm_kernel(wy_bd_ref, wxt_ref, x_ref, patch_ref, *,
                        B, C, hs, ws, h_act, x0, n_el):
    # Stage 1 (columns): (B*C*Hin, Win) @ (Win, 224) — resized columns land at
    # lane offset x0, all other columns are exactly zero.
    t = jnp.dot(x_ref[...], wxt_ref[...], preferred_element_type=jnp.float32)
    # Stage 2 (rows): one block-diagonal matmul covering every (batch, channel).
    r = jnp.dot(wy_bd_ref[...], t.astype(jnp.bfloat16),
                preferred_element_type=jnp.float32)           # (B*C*hs, 224)

    # Global statistics over the real resized data (torch.mean / torch.std,
    # unbiased).  Zero-shifted columns add nothing to the sum; the centered
    # pass masks them out -> exact two-pass variance, no cancellation issue.
    total = jnp.sum(r, keepdims=True)                         # (1, 1)
    mean = total * (1.0 / n_el)
    col = lax.broadcasted_iota(jnp.int32, r.shape, 1)
    real = (col >= x0) & (col < x0 + ws)
    d = jnp.where(real, r - mean, 0.0)
    var = jnp.sum(d * d, keepdims=True) * (1.0 / max(n_el - 1, 1))
    inv_std = 1.0 / (jnp.sqrt(var) + 1e-5)

    # Normalize + emit the channel-0 patch of every batch item (rows already in
    # the paste row range, columns already at the paste lane offset).  Columns
    # outside [x0, x0+ws) hold (0-mean)*inv_std and are masked again in kernel 2.
    for b in range(B):
        rows = r[b * C * hs:b * C * hs + h_act, :]
        patch_ref[b] = (rows - mean) * inv_std


def _resize_and_normalize(x_stack, wy_bd, wxt_shift, *, B, C, hs, ws, h_act, x0):
    n_el = B * C * hs * ws
    kernel = functools.partial(_resize_norm_kernel, B=B, C=C, hs=hs, ws=ws,
                               h_act=h_act, x0=x0, n_el=n_el)
    return pl.pallas_call(
        kernel,
        out_shape=jax.ShapeDtypeStruct((B, h_act, TARGET[1]), jnp.float32),
        grid=(1,),
        in_specs=[
            pl.BlockSpec(wy_bd.shape, lambda i: (0, 0)),       # block-diag Wy (const)
            pl.BlockSpec(wxt_shift.shape, lambda i: (0, 0)),   # shifted Wx^T (const)
            pl.BlockSpec(x_stack.shape, lambda i: (0, 0)),     # all batch*channel rows
        ],
        out_specs=pl.BlockSpec((B, h_act, TARGET[1]), lambda i: (0, 0, 0)),
        compiler_params=pltpu.CompilerParams(dimension_semantics=("arbitrary",)),
    )(wy_bd, wxt_shift, x_stack)


# ---------------------------------------------------------------------------
# Kernel 2: DMA canvas copy (overlapped) + lane-aligned masked merge.
# ---------------------------------------------------------------------------
def _paste_kernel(canvas_ref, patch_ref, out_ref, copy_sem, *, y0, x0, w_act, h_act):
    # Offload the (3,224,224) canvas copy to the DMA engine; build the merged
    # rows (reads only canvas_ref / patch_ref) while the copy is in flight.
    cp = pltpu.make_async_copy(canvas_ref, out_ref, copy_sem)
    cp.start()

    col = lax.broadcasted_iota(jnp.int32, (h_act, TARGET[1]), 1)
    in_patch = (col >= x0) & (col < x0 + w_act)
    patch = patch_ref[...]                                     # (h_act, 224), normalized
    merged = [jnp.where(in_patch, patch, canvas_ref[ch, pl.ds(y0, h_act), :])
              for ch in range(3)]

    cp.wait()
    for ch in range(3):                                        # full-width row stores
        out_ref[ch, pl.ds(y0, h_act), :] = merged[ch]


def _paste_into_canvas(canvas, patch, *, y0, x0, h_act, w_act):
    h, w = TARGET
    b = patch.shape[0]
    kernel = functools.partial(_paste_kernel, y0=y0, x0=x0, w_act=w_act, h_act=h_act)
    return pl.pallas_call(
        kernel,
        out_shape=jax.ShapeDtypeStruct((b, 3, h, w), jnp.float32),
        grid=(b,),
        in_specs=[
            pl.BlockSpec((None, 3, h, w), lambda i: (0, 0, 0, 0)),  # canvas, resident
            pl.BlockSpec((None, h_act, w), lambda i: (i, 0, 0)),    # per-batch patch
        ],
        out_specs=pl.BlockSpec((None, 3, h, w), lambda i: (i, 0, 0, 0)),
        scratch_shapes=[pltpu.SemaphoreType.DMA],
        compiler_params=pltpu.CompilerParams(dimension_semantics=("parallel",)),
    )(canvas, patch)


# ---------------------------------------------------------------------------
# Module wrapper
# ---------------------------------------------------------------------------
class VisualPromptAdapterPallas:
    def __init__(self, embed_size=(128, 128), position=(10, 10),
                 init_scale=0.01, key=None):
        self.target_size = TARGET
        self.embed_size = embed_size
        self.position = position
        key = jax.random.PRNGKey(42) if key is None else key
        # "learnable" prompt canvas as a plain array (forward pass only)
        self.prompt_canvas = (jax.random.normal(
            key, (1, 3, TARGET[0], TARGET[1]), jnp.float32) * init_scale)
        self._forward = jax.jit(self._forward_impl)

    def __call__(self, x):
        return self._forward(x)

    def _forward_impl(self, x):
        b, c, hin, win = x.shape
        hs, ws = self.embed_size
        y0, x0 = self.position
        y1 = min(y0 + hs, TARGET[0])
        x1 = min(x0 + ws, TARGET[1])
        h_act, w_act = y1 - y0, x1 - x0
        # TODO(synk): if the embed region were clipped horizontally
        # (x0 + ws > 224) the shifted-Wx layout could not carry all ws columns
        # needed for the statistics; the default configuration never clips there.
        assert x0 + ws <= TARGET[1]
        # TODO(synk): the block-diagonal Wy grows as (B*C)^2; for large batches
        # switch back to a per-batch grid with C-wide block-diagonal instead.

        wy = _interp_matrix(hs, hin)
        wx = _interp_matrix(ws, win)
        wy_bd = jnp.asarray(_block_diag(wy, b * c), jnp.bfloat16)
        wxt_shift = np.zeros((win, TARGET[1]), dtype=np.float32)
        wxt_shift[:, x0:x0 + ws] = wx.T
        wxt_shift = jnp.asarray(wxt_shift, jnp.bfloat16)

        # stack batch & channels on the sublane axis: free, contiguous reshape
        x_stack = x.reshape(b * c * hin, win).astype(jnp.bfloat16)

        patch = _resize_and_normalize(x_stack, wy_bd, wxt_shift, B=b, C=c,
                                      hs=hs, ws=ws, h_act=h_act, x0=x0)
        return _paste_into_canvas(self.prompt_canvas, patch,
                                  y0=y0, x0=x0, h_act=h_act, w_act=w_act)


if __name__ == "__main__":
    key = jax.random.PRNGKey(0)
    kx, kc = jax.random.split(key)

    B, C, HIN, WIN = 2, 4, 16, 16
    x = jax.random.normal(kx, (B, C, HIN, WIN), jnp.float32)

    adapter = VisualPromptAdapterPallas(embed_size=(128, 128),
                                        position=(10, 10),
                                        init_scale=0.01, key=kc)
    out = jax.block_until_ready(adapter(x))
    assert out.shape == (B, 3, 224, 224)

    # float64 numpy reference (same interpolation matrices) for a sanity check
    hs, ws = adapter.embed_size
    wy64 = _interp_matrix(hs, HIN).astype(np.float64)
    wx64 = _interp_matrix(ws, WIN).astype(np.float64)
    x64 = np.asarray(x, np.float64)
    ref_small = np.einsum('oi,bcip,qp->bcoq', wy64, x64, wx64)
    m = ref_small.mean()
    s = ref_small.std(ddof=1) + 1e-5
    norm = (ref_small - m) / s
    y0, x0p = adapter.position
    y1, x1p = min(y0 + hs, 224), min(x0p + ws, 224)
    ref = np.broadcast_to(np.asarray(adapter.prompt_canvas),
                          (B, 3, 224, 224)).astype(np.float64)
    ref[:, :, y0:y1, x0p:x1p] = norm[:, 0:1, :y1 - y0, :x1p - x0p]
    np.testing.assert_allclose(np.asarray(out), ref, rtol=5e-2, atol=5e-2)

    print("KERNEL_OK")
</pallas_src>

<mosaic_0001>
module attributes {stable_mosaic.version = 11 : i64} {
  func.func @_paste_kernel(%arg0: i32, %arg1: memref<1x3x224x224xf32, #tpu.memory_space<vmem>>, %arg2: memref<1x128x224xf32, #tpu.memory_space<vmem>>, %arg3: memref<1x3x224x224xf32, #tpu.memory_space<vmem>>, %arg4: memref<!tpu.dma_semaphore, #tpu.memory_space<semaphore_mem>>) attributes {dimension_semantics = [#tpu.dimension_semantics<parallel>], iteration_bounds = array<i64: 2>, scalar_prefetch = 0 : i64, scratch_operands = 1 : i64, tpu.core_type = #tpu.core_type<tc>, window_params = [{pipeline_mode = #tpu.pipeline_mode<synchronous>, transform_indices = @transform_0, window_bounds = array<i64: 1, 3, 224, 224>}, {transform_indices = @transform_1, window_bounds = array<i64: 1, 128, 224>}, {transform_indices = @transform_2, window_bounds = array<i64: 1, 3, 224, 224>}]} {
    tpu.enqueue_dma source(%arg1 : memref<1x3x224x224xf32, #tpu.memory_space<vmem>>) target(%arg3 : memref<1x3x224x224xf32, #tpu.memory_space<vmem>>) target_semaphore(%arg4 : memref<!tpu.dma_semaphore, #tpu.memory_space<semaphore_mem>>)
    %0 = tpu.iota {dimensions = array<i32: 1>} : vector<128x224xi32>
    %c10_i32 = arith.constant 10 : i32
    %1 = vector.broadcast %c10_i32 : i32 to vector<128x224xi32>
    %2 = arith.cmpi sge, %0, %1 : vector<128x224xi32>
    %c138_i32 = arith.constant 138 : i32
    %3 = vector.broadcast %c138_i32 : i32 to vector<128x224xi32>
    %4 = arith.cmpi slt, %0, %3 : vector<128x224xi32>
    %5 = arith.andi %2, %4 : vector<128x224xi1>
    %c0 = arith.constant 0 : index
    %c0_0 = arith.constant 0 : index
    %c0_1 = arith.constant 0 : index
    %6 = vector.load %arg2[%c0, %c0_0, %c0_1] : memref<1x128x224xf32, #tpu.memory_space<vmem>>, vector<1x128x224xf32>
    %7 = vector.shape_cast %6 : vector<1x128x224xf32> to vector<128x224xf32>
    %c0_2 = arith.constant 0 : index
    %c0_3 = arith.constant 0 : index
    %c10 = arith.constant 10 : index
    %c0_4 = arith.constant 0 : index
    %8 = vector.load %arg1[%c0_2, %c0_3, %c10, %c0_4] : memref<1x3x224x224xf32, #tpu.memory_space<vmem>>, vector<1x1x128x224xf32>
    %9 = vector.shape_cast %8 : vector<1x1x128x224xf32> to vector<128x224xf32>
    %10 = arith.select %5, %7, %9 : vector<128x224xi1>, vector<128x224xf32>
    %c0_5 = arith.constant 0 : index
    %c1 = arith.constant 1 : index
    %c10_6 = arith.constant 10 : index
    %c0_7 = arith.constant 0 : index
    %11 = vector.load %arg1[%c0_5, %c1, %c10_6, %c0_7] : memref<1x3x224x224xf32, #tpu.memory_space<vmem>>, vector<1x1x128x224xf32>
    %12 = vector.shape_cast %11 : vector<1x1x128x224xf32> to vector<128x224xf32>
    %13 = arith.select %5, %7, %12 : vector<128x224xi1>, vector<128x224xf32>
    %c0_8 = arith.constant 0 : index
    %c2 = arith.constant 2 : index
    %c10_9 = arith.constant 10 : index
    %c0_10 = arith.constant 0 : index
    %14 = vector.load %arg1[%c0_8, %c2, %c10_9, %c0_10] : memref<1x3x224x224xf32, #tpu.memory_space<vmem>>, vector<1x1x128x224xf32>
    %15 = vector.shape_cast %14 : vector<1x1x128x224xf32> to vector<128x224xf32>
    %16 = arith.select %5, %7, %15 : vector<128x224xi1>, vector<128x224xf32>
    tpu.wait_dma2 semaphore(%arg4 : memref<!tpu.dma_semaphore, #tpu.memory_space<semaphore_mem>>) src(%arg1 : memref<1x3x224x224xf32, #tpu.memory_space<vmem>>) dst(%arg3 : memref<1x3x224x224xf32, #tpu.memory_space<vmem>>)
    %c0_11 = arith.constant 0 : index
    %c0_12 = arith.constant 0 : index
    %c10_13 = arith.constant 10 : index
    %c0_14 = arith.constant 0 : index
    %17 = vector.load %arg3[%c0_11, %c0_12, %c10_13, %c0_14] : memref<1x3x224x224xf32, #tpu.memory_space<vmem>>, vector<1x1x128x224xf32>
    %18 = vector.shape_cast %17 : vector<1x1x128x224xf32> to vector<128x224xf32>
    %19 = vector.shape_cast %10 : vector<128x224xf32> to vector<1x1x128x224xf32>
    tpu.vector_store %arg3[%c0_11, %c0_12, %c10_13, %c0_14], %19 {strides = array<i32>} : memref<1x3x224x224xf32, #tpu.memory_space<vmem>>, vector<1x1x128x224xf32>,
    %c0_15 = arith.constant 0 : index
    %c1_16 = arith.constant 1 : index
    %c10_17 = arith.constant 10 : index
    %c0_18 = arith.constant 0 : index
    %20 = vector.load %arg3[%c0_15, %c1_16, %c10_17, %c0_18] : memref<1x3x224x224xf32, #tpu.memory_space<vmem>>, vector<1x1x128x224xf32>
    %21 = vector.shape_cast %20 : vector<1x1x128x224xf32> to vector<128x224xf32>
    %22 = vector.shape_cast %13 : vector<128x224xf32> to vector<1x1x128x224xf32>
    tpu.vector_store %arg3[%c0_15, %c1_16, %c10_17, %c0_18], %22 {strides = array<i32>} : memref<1x3x224x224xf32, #tpu.memory_space<vmem>>, vector<1x1x128x224xf32>,
    %c0_19 = arith.constant 0 : index
    %c2_20 = arith.constant 2 : index
    %c10_21 = arith.constant 10 : index
    %c0_22 = arith.constant 0 : index
    %23 = vector.load %arg3[%c0_19, %c2_20, %c10_21, %c0_22] : memref<1x3x224x224xf32, #tpu.memory_space<vmem>>, vector<1x1x128x224xf32>
    %24 = vector.shape_cast %23 : vector<1x1x128x224xf32> to vector<128x224xf32>
    %25 = vector.shape_cast %16 : vector<128x224xf32> to vector<1x1x128x224xf32>
    tpu.vector_store %arg3[%c0_19, %c2_20, %c10_21, %c0_22], %25 {strides = array<i32>} : memref<1x3x224x224xf32, #tpu.memory_space<vmem>>, vector<1x1x128x224xf32>,
    return
  }
  func.func @transform_0(%arg0: i32) -> (i32, i32, i32, i32) {
    %c0_i32 = arith.constant 0 : i32
    %c0_i32_0 = arith.constant 0 : i32
    %c0_i32_1 = arith.constant 0 : i32
    %c0_i32_2 = arith.constant 0 : i32
    %c0_i32_3 = arith.constant 0 : i32
    return %c0_i32, %c0_i32_0, %c0_i32_1, %c0_i32_2 : i32, i32, i32, i32
  }
  func.func @transform_1(%arg0: i32) -> (i32, i32, i32) {
    %c0_i32 = arith.constant 0 : i32
    %c0_i32_0 = arith.constant 0 : i32
    %c0_i32_1 = arith.constant 0 : i32
    return %arg0, %c0_i32, %c0_i32_0 : i32, i32, i32
  }
  func.func @transform_2(%arg0: i32) -> (i32, i32, i32, i32) {
    %c0_i32 = arith.constant 0 : i32
    %c0_i32_0 = arith.constant 0 : i32
    %c0_i32_1 = arith.constant 0 : i32
    %c0_i32_2 = arith.constant 0 : i32
    return %arg0, %c0_i32, %c0_i32_0, %c0_i32_1 : i32, i32, i32, i32
  }
}

module attributes {stable_mosaic.version = 11 : i64} {
  func.func @_resize_norm_kernel(%arg0: i32, %arg1: memref<1024x128xbf16, #tpu.memory_space<vmem>>, %arg2: memref<16x224xbf16, #tpu.memory_space<vmem>>, %arg3: memref<128x16xbf16, #tpu.memory_space<vmem>>, %arg4: memref<2x128x224xf32, #tpu.memory_space<vmem>>) attributes {dimension_semantics = [#tpu.dimension_semantics<arbitrary>], iteration_bounds = array<i64: 1>, scalar_prefetch = 0 : i64, scratch_operands = 0 : i64, tpu.core_type = #tpu.core_type<tc>, window_params = [{pipeline_mode = #tpu.pipeline_mode<synchronous>, transform_indices = @transform_0, window_bounds = array<i64: 1024, 128>}, {pipeline_mode = #tpu.pipeline_mode<synchronous>, transform_indices = @transform_1, window_bounds = array<i64: 16, 224>}, {pipeline_mode = #tpu.pipeline_mode<synchronous>, transform_indices = @transform_2, window_bounds = array<i64: 128, 16>}, {pipeline_mode = #tpu.pipeline_mode<synchronous>, transform_indices = @transform_3, window_bounds = array<i64: 2, 128, 224>}]} {
    %c0 = arith.constant 0 : index
    %c0_0 = arith.constant 0 : index
    %0 = vector.load %arg3[%c0, %c0_0] : memref<128x16xbf16, #tpu.memory_space<vmem>>, vector<128x16xbf16>
    %c0_1 = arith.constant 0 : index
    %c0_2 = arith.constant 0 : index
    %1 = vector.load %arg2[%c0_1, %c0_2] : memref<16x224xbf16, #tpu.memory_space<vmem>>, vector<16x224xbf16>
    %cst = arith.constant dense<0.000000e+00> : vector<128x224xf32>
    %2 = tpu.matmul %0, %1, %cst {dimension_numbers = #tpu.dot_dimension_numbers<[1], [0], [0], [1], [0, 0, 1, 1], [], []>} : vector<128x16xbf16>, vector<16x224xbf16>, vector<128x224xf32> -> vector<128x224xf32>
    %c0_3 = arith.constant 0 : index
    %c0_4 = arith.constant 0 : index
    %3 = vector.load %arg1[%c0_3, %c0_4] : memref<1024x128xbf16, #tpu.memory_space<vmem>>, vector<1024x128xbf16>
    %4 = arith.truncf %2 : vector<128x224xf32> to vector<128x224xbf16>
    %cst_5 = arith.constant dense<0.000000e+00> : vector<1024x224xf32>
    %5 = tpu.matmul %3, %4, %cst_5 {dimension_numbers = #tpu.dot_dimension_numbers<[1], [0], [0], [1], [0, 0, 1, 1], [], []>} : vector<1024x128xbf16>, vector<128x224xbf16>, vector<1024x224xf32> -> vector<1024x224xf32>
    %6 = vector.shape_cast %5 : vector<1024x224xf32> to vector<1x1024x224xf32>
    %cst_6 = arith.constant dense<0.000000e+00> : vector<1xf32>
    %7 = vector.multi_reduction <add>, %6, %cst_6 [1, 2] : vector<1x1024x224xf32> to vector<1xf32>
    %8 = vector.shape_cast %7 : vector<1xf32> to vector<1x1x1xf32>
    %9 = vector.extract %8[0, 0, 0] : f32 from vector<1x1x1xf32>
    %10 = vector.broadcast %9 : f32 to vector<1x1xf32>
    %cst_7 = arith.constant 7.62939453E-6 : f32
    %11 = vector.broadcast %cst_7 : f32 to vector<1x1xf32>
    %12 = arith.mulf %10, %11 : vector<1x1xf32>
    %13 = tpu.iota {dimensions = array<i32: 1>} : vector<1024x224xi32>
    %c10_i32 = arith.constant 10 : i32
    %14 = vector.broadcast %c10_i32 : i32 to vector<1024x224xi32>
    %15 = arith.cmpi sge, %13, %14 : vector<1024x224xi32>
    %c138_i32 = arith.constant 138 : i32
    %16 = vector.broadcast %c138_i32 : i32 to vector<1024x224xi32>
    %17 = arith.cmpi slt, %13, %16 : vector<1024x224xi32>
    %18 = arith.andi %15, %17 : vector<1024x224xi1>
    %19 = vector.broadcast %12 : vector<1x1xf32> to vector<1024x224xf32>
    %20 = arith.subf %5, %19 : vector<1024x224xf32>
    %cst_8 = arith.constant 0.000000e+00 : f32
    %21 = vector.broadcast %cst_8 : f32 to vector<1024x224xf32>
    %22 = arith.select %18, %20, %21 : vector<1024x224xi1>, vector<1024x224xf32>
    %23 = arith.mulf %22, %22 : vector<1024x224xf32>
    %24 = vector.shape_cast %23 : vector<1024x224xf32> to vector<1x1024x224xf32>
    %cst_9 = arith.constant dense<0.000000e+00> : vector<1xf32>
    %25 = vector.multi_reduction <add>, %24, %cst_9 [1, 2] : vector<1x1024x224xf32> to vector<1xf32>
    %26 = vector.shape_cast %25 : vector<1xf32> to vector<1x1x1xf32>
    %27 = vector.extract %26[0, 0, 0] : f32 from vector<1x1x1xf32>
    %28 = vector.broadcast %27 : f32 to vector<1x1xf32>
    %cst_10 = arith.constant 7.62945274E-6 : f32
    %29 = vector.broadcast %cst_10 : f32 to vector<1x1xf32>
    %30 = arith.mulf %28, %29 : vector<1x1xf32>
    %31 = math.sqrt %30 : vector<1x1xf32>
    %cst_11 = arith.constant 9.99999974E-6 : f32
    %32 = vector.broadcast %cst_11 : f32 to vector<1x1xf32>
    %33 = arith.addf %31, %32 : vector<1x1xf32>
    %cst_12 = arith.constant 1.000000e+00 : f32
    %34 = vector.broadcast %cst_12 : f32 to vector<1x1xf32>
    %35 = arith.divf %34, %33 : vector<1x1xf32>
    %36 = vector.extract_strided_slice %5 {offsets = [0, 0], sizes = [128, 224], strides = [1, 1]} : vector<1024x224xf32> to vector<128x224xf32>
    %37 = vector.broadcast %12 : vector<1x1xf32> to vector<128x224xf32>
    %38 = arith.subf %36, %37 : vector<128x224xf32>
    %39 = vector.broadcast %35 : vector<1x1xf32> to vector<128x224xf32>
    %40 = arith.mulf %38, %39 : vector<128x224xf32>
    %c0_13 = arith.constant 0 : index
    %c0_14 = arith.constant 0 : index
    %c0_15 = arith.constant 0 : index
    %41 = vector.load %arg4[%c0_13, %c0_14, %c0_15] : memref<2x128x224xf32, #tpu.memory_space<vmem>>, vector<1x128x224xf32>
    %42 = vector.shape_cast %41 : vector<1x128x224xf32> to vector<128x224xf32>
    %43 = vector.shape_cast %40 : vector<128x224xf32> to vector<1x128x224xf32>
    tpu.vector_store %arg4[%c0_13, %c0_14, %c0_15], %43 {strides = array<i32>} : memref<2x128x224xf32, #tpu.memory_space<vmem>>, vector<1x128x224xf32>,
    %44 = vector.extract_strided_slice %5 {offsets = [512, 0], sizes = [128, 224], strides = [1, 1]} : vector<1024x224xf32> to vector<128x224xf32>
    %45 = vector.broadcast %12 : vector<1x1xf32> to vector<128x224xf32>
    %46 = arith.subf %44, %45 : vector<128x224xf32>
    %47 = vector.broadcast %35 : vector<1x1xf32> to vector<128x224xf32>
    %48 = arith.mulf %46, %47 : vector<128x224xf32>
    %c1 = arith.constant 1 : index
    %c0_16 = arith.constant 0 : index
    %c0_17 = arith.constant 0 : index
    %49 = vector.load %arg4[%c1, %c0_16, %c0_17] : memref<2x128x224xf32, #tpu.memory_space<vmem>>, vector<1x128x224xf32>
    %50 = vector.shape_cast %49 : vector<1x128x224xf32> to vector<128x224xf32>
    %51 = vector.shape_cast %48 : vector<128x224xf32> to vector<1x128x224xf32>
    tpu.vector_store %arg4[%c1, %c0_16, %c0_17], %51 {strides = array<i32>} : memref<2x128x224xf32, #tpu.memory_space<vmem>>, vector<1x128x224xf32>,
    return
  }
  func.func @transform_0(%arg0: i32) -> (i32, i32) {
    %c0_i32 = arith.constant 0 : i32
    %c0_i32_0 = arith.constant 0 : i32
    %c0_i32_1 = arith.constant 0 : i32
    return %c0_i32, %c0_i32_0 : i32, i32
  }
  func.func @transform_1(%arg0: i32) -> (i32, i32) {
    %c0_i32 = arith.constant 0 : i32
    %c0_i32_0 = arith.constant 0 : i32
    %c0_i32_1 = arith.constant 0 : i32
    return %c0_i32, %c0_i32_0 : i32, i32
  }
  func.func @transform_2(%arg0: i32) -> (i32, i32) {
    %c0_i32 = arith.constant 0 : i32
    %c0_i32_0 = arith.constant 0 : i32
    %c0_i32_1 = arith.constant 0 : i32
    return %c0_i32, %c0_i32_0 : i32, i32
  }
  func.func @transform_3(%arg0: i32) -> (i32, i32, i32) {
    %c0_i32 = arith.constant 0 : i32
    %c0_i32_0 = arith.constant 0 : i32
    %c0_i32_1 = arith.constant 0 : i32
    %c0_i32_2 = arith.constant 0 : i32
    return %c0_i32, %c0_i32_0, %c0_i32_1 : i32, i32, i32
  }
}

</mosaic_0001>

<bundles_post_ra>
// kernel: _forward_impl.3
= control target key start
LH: loop header
LB: loop body
LE: loop exit
PB: predicated region body
PF: predicated region fallthrough
CT: control target
= control target key end

     0   :  { %7 = vsyncpa [#allocation4], 0  ;;  %s3459_s0 = inlined_call_operand.hbm [shape: f32[1,3,224,224], index: 0, kind: input, shape index: {}]   ;;  %s3460_s1 = inlined_call_operand.vmem [shape: f32[2,128,224], index: 1, kind: input, shape index: {}]   ;;  %s3461_s2 = inlined_call_operand.hbm [shape: f32[2,3,224,224], index: 2, kind: output, shape index: {}]  }
   0x1   :  { %8 = vsyncpa [#allocation5], 0 }
   0x2   :  { %10 = vsyncpa [#allocation5 + $0x1], 0  ;;  %s2024_s9 = smov 0   ;;  %s2026_s10 = smov 0  }
   0x3   :  { %s2028_s11 = smov 0   ;;  %s2030_s12 = smov 0  }
   0x4 LB: > { %s2045_s13 = sadd.s32 4294967295, %s2001_s12   ;;  %s1772_s14 = sadd.s32 4294967294, %s2001_s12   ;;  %s2001_s12 = sphi %s2030_s12, %s3687_s12   ;;  %s1997_s11 = sphi %s2028_s11, %s3686_s11   ;;  %s1993_s10 = sphi %s2026_s10, %s3685_s10   ;;  %s1989_s9 = sphi %s2024_s9, %s3684_s9  }
   0x5   : > { %s2049_s15 = sadd.s32 1, %s2001_s12   ;;  %s70_s16 = sadd.s32 1, %s1997_s11 }
   0x6   : > { %s67_s17 = ssub.s32 %s2001_s12, %s2049_s15  ;;  %p80_p0 = scmp.ne.s32.totalorder %s1997_s11, %s1993_s10 }
   0x7   : > { %p68_p1 = scmp.eq.s32.totalorder %s67_s17, 0  ;;  %p81_p2 = scmp.eq.s32.totalorder %s2045_s13, 1 }
   0x8   : > { %p86_p3 = scmp.ne.s32.totalorder %s1993_s10, %s1989_s9  ;;  %p87_p4 = scmp.eq.s32.totalorder %s1772_s14, 1 }
   0x9   : > { %s2060_s18 = scalar_select %p68_p1, %s1997_s11, %s70_s16  }
   0xa   : > { %p2062_p5 = por %p81_p2, %p80_p0  ;;  %p2066_p6 = por %p87_p4, %p86_p3 }
   0xb   : > { %p1773_p7 = scmp.ge.s32.totalorder %s2001_s12, 1  ;;  %p94_p8 = scmp.lt.s32.totalorder %s2001_s12, 3 }
   0xc   : > { %s3499_s20 = scalar_select %p2066_p6, 1, 0 }
   0xd   : > { %p1869_p9 = scmp.eq.s32.totalorder %s2045_s13, 0  ;;  %p2073_p10 = pnand %p1773_p7, %p94_p8 }
   0xe   : > { %s2003_s22 = smov [#allocation3]  }
   0xf   : > { %s106_s23 = sshll.u32 %s2003_s22, 4  ;;  %p1861_p11 = pneg %p2073_p10  ;;  %s107_s23 = int_to_ptr.vmem [resolvable:$true] %s106_s23 }
  0x10   : > { %s1920_s24 = scalar_lea.vmem %s107_s23, 21504  ;;  %p1928_p3 = scmp.lt.s32.totalorder %s107_s23, %s107_s23 }
  0x11   : > { %p1862_p12 = pnand %p1869_p9, %p1861_p11  ;;  %p1921_p0 = scmp.ne.s32.totalorder %s107_s23, %s1920_s24 }
  0x12   : > { %p1929_p4 = scmp.lt.s32.totalorder %s1920_s24, %s1920_s24 }
  0x13   : > { %p1911_p13 = pneg %p1862_p12 }
  0x14   : > { %p1930_p6 = por %p1929_p4, %p1928_p3 }
  0x15   : > { %p1923_p1 = pnand %p1921_p0, %p1911_p13 }
  0x17   : > { %p1924_p2 = pneg %p1923_p1 }
  0x19   : > { %p1931_p7 = pnand %p1930_p6, %p1924_p2 }
  0x1b   : > { %1934 = shalt.err (!%p1931_p7)
}
  0x1c   : > { %s2004_s25 = smov 256   ;;  %s2005_s26 = smov 16  }
  0x1d   : > { %1864 = dma.hbm_to_vmem [thread:$0]  (!%p1862_p12), %s3459_s0, 21504, %s107_s23, [#allocation4], %s2004_s25, %s2004_s25, %s2005_s26  }
  0x1e   : > { %130 = sbr.rel (%p2073_p10) target bundleno = 285 (0x11d), region = 28 }
  0x23   : > { %1978 = dma.done.wait (%p1869_p9), [#allocation4], 21504  }
  0x24   : > { %1980 = vsyncadd (%p1869_p9), [#allocation4], 4294945792  ;;  %s149_s29 = sand.u32 1, %s1993_s10   ;;  %p152_p6 = scmp.lt.s32.totalorder %s2045_s13, 1  ;;  %v190_v0 = vld [vmem:[#allocation3] sm:$0xff]  ;;  %v192_v1 = vld [vmem:[#allocation3 + $0x8] sm:$0xff] }
  0x25   : > { %s1853_s30 = smul.u32 1344, %s149_s29  ;;  %v194_v2 = vld [vmem:[#allocation3 + $0x10] sm:$0xff]  ;;  %v196_v3 = vld [vmem:[#allocation3 + $0x18] sm:$0xff]  ;;  %v198_v4 = vld [vmem:[#allocation3 + $0x20] sm:$0xff] }
  0x26   : > { %s153_s3 = scalar_select %p152_p6, %s2045_s13, 1  ;;  %v200_v5 = vld [vmem:[#allocation3 + $0x28] sm:$0xff]  ;;  %v202_v6 = vld [vmem:[#allocation3 + $0x30] sm:$0xff]  ;;  %v204_v7 = vld [vmem:[#allocation3 + $0x38] sm:$0xff] }
  0x27   : > { %s2100_s8 = scalar_lea.vmem [#allocation6], %s1853_s30  ;;  %v206_v8 = vld [vmem:[#allocation3 + $0x40] sm:$0xff]  ;;  %v208_v9 = vld [vmem:[#allocation3 + $0x48] sm:$0xff]  ;;  %v210_v10 = vld [vmem:[#allocation3 + $0x50] sm:$0xff] }
  0x28   : > { %s1852_s4 = sshll.u32 %s153_s3, 8  ;;  %191 = vst [vmem:[%s2100_s8] sm:$0xff] %v190_v0  ;;  %193 = vst [vmem:[%s2100_s8 + $0x8] sm:$0xff] %v192_v1  ;;  %v212_v11 = vld [vmem:[#allocation3 + $0x58] sm:$0xff]  ;;  %v214_v12 = vld [vmem:[#allocation3 + $0x60] sm:$0xff] }
  0x29   : > { %s2098_s7 = scalar_lea.vmem %s3460_s1, %s1852_s4  ;;  %195 = vst [vmem:[%s2100_s8 + $0x10] sm:$0xff] %v194_v2  ;;  %197 = vst [vmem:[%s2100_s8 + $0x18] sm:$0xff] %v196_v3  ;;  %v216_v13 = vld [vmem:[#allocation3 + $0x68] sm:$0xff]  ;;  %v218_v14 = vld [vmem:[#allocation3 + $0x70] sm:$0xff] }
  0x2a   : > { %199 = vst [vmem:[%s2100_s8 + $0x20] sm:$0xff] %v198_v4  ;;  %201 = vst [vmem:[%s2100_s8 + $0x28] sm:$0xff] %v200_v5  ;;  %v220_v15 = vld [vmem:[#allocation3 + $0x78] sm:$0xff]  ;;  %v222_v16 = vld [vmem:[#allocation3 + $0x80] sm:$0xff] }
  0x2b   : > { %203 = vst [vmem:[%s2100_s8 + $0x30] sm:$0xff] %v202_v6  ;;  %205 = vst [vmem:[%s2100_s8 + $0x38] sm:$0xff] %v204_v7  ;;  %v224_v17 = vld [vmem:[#allocation3 + $0x88] sm:$0xff]  ;;  %v226_v18 = vld [vmem:[#allocation3 + $0x90] sm:$0xff] }
  0x2c   : > { %207 = vst [vmem:[%s2100_s8 + $0x40] sm:$0xff] %v206_v8  ;;  %209 = vst [vmem:[%s2100_s8 + $0x48] sm:$0xff] %v208_v9  ;;  %v228_v19 = vld [vmem:[#allocation3 + $0x98] sm:$0xff]  ;;  %v230_v20 = vld [vmem:[#allocation3 + $0xa0] sm:$0xff] }
  0x2d   : > { %211 = vst [vmem:[%s2100_s8 + $0x50] sm:$0xff] %v210_v10  ;;  %213 = vst [vmem:[%s2100_s8 + $0x58] sm:$0xff] %v212_v11  ;;  %v232_v21 = vld [vmem:[#allocation3 + $0xa8] sm:$0xff]  ;;  %v234_v22 = vld [vmem:[#allocation3 + $0xb0] sm:$0xff] }
  0x2e   : > { %215 = vst [vmem:[%s2100_s8 + $0x60] sm:$0xff] %v214_v12  ;;  %217 = vst [vmem:[%s2100_s8 + $0x68] sm:$0xff] %v216_v13  ;;  %v236_v23 = vld [vmem:[#allocation3 + $0xb8] sm:$0xff]  ;;  %v238_v24 = vld [vmem:[#allocation3 + $0xc0] sm:$0xff] }
  0x2f   : > { %219 = vst [vmem:[%s2100_s8 + $0x70] sm:$0xff] %v218_v14  ;;  %221 = vst [vmem:[%s2100_s8 + $0x78] sm:$0xff] %v220_v15  ;;  %v240_v25 = vld [vmem:[#allocation3 + $0xc8] sm:$0xff]  ;;  %v242_v26 = vld [vmem:[#allocation3 + $0xd0] sm:$0xff] }
  0x30   : > { %223 = vst [vmem:[%s2100_s8 + $0x80] sm:$0xff] %v222_v16  ;;  %225 = vst [vmem:[%s2100_s8 + $0x88] sm:$0xff] %v224_v17  ;;  %v244_v27 = vld [vmem:[#allocation3 + $0xd8] sm:$0xff]  ;;  %v246_v28 = vld [vmem:[#allocation3 + $0xe0] sm:$0xff] }
  0x31   : > { %227 = vst [vmem:[%s2100_s8 + $0x90] sm:$0xff] %v226_v18  ;;  %229 = vst [vmem:[%s2100_s8 + $0x98] sm:$0xff] %v228_v19  ;;  %v248_v29 = vld [vmem:[#allocation3 + $0xe8] sm:$0xff]  ;;  %v250_v30 = vld [vmem:[#allocation3 + $0xf0] sm:$0xff] }
  0x32   : > { %231 = vst [vmem:[%s2100_s8 + $0xa0] sm:$0xff] %v230_v20  ;;  %233 = vst [vmem:[%s2100_s8 + $0xa8] sm:$0xff] %v232_v21  ;;  %v252_v31 = vld [vmem:[#allocation3 + $0xf8] sm:$0xff]  ;;  %v254_v32 = vld [vmem:[#allocation3 + $0x100] sm:$0xff] }
  0x33   : > { %235 = vst [vmem:[%s2100_s8 + $0xb0] sm:$0xff] %v234_v22  ;;  %237 = vst [vmem:[%s2100_s8 + $0xb8] sm:$0xff] %v236_v23  ;;  %v256_v33 = vld [vmem:[#allocation3 + $0x108] sm:$0xff]  ;;  %v258_v34 = vld [vmem:[#allocation3 + $0x110] sm:$0xff] }
  0x34   : > { %239 = vst [vmem:[%s2100_s8 + $0xc0] sm:$0xff] %v238_v24  ;;  %241 = vst [vmem:[%s2100_s8 + $0xc8] sm:$0xff] %v240_v25  ;;  %v260_v35 = vld [vmem:[#allocation3 + $0x118] sm:$0xff]  ;;  %v262_v36 = vld [vmem:[#allocation3 + $0x120] sm:$0xff] }
  0x35   : > { %243 = vst [vmem:[%s2100_s8 + $0xd0] sm:$0xff] %v242_v26  ;;  %245 = vst [vmem:[%s2100_s8 + $0xd8] sm:$0xff] %v244_v27  ;;  %v264_v37 = vld [vmem:[#allocation3 + $0x128] sm:$0xff]  ;;  %v266_v38 = vld [vmem:[#allocation3 + $0x130] sm:$0xff] }
  0x36   : > { %247 = vst [vmem:[%s2100_s8 + $0xe0] sm:$0xff] %v246_v28  ;;  %249 = vst [vmem:[%s2100_s8 + $0xe8] sm:$0xff] %v248_v29  ;;  %v268_v39 = vld [vmem:[#allocation3 + $0x138] sm:$0xff]  ;;  %v270_v40 = vld [vmem:[#allocation3 + $0x140] sm:$0xff] }
  0x37   : > { %251 = vst [vmem:[%s2100_s8 + $0xf0] sm:$0xff] %v250_v30  ;;  %253 = vst [vmem:[%s2100_s8 + $0xf8] sm:$0xff] %v252_v31  ;;  %v272_v41 = vld [vmem:[#allocation3 + $0x148] sm:$0xff]  ;;  %v274_v42 = vld [vmem:[#allocation3 + $0x150] sm:$0xff] }
  0x38   : > { %255 = vst [vmem:[%s2100_s8 + $0x100] sm:$0xff] %v254_v32  ;;  %257 = vst [vmem:[%s2100_s8 + $0x108] sm:$0xff] %v256_v33  ;;  %v276_v43 = vld [vmem:[#allocation3 + $0x158] sm:$0xff]  ;;  %v278_v44 = vld [vmem:[#allocation3 + $0x160] sm:$0xff] }
  0x39   : > { %259 = vst [vmem:[%s2100_s8 + $0x110] sm:$0xff] %v258_v34  ;;  %261 = vst [vmem:[%s2100_s8 + $0x118] sm:$0xff] %v260_v35  ;;  %v280_v45 = vld [vmem:[#allocation3 + $0x168] sm:$0xff]  ;;  %v282_v46 = vld [vmem:[#allocation3 + $0x170] sm:$0xff] }
  0x3a   : > { %263 = vst [vmem:[%s2100_s8 + $0x120] sm:$0xff] %v262_v36  ;;  %265 = vst [vmem:[%s2100_s8 + $0x128] sm:$0xff] %v264_v37  ;;  %v284_v47 = vld [vmem:[#allocation3 + $0x178] sm:$0xff]  ;;  %v286_v48 = vld [vmem:[#allocation3 + $0x180] sm:$0xff] }
  0x3b   : > { %267 = vst [vmem:[%s2100_s8 + $0x130] sm:$0xff] %v266_v38  ;;  %269 = vst [vmem:[%s2100_s8 + $0x138] sm:$0xff] %v268_v39  ;;  %v288_v49 = vld [vmem:[#allocation3 + $0x188] sm:$0xff]  ;;  %v290_v50 = vld [vmem:[#allocation3 + $0x190] sm:$0xff] }
  0x3c   : > { %271 = vst [vmem:[%s2100_s8 + $0x140] sm:$0xff] %v270_v40  ;;  %273 = vst [vmem:[%s2100_s8 + $0x148] sm:$0xff] %v272_v41  ;;  %v292_v51 = vld [vmem:[#allocation3 + $0x198] sm:$0xff]  ;;  %v294_v52 = vld [vmem:[#allocation3 + $0x1a0] sm:$0xff] }
  0x3d   : > { %275 = vst [vmem:[%s2100_s8 + $0x150] sm:$0xff] %v274_v42  ;;  %277 = vst [vmem:[%s2100_s8 + $0x158] sm:$0xff] %v276_v43  ;;  %v296_v53 = vld [vmem:[#allocation3 + $0x1a8] sm:$0xff]  ;;  %v298_v54 = vld [vmem:[#allocation3 + $0x1b0] sm:$0xff] }
  0x3e   : > { %279 = vst [vmem:[%s2100_s8 + $0x160] sm:$0xff] %v278_v44  ;;  %281 = vst [vmem:[%s2100_s8 + $0x168] sm:$0xff] %v280_v45  ;;  %v300_v55 = vld [vmem:[#allocation3 + $0x1b8] sm:$0xff]  ;;  %v302_v56 = vld [vmem:[#allocation3 + $0x1c0] sm:$0xff] }
  0x3f   : > { %283 = vst [vmem:[%s2100_s8 + $0x170] sm:$0xff] %v282_v46  ;;  %285 = vst [vmem:[%s2100_s8 + $0x178] sm:$0xff] %v284_v47  ;;  %v304_v57 = vld [vmem:[#allocation3 + $0x1c8] sm:$0xff]  ;;  %v306_v58 = vld [vmem:[#allocation3 + $0x1d0] sm:$0xff] }
  0x40   : > { %287 = vst [vmem:[%s2100_s8 + $0x180] sm:$0xff] %v286_v48  ;;  %289 = vst [vmem:[%s2100_s8 + $0x188] sm:$0xff] %v288_v49  ;;  %v308_v59 = vld [vmem:[#allocation3 + $0x1d8] sm:$0xff]  ;;  %v310_v60 = vld [vmem:[#allocation3 + $0x1e0] sm:$0xff] }
  0x41   : > { %291 = vst [vmem:[%s2100_s8 + $0x190] sm:$0xff] %v290_v50  ;;  %293 = vst [vmem:[%s2100_s8 + $0x198] sm:$0xff] %v292_v51  ;;  %v312_v61 = vld [vmem:[#allocation3 + $0x1e8] sm:$0xff]  ;;  %v314_v62 = vld [vmem:[#allocation3 + $0x1f0] sm:$0xff] }
  0x42   : > { %295 = vst [vmem:[%s2100_s8 + $0x1a0] sm:$0xff] %v294_v52  ;;  %297 = vst [vmem:[%s2100_s8 + $0x1a8] sm:$0xff] %v296_v53  ;;  %v316_v63 = vld [vmem:[#allocation3 + $0x1f8] sm:$0xff]  ;;  %v318_v0 = vld [vmem:[#allocation3 + $0x200] sm:$0xff] }
  0x43   : > { %299 = vst [vmem:[%s2100_s8 + $0x1b0] sm:$0xff] %v298_v54  ;;  %301 = vst [vmem:[%s2100_s8 + $0x1b8] sm:$0xff] %v300_v55  ;;  %v320_v1 = vld [vmem:[#allocation3 + $0x208] sm:$0xff]  ;;  %v322_v2 = vld [vmem:[#allocation3 + $0x210] sm:$0xff] }
  0x44   : > { %303 = vst [vmem:[%s2100_s8 + $0x1c0] sm:$0xff] %v302_v56  ;;  %305 = vst [vmem:[%s2100_s8 + $0x1c8] sm:$0xff] %v304_v57  ;;  %v324_v3 = vld [vmem:[#allocation3 + $0x218] sm:$0xff]  ;;  %v326_v4 = vld [vmem:[#allocation3 + $0x220] sm:$0xff] }
  0x45   : > { %307 = vst [vmem:[%s2100_s8 + $0x1d0] sm:$0xff] %v306_v58  ;;  %309 = vst [vmem:[%s2100_s8 + $0x1d8] sm:$0xff] %v308_v59  ;;  %v328_v5 = vld [vmem:[#allocation3 + $0x228] sm:$0xff]  ;;  %v330_v6 = vld [vmem:[#allocation3 + $0x230] sm:$0xff] }
  0x46   : > { %311 = vst [vmem:[%s2100_s8 + $0x1e0] sm:$0xff] %v310_v60  ;;  %313 = vst [vmem:[%s2100_s8 + $0x1e8] sm:$0xff] %v312_v61  ;;  %v332_v7 = vld [vmem:[#allocation3 + $0x238] sm:$0xff]  ;;  %v334_v8 = vld [vmem:[#allocation3 + $0x240] sm:$0xff] }
  0x47   : > { %315 = vst [vmem:[%s2100_s8 + $0x1f0] sm:$0xff] %v314_v62  ;;  %317 = vst [vmem:[%s2100_s8 + $0x1f8] sm:$0xff] %v316_v63  ;;  %v336_v9 = vld [vmem:[#allocation3 + $0x248] sm:$0xff]  ;;  %v338_v10 = vld [vmem:[#allocation3 + $0x250] sm:$0xff] }
  0x48   : > { %319 = vst [vmem:[%s2100_s8 + $0x200] sm:$0xff] %v318_v0  ;;  %321 = vst [vmem:[%s2100_s8 + $0x208] sm:$0xff] %v320_v1  ;;  %v340_v11 = vld [vmem:[#allocation3 + $0x258] sm:$0xff]  ;;  %v342_v12 = vld [vmem:[#allocation3 + $0x260] sm:$0xff] }
  0x49   : > { %323 = vst [vmem:[%s2100_s8 + $0x210] sm:$0xff] %v322_v2  ;;  %325 = vst [vmem:[%s2100_s8 + $0x218] sm:$0xff] %v324_v3  ;;  %v344_v13 = vld [vmem:[#allocation3 + $0x268] sm:$0xff]  ;;  %v346_v14 = vld [vmem:[#allocation3 + $0x270] sm:$0xff] }
  0x4a   : > { %327 = vst [vmem:[%s2100_s8 + $0x220] sm:$0xff] %v326_v4  ;;  %329 = vst [vmem:[%s2100_s8 + $0x228] sm:$0xff] %v328_v5  ;;  %v348_v15 = vld [vmem:[#allocation3 + $0x278] sm:$0xff]  ;;  %v350_v16 = vld [vmem:[#allocation3 + $0x280] sm:$0xff] }
  0x4b   : > { %331 = vst [vmem:[%s2100_s8 + $0x230] sm:$0xff] %v330_v6  ;;  %333 = vst [vmem:[%s2100_s8 + $0x238] sm:$0xff] %v332_v7  ;;  %v352_v17 = vld [vmem:[#allocation3 + $0x288] sm:$0xff]  ;;  %v354_v18 = vld [vmem:[#allocation3 + $0x290] sm:$0xff] }
  0x4c   : > { %335 = vst [vmem:[%s2100_s8 + $0x240] sm:$0xff] %v334_v8  ;;  %337 = vst [vmem:[%s2100_s8 + $0x248] sm:$0xff] %v336_v9  ;;  %v356_v19 = vld [vmem:[#allocation3 + $0x298] sm:$0xff]  ;;  %v358_v20 = vld [vmem:[#allocation3 + $0x2a0] sm:$0xff] }
  0x4d   : > { %339 = vst [vmem:[%s2100_s8 + $0x250] sm:$0xff] %v338_v10  ;;  %341 = vst [vmem:[%s2100_s8 + $0x258] sm:$0xff] %v340_v11  ;;  %v360_v21 = vld [vmem:[#allocation3 + $0x2a8] sm:$0xff]  ;;  %v362_v22 = vld [vmem:[#allocation3 + $0x2b0] sm:$0xff] }
  0x4e   : > { %343 = vst [vmem:[%s2100_s8 + $0x260] sm:$0xff] %v342_v12  ;;  %345 = vst [vmem:[%s2100_s8 + $0x268] sm:$0xff] %v344_v13  ;;  %v364_v23 = vld [vmem:[#allocation3 + $0x2b8] sm:$0xff]  ;;  %v366_v24 = vld [vmem:[#allocation3 + $0x2c0] sm:$0xff] }
  0x4f   : > { %347 = vst [vmem:[%s2100_s8 + $0x270] sm:$0xff] %v346_v14  ;;  %349 = vst [vmem:[%s2100_s8 + $0x278] sm:$0xff] %v348_v15  ;;  %v368_v25 = vld [vmem:[#allocation3 + $0x2c8] sm:$0xff]  ;;  %v370_v26 = vld [vmem:[#allocation3 + $0x2d0] sm:$0xff] }
  0x50   : > { %351 = vst [vmem:[%s2100_s8 + $0x280] sm:$0xff] %v350_v16  ;;  %353 = vst [vmem:[%s2100_s8 + $0x288] sm:$0xff] %v352_v17  ;;  %v372_v27 = vld [vmem:[#allocation3 + $0x2d8] sm:$0xff]  ;;  %v374_v28 = vld [vmem:[#allocation3 + $0x2e0] sm:$0xff] }
  0x51   : > { %355 = vst [vmem:[%s2100_s8 + $0x290] sm:$0xff] %v354_v18  ;;  %357 = vst [vmem:[%s2100_s8 + $0x298] sm:$0xff] %v356_v19  ;;  %v376_v29 = vld [vmem:[#allocation3 + $0x2e8] sm:$0xff]  ;;  %v378_v30 = vld [vmem:[#allocation3 + $0x2f0] sm:$0xff] }
  0x52   : > { %359 = vst [vmem:[%s2100_s8 + $0x2a0] sm:$0xff] %v358_v20  ;;  %361 = vst [vmem:[%s2100_s8 + $0x2a8] sm:$0xff] %v360_v21  ;;  %v380_v31 = vld [vmem:[#allocation3 + $0x2f8] sm:$0xff]  ;;  %v382_v32 = vld [vmem:[#allocation3 + $0x300] sm:$0xff] }
  0x53   : > { %363 = vst [vmem:[%s2100_s8 + $0x2b0] sm:$0xff] %v362_v22  ;;  %365 = vst [vmem:[%s2100_s8 + $0x2b8] sm:$0xff] %v364_v23  ;;  %v384_v33 = vld [vmem:[#allocation3 + $0x308] sm:$0xff]  ;;  %v386_v34 = vld [vmem:[#allocation3 + $0x310] sm:$0xff] }
  0x54   : > { %367 = vst [vmem:[%s2100_s8 + $0x2c0] sm:$0xff] %v366_v24  ;;  %369 = vst [vmem:[%s2100_s8 + $0x2c8] sm:$0xff] %v368_v25  ;;  %v388_v35 = vld [vmem:[#allocation3 + $0x318] sm:$0xff]  ;;  %v390_v36 = vld [vmem:[#allocation3 + $0x320] sm:$0xff] }
  0x55   : > { %371 = vst [vmem:[%s2100_s8 + $0x2d0] sm:$0xff] %v370_v26  ;;  %373 = vst [vmem:[%s2100_s8 + $0x2d8] sm:$0xff] %v372_v27  ;;  %v392_v37 = vld [vmem:[#allocation3 + $0x328] sm:$0xff]  ;;  %v394_v38 = vld [vmem:[#allocation3 + $0x330] sm:$0xff] }
  0x56   : > { %375 = vst [vmem:[%s2100_s8 + $0x2e0] sm:$0xff] %v374_v28  ;;  %377 = vst [vmem:[%s2100_s8 + $0x2e8] sm:$0xff] %v376_v29  ;;  %v396_v39 = vld [vmem:[#allocation3 + $0x338] sm:$0xff]  ;;  %v398_v40 = vld [vmem:[#allocation3 + $0x340] sm:$0xff] }
  0x57   : > { %379 = vst [vmem:[%s2100_s8 + $0x2f0] sm:$0xff] %v378_v30  ;;  %381 = vst [vmem:[%s2100_s8 + $0x2f8] sm:$0xff] %v380_v31  ;;  %v400_v41 = vld [vmem:[#allocation3 + $0x348] sm:$0xff]  ;;  %v402_v42 = vld [vmem:[#allocation3 + $0x350] sm:$0xff] }
  0x58   : > { %383 = vst [vmem:[%s2100_s8 + $0x300] sm:$0xff] %v382_v32  ;;  %385 = vst [vmem:[%s2100_s8 + $0x308] sm:$0xff] %v384_v33  ;;  %v404_v43 = vld [vmem:[#allocation3 + $0x358] sm:$0xff]  ;;  %v406_v44 = vld [vmem:[#allocation3 + $0x360] sm:$0xff] }
  0x59   : > { %387 = vst [vmem:[%s2100_s8 + $0x310] sm:$0xff] %v386_v34  ;;  %389 = vst [vmem:[%s2100_s8 + $0x318] sm:$0xff] %v388_v35  ;;  %v408_v45 = vld [vmem:[#allocation3 + $0x368] sm:$0xff]  ;;  %v410_v46 = vld [vmem:[#allocation3 + $0x370] sm:$0xff] }
  0x5a   : > { %391 = vst [vmem:[%s2100_s8 + $0x320] sm:$0xff] %v390_v36  ;;  %393 = vst [vmem:[%s2100_s8 + $0x328] sm:$0xff] %v392_v37  ;;  %v412_v47 = vld [vmem:[#allocation3 + $0x378] sm:$0xff]  ;;  %v414_v48 = vld [vmem:[#allocation3 + $0x380] sm:$0xff] }
  0x5b   : > { %395 = vst [vmem:[%s2100_s8 + $0x330] sm:$0xff] %v394_v38  ;;  %397 = vst [vmem:[%s2100_s8 + $0x338] sm:$0xff] %v396_v39  ;;  %v416_v49 = vld [vmem:[#allocation3 + $0x388] sm:$0xff]  ;;  %v418_v50 = vld [vmem:[#allocation3 + $0x390] sm:$0xff] }
  0x5c   : > { %399 = vst [vmem:[%s2100_s8 + $0x340] sm:$0xff] %v398_v40  ;;  %401 = vst [vmem:[%s2100_s8 + $0x348] sm:$0xff] %v400_v41  ;;  %v420_v51 = vld [vmem:[#allocation3 + $0x398] sm:$0xff]  ;;  %v422_v52 = vld [vmem:[#allocation3 + $0x3a0] sm:$0xff] }
  0x5d   : > { %403 = vst [vmem:[%s2100_s8 + $0x350] sm:$0xff] %v402_v42  ;;  %405 = vst [vmem:[%s2100_s8 + $0x358] sm:$0xff] %v404_v43  ;;  %v424_v53 = vld [vmem:[#allocation3 + $0x3a8] sm:$0xff]  ;;  %v426_v54 = vld [vmem:[#allocation3 + $0x3b0] sm:$0xff] }
  0x5e   : > { %407 = vst [vmem:[%s2100_s8 + $0x360] sm:$0xff] %v406_v44  ;;  %409 = vst [vmem:[%s2100_s8 + $0x368] sm:$0xff] %v408_v45  ;;  %v428_v55 = vld [vmem:[#allocation3 + $0x3b8] sm:$0xff]  ;;  %v430_v56 = vld [vmem:[#allocation3 + $0x3c0] sm:$0xff] }
  0x5f   : > { %411 = vst [vmem:[%s2100_s8 + $0x370] sm:$0xff] %v410_v46  ;;  %413 = vst [vmem:[%s2100_s8 + $0x378] sm:$0xff] %v412_v47  ;;  %v432_v57 = vld [vmem:[#allocation3 + $0x3c8] sm:$0xff]  ;;  %v434_v58 = vld [vmem:[#allocation3 + $0x3d0] sm:$0xff] }
  0x60   : > { %415 = vst [vmem:[%s2100_s8 + $0x380] sm:$0xff] %v414_v48  ;;  %417 = vst [vmem:[%s2100_s8 + $0x388] sm:$0xff] %v416_v49  ;;  %v436_v59 = vld [vmem:[#allocation3 + $0x3d8] sm:$0xff]  ;;  %v438_v60 = vld [vmem:[#allocation3 + $0x3e0] sm:$0xff] }
  0x61   : > { %419 = vst [vmem:[%s2100_s8 + $0x390] sm:$0xff] %v418_v50  ;;  %421 = vst [vmem:[%s2100_s8 + $0x398] sm:$0xff] %v420_v51  ;;  %v440_v61 = vld [vmem:[#allocation3 + $0x3e8] sm:$0xff]  ;;  %v442_v62 = vld [vmem:[#allocation3 + $0x3f0] sm:$0xff] }
  0x62   : > { %423 = vst [vmem:[%s2100_s8 + $0x3a0] sm:$0xff] %v422_v52  ;;  %425 = vst [vmem:[%s2100_s8 + $0x3a8] sm:$0xff] %v424_v53  ;;  %v444_v63 = vld [vmem:[#allocation3 + $0x3f8] sm:$0xff]  ;;  %v446_v0 = vld [vmem:[#allocation3 + $0x400] sm:$0xff] }
  0x63   : > { %427 = vst [vmem:[%s2100_s8 + $0x3b0] sm:$0xff] %v426_v54  ;;  %429 = vst [vmem:[%s2100_s8 + $0x3b8] sm:$0xff] %v428_v55  ;;  %v448_v1 = vld [vmem:[#allocation3 + $0x408] sm:$0xff]  ;;  %v450_v2 = vld [vmem:[#allocation3 + $0x410] sm:$0xff] }
  0x64   : > { %431 = vst [vmem:[%s2100_s8 + $0x3c0] sm:$0xff] %v430_v56  ;;  %433 = vst [vmem:[%s2100_s8 + $0x3c8] sm:$0xff] %v432_v57  ;;  %v452_v3 = vld [vmem:[#allocation3 + $0x418] sm:$0xff]  ;;  %v454_v4 = vld [vmem:[#allocation3 + $0x420] sm:$0xff] }
  0x65   : > { %435 = vst [vmem:[%s2100_s8 + $0x3d0] sm:$0xff] %v434_v58  ;;  %437 = vst [vmem:[%s2100_s8 + $0x3d8] sm:$0xff] %v436_v59  ;;  %v456_v5 = vld [vmem:[#allocation3 + $0x428] sm:$0xff]  ;;  %v458_v6 = vld [vmem:[#allocation3 + $0x430] sm:$0xff] }
  0x66   : > { %439 = vst [vmem:[%s2100_s8 + $0x3e0] sm:$0xff] %v438_v60  ;;  %441 = vst [vmem:[%s2100_s8 + $0x3e8] sm:$0xff] %v440_v61  ;;  %v460_v7 = vld [vmem:[#allocation3 + $0x438] sm:$0xff]  ;;  %v462_v8 = vld [vmem:[#allocation3 + $0x440] sm:$0xff] }
  0x67   : > { %443 = vst [vmem:[%s2100_s8 + $0x3f0] sm:$0xff] %v442_v62  ;;  %445 = vst [vmem:[%s2100_s8 + $0x3f8] sm:$0xff] %v444_v63  ;;  %v464_v9 = vld [vmem:[#allocation3 + $0x448] sm:$0xff]  ;;  %v466_v10 = vld [vmem:[#allocation3 + $0x450] sm:$0xff] }
  0x68   : > { %447 = vst [vmem:[%s2100_s8 + $0x400] sm:$0xff] %v446_v0  ;;  %449 = vst [vmem:[%s2100_s8 + $0x408] sm:$0xff] %v448_v1  ;;  %v468_v11 = vld [vmem:[#allocation3 + $0x458] sm:$0xff]  ;;  %v470_v12 = vld [vmem:[#allocation3 + $0x460] sm:$0xff] }
  0x69   : > { %451 = vst [vmem:[%s2100_s8 + $0x410] sm:$0xff] %v450_v2  ;;  %453 = vst [vmem:[%s2100_s8 + $0x418] sm:$0xff] %v452_v3  ;;  %v472_v13 = vld [vmem:[#allocation3 + $0x468] sm:$0xff]  ;;  %v474_v14 = vld [vmem:[#allocation3 + $0x470] sm:$0xff] }
  0x6a   : > { %455 = vst [vmem:[%s2100_s8 + $0x420] sm:$0xff] %v454_v4  ;;  %457 = vst [vmem:[%s2100_s8 + $0x428] sm:$0xff] %v456_v5  ;;  %v476_v15 = vld [vmem:[#allocation3 + $0x478] sm:$0xff]  ;;  %v478_v16 = vld [vmem:[#allocation3 + $0x480] sm:$0xff] }
  0x6b   : > { %459 = vst [vmem:[%s2100_s8 + $0x430] sm:$0xff] %v458_v6  ;;  %461 = vst [vmem:[%s2100_s8 + $0x438] sm:$0xff] %v460_v7  ;;  %v480_v17 = vld [vmem:[#allocation3 + $0x488] sm:$0xff]  ;;  %v482_v18 = vld [vmem:[#allocation3 + $0x490] sm:$0xff] }
  0x6c   : > { %463 = vst [vmem:[%s2100_s8 + $0x440] sm:$0xff] %v462_v8  ;;  %465 = vst [vmem:[%s2100_s8 + $0x448] sm:$0xff] %v464_v9  ;;  %v484_v19 = vld [vmem:[#allocation3 + $0x498] sm:$0xff]  ;;  %v486_v20 = vld [vmem:[#allocation3 + $0x4a0] sm:$0xff] }
  0x6d   : > { %467 = vst [vmem:[%s2100_s8 + $0x450] sm:$0xff] %v466_v10  ;;  %469 = vst [vmem:[%s2100_s8 + $0x458] sm:$0xff] %v468_v11  ;;  %v488_v21 = vld [vmem:[#allocation3 + $0x4a8] sm:$0xff]  ;;  %v490_v22 = vld [vmem:[#allocation3 + $0x4b0] sm:$0xff] }
  0x6e   : > { %471 = vst [vmem:[%s2100_s8 + $0x460] sm:$0xff] %v470_v12  ;;  %473 = vst [vmem:[%s2100_s8 + $0x468] sm:$0xff] %v472_v13  ;;  %v492_v23 = vld [vmem:[#allocation3 + $0x4b8] sm:$0xff]  ;;  %v494_v24 = vld [vmem:[#allocation3 + $0x4c0] sm:$0xff] }
  0x6f   : > { %475 = vst [vmem:[%s2100_s8 + $0x470] sm:$0xff] %v474_v14  ;;  %477 = vst [vmem:[%s2100_s8 + $0x478] sm:$0xff] %v476_v15  ;;  %v496_v25 = vld [vmem:[#allocation3 + $0x4c8] sm:$0xff]  ;;  %v498_v26 = vld [vmem:[#allocation3 + $0x4d0] sm:$0xff] }
  0x70   : > { %479 = vst [vmem:[%s2100_s8 + $0x480] sm:$0xff] %v478_v16  ;;  %481 = vst [vmem:[%s2100_s8 + $0x488] sm:$0xff] %v480_v17  ;;  %v500_v27 = vld [vmem:[#allocation3 + $0x4d8] sm:$0xff]  ;;  %v502_v28 = vld [vmem:[#allocation3 + $0x4e0] sm:$0xff] }
  0x71   : > { %483 = vst [vmem:[%s2100_s8 + $0x490] sm:$0xff] %v482_v18  ;;  %485 = vst [vmem:[%s2100_s8 + $0x498] sm:$0xff] %v484_v19  ;;  %v504_v29 = vld [vmem:[#allocation3 + $0x4e8] sm:$0xff]  ;;  %v506_v30 = vld [vmem:[#allocation3 + $0x4f0] sm:$0xff] }
  0x72   : > { %487 = vst [vmem:[%s2100_s8 + $0x4a0] sm:$0xff] %v486_v20  ;;  %489 = vst [vmem:[%s2100_s8 + $0x4a8] sm:$0xff] %v488_v21  ;;  %v508_v31 = vld [vmem:[#allocation3 + $0x4f8] sm:$0xff]  ;;  %v510_v32 = vld [vmem:[#allocation3 + $0x500] sm:$0xff] }
  0x73   : > { %491 = vst [vmem:[%s2100_s8 + $0x4b0] sm:$0xff] %v490_v22  ;;  %493 = vst [vmem:[%s2100_s8 + $0x4b8] sm:$0xff] %v492_v23  ;;  %v512_v33 = vld [vmem:[#allocation3 + $0x508] sm:$0xff]  ;;  %v514_v34 = vld [vmem:[#allocation3 + $0x510] sm:$0xff] }
  0x74   : > { %495 = vst [vmem:[%s2100_s8 + $0x4c0] sm:$0xff] %v494_v24  ;;  %497 = vst [vmem:[%s2100_s8 + $0x4c8] sm:$0xff] %v496_v25  ;;  %v516_v35 = vld [vmem:[#allocation3 + $0x518] sm:$0xff]  ;;  %v518_v36 = vld [vmem:[#allocation3 + $0x520] sm:$0xff] }
  0x75   : > { %499 = vst [vmem:[%s2100_s8 + $0x4d0] sm:$0xff] %v498_v26  ;;  %501 = vst [vmem:[%s2100_s8 + $0x4d8] sm:$0xff] %v500_v27  ;;  %v520_v37 = vld [vmem:[#allocation3 + $0x528] sm:$0xff]  ;;  %v522_v38 = vld [vmem:[#allocation3 + $0x530] sm:$0xff] }
  0x76   : > { %503 = vst [vmem:[%s2100_s8 + $0x4e0] sm:$0xff] %v502_v28  ;;  %505 = vst [vmem:[%s2100_s8 + $0x4e8] sm:$0xff] %v504_v29  ;;  %v524_v39 = vld [vmem:[#allocation3 + $0x538] sm:$0xff] }
  0x77   : > { %507 = vst [vmem:[%s2100_s8 + $0x4f0] sm:$0xff] %v506_v30  ;;  %509 = vst [vmem:[%s2100_s8 + $0x4f8] sm:$0xff] %v508_v31 }
  0x78   : > { %511 = vst [vmem:[%s2100_s8 + $0x500] sm:$0xff] %v510_v32  ;;  %513 = vst [vmem:[%s2100_s8 + $0x508] sm:$0xff] %v512_v33 }
  0x79   : > { %515 = vst [vmem:[%s2100_s8 + $0x510] sm:$0xff] %v514_v34  ;;  %517 = vst [vmem:[%s2100_s8 + $0x518] sm:$0xff] %v516_v35 }
  0x7a   : > { %519 = vst [vmem:[%s2100_s8 + $0x520] sm:$0xff] %v518_v36  ;;  %521 = vst [vmem:[%s2100_s8 + $0x528] sm:$0xff] %v520_v37 }
  0x7b   : > { %523 = vst [vmem:[%s2100_s8 + $0x530] sm:$0xff] %v522_v38  ;;  %525 = vst [vmem:[%s2100_s8 + $0x538] sm:$0xff] %v524_v39 }
  0x7c   : > { %533 = vsyncadd [#allocation2], 21504  ;;  %v534_v40 = vlaneseq  ;;  %vm643_vm0 = vcmask 1045504   ;;  %v575_v43 = vld [vmem:[#allocation3 + $0x10] sm:$0xfc]  ;;  %v577_v45 = vld [vmem:[#allocation3 + $0x20] sm:$0xff] }
  0x7d   : > { %v576_v44 = vld [vmem:[#allocation3 + $0x18] sm:$0xfc]  ;;  %v578_v46 = vld [vmem:[#allocation3 + $0x28] sm:$0xff]  ;;  %v579_v47 = vld [vmem:[#allocation3 + $0x30] sm:$0xff]  ;;  %v644_v49 = vrot.slane %v575_v43, 2  ;;  %v645_v50 = vrot.slane %v577_v45, 2 }
  0x7e   : > { %v2270_v41 = vand.u32 127, %v534_v40  ;;  %v580_v48 = vld [vmem:[#allocation3 + $0x38] sm:$0xff]  ;;  %v647_v51 = vrot.slane %v576_v44, 2  ;;  %v581_v52 = vld [vmem:[#allocation3 + $0x40] sm:$0xff]  ;;  %v582_v53 = vld [vmem:[#allocation3 + $0x48] sm:$0xff]  ;;  %v648_v55 = vrot.slane %v578_v46, 2 }
  0x7f   : > { %v583_v54 = vld [vmem:[#allocation3 + $0x50] sm:$0xff]  ;;  %v650_v56 = vrot.slane %v579_v47, 2  ;;  %v652_v57 = vrot.slane %v580_v48, 2  ;;  %v584_v58 = vld [vmem:[#allocation3 + $0x58] sm:$0xff]  ;;  %v585_v59 = vld [vmem:[#allocation3 + $0x60] sm:$0xff]  ;;  %v646_v61 = vsel %vm643_vm0, %v644_v49, %v645_v50  ;;  %v654_v62 = vrot.slane %v581_v52, 2 }
  0x80   : > { %v2273_v42 = vadd.s32 128, %v2270_v41  ;;  %vm537_vm1 = vcmp.ge.s32.totalorder %v2270_v41, 10  ;;  %v586_v60 = vld [vmem:[#allocation3 + $0x68] sm:$0xff]  ;;  %v656_v63 = vrot.slane %v582_v53, 2  ;;  %v658_v0 = vrot.slane %v583_v54, 2  ;;  %v587_v1 = vld [vmem:[#allocation3 + $0x70] sm:$0xff] }
  0x81   : > { %v588_v2 = vld [vmem:[#allocation3 + $0x78] sm:$0xff]  ;;  %v589_v3 = vld [vmem:[#allocation3 + $0x80] sm:$0xff]  ;;  %v2278_v4 = vsel %vm643_vm0, %v647_v51, %v648_v55  ;;  %v2281_v5 = vsel %vm643_vm0, %v645_v50, %v650_v56  ;;  %v2284_v6 = vsel %vm643_vm0, %v648_v55, %v652_v57  ;;  %v660_v7 = vrot.slane %v584_v58, 2  ;;  %v590_v8 = vld [vmem:[#allocation3 + $0x88] sm:$0xff] }
  0x82   : > { %v591_v9 = vld [vmem:[#allocation3 + $0x90] sm:$0xff]  ;;  %v592_v10 = vld [vmem:[#allocation3 + $0x98] sm:$0xff]  ;;  %v2287_v11 = vsel %vm643_vm0, %v650_v56, %v654_v62  ;;  %v2290_v12 = vsel %vm643_vm0, %v652_v57, %v656_v63  ;;  %v2293_v13 = vsel %vm643_vm0, %v654_v62, %v658_v0  ;;  %v662_v14 = vrot.slane %v585_v59, 2  ;;  %v593_v15 = vld [vmem:[#allocation3 + $0xa0] sm:$0xff] }
  0x83   : > { %vm540_vm2 = vcmp.lt.s32.totalorder %v2273_v42, 138  ;;  %v2297_v16 = vsel %vm643_vm0, %v656_v63, %v660_v7  ;;  %v664_v17 = vrot.slane %v586_v60, 2  ;;  %v666_v18 = vrot.slane %v587_v1, 2  ;;  %v2300_v20 = vld [vmem:[%s2098_s7] sm:$0xff]  ;;  %v594_v21 = vld [vmem:[#allocation3 + $0xa8] sm:$0xff]  ;;  %v595_v22 = vld [vmem:[#allocation3 + $0xb0] sm:$0xff] }
  0x84   : > { %v668_v19 = vrot.slane %v588_v2, 2  ;;  %v2303_v23 = vsel %vm643_vm0, %v658_v0, %v662_v14  ;;  %v670_v24 = vrot.slane %v589_v3, 2  ;;  %v672_v25 = vrot.slane %v590_v8, 2  ;;  %v596_v27 = vld [vmem:[#allocation3 + $0xb8] sm:$0xff]  ;;  %v597_v28 = vld [vmem:[#allocation3 + $0xc0] sm:$0xff]  ;;  %v598_v29 = vld [vmem:[#allocation3 + $0xc8] sm:$0xff] }
  0x85   : > { %v674_v26 = vrot.slane %v591_v9, 2  ;;  %v2306_v30 = vsel %vm643_vm0, %v660_v7, %v664_v17  ;;  %v2309_v31 = vsel %vm643_vm0, %v662_v14, %v666_v18  ;;  %v676_v33 = vrot.slane %v592_v10, 2  ;;  %v599_v34 = vld [vmem:[#allocation3 + $0xd0] sm:$0xff]  ;;  %v600_v35 = vld [vmem:[#allocation3 + $0xd8] sm:$0xff]  ;;  %v601_v40 = vld [vmem:[#allocation3 + $0xe0] sm:$0xff] }
  0x86   : > { %v2312_v32 = vsel %vm643_vm0, %v664_v17, %v668_v19  ;;  %v2315_v36 = vsel %vm643_vm0, %v666_v18, %v670_v24  ;;  %v2318_v37 = vsel %vm643_vm0, %v668_v19, %v672_v25  ;;  %v678_v39 = vrot.slane %v593_v15, 2  ;;  %v602_v47 = vld [vmem:[#allocation3 + $0xe8] sm:$0xff]  ;;  %v603_v48 = vld [vmem:[#allocation3 + $0xf0] sm:$0xff]  ;;  %v604_v54 = vld [vmem:[#allocation3 + $0xf8] sm:$0xff] }
  0x87   : > { %v2321_v38 = vsel %vm643_vm0, %v670_v24, %v674_v26  ;;  %v2324_v43 = vsel %vm643_vm0, %v672_v25, %v676_v33  ;;  %v680_v44 = vrot.slane %v594_v21, 2  ;;  %v682_v45 = vrot.slane %v595_v22, 2  ;;  %v2335_v53 = vld [vmem:[%s2098_s7 + $0x8] sm:$0xff]  ;;  %v605_v55 = vld [vmem:[#allocation3 + $0x100] sm:$0xff]  ;;  %v2347_v62 = vld [vmem:[%s2098_s7 + $0x18] sm:$0xff] }
  0x88   : > { %v2329_v46 = vsel %vm537_vm1, %v2300_v20, %v646_v61  ;;  %v2332_v49 = vsel %vm643_vm0, %v674_v26, %v678_v39  ;;  %v684_v50 = vrot.slane %v596_v27, 2  ;;  %v686_v51 = vrot.slane %v597_v28, 2  ;;  %v606_v56 = vld [vmem:[#allocation3 + $0x108] sm:$0xff]  ;;  %v2344_v61 = vld [vmem:[%s2098_s7 + $0x10] sm:$0xff]  ;;  %v608_v0 = vld [vmem:[#allocation3 + $0x118] sm:$0x3] }
  0x89   : > { %3501 = vst [vmem:[#allocation11_spill] sm:$0xff] %v2329_v46  ;;  %v688_v52 = vrot.slane %v598_v29, 2  ;;  %v2338_v57 = vsel %vm643_vm0, %v676_v33, %v680_v44  ;;  %v2341_v58 = vsel %vm643_vm0, %v678_v39, %v682_v45  ;;  %v690_v59 = vrot.slane %v599_v34, 2  ;;  %v607_v63 = vld [vmem:[#allocation3 + $0x110] sm:$0x3]  ;;  %v2359_v8 = vld [vmem:[%s2098_s7 + $0x20] sm:$0xff] }
  0x8a   : > { %v692_v60 = vrot.slane %v600_v35, 2  ;;  %v2350_v1 = vsel %vm643_vm0, %v680_v44, %v684_v50  ;;  %v2353_v2 = vsel %vm643_vm0, %v682_v45, %v686_v51  ;;  %v694_v7 = vrot.slane %v601_v40, 2  ;;  %v2362_v9 = vld [vmem:[%s2098_s7 + $0x28] sm:$0xff]  ;;  %v2365_v10 = vld [vmem:[%s2098_s7 + $0x30] sm:$0xff]  ;;  %v2368_v14 = vld [vmem:[%s2098_s7 + $0x38] sm:$0xff] }
  0x8b   : > { %v2356_v3 = vsel %vm643_vm0, %v684_v50, %v688_v52  ;;  %v2371_v15 = vsel %vm643_vm0, %v686_v51, %v690_v59  ;;  %v696_v18 = vrot.slane %v602_v47, 2  ;;  %v698_v19 = vrot.slane %v603_v48, 2  ;;  %v2377_v21 = vld [vmem:[%s2098_s7 + $0x40] sm:$0xff]  ;;  %v2380_v22 = vld [vmem:[%s2098_s7 + $0x48] sm:$0xff]  ;;  %v2383_v24 = vld [vmem:[%s2098_s7 + $0x50] sm:$0xff] }
  0x8c   : > { %v2374_v17 = vsel %vm643_vm0, %v688_v52, %v692_v60  ;;  %v2386_v25 = vld [vmem:[%s2098_s7 + $0x58] sm:$0xff]  ;;  %v695_v26 = vsel %vm643_vm0, %v690_v59, %v694_v7  ;;  %v700_v27 = vrot.slane %v604_v54, 2  ;;  %v702_v28 = vrot.slane %v605_v55, 2  ;;  %v2390_v33 = vld [vmem:[%s2098_s7 + $0x60] sm:$0xff]  ;;  %v2393_v34 = vld [vmem:[%s2098_s7 + $0x68] sm:$0xff] }
  0x8d   : > { %v704_v29 = vrot.slane %v606_v56, 2  ;;  %v2396_v35 = vld [vmem:[%s2098_s7 + $0x70] sm:$0xff]  ;;  %v2399_v39 = vld [vmem:[%s2098_s7 + $0x78] sm:$0xff]  ;;  %v697_v40 = vsel %vm643_vm0, %v692_v60, %v696_v18  ;;  %v699_v44 = vsel %vm643_vm0, %v694_v7, %v698_v19  ;;  %v706_v45 = vrot.slane %v607_v63, 2  ;;  %v2404_v48 = vld [vmem:[%s2098_s7 + $0x80] sm:$0xff] }
  0x8e   : > { %3502 = vst [vmem:[#allocation12_spill] sm:$0xff] %v2396_v35  ;;  %3503 = vst [vmem:[#allocation13_spill] sm:$0xff] %v2399_v39  ;;  %v708_v47 = vrot.slane %v608_v0, 2  ;;  %v2407_v50 = vld [vmem:[%s2098_s7 + $0x88] sm:$0xff]  ;;  %v2410_v51 = vld [vmem:[%s2098_s7 + $0x90] sm:$0xff]  ;;  %v701_v52 = vsel %vm643_vm0, %v696_v18, %v700_v27  ;;  %v703_v54 = vsel %vm643_vm0, %v698_v19, %v702_v28  ;;  %v2419_v56 = vsel %vm540_vm2, %v2335_v53, %v2278_v4 }
  0x8f   : > { %3504 = vst [vmem:[#allocation14_spill] sm:$0xff] %v2404_v48  ;;  %3505 = vst [vmem:[#allocation15_spill] sm:$0xff] %v2407_v50  ;;  %v705_v55 = vsel %vm643_vm0, %v700_v27, %v704_v29  ;;  %v2422_v59 = vld [vmem:[%s2098_s7 + $0x98] sm:$0xff]  ;;  %v2425_v60 = vld [vmem:[%s2098_s7 + $0xa0] sm:$0xff]  ;;  %v707_v0 = vsel %vm643_vm0, %v702_v28, %v706_v45  ;;  %v2436_v18 = vsel %vm537_vm1, %v2344_v61, %v2281_v5 }
  0x90   : > { %3506 = vst [vmem:[#allocation16_spill] sm:$0xff] %v2410_v51  ;;  %3507 = vst [vmem:[#allocation17_spill] sm:$0xff] %v2419_v56  ;;  %v2428_v63 = vld [vmem:[%s2098_s7 + $0xa8] sm:$0xff]  ;;  %v709_v7 = vsel %vm643_vm0, %v704_v29, %v708_v47  ;;  %v2442_v4 = vsel %vm540_vm2, %v2347_v62, %v2284_v6  ;;  %v2445_v19 = vld [vmem:[%s2098_s7 + $0xb0] sm:$0xff]  ;;  %v2457_v5 = vsel %vm537_vm1, %v2359_v8, %v2287_v11 }
  0x91   : > { %3508 = vst [vmem:[#allocation18_spill] sm:$0xff] %v2422_v59  ;;  %3509 = vst [vmem:[#allocation19_spill] sm:$0xff] %v2425_v60  ;;  %v2448_v27 = vld [vmem:[%s2098_s7 + $0xb8] sm:$0xff]  ;;  %v2451_v28 = vld [vmem:[%s2098_s7 + $0xc0] sm:$0xff]  ;;  %v2463_v6 = vsel %vm540_vm2, %v2362_v9, %v2290_v12  ;;  %v2469_v29 = vsel %vm537_vm1, %v2365_v10, %v2293_v13  ;;  %v2475_v45 = vsel %vm540_vm2, %v2368_v14, %v2297_v16 }
  0x92   : > { %3510 = vst [vmem:[#allocation20_spill] sm:$0xff] %v2428_v63  ;;  %3511 = vst [vmem:[#allocation21_spill] sm:$0xff] %v2436_v18  ;;  %v2478_v11 = vld [vmem:[%s2098_s7 + $0xc8] sm:$0xff]  ;;  %v2481_v47 = vld [vmem:[%s2098_s7 + $0xd0] sm:$0xff]  ;;  %v2490_v12 = vsel %vm537_vm1, %v2377_v21, %v2303_v23  ;;  %v2496_v13 = vsel %vm540_vm2, %v2380_v22, %v2306_v30  ;;  %v2502_v16 = vsel %vm537_vm1, %v2383_v24, %v2309_v31 }
  0x93   : > { %3512 = vst [vmem:[#allocation22_spill] sm:$0xff] %v2442_v4  ;;  %3513 = vst [vmem:[#allocation23_spill] sm:$0xff] %v2445_v19  ;;  %v2511_v23 = vld [vmem:[%s2098_s7 + $0xe0] sm:$0xff]  ;;  %v2523_v30 = vsel %vm537_vm1, %v2390_v33, %v2315_v36  ;;  %v2529_v31 = vsel %vm540_vm2, %v2393_v34, %v2318_v37  ;;  %v2544_v36 = vld [vmem:[%s2098_s7 + $0xf8] sm:$0xff]  ;;  %v2550_v37 = vsel %vm537_vm1, %v2404_v48, %v2332_v49 }
  0x94   : > { %3514 = vst [vmem:[#allocation24_spill] sm:$0xff] %v2448_v27  ;;  %3515 = vst [vmem:[#allocation25_spill] sm:$0xff] %v2451_v28  ;;  %v775_v49 = vld [vmem:[#allocation3 + $0x1d0] sm:$0xfc] }
  0x95   : > { %3516 = vst [vmem:[#allocation26_spill] sm:$0xff] %v2457_v5  ;;  %3517 = vst [vmem:[#allocation27_spill] sm:$0xff] %v2463_v6  ;;  %v2484_v5 = vld [vmem:[%s2098_s7 + $0xd8] sm:$0xff]  ;;  %v790_v6 = vld [vmem:[#allocation3 + $0x248] sm:$0xff] }
  0x96   : > { %3518 = vst [vmem:[#allocation28_spill] sm:$0xff] %v2469_v29  ;;  %3519 = vst [vmem:[#allocation29_spill] sm:$0xff] %v2475_v45  ;;  %v2508_v45 = vsel %vm540_vm2, %v2386_v25, %v2312_v32  ;;  %v2517_v29 = vld [vmem:[%s2098_s7 + $0xf0] sm:$0xff]  ;;  %v2535_v32 = vsel %vm537_vm1, %v2396_v35, %v2321_v38  ;;  %v2556_v38 = vsel %vm540_vm2, %v2407_v50, %v2338_v57  ;;  %v808_v50 = vld [vmem:[#allocation3 + $0x2d8] sm:$0x3] }
  0x97   : > { %3520 = vst [vmem:[#allocation30_spill] sm:$0xff] %v2478_v11  ;;  %3521 = vst [vmem:[#allocation31_spill] sm:$0xff] %v2481_v47  ;;  %v2574_v57 = vsel %vm537_vm1, %v2425_v60, %v2353_v2  ;;  %v776_v2 = vld [vmem:[#allocation3 + $0x1d8] sm:$0xfc]  ;;  %v795_v18 = vld [vmem:[#allocation3 + $0x270] sm:$0xff] }
  0x98   : > { %3522 = vst [vmem:[#allocation32_spill] sm:$0xff] %v2484_v5  ;;  %3523 = vst [vmem:[#allocation33_spill] sm:$0xff] %v2490_v12  ;;  %v2514_v12 = vld [vmem:[%s2098_s7 + $0xe8] sm:$0xff]  ;;  %v805_v60 = vld [vmem:[#allocation3 + $0x2c0] sm:$0xff] }
  0x99   : > { %3524 = vst [vmem:[#allocation34_spill] sm:$0xff] %v2496_v13  ;;  %3525 = vst [vmem:[#allocation35_spill] sm:$0xff] %v2502_v16 }
  0x9a   : > { %3526 = vst [vmem:[#allocation36_spill] sm:$0xff] %v2508_v45  ;;  %3527 = vst [vmem:[#allocation37_spill] sm:$0xff] %v2511_v23  ;;  %v2541_v45 = vsel %vm540_vm2, %v2399_v39, %v2324_v43  ;;  %v2562_v43 = vsel %vm537_vm1, %v2410_v51, %v2341_v58  ;;  %v2580_v58 = vsel %vm540_vm2, %v2428_v63, %v2356_v3 }
  0x9b   : > { %3528 = vst [vmem:[#allocation38_spill] sm:$0xff] %v2514_v12  ;;  %3529 = vst [vmem:[#allocation39_spill] sm:$0xff] %v2517_v29  ;;  %v2597_v3 = vsel %vm537_vm1, %v2451_v28, %v695_v26  ;;  %v2617_v26 = vsel %vm537_vm1, %v2511_v23, %v703_v54  ;;  %v843_v54 = vrot.slane %v775_v49, 2 }
  0x9c   : > { %3530 = vst [vmem:[#allocation40_spill] sm:$0xff] %v2523_v30  ;;  %3531 = vst [vmem:[#allocation41_spill] sm:$0xff] %v2529_v31  ;;  %v786_v31 = vld [vmem:[#allocation3 + $0x228] sm:$0xff] }
  0x9d   : > { %3532 = vst [vmem:[#allocation42_spill] sm:$0xff] %v2535_v32  ;;  %3533 = vst [vmem:[#allocation43_spill] sm:$0xff] %v2541_v45  ;;  %v2568_v45 = vsel %vm540_vm2, %v2422_v59, %v2350_v1  ;;  %v2586_v1 = vsel %vm537_vm1, %v2445_v19, %v2371_v15  ;;  %v2607_v15 = vsel %vm537_vm1, %v2481_v47, %v699_v44  ;;  %v799_v47 = vld [vmem:[#allocation3 + $0x290] sm:$0xff] }
  0x9e   : > { %3534 = vst [vmem:[#allocation44_spill] sm:$0xff] %v2544_v36  ;;  %3535 = vst [vmem:[#allocation45_spill] sm:$0xff] %v2550_v37  ;;  %v777_v37 = vld [vmem:[#allocation3 + $0x1e0] sm:$0xff]  ;;  %v2627_v44 = vsel %vm537_vm1, %v2517_v29, %v707_v0  ;;  %v788_v0 = vld [vmem:[#allocation3 + $0x238] sm:$0xff]  ;;  %v889_v59 = vrot.slane %v799_v47, 2  ;;  %v901_v47 = vrot.slane %v805_v60, 2 }
  0x9f   : > { %3536 = vst [vmem:[#allocation46_spill] sm:$0xff] %v2556_v38  ;;  %3537 = vst [vmem:[#allocation47_spill] sm:$0xff] %v2562_v43  ;;  %v779_v43 = vld [vmem:[#allocation3 + $0x1f0] sm:$0xff]  ;;  %v782_v38 = vld [vmem:[#allocation3 + $0x208] sm:$0xff] }
  0xa0   : > { %3538 = vst [vmem:[#allocation48_spill] sm:$0xff] %v2568_v45  ;;  %3539 = vst [vmem:[#allocation49_spill] sm:$0xff] %v2574_v57  ;;  %v2592_v45 = vsel %vm540_vm2, %v2448_v27, %v2374_v17  ;;  %v778_v57 = vld [vmem:[#allocation3 + $0x1e8] sm:$0xff]  ;;  %v2612_v17 = vsel %vm540_vm2, %v2484_v5, %v701_v52  ;;  %v2632_v52 = vsel %vm540_vm2, %v2544_v36, %v709_v7  ;;  %v855_v13 = vrot.slane %v782_v38, 2  ;;  %v797_v29 = vld [vmem:[#allocation3 + $0x280] sm:$0xff] }
  0xa1   : > { %3540 = vst [vmem:[#allocation50_spill] sm:$0xff] %v2580_v58  ;;  %3541 = vst [vmem:[#allocation51_spill] sm:$0xff] %v2586_v1  ;;  %v2602_v58 = vsel %vm540_vm2, %v2478_v11, %v697_v40  ;;  %v781_v1 = vld [vmem:[#allocation3 + $0x200] sm:$0xff]  ;;  %v2622_v40 = vsel %vm540_vm2, %v2514_v12, %v705_v55  ;;  %v847_v32 = vrot.slane %v778_v57, 2  ;;  %v787_v55 = vld [vmem:[#allocation3 + $0x230] sm:$0xff]  ;;  %v871_v36 = vrot.slane %v790_v6, 2 }
  0xa2   : > { %3542 = vst [vmem:[#allocation52_spill] sm:$0xff] %v2592_v45  ;;  %3543 = vst [vmem:[#allocation53_spill] sm:$0xff] %v2597_v3  ;;  %v780_v45 = vld [vmem:[#allocation3 + $0x1f8] sm:$0xff]  ;;  %v846_v3 = vrot.slane %v776_v2, 2  ;;  %v853_v16 = vrot.slane %v781_v1, 2  ;;  %v793_v1 = vld [vmem:[#allocation3 + $0x260] sm:$0xff] }
  0xa3   : > { %3544 = vst [vmem:[#allocation54_spill] sm:$0xff] %v2602_v58  ;;  %3545 = vst [vmem:[#allocation55_spill] sm:$0xff] %v2607_v15  ;;  %v784_v15 = vld [vmem:[#allocation3 + $0x218] sm:$0xff]  ;;  %v785_v58 = vld [vmem:[#allocation3 + $0x220] sm:$0xff]  ;;  %v851_v30 = vrot.slane %v780_v45, 2  ;;  %v865_v56 = vrot.slane %v787_v55, 2 }
  0xa4   : > { %3546 = vst [vmem:[#allocation56_spill] sm:$0xff] %v2612_v17  ;;  %3547 = vst [vmem:[#allocation57_spill] sm:$0xff] %v2617_v26  ;;  %v783_v17 = vld [vmem:[#allocation3 + $0x210] sm:$0xff]  ;;  %v844_v26 = vrot.slane %v777_v37, 2  ;;  %v2638_v7 = vsel %vm643_vm0, %v846_v3, %v847_v32  ;;  %v859_v49 = vrot.slane %v784_v15, 2  ;;  %v792_v2 = vld [vmem:[#allocation3 + $0x258] sm:$0xff] }
  0xa5   : > { %3548 = vst [vmem:[#allocation58_spill] sm:$0xff] %v2622_v40  ;;  %3549 = vst [vmem:[#allocation59_spill] sm:$0xff] %v2627_v44  ;;  %v849_v40 = vrot.slane %v779_v43, 2  ;;  %v789_v44 = vld [vmem:[#allocation3 + $0x240] sm:$0xff]  ;;  %v791_v37 = vld [vmem:[#allocation3 + $0x250] sm:$0xff]  ;;  %v2644_v45 = vsel %vm643_vm0, %v847_v32, %v851_v30  ;;  %v2650_v43 = vsel %vm643_vm0, %v851_v30, %v855_v13  ;;  %v867_v32 = vrot.slane %v788_v0, 2 }
  0xa6   : > { %3550 = vst [vmem:[#allocation60_spill] sm:$0xff] %v2632_v52  ;;  %v2635_v4 = vsel %vm643_vm0, %v843_v54, %v844_v26  ;;  %v857_v52 = vrot.slane %v783_v17, 2  ;;  %v2656_v15 = vsel %vm643_vm0, %v855_v13, %v859_v49  ;;  %v861_v17 = vrot.slane %v785_v58, 2  ;;  %v798_v12 = vld [vmem:[#allocation3 + $0x288] sm:$0xff]  ;;  %v800_v13 = vld [vmem:[#allocation3 + $0x298] sm:$0xff]  ;;  %v801_v6 = vld [vmem:[#allocation3 + $0x2a0] sm:$0xff] }
  0xa7   : > { %v2641_v57 = vsel %vm643_vm0, %v844_v26, %v849_v40  ;;  %v2647_v38 = vsel %vm643_vm0, %v849_v40, %v853_v16  ;;  %v863_v54 = vrot.slane %v786_v31, 2  ;;  %v794_v26 = vld [vmem:[#allocation3 + $0x268] sm:$0xff]  ;;  %v869_v46 = vrot.slane %v789_v44, 2  ;;  %v796_v40 = vld [vmem:[#allocation3 + $0x278] sm:$0xff] }
  0xa8   : > { %v2653_v3 = vsel %vm643_vm0, %v853_v16, %v857_v52  ;;  %v862_v30 = vsel %vm643_vm0, %v857_v52, %v861_v17  ;;  %v873_v16 = vrot.slane %v791_v37, 2  ;;  %v875_v5 = vrot.slane %v792_v2, 2  ;;  %v803_v37 = vld [vmem:[#allocation3 + $0x2b0] sm:$0xff] }
  0xa9   : > { %v864_v23 = vsel %vm643_vm0, %v859_v49, %v863_v54  ;;  %v866_v58 = vsel %vm643_vm0, %v861_v17, %v865_v56  ;;  %v868_v31 = vsel %vm643_vm0, %v863_v54, %v867_v32  ;;  %v870_v55 = vsel %vm643_vm0, %v865_v56, %v869_v46  ;;  %v802_v49 = vld [vmem:[#allocation3 + $0x2a8] sm:$0xff]  ;;  %v804_v17 = vld [vmem:[#allocation3 + $0x2b8] sm:$0xff] }
  0xaa   : > { %v872_v44 = vsel %vm643_vm0, %v867_v32, %v871_v36  ;;  %v874_v0 = vsel %vm643_vm0, %v869_v46, %v873_v16  ;;  %v876_v11 = vsel %vm643_vm0, %v871_v36, %v875_v5  ;;  %v877_v52 = vrot.slane %v793_v1, 2  ;;  %v806_v54 = vld [vmem:[#allocation3 + $0x2c8] sm:$0xff]  ;;  %v807_v46 = vld [vmem:[#allocation3 + $0x2d0] sm:$0x3] }
  0xab   : > { %v879_v28 = vrot.slane %v794_v26, 2  ;;  %v881_v2 = vrot.slane %v795_v18, 2  ;;  %v883_v27 = vrot.slane %v796_v40, 2  ;;  %v885_v19 = vrot.slane %v797_v29, 2 }
  0xac   : > { %v887_v63 = vrot.slane %v798_v12, 2  ;;  %v878_v56 = vsel %vm643_vm0, %v873_v16, %v877_v52  ;;  %v891_v51 = vrot.slane %v800_v13, 2  ;;  %v893_v40 = vrot.slane %v801_v6, 2 }
  0xad   : > { %v880_v32 = vsel %vm643_vm0, %v875_v5, %v879_v28  ;;  %v882_v36 = vsel %vm643_vm0, %v877_v52, %v881_v2  ;;  %v884_v1 = vsel %vm643_vm0, %v879_v28, %v883_v27  ;;  %v886_v18 = vsel %vm643_vm0, %v881_v2, %v885_v19 }
  0xae   : > { %v888_v29 = vsel %vm643_vm0, %v883_v27, %v887_v63  ;;  %v890_v12 = vsel %vm643_vm0, %v885_v19, %v889_v59  ;;  %v892_v26 = vsel %vm643_vm0, %v887_v63, %v891_v51  ;;  %v895_v16 = vrot.slane %v802_v49, 2 }
  0xaf   : > { %v897_v48 = vrot.slane %v803_v37, 2  ;;  %v899_v5 = vrot.slane %v804_v17, 2  ;;  %v903_v13 = vrot.slane %v806_v54, 2  ;;  %v894_v39 = vsel %vm643_vm0, %v889_v59, %v893_v40  ;;  %v3569_v37 = vld [vmem:[#allocation14_spill] sm:$0xff]  ;;  %v3571_v17 = vld [vmem:[#allocation15_spill] sm:$0xff]  ;;  %v3573_v54 = vld [vmem:[#allocation16_spill] sm:$0xff] }
  0xb0   : > { %v896_v52 = vsel %vm643_vm0, %v891_v51, %v895_v16  ;;  %v905_v35 = vrot.slane %v807_v46, 2  ;;  %v907_v28 = vrot.slane %v808_v50, 2  ;;  %v2686_v59 = vsel %vm537_vm1, %v2300_v20, %v2635_v4  ;;  %v3575_v46 = vld [vmem:[#allocation18_spill] sm:$0xff] }
  0xb1   : > { %v898_v2 = vsel %vm643_vm0, %v893_v40, %v897_v48  ;;  %v900_v27 = vsel %vm643_vm0, %v895_v16, %v899_v5  ;;  %v902_v19 = vsel %vm643_vm0, %v897_v48, %v901_v47  ;;  %v904_v63 = vsel %vm643_vm0, %v899_v5, %v903_v13  ;;  %3551 = vst [vmem:[#allocation61_spill] sm:$0xff] %v2686_v59  ;;  %v3577_v40 = vld [vmem:[#allocation19_spill] sm:$0xff]  ;;  %v3579_v16 = vld [vmem:[#allocation20_spill] sm:$0xff]  ;;  %v974_v5 = vld [vmem:[#allocation3 + $0x390] sm:$0xfc] }
  0xb2   : > { %v906_v6 = vsel %vm643_vm0, %v901_v47, %v905_v35  ;;  %v908_v49 = vsel %vm643_vm0, %v903_v13, %v907_v28  ;;  %v2692_v50 = vsel %vm540_vm2, %v2335_v53, %v2638_v7  ;;  %v2698_v48 = vsel %vm537_vm1, %v2344_v61, %v2641_v57  ;;  %v975_v47 = vld [vmem:[#allocation3 + $0x398] sm:$0xfc]  ;;  %v976_v13 = vld [vmem:[#allocation3 + $0x3a0] sm:$0xff] }
  0xb3   : > { %3552 = vst [vmem:[#allocation62_spill] sm:$0xff] %v2692_v50  ;;  %3553 = vst [vmem:[#allocation63_spill] sm:$0xff] %v2698_v48  ;;  %v2704_v35 = vsel %vm540_vm2, %v2347_v62, %v2644_v45  ;;  %v2710_v51 = vsel %vm537_vm1, %v2359_v8, %v2647_v38  ;;  %v2716_v60 = vsel %vm540_vm2, %v2362_v9, %v2650_v43  ;;  %v993_v50 = vld [vmem:[#allocation3 + $0x428] sm:$0xff]  ;;  %v995_v59 = vld [vmem:[#allocation3 + $0x438] sm:$0xff] }
  0xb4   : > { %3554 = vst [vmem:[#allocation64_spill] sm:$0xff] %v2704_v35  ;;  %3555 = vst [vmem:[#allocation65_spill] sm:$0xff] %v2710_v51  ;;  %v2722_v4 = vsel %vm537_vm1, %v2365_v10, %v2653_v3  ;;  %v2728_v7 = vsel %vm540_vm2, %v2368_v14, %v2656_v15  ;;  %v2733_v57 = vsel %vm537_vm1, %v2377_v21, %v862_v30  ;;  %v3565_v15 = vld [vmem:[#allocation12_spill] sm:$0xff]  ;;  %v988_v35 = vld [vmem:[#allocation3 + $0x400] sm:$0xff] }
  0xb5   : > { %3556 = vst [vmem:[#allocation66_spill] sm:$0xff] %v2716_v60  ;;  %3557 = vst [vmem:[#allocation67_spill] sm:$0xff] %v2722_v4  ;;  %v2738_v45 = vsel %vm540_vm2, %v2380_v22, %v864_v23  ;;  %v2743_v38 = vsel %vm537_vm1, %v2383_v24, %v866_v58  ;;  %v2748_v43 = vsel %vm540_vm2, %v2386_v25, %v868_v31  ;;  %v3567_v58 = vld [vmem:[#allocation13_spill] sm:$0xff]  ;;  %v987_v4 = vld [vmem:[#allocation3 + $0x3f8] sm:$0xff] }
  0xb6   : > { %3558 = vst [vmem:[#allocation68_spill] sm:$0xff] %v2728_v7  ;;  %3559 = vst [vmem:[#allocation69_spill] sm:$0xff] %v2733_v57  ;;  %v2753_v3 = vsel %vm537_vm1, %v2390_v33, %v870_v55  ;;  %v2758_v23 = vsel %vm540_vm2, %v2393_v34, %v872_v44  ;;  %v2763_v30 = vsel %vm537_vm1, %v3565_v15, %v874_v0  ;;  %v985_v57 = vld [vmem:[#allocation3 + $0x3e8] sm:$0xff]  ;;  %v986_v7 = vld [vmem:[#allocation3 + $0x3f0] sm:$0xff] }
  0xb7   : > { %3560 = vst [vmem:[#allocation70_spill] sm:$0xff] %v2738_v45  ;;  %3561 = vst [vmem:[#allocation71_spill] sm:$0xff] %v2743_v38  ;;  %v2768_v31 = vsel %vm540_vm2, %v3567_v58, %v876_v11  ;;  %v2773_v55 = vsel %vm537_vm1, %v3569_v37, %v878_v56  ;;  %v2778_v44 = vsel %vm540_vm2, %v3571_v17, %v880_v32  ;;  %v1045_v38 = vrot.slane %v975_v47, 2 }
  0xb8   : > { %3562 = vst [vmem:[#allocation72_spill] sm:$0xff] %v2748_v43  ;;  %3563 = vst [vmem:[#allocation73_spill] sm:$0xff] %v2753_v3  ;;  %v2783_v0 = vsel %vm537_vm1, %v3573_v54, %v882_v36  ;;  %v2788_v11 = vsel %vm540_vm2, %v3575_v46, %v884_v1  ;;  %v2793_v56 = vsel %vm537_vm1, %v3577_v40, %v886_v18  ;;  %v3581_v36 = vld [vmem:[#allocation23_spill] sm:$0xff]  ;;  %v3583_v1 = vld [vmem:[#allocation24_spill] sm:$0xff]  ;;  %v1043_v3 = vrot.slane %v976_v13, 2 }
  0xb9   : > { %3564 = vst [vmem:[#allocation74_spill] sm:$0xff] %v2758_v23  ;;  %3566 = vst [vmem:[#allocation75_spill] sm:$0xff] %v2763_v30  ;;  %v2798_v32 = vsel %vm540_vm2, %v3579_v16, %v888_v29  ;;  %v2803_v28 = vsel %vm537_vm1, %v3581_v36, %v890_v12  ;;  %v3585_v18 = vld [vmem:[#allocation25_spill] sm:$0xff]  ;;  %v3587_v29 = vld [vmem:[#allocation30_spill] sm:$0xff]  ;;  %v1064_v48 = vrot.slane %v986_v7, 2 }
  0xba   : > { %3568 = vst [vmem:[#allocation76_spill] sm:$0xff] %v2768_v31  ;;  %3570 = vst [vmem:[#allocation77_spill] sm:$0xff] %v2773_v55  ;;  %v979_v55 = vld [vmem:[#allocation3 + $0x3b8] sm:$0xff]  ;;  %v3589_v12 = vld [vmem:[#allocation31_spill] sm:$0xff] }
  0xbb   : > { %3572 = vst [vmem:[#allocation78_spill] sm:$0xff] %v2778_v44  ;;  %3574 = vst [vmem:[#allocation79_spill] sm:$0xff] %v2783_v0  ;;  %v977_v0 = vld [vmem:[#allocation3 + $0x3a8] sm:$0xff]  ;;  %v978_v44 = vld [vmem:[#allocation3 + $0x3b0] sm:$0xff]  ;;  %v1050_v45 = vrot.slane %v979_v55, 2 }
  0xbc   : > { %3576 = vst [vmem:[#allocation80_spill] sm:$0xff] %v2788_v11  ;;  %3578 = vst [vmem:[#allocation81_spill] sm:$0xff] %v2793_v56  ;;  %v2808_v11 = vsel %vm540_vm2, %v3583_v1, %v892_v26  ;;  %v2813_v56 = vsel %vm537_vm1, %v3585_v18, %v894_v39  ;;  %v3591_v26 = vld [vmem:[#allocation32_spill] sm:$0xff]  ;;  %v3593_v39 = vld [vmem:[#allocation37_spill] sm:$0xff]  ;;  %v1082_v1 = vrot.slane %v995_v59, 2 }
  0xbd   : > { %3580 = vst [vmem:[#allocation82_spill] sm:$0xff] %v2798_v32  ;;  %3582 = vst [vmem:[#allocation83_spill] sm:$0xff] %v2803_v28  ;;  %v2818_v32 = vsel %vm540_vm2, %v3587_v29, %v896_v52  ;;  %v2823_v28 = vsel %vm537_vm1, %v3589_v12, %v898_v2  ;;  %v3595_v52 = vld [vmem:[#allocation38_spill] sm:$0xff]  ;;  %v980_v31 = vld [vmem:[#allocation3 + $0x3c0] sm:$0xff]  ;;  %v1078_v29 = vrot.slane %v993_v50, 2 }
  0xbe   : > { %3584 = vst [vmem:[#allocation84_spill] sm:$0xff] %v2808_v11  ;;  %3586 = vst [vmem:[#allocation85_spill] sm:$0xff] %v2813_v56  ;;  %v2828_v11 = vsel %vm540_vm2, %v3591_v26, %v900_v27  ;;  %v2833_v56 = vsel %vm537_vm1, %v3593_v39, %v902_v19  ;;  %v981_v30 = vld [vmem:[#allocation3 + $0x3c8] sm:$0xff]  ;;  %v982_v23 = vld [vmem:[#allocation3 + $0x3d0] sm:$0xff] }
  0xbf   : > { %3588 = vst [vmem:[#allocation86_spill] sm:$0xff] %v2818_v32  ;;  %3590 = vst [vmem:[#allocation87_spill] sm:$0xff] %v2823_v28  ;;  %v2838_v32 = vsel %vm540_vm2, %v3595_v52, %v904_v63  ;;  %v3597_v2 = vld [vmem:[#allocation39_spill] sm:$0xff]  ;;  %v3599_v27 = vld [vmem:[#allocation44_spill] sm:$0xff]  ;;  %v1046_v63 = vrot.slane %v977_v0, 2  ;;  %v1056_v51 = vrot.slane %v982_v23, 2 }
  0xc0   : > { %3592 = vst [vmem:[#allocation88_spill] sm:$0xff] %v2828_v11  ;;  %3594 = vst [vmem:[#allocation89_spill] sm:$0xff] %v2833_v56  ;;  %v2843_v28 = vsel %vm537_vm1, %v3597_v2, %v906_v6  ;;  %v2848_v11 = vsel %vm540_vm2, %v3599_v27, %v908_v49  ;;  %v983_v19 = vld [vmem:[#allocation3 + $0x3d8] sm:$0xff]  ;;  %v1042_v56 = vrot.slane %v974_v5, 2  ;;  %v984_v43 = vld [vmem:[#allocation3 + $0x3e0] sm:$0xff]  ;;  %v1052_v6 = vrot.slane %v980_v31, 2 }
  0xc1   : > { %3596 = vst [vmem:[#allocation90_spill] sm:$0xff] %v2838_v32  ;;  %3598 = vst [vmem:[#allocation91_spill] sm:$0xff] %v2843_v28  ;;  %v1048_v32 = vrot.slane %v978_v44, 2  ;;  %v1054_v28 = vrot.slane %v981_v30, 2  ;;  %v989_v49 = vld [vmem:[#allocation3 + $0x408] sm:$0xff]  ;;  %v2854_v5 = vsel %vm643_vm0, %v1045_v38, %v1046_v63  ;;  %v2860_v55 = vsel %vm643_vm0, %v1046_v63, %v1050_v45  ;;  %v991_v0 = vld [vmem:[#allocation3 + $0x418] sm:$0xff] }
  0xc2   : > { %3600 = vst [vmem:[#allocation92_spill] sm:$0xff] %v2848_v11  ;;  %v2851_v60 = vsel %vm643_vm0, %v1042_v56, %v1043_v3  ;;  %v990_v11 = vld [vmem:[#allocation3 + $0x410] sm:$0xff]  ;;  %v1058_v44 = vrot.slane %v983_v19, 2  ;;  %v2869_v23 = vsel %vm643_vm0, %v1052_v6, %v1056_v51  ;;  %v1060_v31 = vrot.slane %v984_v43, 2  ;;  %v992_v38 = vld [vmem:[#allocation3 + $0x420] sm:$0xff]  ;;  %v1005_v46 = vld [vmem:[#allocation3 + $0x488] sm:$0xff] }
  0xc3   : > { %v2857_v47 = vsel %vm643_vm0, %v1043_v3, %v1048_v32  ;;  %v2863_v56 = vsel %vm643_vm0, %v1048_v32, %v1052_v6  ;;  %v2866_v30 = vsel %vm643_vm0, %v1050_v45, %v1054_v28  ;;  %v1062_v3 = vrot.slane %v985_v57, 2  ;;  %v994_v19 = vld [vmem:[#allocation3 + $0x430] sm:$0xff]  ;;  %v996_v52 = vld [vmem:[#allocation3 + $0x440] sm:$0xff]  ;;  %v997_v6 = vld [vmem:[#allocation3 + $0x448] sm:$0xff] }
  0xc4   : > { %v2872_v13 = vsel %vm643_vm0, %v1054_v28, %v1058_v44  ;;  %v1066_v63 = vrot.slane %v987_v4, 2  ;;  %v2875_v32 = vsel %vm643_vm0, %v1056_v51, %v1060_v31  ;;  %v1068_v27 = vrot.slane %v988_v35, 2  ;;  %v998_v39 = vld [vmem:[#allocation3 + $0x450] sm:$0xff]  ;;  %v999_v4 = vld [vmem:[#allocation3 + $0x458] sm:$0xff] }
  0xc5   : > { %v1070_v45 = vrot.slane %v989_v49, 2  ;;  %v1072_v2 = vrot.slane %v990_v11, 2  ;;  %v1063_v43 = vsel %vm643_vm0, %v1058_v44, %v1062_v3  ;;  %v1065_v28 = vsel %vm643_vm0, %v1060_v31, %v1064_v48  ;;  %v1000_v49 = vld [vmem:[#allocation3 + $0x460] sm:$0xff]  ;;  %v1001_v44 = vld [vmem:[#allocation3 + $0x468] sm:$0xff]  ;;  %v1002_v36 = vld [vmem:[#allocation3 + $0x470] sm:$0xff] }
  0xc6   : > { %v1067_v57 = vsel %vm643_vm0, %v1062_v3, %v1066_v63  ;;  %v1074_v7 = vrot.slane %v991_v0, 2  ;;  %v1069_v26 = vsel %vm643_vm0, %v1064_v48, %v1068_v27  ;;  %v1076_v35 = vrot.slane %v992_v38, 2  ;;  %v1003_v31 = vld [vmem:[#allocation3 + $0x478] sm:$0xff]  ;;  %v1004_v48 = vld [vmem:[#allocation3 + $0x480] sm:$0xff] }
  0xc7   : > { %v1071_v12 = vsel %vm643_vm0, %v1066_v63, %v1070_v45  ;;  %v1073_v51 = vsel %vm643_vm0, %v1068_v27, %v1072_v2  ;;  %v1080_v18 = vrot.slane %v994_v19, 2  ;;  %v1084_v0 = vrot.slane %v996_v52, 2  ;;  %v1006_v63 = vld [vmem:[#allocation3 + $0x490] sm:$0x3]  ;;  %v1007_v19 = vld [vmem:[#allocation3 + $0x498] sm:$0x3] }
  0xc8   : > { %v1075_v11 = vsel %vm643_vm0, %v1070_v45, %v1074_v7  ;;  %v1077_v3 = vsel %vm643_vm0, %v1072_v2, %v1076_v35  ;;  %v1086_v16 = vrot.slane %v997_v6, 2  ;;  %v1088_v40 = vrot.slane %v998_v39, 2 }
  0xc9   : > { %v1079_v27 = vsel %vm643_vm0, %v1074_v7, %v1078_v29  ;;  %v1081_v38 = vsel %vm643_vm0, %v1076_v35, %v1080_v18  ;;  %v1083_v45 = vsel %vm643_vm0, %v1078_v29, %v1082_v1  ;;  %v1090_v50 = vrot.slane %v999_v4, 2 }
  0xca   : > { %v1085_v59 = vsel %vm643_vm0, %v1080_v18, %v1084_v0  ;;  %v1087_v54 = vsel %vm643_vm0, %v1082_v1, %v1086_v16  ;;  %v1089_v2 = vsel %vm643_vm0, %v1084_v0, %v1088_v40  ;;  %v1092_v52 = vrot.slane %v1000_v49, 2 }
  0xcb   : > { %v1091_v39 = vsel %vm643_vm0, %v1086_v16, %v1090_v50  ;;  %v1094_v6 = vrot.slane %v1001_v44, 2  ;;  %v1096_v17 = vrot.slane %v1002_v36, 2  ;;  %v1098_v37 = vrot.slane %v1003_v31, 2  ;;  %v3612_v44 = vld [vmem:[#allocation30_spill] sm:$0xff]  ;;  %v3613_v31 = vld [vmem:[#allocation31_spill] sm:$0xff] }
  0xcc   : > { %v1093_v7 = vsel %vm643_vm0, %v1088_v40, %v1092_v52  ;;  %v1100_v58 = vrot.slane %v1004_v48, 2  ;;  %v1102_v35 = vrot.slane %v1005_v46, 2  ;;  %v1104_v15 = vrot.slane %v1006_v63, 2  ;;  %v3614_v48 = vld [vmem:[#allocation32_spill] sm:$0xff] }
  0xcd   : > { %v1095_v29 = vsel %vm643_vm0, %v1090_v50, %v1094_v6  ;;  %v1097_v4 = vsel %vm643_vm0, %v1092_v52, %v1096_v17  ;;  %v1099_v18 = vsel %vm643_vm0, %v1094_v6, %v1098_v37  ;;  %v1106_v1 = vrot.slane %v1007_v19, 2  ;;  %v3617_v19 = vld [vmem:[#allocation39_spill] sm:$0xff] }
  0xce   : > { %v1101_v0 = vsel %vm643_vm0, %v1096_v17, %v1100_v58  ;;  %v1103_v49 = vsel %vm643_vm0, %v1098_v37, %v1102_v35  ;;  %v1105_v16 = vsel %vm643_vm0, %v1100_v58, %v1104_v15  ;;  %v2903_v40 = vsel %vm537_vm1, %v2300_v20, %v2851_v60  ;;  %v3601_v15 = vld [vmem:[#allocation12_spill] sm:$0xff]  ;;  %v3602_v58 = vld [vmem:[#allocation13_spill] sm:$0xff]  ;;  %v3603_v17 = vld [vmem:[#allocation14_spill] sm:$0xff] }
  0xcf   : > { %v1107_v46 = vsel %vm643_vm0, %v1102_v35, %v1106_v1  ;;  %v2910_v36 = vsel %vm540_vm2, %v2335_v53, %v2854_v5  ;;  %v2916_v37 = vsel %vm537_vm1, %v2344_v61, %v2857_v47  ;;  %v2922_v20 = vsel %vm540_vm2, %v2347_v62, %v2860_v55  ;;  %v3606_v47 = vld [vmem:[#allocation18_spill] sm:$0xff] }
  0xd0   : > { %v2928_v60 = vsel %vm537_vm1, %v2359_v8, %v2863_v56  ;;  %v2934_v53 = vsel %vm540_vm2, %v2362_v9, %v2866_v30  ;;  %v2940_v61 = vsel %vm537_vm1, %v2365_v10, %v2869_v23  ;;  %v2946_v62 = vsel %vm540_vm2, %v2368_v14, %v2872_v13  ;;  %v3607_v56 = vld [vmem:[#allocation19_spill] sm:$0xff]  ;;  %v3608_v23 = vld [vmem:[#allocation20_spill] sm:$0xff] }
  0xd1   : > { %v2952_v8 = vsel %vm537_vm1, %v2377_v21, %v2875_v32  ;;  %v2957_v9 = vsel %vm540_vm2, %v2380_v22, %v1063_v43  ;;  %v2962_v10 = vsel %vm537_vm1, %v2383_v24, %v1065_v28  ;;  %v2967_v14 = vsel %vm540_vm2, %v2386_v25, %v1067_v57  ;;  %v3609_v32 = vld [vmem:[#allocation23_spill] sm:$0xff]  ;;  %v3610_v28 = vld [vmem:[#allocation24_spill] sm:$0xff] }
  0xd2   : > { %v2972_v21 = vsel %vm537_vm1, %v2390_v33, %v1069_v26  ;;  %v2977_v22 = vsel %vm540_vm2, %v2393_v34, %v1071_v12  ;;  %v2982_v24 = vsel %vm537_vm1, %v3601_v15, %v1073_v51  ;;  %v2987_v25 = vsel %vm540_vm2, %v3602_v58, %v1075_v11  ;;  %v3604_v26 = vld [vmem:[#allocation15_spill] sm:$0xff]  ;;  %v3605_v12 = vld [vmem:[#allocation16_spill] sm:$0xff]  ;;  %v3611_v51 = vld [vmem:[#allocation25_spill] sm:$0xff] }
  0xd3   : > { %v2992_v33 = vsel %vm537_vm1, %v3603_v17, %v1077_v3  ;;  %v2997_v34 = vsel %vm540_vm2, %v3604_v26, %v1079_v27  ;;  %v3002_v5 = vsel %vm537_vm1, %v3605_v12, %v1081_v38  ;;  %v3007_v55 = vsel %vm540_vm2, %v3606_v47, %v1083_v45  ;;  %v3615_v27 = vld [vmem:[#allocation37_spill] sm:$0xff]  ;;  %v3616_v45 = vld [vmem:[#allocation38_spill] sm:$0xff] }
  0xd4   : > { %v3012_v30 = vsel %vm537_vm1, %v3607_v56, %v1085_v59  ;;  %v3017_v13 = vsel %vm540_vm2, %v3608_v23, %v1087_v54  ;;  %v3022_v43 = vsel %vm537_vm1, %v3609_v32, %v1089_v2  ;;  %v3027_v57 = vsel %vm540_vm2, %v3610_v28, %v1091_v39  ;;  %v3618_v2 = vld [vmem:[#allocation44_spill] sm:$0xff] }
  0xd5   : > { %v3032_v11 = vsel %vm537_vm1, %v3611_v51, %v1093_v7  ;;  %v3037_v54 = vsel %vm540_vm2, %v3612_v44, %v1095_v29  ;;  %v3042_v3 = vsel %vm537_vm1, %v3613_v31, %v1097_v4  ;;  %v3047_v63 = vsel %vm540_vm2, %v3614_v48, %v1099_v18 }
  0xd6   : > { %v3052_v38 = vsel %vm537_vm1, %v3615_v27, %v1101_v0  ;;  %v3057_v50 = vsel %vm540_vm2, %v3616_v45, %v1103_v49  ;;  %v3062_v59 = vsel %vm537_vm1, %v3617_v19, %v1105_v16  ;;  %v3067_v52 = vsel %vm540_vm2, %v3618_v2, %v1107_v46 }
  0xd7   : > { %1981 = dma.done.wait [#allocation2], 21504 }
  0xd8   : > { %1982 = vsyncadd [#allocation2], 4294945792  ;;  %v3619_v39 = vld [vmem:[#allocation11_spill] sm:$0xff]  ;;  %v3620_v7 = vld [vmem:[#allocation17_spill] sm:$0xff]  ;;  %vm1308_vm3 = vcmask 785410   ;;  %vm1210_vm4 = vcmask 1041408  }
  0xd9   : > { %v1211_v6 = vrot.slane %v3619_v39, 6  ;;  %v1212_v35 = vrot.slane %v3620_v7, 6  ;;  %v3621_v29 = vld [vmem:[#allocation21_spill] sm:$0xff]  ;;  %v3622_v4 = vld [vmem:[#allocation22_spill] sm:$0xff]  ;;  %vm1311_vm5 = vcmask 785408   ;;  %v3624_v0 = vld [vmem:[#allocation27_spill] sm:$0xff] }
  0xda   : > { %v1213_v41 = vrot.slane %v3621_v29, 6  ;;  %v1215_v18 = vrot.slane %v3622_v4, 6  ;;  %v3623_v42 = vld [vmem:[#allocation26_spill] sm:$0xff]  ;;  %v1219_v49 = vrot.slane %v3624_v0, 6  ;;  %v3625_v16 = vld [vmem:[#allocation28_spill] sm:$0xff]  ;;  %v3626_v15 = vld [vmem:[#allocation29_spill] sm:$0xff] }
  0xdb   : > { %v1217_v1 = vrot.slane %v3623_v42, 6  ;;  %1307 = vst [vmem:[%s2100_s8 + $0x10] sm:$0xfc] %v1211_v6  ;;  %1309 = vst.msk [vmem:[%s2100_s8 + $0x18] sm:$0xfc] %vm1308_vm3, %v1212_v35  ;;  %v1221_v46 = vrot.slane %v3625_v16, 6 }
  0xdc   : > { %v1223_v58 = vrot.slane %v3626_v15, 6  ;;  %v3627_v17 = vld [vmem:[#allocation33_spill] sm:$0xff]  ;;  %v1214_v12 = vsel %vm1210_vm4, %v1211_v6, %v1213_v41  ;;  %v1216_v47 = vsel %vm1210_vm4, %v1212_v35, %v1215_v18  ;;  %v3628_v23 = vld [vmem:[#allocation34_spill] sm:$0xff]  ;;  %v1220_v28 = vsel %vm1210_vm4, %v1215_v18, %v1219_v49  ;;  %v3629_v27 = vld [vmem:[#allocation35_spill] sm:$0xff]  ;;  %s1854_s14 = smul.u32 21504, %s2045_s13  ;;  %s1684_s13 = sshll.u32 %s2100_s8, 4  ;;  %s3399_s13 = int_to_ptr.vmem [resolvable:$true] %s1684_s13 }
  0xdd   : > { %v1225_v26 = vrot.slane %v3627_v17, 6  ;;  %v1218_v56 = vsel %vm1210_vm4, %v1213_v41, %v1217_v1  ;;  %v1227_v32 = vrot.slane %v3628_v23, 6  ;;  %1310 = vst [vmem:[%s2100_s8 + $0x20] sm:$0xff] %v1214_v12  ;;  %1312 = vst.msk [vmem:[%s2100_s8 + $0x28] sm:$0xff] %vm1311_vm5, %v1216_v47  ;;  %v1222_v51 = vsel %vm1210_vm4, %v1217_v1, %v1221_v46  ;;  %v3630_v19 = vld [vmem:[#allocation36_spill] sm:$0xff]  ;;  %v3632_v7 = vld [vmem:[#allocation41_spill] sm:$0xff] }
  0xde   : > { %1313 = vst [vmem:[%s2100_s8 + $0x30] sm:$0xff] %v1218_v56  ;;  %v1224_v44 = vsel %vm1210_vm4, %v1219_v49, %v1223_v58  ;;  %1314 = vst.msk [vmem:[%s2100_s8 + $0x38] sm:$0xff] %vm1311_vm5, %v1220_v28  ;;  %v1229_v45 = vrot.slane %v3629_v27, 6  ;;  %v1231_v2 = vrot.slane %v3630_v19, 6  ;;  %v3631_v39 = vld [vmem:[#allocation40_spill] sm:$0xff]  ;;  %v1235_v35 = vrot.slane %v3632_v7, 6  ;;  %s3395_s21 = scalar_lea.hbm %s3461_s2, %s1854_s14 }
  0xdf   : > { %v1226_v31 = vsel %vm1210_vm4, %v1221_v46, %v1225_v26  ;;  %1315 = vst [vmem:[%s2100_s8 + $0x40] sm:$0xff] %v1222_v51  ;;  %1316 = vst.msk [vmem:[%s2100_s8 + $0x48] sm:$0xff] %vm1311_vm5, %v1224_v44  ;;  %v1228_v48 = vsel %vm1210_vm4, %v1223_v58, %v1227_v32  ;;  %v1233_v6 = vrot.slane %v3631_v39, 6  ;;  %v3633_v29 = vld [vmem:[#allocation42_spill] sm:$0xff]  ;;  %v3634_v4 = vld [vmem:[#allocation43_spill] sm:$0xff]  ;;  %vm1342_vm6 = vcmask 779264  }
  0xe0   : > { %1317 = vst [vmem:[%s2100_s8 + $0x50] sm:$0xff] %v1226_v31  ;;  %1318 = vst.msk [vmem:[%s2100_s8 + $0x58] sm:$0xff] %vm1311_vm5, %v1228_v48  ;;  %v1237_v41 = vrot.slane %v3633_v29, 6  ;;  %v1239_v18 = vrot.slane %v3634_v4, 6  ;;  %v3635_v42 = vld [vmem:[#allocation45_spill] sm:$0xff]  ;;  %v1230_v0 = vsel %vm1210_vm4, %v1225_v26, %v1229_v45  ;;  %v1232_v49 = vsel %vm1210_vm4, %v1227_v32, %v1231_v2  ;;  %v3636_v46 = vld [vmem:[#allocation46_spill] sm:$0xff] }
  0xe1   : > { %v1241_v1 = vrot.slane %v3635_v42, 6  ;;  %v1234_v16 = vsel %vm1210_vm4, %v1229_v45, %v1233_v6  ;;  %v1243_v15 = vrot.slane %v3636_v46, 6  ;;  %1319 = vst [vmem:[%s2100_s8 + $0x60] sm:$0xff] %v1230_v0  ;;  %1320 = vst.msk [vmem:[%s2100_s8 + $0x68] sm:$0xff] %vm1311_vm5, %v1232_v49  ;;  %v1236_v58 = vsel %vm1210_vm4, %v1231_v2, %v1235_v35  ;;  %v3637_v56 = vld [vmem:[#allocation47_spill] sm:$0xff]  ;;  %v3638_v32 = vld [vmem:[#allocation48_spill] sm:$0xff] }
  0xe2   : > { %1321 = vst [vmem:[%s2100_s8 + $0x70] sm:$0xff] %v1234_v16  ;;  %v1238_v17 = vsel %vm1210_vm4, %v1233_v6, %v1237_v41  ;;  %v1240_v12 = vsel %vm1210_vm4, %v1235_v35, %v1239_v18  ;;  %1322 = vst.msk [vmem:[%s2100_s8 + $0x78] sm:$0xff] %vm1311_vm5, %v1236_v58  ;;  %v1245_v23 = vrot.slane %v3637_v56, 6  ;;  %v1247_v28 = vrot.slane %v3638_v32, 6  ;;  %v3639_v51 = vld [vmem:[#allocation49_spill] sm:$0xff]  ;;  %v3640_v31 = vld [vmem:[#allocation50_spill] sm:$0xff] }
  0xe3   : > { %v1242_v47 = vsel %vm1210_vm4, %v1237_v41, %v1241_v1  ;;  %1323 = vst [vmem:[%s2100_s8 + $0x80] sm:$0xff] %v1238_v17  ;;  %1324 = vst.msk [vmem:[%s2100_s8 + $0x88] sm:$0xff] %vm1311_vm5, %v1240_v12  ;;  %v1244_v26 = vsel %vm1210_vm4, %v1239_v18, %v1243_v15  ;;  %v1249_v44 = vrot.slane %v3639_v51, 6  ;;  %v1251_v48 = vrot.slane %v3640_v31, 6  ;;  %v3641_v27 = vld [vmem:[#allocation51_spill] sm:$0xff]  ;;  %v3642_v19 = vld [vmem:[#allocation52_spill] sm:$0xff] }
  0xe4   : > { %1325 = vst [vmem:[%s2100_s8 + $0x90] sm:$0xff] %v1242_v47  ;;  %1326 = vst.msk [vmem:[%s2100_s8 + $0x98] sm:$0xff] %vm1311_vm5, %v1244_v26  ;;  %v1253_v45 = vrot.slane %v3641_v27, 6  ;;  %v1255_v2 = vrot.slane %v3642_v19, 6  ;;  %v3643_v39 = vld [vmem:[#allocation53_spill] sm:$0xff]  ;;  %v1246_v7 = vsel %vm1210_vm4, %v1241_v1, %v1245_v23  ;;  %v1248_v35 = vsel %vm1210_vm4, %v1243_v15, %v1247_v28  ;;  %v3644_v41 = vld [vmem:[#allocation54_spill] sm:$0xff] }
  0xe5   : > { %v1257_v6 = vrot.slane %v3643_v39, 6  ;;  %v1250_v29 = vsel %vm1210_vm4, %v1245_v23, %v1249_v44  ;;  %v1259_v4 = vrot.slane %v3644_v41, 6  ;;  %1327 = vst [vmem:[%s2100_s8 + $0xa0] sm:$0xff] %v1246_v7  ;;  %1328 = vst.msk [vmem:[%s2100_s8 + $0xa8] sm:$0xff] %vm1311_vm5, %v1248_v35  ;;  %v1252_v18 = vsel %vm1210_vm4, %v1247_v28, %v1251_v48  ;;  %v3645_v16 = vld [vmem:[#allocation55_spill] sm:$0xff]  ;;  %v3646_v15 = vld [vmem:[#allocation56_spill] sm:$0xff] }
  0xe6   : > { %1329 = vst [vmem:[%s2100_s8 + $0xb0] sm:$0xff] %v1250_v29  ;;  %v1254_v42 = vsel %vm1210_vm4, %v1249_v44, %v1253_v45  ;;  %v1256_v0 = vsel %vm1210_vm4, %v1251_v48, %v1255_v2  ;;  %1330 = vst.msk [vmem:[%s2100_s8 + $0xb8] sm:$0xff] %vm1311_vm5, %v1252_v18  ;;  %v1261_v46 = vrot.slane %v3645_v16, 6  ;;  %v1263_v58 = vrot.slane %v3646_v15, 6  ;;  %v3647_v17 = vld [vmem:[#allocation57_spill] sm:$0xff]  ;;  %v3648_v47 = vld [vmem:[#allocation58_spill] sm:$0xff] }
  0xe7   : > { %v1258_v49 = vsel %vm1210_vm4, %v1253_v45, %v1257_v6  ;;  %1331 = vst [vmem:[%s2100_s8 + $0xc0] sm:$0xff] %v1254_v42  ;;  %1332 = vst.msk [vmem:[%s2100_s8 + $0xc8] sm:$0xff] %vm1311_vm5, %v1256_v0  ;;  %v1260_v1 = vsel %vm1210_vm4, %v1255_v2, %v1259_v4  ;;  %v1265_v12 = vrot.slane %v3647_v17, 6  ;;  %v1267_v26 = vrot.slane %v3648_v47, 6  ;;  %v3649_v56 = vld [vmem:[#allocation59_spill] sm:$0xff]  ;;  %v3650_v32 = vld [vmem:[#allocation60_spill] sm:$0xff] }
  0xe8   : > { %1333 = vst [vmem:[%s2100_s8 + $0xd0] sm:$0xff] %v1258_v49  ;;  %1334 = vst.msk [vmem:[%s2100_s8 + $0xd8] sm:$0xff] %vm1311_vm5, %v1260_v1  ;;  %v1269_v23 = vrot.slane %v3649_v56, 6  ;;  %v1271_v28 = vrot.slane %v3650_v32, 6  ;;  %v1262_v51 = vsel %vm1210_vm4, %v1257_v6, %v1261_v46  ;;  %v1264_v44 = vsel %vm1210_vm4, %v1259_v4, %v1263_v58  ;;  %v3651_v48 = vld [vmem:[#allocation61_spill] sm:$0xff]  ;;  %v3652_v39 = vld [vmem:[#allocation62_spill] sm:$0xff] }
  0xe9   : > { %v1266_v31 = vsel %vm1210_vm4, %v1261_v46, %v1265_v12  ;;  %v1376_v27 = vrot.slane %v3651_v48, 6  ;;  %1335 = vst [vmem:[%s2100_s8 + $0xe0] sm:$0xff] %v1262_v51  ;;  %1336 = vst.msk [vmem:[%s2100_s8 + $0xe8] sm:$0xff] %vm1311_vm5, %v1264_v44  ;;  %v1268_v45 = vsel %vm1210_vm4, %v1263_v58, %v1267_v26  ;;  %v1377_v6 = vrot.slane %v3652_v39, 6  ;;  %v3653_v7 = vld [vmem:[#allocation63_spill] sm:$0xff]  ;;  %v3654_v29 = vld [vmem:[#allocation64_spill] sm:$0xff] }
  0xea   : > { %1337 = vst [vmem:[%s2100_s8 + $0xf0] sm:$0xff] %v1266_v31  ;;  %v1270_v19 = vsel %vm1210_vm4, %v1265_v12, %v1269_v23  ;;  %1341 = vst [vmem:[%s2100_s8 + $0x110] sm:$0x3] %v1269_v23  ;;  %v1272_v2 = vsel %vm1210_vm4, %v1267_v26, %v1271_v28  ;;  %v1378_v35 = vrot.slane %v3653_v7, 6  ;;  %v1380_v41 = vrot.slane %v3654_v29, 6  ;;  %v3655_v4 = vld [vmem:[#allocation65_spill] sm:$0xff] }
  0xeb   : > { %1343 = vst.msk [vmem:[%s2100_s8 + $0x118] sm:$0x3] %vm1342_vm6, %v1271_v28  ;;  %1339 = vst [vmem:[%s2100_s8 + $0x100] sm:$0xff] %v1270_v19  ;;  %v1382_v18 = vrot.slane %v3655_v4, 6  ;;  %v3656_v42 = vld [vmem:[#allocation66_spill] sm:$0xff]  ;;  %v3657_v49 = vld [vmem:[#allocation67_spill] sm:$0xff] }
  0xec   : > { %1338 = vst.msk [vmem:[%s2100_s8 + $0xf8] sm:$0xff] %vm1311_vm5, %v1268_v45  ;;  %1340 = vst.msk [vmem:[%s2100_s8 + $0x108] sm:$0xff] %vm1311_vm5, %v1272_v2  ;;  %v1384_v0 = vrot.slane %v3656_v42, 6  ;;  %v1386_v1 = vrot.slane %v3657_v49, 6  ;;  %v3658_v16 = vld [vmem:[#allocation68_spill] sm:$0xff]  ;;  %v3659_v15 = vld [vmem:[#allocation69_spill] sm:$0xff]  ;;  %v1379_v47 = vsel %vm1210_vm4, %v1376_v27, %v1378_v35  ;;  %v1381_v26 = vsel %vm1210_vm4, %v1377_v6, %v1380_v41 }
  0xed   : > { %1780 = vst [vmem:[%s2100_s8 + $0x1d0] sm:$0xfc] %v1376_v27  ;;  %1781 = vst.msk [vmem:[%s2100_s8 + $0x1d8] sm:$0xfc] %vm1308_vm3, %v1377_v6  ;;  %v1388_v46 = vrot.slane %v3658_v16, 6  ;;  %v1390_v58 = vrot.slane %v3659_v15, 6  ;;  %v1383_v56 = vsel %vm1210_vm4, %v1378_v35, %v1382_v18 }
  0xee   : > { %v3660_v17 = vld [vmem:[#allocation70_spill] sm:$0xff]  ;;  %v1385_v23 = vsel %vm1210_vm4, %v1380_v41, %v1384_v0  ;;  %1782 = vst [vmem:[%s2100_s8 + $0x1e0] sm:$0xff] %v1379_v47  ;;  %1783 = vst.msk [vmem:[%s2100_s8 + $0x1e8] sm:$0xff] %vm1311_vm5, %v1381_v26  ;;  %v1387_v32 = vsel %vm1210_vm4, %v1382_v18, %v1386_v1  ;;  %v3661_v31 = vld [vmem:[#allocation71_spill] sm:$0xff]  ;;  %s3419_s22 = scalar_lea.sflag [#allocation5], %s149_s29  ;;  %s1935_s23 = scalar_lea.vmem %s3399_s13, 21504 }
  0xef   : > { %v1392_v12 = vrot.slane %v3660_v17, 6  ;;  %1784 = vst [vmem:[%s2100_s8 + $0x1f0] sm:$0xff] %v1383_v56  ;;  %1785 = vst.msk [vmem:[%s2100_s8 + $0x1f8] sm:$0xff] %vm1311_vm5, %v1385_v23  ;;  %v1389_v28 = vsel %vm1210_vm4, %v1384_v0, %v1388_v46  ;;  %v1391_v51 = vsel %vm1210_vm4, %v1386_v1, %v1390_v58  ;;  %v1394_v48 = vrot.slane %v3661_v31, 6  ;;  %v3662_v27 = vld [vmem:[#allocation72_spill] sm:$0xff]  ;;  %v3663_v19 = vld [vmem:[#allocation73_spill] sm:$0xff]  ;;  %p1936_p8 = scmp.ne.s32.totalorder %s3399_s13, %s1935_s23 }
  0xf0   : > { %1786 = vst [vmem:[%s2100_s8 + $0x200] sm:$0xff] %v1387_v32  ;;  %1787 = vst.msk [vmem:[%s2100_s8 + $0x208] sm:$0xff] %vm1311_vm5, %v1389_v28  ;;  %v1396_v45 = vrot.slane %v3662_v27, 6  ;;  %v1398_v2 = vrot.slane %v3663_v19, 6  ;;  %v3664_v39 = vld [vmem:[#allocation74_spill] sm:$0xff]  ;;  %v3665_v7 = vld [vmem:[#allocation75_spill] sm:$0xff] }
  0xf1   : > { %v1393_v44 = vsel %vm1210_vm4, %v1388_v46, %v1392_v12  ;;  %1788 = vst [vmem:[%s2100_s8 + $0x210] sm:$0xff] %v1391_v51  ;;  %v1400_v6 = vrot.slane %v3664_v39, 6  ;;  %v1402_v35 = vrot.slane %v3665_v7, 6  ;;  %v3666_v29 = vld [vmem:[#allocation76_spill] sm:$0xff]  ;;  %v3667_v4 = vld [vmem:[#allocation77_spill] sm:$0xff]  ;;  %v3668_v42 = vld [vmem:[#allocation78_spill] sm:$0xff]  ;;  %v1395_v49 = vsel %vm1210_vm4, %v1390_v58, %v1394_v48  ;;  %p1937_p9 = pnand %p1936_p8, %p2062_p5 }
  0xf2   : > { %1789 = vst.msk [vmem:[%s2100_s8 + $0x218] sm:$0xff] %vm1311_vm5, %v1393_v44  ;;  %v1404_v41 = vrot.slane %v3666_v29, 6  ;;  %v1406_v18 = vrot.slane %v3667_v4, 6  ;;  %v1408_v0 = vrot.slane %v3668_v42, 6  ;;  %v1397_v1 = vsel %vm1210_vm4, %v1392_v12, %v1396_v45  ;;  %1790 = vst [vmem:[%s2100_s8 + $0x220] sm:$0xff] %v1395_v49  ;;  %v3669_v12 = vld [vmem:[#allocation79_spill] sm:$0xff] }
  0xf3   : > { %v1399_v16 = vsel %vm1210_vm4, %v1394_v48, %v1398_v2  ;;  %v1401_v46 = vsel %vm1210_vm4, %v1396_v45, %v1400_v6  ;;  %1791 = vst.msk [vmem:[%s2100_s8 + $0x228] sm:$0xff] %vm1311_vm5, %v1397_v1  ;;  %v1403_v15 = vsel %vm1210_vm4, %v1398_v2, %v1402_v35  ;;  %v1410_v26 = vrot.slane %v3669_v12, 6  ;;  %v3670_v56 = vld [vmem:[#allocation80_spill] sm:$0xff]  ;;  %v3671_v32 = vld [vmem:[#allocation81_spill] sm:$0xff]  ;;  %v3672_v51 = vld [vmem:[#allocation82_spill] sm:$0xff]  ;;  %p1938_p10 = pneg %p1937_p9  ;;  %s2006_s24 = smov [#allocation6]  }
  0xf4   : > { %1792 = vst [vmem:[%s2100_s8 + $0x230] sm:$0xff] %v1399_v16  ;;  %1793 = vst.msk [vmem:[%s2100_s8 + $0x238] sm:$0xff] %vm1311_vm5, %v1401_v46  ;;  %v1405_v17 = vsel %vm1210_vm4, %v1400_v6, %v1404_v41  ;;  %v1407_v47 = vsel %vm1210_vm4, %v1402_v35, %v1406_v18  ;;  %v1409_v58 = vsel %vm1210_vm4, %v1404_v41, %v1408_v0  ;;  %v1412_v23 = vrot.slane %v3670_v56, 6  ;;  %v3673_v31 = vld [vmem:[#allocation83_spill] sm:$0xff]  ;;  %v3674_v27 = vld [vmem:[#allocation84_spill] sm:$0xff]  ;;  %s1939_s25 = sshll.u32 %s2006_s24, 4  ;;  %s1940_s25 = int_to_ptr.vmem [resolvable:$false] %s1939_s25 }
  0xf5   : > { %1794 = vst [vmem:[%s2100_s8 + $0x240] sm:$0xff] %v1403_v15  ;;  %1795 = vst.msk [vmem:[%s2100_s8 + $0x248] sm:$0xff] %vm1311_vm5, %v1405_v17  ;;  %v1414_v28 = vrot.slane %v3671_v32, 6  ;;  %v1416_v44 = vrot.slane %v3672_v51, 6  ;;  %v1418_v48 = vrot.slane %v3673_v31, 6  ;;  %v1420_v45 = vrot.slane %v3674_v27, 6  ;;  %p1942_p11 = scmp.lt.s32.totalorder %s3399_s13, %s1940_s25 }
  0xf6   : > { %1796 = vst [vmem:[%s2100_s8 + $0x250] sm:$0xff] %v1407_v47  ;;  %1797 = vst.msk [vmem:[%s2100_s8 + $0x258] sm:$0xff] %vm1311_vm5, %v1409_v58  ;;  %v3675_v19 = vld [vmem:[#allocation85_spill] sm:$0xff]  ;;  %v3676_v39 = vld [vmem:[#allocation86_spill] sm:$0xff]  ;;  %v1411_v7 = vsel %vm1210_vm4, %v1406_v18, %v1410_v26  ;;  %v1413_v35 = vsel %vm1210_vm4, %v1408_v0, %v1412_v23  ;;  %v1539_v32 = vrot.slane %v2903_v40, 6  ;;  %v1541_v27 = vrot.slane %v2916_v37, 6 }
  0xf7   : > { %v1422_v2 = vrot.slane %v3675_v19, 6  ;;  %v1424_v6 = vrot.slane %v3676_v39, 6  ;;  %v1415_v29 = vsel %vm1210_vm4, %v1410_v26, %v1414_v28  ;;  %v1417_v41 = vsel %vm1210_vm4, %v1412_v23, %v1416_v44  ;;  %1798 = vst [vmem:[%s2100_s8 + $0x260] sm:$0xff] %v1411_v7  ;;  %1799 = vst.msk [vmem:[%s2100_s8 + $0x268] sm:$0xff] %vm1311_vm5, %v1413_v35  ;;  %v3677_v0 = vld [vmem:[#allocation87_spill] sm:$0xff]  ;;  %v3678_v16 = vld [vmem:[#allocation88_spill] sm:$0xff] }
  0xf8   : > { %1800 = vst [vmem:[%s2100_s8 + $0x270] sm:$0xff] %v1415_v29  ;;  %1801 = vst.msk [vmem:[%s2100_s8 + $0x278] sm:$0xff] %vm1311_vm5, %v1417_v41  ;;  %v1419_v4 = vsel %vm1210_vm4, %v1414_v28, %v1418_v48  ;;  %v1421_v42 = vsel %vm1210_vm4, %v1416_v44, %v1420_v45  ;;  %v1426_v1 = vrot.slane %v3677_v0, 6  ;;  %v1428_v46 = vrot.slane %v3678_v16, 6  ;;  %v3679_v15 = vld [vmem:[#allocation89_spill] sm:$0xff]  ;;  %v3680_v47 = vld [vmem:[#allocation90_spill] sm:$0xff] }
  0xf9   : > { %v1423_v49 = vsel %vm1210_vm4, %v1418_v48, %v1422_v2  ;;  %v1425_v18 = vsel %vm1210_vm4, %v1420_v45, %v1424_v6  ;;  %1802 = vst [vmem:[%s2100_s8 + $0x280] sm:$0xff] %v1419_v4  ;;  %1803 = vst.msk [vmem:[%s2100_s8 + $0x288] sm:$0xff] %vm1311_vm5, %v1421_v42  ;;  %v1430_v17 = vrot.slane %v3679_v15, 6  ;;  %v1432_v58 = vrot.slane %v3680_v47, 6  ;;  %v3681_v12 = vld [vmem:[#allocation91_spill] sm:$0xff]  ;;  %v3682_v56 = vld [vmem:[#allocation92_spill] sm:$0xff] }
  0xfa   : > { %1804 = vst [vmem:[%s2100_s8 + $0x290] sm:$0xff] %v1423_v49  ;;  %1805 = vst.msk [vmem:[%s2100_s8 + $0x298] sm:$0xff] %vm1311_vm5, %v1425_v18  ;;  %v1434_v26 = vrot.slane %v3681_v12, 6  ;;  %v1436_v23 = vrot.slane %v3682_v56, 6  ;;  %v1540_v28 = vrot.slane %v2910_v36, 6  ;;  %v1427_v51 = vsel %vm1210_vm4, %v1422_v2, %v1426_v1  ;;  %s1941_s26 = scalar_lea.vmem %s1940_s25, 43008 }
  0xfb   : > { %v1429_v44 = vsel %vm1210_vm4, %v1424_v6, %v1428_v46  ;;  %v1431_v31 = vsel %vm1210_vm4, %v1426_v1, %v1430_v17  ;;  %v1433_v48 = vsel %vm1210_vm4, %v1428_v46, %v1432_v58  ;;  %1806 = vst [vmem:[%s2100_s8 + $0x2a0] sm:$0xff] %v1427_v51  ;;  %1814 = vst [vmem:[%s2100_s8 + $0x390] sm:$0xfc] %v1539_v32  ;;  %v1543_v45 = vrot.slane %v2922_v20, 6  ;;  %p1943_p12 = scmp.lt.s32.totalorder %s1941_s26, %s1935_s23 }
  0xfc   : > { %1807 = vst.msk [vmem:[%s2100_s8 + $0x2a8] sm:$0xff] %vm1311_vm5, %v1429_v44  ;;  %1808 = vst [vmem:[%s2100_s8 + $0x2b0] sm:$0xff] %v1431_v31  ;;  %v1435_v40 = vsel %vm1210_vm4, %v1430_v17, %v1434_v26  ;;  %v1437_v36 = vsel %vm1210_vm4, %v1432_v58, %v1436_v23  ;;  %v1545_v19 = vrot.slane %v2928_v60, 6  ;;  %v1547_v2 = vrot.slane %v2934_v53, 6 }
  0xfd   : > { %1809 = vst.msk [vmem:[%s2100_s8 + $0x2b8] sm:$0xff] %vm1311_vm5, %v1433_v48  ;;  %1812 = vst [vmem:[%s2100_s8 + $0x2d0] sm:$0x3] %v1434_v26  ;;  %v1549_v39 = vrot.slane %v2940_v61, 6  ;;  %v1551_v6 = vrot.slane %v2946_v62, 6  ;;  %v1542_v7 = vsel %vm1210_vm4, %v1539_v32, %v1541_v27  ;;  %v1544_v37 = vsel %vm1210_vm4, %v1540_v28, %v1543_v45  ;;  %p1944_p13 = por %p1943_p12, %p1942_p11 }
  0xfe   : > { %1813 = vst.msk [vmem:[%s2100_s8 + $0x2d8] sm:$0x3] %vm1342_vm6, %v1436_v23  ;;  %1810 = vst [vmem:[%s2100_s8 + $0x2c0] sm:$0xff] %v1435_v40  ;;  %v1553_v20 = vrot.slane %v2952_v8, 6  ;;  %v1555_v35 = vrot.slane %v2957_v9, 6  ;;  %v1546_v60 = vsel %vm1210_vm4, %v1541_v27, %v1545_v19  ;;  %v1548_v53 = vsel %vm1210_vm4, %v1543_v45, %v1547_v2 }
  0xff   : > { %1815 = vst.msk [vmem:[%s2100_s8 + $0x398] sm:$0xfc] %vm1308_vm3, %v1540_v28  ;;  %1816 = vst [vmem:[%s2100_s8 + $0x3a0] sm:$0xff] %v1542_v7  ;;  %v1550_v61 = vsel %vm1210_vm4, %v1545_v19, %v1549_v39  ;;  %v1552_v62 = vsel %vm1210_vm4, %v1547_v2, %v1551_v6  ;;  %v1557_v29 = vrot.slane %v2962_v10, 6  ;;  %v1559_v41 = vrot.slane %v2967_v14, 6  ;;  %p1945_p0 = pnand %p1944_p13, %p1938_p10 }
 0x100   : > { %1811 = vst.msk [vmem:[%s2100_s8 + $0x2c8] sm:$0xff] %vm1311_vm5, %v1437_v36  ;;  %1817 = vst.msk [vmem:[%s2100_s8 + $0x3a8] sm:$0xff] %vm1311_vm5, %v1544_v37  ;;  %v1554_v8 = vsel %vm1210_vm4, %v1549_v39, %v1553_v20  ;;  %v1556_v9 = vsel %vm1210_vm4, %v1551_v6, %v1555_v35  ;;  %v1561_v4 = vrot.slane %v2972_v21, 6  ;;  %v1563_v42 = vrot.slane %v2977_v22, 6 }
 0x101   : > { %1818 = vst [vmem:[%s2100_s8 + $0x3b0] sm:$0xff] %v1546_v60  ;;  %1819 = vst.msk [vmem:[%s2100_s8 + $0x3b8] sm:$0xff] %vm1311_vm5, %v1548_v53  ;;  %v1565_v49 = vrot.slane %v2982_v24, 6  ;;  %v1567_v18 = vrot.slane %v2987_v25, 6  ;;  %v1558_v0 = vsel %vm1210_vm4, %v1553_v20, %v1557_v29  ;;  %v1560_v10 = vsel %vm1210_vm4, %v1555_v35, %v1559_v41 }
 0x102   : > { %1820 = vst [vmem:[%s2100_s8 + $0x3c0] sm:$0xff] %v1550_v61  ;;  %1821 = vst.msk [vmem:[%s2100_s8 + $0x3c8] sm:$0xff] %vm1311_vm5, %v1552_v62  ;;  %v1569_v14 = vrot.slane %v2992_v33, 6  ;;  %v1571_v1 = vrot.slane %v2997_v34, 6  ;;  %v1562_v21 = vsel %vm1210_vm4, %v1557_v29, %v1561_v4  ;;  %v1564_v22 = vsel %vm1210_vm4, %v1559_v41, %v1563_v42 }
 0x103   : > { %1822 = vst [vmem:[%s2100_s8 + $0x3d0] sm:$0xff] %v1554_v8  ;;  %1823 = vst.msk [vmem:[%s2100_s8 + $0x3d8] sm:$0xff] %vm1311_vm5, %v1556_v9  ;;  %v1566_v24 = vsel %vm1210_vm4, %v1561_v4, %v1565_v49  ;;  %v1568_v25 = vsel %vm1210_vm4, %v1563_v42, %v1567_v18  ;;  %v1573_v16 = vrot.slane %v3002_v5, 6  ;;  %v1575_v46 = vrot.slane %v3007_v55, 6 }
 0x104   : > { %1824 = vst [vmem:[%s2100_s8 + $0x3e0] sm:$0xff] %v1558_v0  ;;  %1825 = vst.msk [vmem:[%s2100_s8 + $0x3e8] sm:$0xff] %vm1311_vm5, %v1560_v10  ;;  %v1570_v33 = vsel %vm1210_vm4, %v1565_v49, %v1569_v14  ;;  %v1572_v34 = vsel %vm1210_vm4, %v1567_v18, %v1571_v1  ;;  %v1577_v15 = vrot.slane %v3012_v30, 6  ;;  %v1579_v17 = vrot.slane %v3017_v13, 6 }
 0x105   : > { %1826 = vst [vmem:[%s2100_s8 + $0x3f0] sm:$0xff] %v1562_v21  ;;  %1827 = vst.msk [vmem:[%s2100_s8 + $0x3f8] sm:$0xff] %vm1311_vm5, %v1564_v22  ;;  %v1581_v47 = vrot.slane %v3022_v43, 6  ;;  %v1583_v58 = vrot.slane %v3027_v57, 6  ;;  %v1574_v5 = vsel %vm1210_vm4, %v1569_v14, %v1573_v16  ;;  %v1576_v55 = vsel %vm1210_vm4, %v1571_v1, %v1575_v46 }
 0x106   : > { %1828 = vst [vmem:[%s2100_s8 + $0x400] sm:$0xff] %v1566_v24  ;;  %1829 = vst.msk [vmem:[%s2100_s8 + $0x408] sm:$0xff] %vm1311_vm5, %v1568_v25  ;;  %v1585_v12 = vrot.slane %v3032_v11, 6  ;;  %v1587_v26 = vrot.slane %v3037_v54, 6  ;;  %v1578_v30 = vsel %vm1210_vm4, %v1573_v16, %v1577_v15  ;;  %v1580_v13 = vsel %vm1210_vm4, %v1575_v46, %v1579_v17 }
 0x107   : > { %1830 = vst [vmem:[%s2100_s8 + $0x410] sm:$0xff] %v1570_v33  ;;  %1831 = vst.msk [vmem:[%s2100_s8 + $0x418] sm:$0xff] %vm1311_vm5, %v1572_v34  ;;  %v1582_v43 = vsel %vm1210_vm4, %v1577_v15, %v1581_v47  ;;  %v1584_v57 = vsel %vm1210_vm4, %v1579_v17, %v1583_v58  ;;  %v1589_v56 = vrot.slane %v3042_v3, 6  ;;  %v1591_v23 = vrot.slane %v3047_v63, 6 }
 0x108   : > { %1832 = vst [vmem:[%s2100_s8 + $0x420] sm:$0xff] %v1574_v5  ;;  %1833 = vst.msk [vmem:[%s2100_s8 + $0x428] sm:$0xff] %vm1311_vm5, %v1576_v55  ;;  %v1586_v11 = vsel %vm1210_vm4, %v1581_v47, %v1585_v12  ;;  %v1588_v54 = vsel %vm1210_vm4, %v1583_v58, %v1587_v26  ;;  %v1593_v32 = vrot.slane %v3052_v38, 6  ;;  %v1595_v28 = vrot.slane %v3057_v50, 6 }
 0x109   : > { %1834 = vst [vmem:[%s2100_s8 + $0x430] sm:$0xff] %v1578_v30  ;;  %1835 = vst.msk [vmem:[%s2100_s8 + $0x438] sm:$0xff] %vm1311_vm5, %v1580_v13  ;;  %v1597_v51 = vrot.slane %v3062_v59, 6  ;;  %v1599_v44 = vrot.slane %v3067_v52, 6  ;;  %v1590_v3 = vsel %vm1210_vm4, %v1585_v12, %v1589_v56  ;;  %v1592_v63 = vsel %vm1210_vm4, %v1587_v26, %v1591_v23 }
 0x10a   : > { %1836 = vst [vmem:[%s2100_s8 + $0x440] sm:$0xff] %v1582_v43  ;;  %1837 = vst.msk [vmem:[%s2100_s8 + $0x448] sm:$0xff] %vm1311_vm5, %v1584_v57  ;;  %v1594_v38 = vsel %vm1210_vm4, %v1589_v56, %v1593_v32  ;;  %v1596_v50 = vsel %vm1210_vm4, %v1591_v23, %v1595_v28 }
 0x10b   : > { %1838 = vst [vmem:[%s2100_s8 + $0x450] sm:$0xff] %v1586_v11  ;;  %1839 = vst.msk [vmem:[%s2100_s8 + $0x458] sm:$0xff] %vm1311_vm5, %v1588_v54  ;;  %v1598_v59 = vsel %vm1210_vm4, %v1593_v32, %v1597_v51  ;;  %v1600_v52 = vsel %vm1210_vm4, %v1595_v28, %v1599_v44 }
 0x10c   : > { %1840 = vst [vmem:[%s2100_s8 + $0x460] sm:$0xff] %v1590_v3  ;;  %1841 = vst.msk [vmem:[%s2100_s8 + $0x468] sm:$0xff] %vm1311_vm5, %v1592_v63 }
 0x10d   : > { %1846 = vst [vmem:[%s2100_s8 + $0x490] sm:$0x3] %v1597_v51  ;;  %1847 = vst.msk [vmem:[%s2100_s8 + $0x498] sm:$0x3] %vm1342_vm6, %v1599_v44 }
 0x10e   : > { %1842 = vst [vmem:[%s2100_s8 + $0x470] sm:$0xff] %v1594_v38  ;;  %1843 = vst.msk [vmem:[%s2100_s8 + $0x478] sm:$0xff] %vm1311_vm5, %v1596_v50 }
 0x10f   : > { %1844 = vst [vmem:[%s2100_s8 + $0x480] sm:$0xff] %v1598_v59  ;;  %1845 = vst.msk [vmem:[%s2100_s8 + $0x488] sm:$0xff] %vm1311_vm5, %v1600_v52 }
 0x110   : > { %1948 = shalt.err (!%p1945_p0)
}
 0x111   : > { %s1949_s27 = scalar_lea.hbm %s3395_s21, 21504  ;;  %s1953_s30 = scalar_lea.hbm %s3461_s2, 43008 }
 0x112   : > { %p1950_p1 = scmp.ne.s32.totalorder %s3395_s21, %s1949_s27  ;;  %p1954_p4 = scmp.lt.s32.totalorder %s3395_s21, %s3461_s2 }
 0x113   : > { %p1955_p7 = scmp.lt.s32.totalorder %s1953_s30, %s1949_s27 }
 0x114   : > { %p1951_p2 = pnand %p1950_p1, %p2062_p5 }
 0x115   : > { %p1956_p6 = por %p1955_p7, %p1954_p4 }
 0x116   : > { %p1952_p3 = pneg %p1951_p2 }
 0x118   : > { %p1957_p8 = pnand %p1956_p6, %p1952_p3 }
 0x11a   : > { %1960 = shalt.err (!%p1957_p8)
}
 0x11b   : > { %s2007_s5 = smov 256   ;;  %s2008_s6 = smov 16  }
 0x11c   : > { %1859 = dma.vmem_to_hbm [thread:$0]  (%p2062_p5), %s3399_s13, 21504, %s3395_s21, %s3419_s22, %s2007_s5, %s2007_s5, %s2008_s6  }
 0x11d PF: > { %p1871_p9 = scmp.ge.s32.totalorder %s2001_s12, 2  ;;  %s1699_s7 = sand.u32 1, %s1989_s9  }
 0x11e   : > { %p3683_p10 = scmp.ne.s32.totalorder %s3499_s20, 0  ;;  %s1700_s8 = scalar_lea.sflag [#allocation5], %s1699_s7 }
 0x120   : > { %p1866_p11 = pnand %p1871_p9, %p3683_p10 }
 0x122   : > { %p1867_p12 = pneg %p1866_p11 }
 0x124   : > { %1984 = dma.done.wait (%p1867_p12), %s1700_s8, 21504  }
 0x125   : > { %1986 = vsyncadd (%p1867_p12), %s1700_s8, 4294945792  ;;  %p13_p13 = scmp.ge.s32.totalorder %s2049_s15, 4   ;;  %s3684_s9 = smov %s1993_s10 }
 0x126   : > { %s3685_s10 = smov %s1997_s11  ;;  %s3686_s11 = smov %s2060_s18 }
 0x127   : > { %s3687_s12 = smov %s2049_s15  ;;  %15 = sbr.rel (!%p13_p13) target bundleno = 4 (0x4), region = 114 }
 0x12c   :  { %1705 = vsyncpa [#allocation4], 1 }
 0x12d   :  { %1707 = vsyncpa [#allocation4 + $0x1], 1 }
 0x12e   :  { %1708 = vsyncpa [#allocation5], 1 }
 0x12f   :  { %1710 = vsyncpa [#allocation5 + $0x1], 1 }
 0x130   :  { %1711 = vsyncmov [#allocation2] }
 0x133   :  { %s1712_s12 = vpop.sfrf %1711 }
 0x134   :  { %p1851_p5 = scmp.ne.s32.totalorder %s1712_s12, 0 }
 0x136   :  { %1716 = shalt.err (%p1851_p5)  }

// kernel: _forward_impl.2
= control target key start
LH: loop header
LB: loop body
LE: loop exit
PB: predicated region body
PF: predicated region fallthrough
CT: control target
= control target key end

     0   :  { %8 = vsyncpa [#allocation3], 0  ;;  %s7516_s0 = inlined_call_operand.hbm [shape: bf16[1024,128], index: 0, kind: input, shape index: {}]   ;;  %s7517_s1 = inlined_call_operand.hbm [shape: bf16[16,224], index: 1, kind: input, shape index: {}]   ;;  %s7518_s2 = inlined_call_operand.vmem [shape: bf16[128,16], index: 2, kind: input, shape index: {}]   ;;  %s7519_s3 = inlined_call_operand.vmem [shape: f32[2,128,224], index: 3, kind: output, shape index: {}]  }
   0x1   :  { %9 = vsyncpa [#allocation5], 0  ;;  %s3425_s12 = smov [#allocation2]  }
   0x2   :  { %s15_s13 = sshll.u32 %s3425_s12, 4  ;;  %s16_s13 = int_to_ptr.vmem [resolvable:$true] %s15_s13 }
   0x3   :  { %s3389_s14 = scalar_lea.vmem %s16_s13, 8192  ;;  %p3394_p1 = scmp.lt.s32.totalorder %s16_s13, %s16_s13 }
   0x4   :  { %p3390_p0 = scmp.ne.s32.totalorder %s16_s13, %s3389_s14  ;;  %p3395_p2 = scmp.lt.s32.totalorder %s3389_s14, %s3389_s14 }
   0x6   :  { %p3396_p3 = por %p3395_p2, %p3394_p1 }
   0x8   :  { %p3397_p4 = pnand %p3396_p3, %p3390_p0 }
   0xa   :  { %3400 = shalt.err (!%p3397_p4)
}
   0xb   :  { %s3426_s15 = smov 64   ;;  %s3427_s16 = smov 4  }
   0xc   :  { %21 = dma.hbm_to_vmem [thread:$0]  %s7516_s0, 8192, %s16_s13, [#allocation3], %s3426_s15, %s3426_s15, %s3427_s16  }
   0xd   :  { %s3428_s19 = smov [#allocation4]  }
   0xe   :  { %s27_s20 = sshll.u32 %s3428_s19, 4  ;;  %s28_s20 = int_to_ptr.vmem [resolvable:$true] %s27_s20 }
   0xf   :  { %s3409_s21 = scalar_lea.vmem %s28_s20, 256  ;;  %p3414_p6 = scmp.lt.s32.totalorder %s28_s20, %s28_s20 }
  0x10   :  { %p3410_p5 = scmp.ne.s32.totalorder %s28_s20, %s3409_s21  ;;  %p3415_p7 = scmp.lt.s32.totalorder %s3409_s21, %s3409_s21 }
  0x12   :  { %p3416_p8 = por %p3415_p7, %p3414_p6 }
  0x14   :  { %p3417_p9 = pnand %p3416_p8, %p3410_p5 }
  0x16   :  { %3420 = shalt.err (!%p3417_p9)
}
  0x17   :  { %s3429_s22 = smov 128   ;;  %s3430_s23 = smov 8  }
  0x18   :  { %33 = dma.hbm_to_vmem [thread:$0]  %s7517_s1, 256, %s28_s20, [#allocation5], %s3429_s22, %s3429_s22, %s3430_s23  }
  0x19   :  { %3421 = dma.done.wait [#allocation3], 8192  }
  0x1a   :  { %3422 = vsyncadd [#allocation3], 4294959104 }
  0x1b   :  { %3423 = dma.done.wait [#allocation5], 256  }
  0x1c   :  { %3424 = vsyncadd [#allocation5], 4294967040  ;;  %v7520_v0 = vmov 0   ;;  %v3302_v1 = vld [vmem:[#allocation4 + $0x4] ss:$8 sps:$4 sm:$0xff]   ;;  %vm111_vm0 = vcmask 130048  }
  0x1d   :  { %168 = vmatprep.mubr.bf16.mxu0 %v7520_v0  ;;  %1099 = vmatprep.mubr.bf16.mxu1 %v7520_v0  ;;  %v3304_v2 = vld [vmem:[#allocation4] ss:$8 sps:$4 sm:$0xff]   ;;  %v3307_v5 = vld [vmem:[%s7518_s2 + $0x10] sm:$0xff]   ;;  %v3308_v6 = vld [vmem:[%s7518_s2 + $0x18] sm:$0xff]   ;;  %vm1450_vm1 = vcmask 785408  }
  0x1e   :  { %150 = vmatprep.subr.bf16.mxu0 %v3302_v1  ;;  %v3305_v3 = vld [vmem:[%s7518_s2] sm:$0xff]   ;;  %v3306_v4 = vld [vmem:[%s7518_s2 + $0x8] sm:$0xff]   ;;  %v3311_v9 = vld [vmem:[%s7518_s2 + $0x30] sm:$0xff]  }
  0x1f   :  { %151 = vmatpush1.bf16.msra.mxu0 %v3304_v2  ;;  %v3309_v7 = vld [vmem:[%s7518_s2 + $0x20] sm:$0xff]   ;;  %v3310_v8 = vld [vmem:[%s7518_s2 + $0x28] sm:$0xff]   ;;  %v3312_v10 = vld [vmem:[%s7518_s2 + $0x38] sm:$0xff]  }
  0x20   :  { %v3313_v59 = vld [vmem:[#allocation2] sm:$0xff]   ;;  %v3314_v60 = vld [vmem:[#allocation2 + $0x8] sm:$0xff]   ;;  %v3315_v61 = vld [vmem:[#allocation2 + $0x10] sm:$0xff]  }
  0x21   :  { %v3316_v62 = vld [vmem:[#allocation2 + $0x18] sm:$0xff]   ;;  %v3317_v63 = vld [vmem:[#allocation2 + $0x20] sm:$0xff]   ;;  %v3318_v1 = vld [vmem:[#allocation2 + $0x28] sm:$0xff]  }
  0x22   :  { %3171 = vmatmul.mubr.msk.bf16.vlgmr.msra.gmra.mxu0 %vm111_vm0, %v3305_v3  ;;  %v3319_v2 = vld [vmem:[#allocation2 + $0x30] sm:$0xff]   ;;  %v3320_v3 = vld [vmem:[#allocation2 + $0x38] sm:$0xff]  }
  0x23   :  { %178 = vmatprep.mubr.bf16.mxu0 %v7520_v0 }
  0x2a   :  { %3172 = vmatmul.mubr.msk.bf16.gmra.mxu0 %vm111_vm0, %v3306_v4  ;;  %v3321_v4 = vld [vmem:[#allocation2 + $0x40] sm:$0xff]  }
  0x2b   :  { %188 = vmatprep.mubr.bf16.mxu0 %v7520_v0 }
  0x32   :  { %3173 = vmatmul.mubr.msk.bf16.gmra.mxu0 %vm111_vm0, %v3307_v5  ;;  %v3322_v5 = vld [vmem:[#allocation2 + $0x48] sm:$0xff]  }
  0x33   :  { %198 = vmatprep.mubr.bf16.mxu0 %v7520_v0 }
  0x3a   :  { %3174 = vmatmul.mubr.msk.bf16.gmra.mxu0 %vm111_vm0, %v3308_v6  ;;  %v3323_v6 = vld [vmem:[#allocation2 + $0x50] sm:$0xff]  }
  0x3b   :  { %208 = vmatprep.mubr.bf16.mxu0 %v7520_v0 }
  0x42   :  { %3175 = vmatmul.mubr.msk.bf16.gmra.mxu0 %vm111_vm0, %v3309_v7  ;;  %v3324_v7 = vld [vmem:[#allocation2 + $0x58] sm:$0xff]  }
  0x43   :  { %218 = vmatprep.mubr.bf16.mxu0 %v7520_v0 }
  0x4a   :  { %3176 = vmatmul.mubr.msk.bf16.gmra.mxu0 %vm111_vm0, %v3310_v8  ;;  %v3325_v8 = vld [vmem:[#allocation2 + $0x60] sm:$0xff]  }
  0x4b   :  { %228 = vmatprep.mubr.bf16.mxu0 %v7520_v0 }
  0x52   :  { %3177 = vmatmul.mubr.msk.bf16.gmra.mxu0 %vm111_vm0, %v3311_v9  ;;  %v3342_v9 = vld [vmem:[#allocation2 + $0xe8] sm:$0xff]  }
  0x53   :  { %238 = vmatprep.mubr.bf16.mxu0 %v7520_v0 }
  0x5a   :  { %3178 = vmatmul.mubr.msk.bf16.gmra.mxu0 %vm111_vm0, %v3312_v10  ;;  %v3326_v10 = vld [vmem:[#allocation2 + $0x68] sm:$0xff]  }
  0x5b   :  { %809 = vmatprep.mubr.bf16.mxu0 %v7520_v0 }
  0xe2   :  { %v170_v11 = vpop.f32.mrf.mxu0 }
  0xe4   :  { %v3500_v12 = vpop.f32.mrf.mxu0 }
  0xe6   :  { %v174_v13 = vpop.f32.mrf.mxu0 }
  0xe7   :  { %v3502_v14 = vpack.c.bf16 %v174_v13, %v170_v11  ;;  %v3343_v11 = vld [vmem:[#allocation2 + $0xf0] sm:$0xff]   ;;  %v3344_v13 = vld [vmem:[#allocation2 + $0xf8] sm:$0xff]  }
  0xe8   :  { %v3504_v15 = vpop.f32.mrf.mxu0 }
  0xe9   :  { %v378_v58 = vpack.c.bf16 %v3504_v15, %v3500_v12  ;;  %v3327_v12 = vld [vmem:[#allocation2 + $0x70] sm:$0xff]   ;;  %v3345_v15 = vld [vmem:[#allocation2 + $0x100] sm:$0xff]  }
  0xea   :  { %v180_v16 = vpop.f32.mrf.mxu0 }
  0xec   :  { %v182_v17 = vpop.f32.mrf.mxu0 }
  0xee   :  { %v184_v18 = vpop.f32.mrf.mxu0 }
  0xef   :  { %v3506_v19 = vpack.c.bf16 %v184_v18, %v180_v16  ;;  %v3329_v16 = vld [vmem:[#allocation2 + $0x80] sm:$0xff]   ;;  %v3330_v18 = vld [vmem:[#allocation2 + $0x88] sm:$0xff]  }
  0xf0   :  { %v186_v20 = vpop.f32.mrf.mxu0 }
  0xf1   :  { %v380_v57 = vpack.c.bf16 %v186_v20, %v182_v17  ;;  %v3346_v17 = vld [vmem:[#allocation2 + $0x108] sm:$0xff]   ;;  %v3331_v20 = vld [vmem:[#allocation2 + $0x90] sm:$0xff]  }
  0xf2   :  { %v190_v21 = vpop.f32.mrf.mxu0 }
  0xf4   :  { %v192_v22 = vpop.f32.mrf.mxu0 }
  0xf6   :  { %v194_v23 = vpop.f32.mrf.mxu0 }
  0xf7   :  { %v381_v56 = vpack.c.bf16 %v194_v23, %v190_v21  ;;  %v3348_v21 = vld [vmem:[#allocation2 + $0x118] sm:$0xff]   ;;  %v3349_v23 = vld [vmem:[#allocation2 + $0x120] sm:$0xff]  }
  0xf8   :  { %v196_v24 = vpop.f32.mrf.mxu0 }
  0xf9   :  { %v382_v55 = vpack.c.bf16 %v196_v24, %v192_v22  ;;  %v3332_v22 = vld [vmem:[#allocation2 + $0x98] sm:$0xff]   ;;  %v3333_v24 = vld [vmem:[#allocation2 + $0xa0] sm:$0xff]  }
  0xfa   :  { %v200_v25 = vpop.f32.mrf.mxu0 }
  0xfc   :  { %v202_v26 = vpop.f32.mrf.mxu0 }
  0xfe   :  { %v204_v27 = vpop.f32.mrf.mxu0 }
  0xff   :  { %v383_v54 = vpack.c.bf16 %v204_v27, %v200_v25  ;;  %v3350_v25 = vld [vmem:[#allocation2 + $0x128] sm:$0xff]   ;;  %v3351_v27 = vld [vmem:[#allocation2 + $0x130] sm:$0xff]  }
 0x100   :  { %v206_v28 = vpop.f32.mrf.mxu0 }
 0x101   :  { %v384_v53 = vpack.c.bf16 %v206_v28, %v202_v26  ;;  %v3334_v26 = vld [vmem:[#allocation2 + $0xa8] sm:$0xff]   ;;  %v3335_v28 = vld [vmem:[#allocation2 + $0xb0] sm:$0xff]  }
 0x102   :  { %v210_v29 = vpop.f32.mrf.mxu0 }
 0x104   :  { %v212_v30 = vpop.f32.mrf.mxu0 }
 0x106   :  { %v214_v31 = vpop.f32.mrf.mxu0 }
 0x107   :  { %v385_v52 = vpack.c.bf16 %v214_v31, %v210_v29  ;;  %v3352_v29 = vld [vmem:[#allocation2 + $0x138] sm:$0xff]   ;;  %v3353_v31 = vld [vmem:[#allocation2 + $0x140] sm:$0xff]  }
 0x108   :  { %v216_v32 = vpop.f32.mrf.mxu0 }
 0x109   :  { %v386_v51 = vpack.c.bf16 %v216_v32, %v212_v30  ;;  %v3336_v30 = vld [vmem:[#allocation2 + $0xb8] sm:$0xff]   ;;  %v3337_v32 = vld [vmem:[#allocation2 + $0xc0] sm:$0xff]  }
 0x10a   :  { %v220_v33 = vpop.f32.mrf.mxu0 }
 0x10c   :  { %v222_v34 = vpop.f32.mrf.mxu0 }
 0x10e   :  { %v224_v35 = vpop.f32.mrf.mxu0 }
 0x10f   :  { %v387_v50 = vpack.c.bf16 %v224_v35, %v220_v33 }
 0x110   :  { %v226_v36 = vpop.f32.mrf.mxu0 }
 0x111   :  { %v388_v49 = vpack.c.bf16 %v226_v36, %v222_v34  ;;  %v3354_v34 = vld [vmem:[#allocation2 + $0x148] sm:$0xff]  }
 0x112   :  { %v230_v37 = vpop.f32.mrf.mxu0 }
 0x114   :  { %v232_v38 = vpop.f32.mrf.mxu0 }
 0x116   :  { %v234_v39 = vpop.f32.mrf.mxu0 }
 0x117   :  { %v389_v48 = vpack.c.bf16 %v234_v39, %v230_v37  ;;  %v3338_v39 = vld [vmem:[#allocation2 + $0xc8] sm:$0xff]  }
 0x118   :  { %v236_v40 = vpop.f32.mrf.mxu0 }
 0x119   :  { %v390_v47 = vpack.c.bf16 %v236_v40, %v232_v38 }
 0x11a   :  { %v240_v41 = vpop.f32.mrf.mxu0 }
 0x11c   :  { %v242_v42 = vpop.f32.mrf.mxu0 }
 0x11e   :  { %v244_v43 = vpop.f32.mrf.mxu0 }
 0x11f   :  { %v391_v46 = vpack.c.bf16 %v244_v43, %v240_v41 }
 0x120   :  { %v246_v44 = vpop.f32.mrf.mxu0 }
 0x121   :  { %v392_v45 = vpack.c.bf16 %v246_v44, %v242_v42 }
 0x123   :  { %777 = vmatprep.subr.bf16.mxu0 %v392_v45  ;;  %3275 = vmatprep.subr.bf16.mxu1 %v392_v45  ;;  %v3355_v45 = vld [vmem:[#allocation2 + $0x150] sm:$0xff]  }
 0x124   :  { %778 = vmatpush1.bf16.msra.mxu0 %v391_v46  ;;  %3283 = vmatpush1.bf16.msra.mxu1 %v391_v46 }
 0x125   :  { %779 = vmatprep.subr.bf16.mxu0 %v390_v47  ;;  %3276 = vmatprep.subr.bf16.mxu1 %v390_v47 }
 0x128   :  { %780 = vmatpush1.bf16.msra.mxu0 %v389_v48  ;;  %3284 = vmatpush1.bf16.msra.mxu1 %v389_v48 }
 0x129   :  { %781 = vmatprep.subr.bf16.mxu0 %v388_v49  ;;  %3277 = vmatprep.subr.bf16.mxu1 %v388_v49 }
 0x12c   :  { %782 = vmatpush1.bf16.msra.mxu0 %v387_v50  ;;  %3285 = vmatpush1.bf16.msra.mxu1 %v387_v50 }
 0x12d   :  { %783 = vmatprep.subr.bf16.mxu0 %v386_v51  ;;  %3278 = vmatprep.subr.bf16.mxu1 %v386_v51  ;;  %v3339_v51 = vld [vmem:[#allocation2 + $0xd0] sm:$0xff]  }
 0x130   :  { %784 = vmatpush1.bf16.msra.mxu0 %v385_v52  ;;  %3286 = vmatpush1.bf16.msra.mxu1 %v385_v52 }
 0x131   :  { %785 = vmatprep.subr.bf16.mxu0 %v384_v53  ;;  %3279 = vmatprep.subr.bf16.mxu1 %v384_v53 }
 0x134   :  { %786 = vmatpush1.bf16.msra.mxu0 %v383_v54  ;;  %3287 = vmatpush1.bf16.msra.mxu1 %v383_v54 }
 0x135   :  { %787 = vmatprep.subr.bf16.mxu0 %v382_v55  ;;  %3280 = vmatprep.subr.bf16.mxu1 %v382_v55 }
 0x138   :  { %788 = vmatpush1.bf16.msra.mxu0 %v381_v56  ;;  %3288 = vmatpush1.bf16.msra.mxu1 %v381_v56 }
 0x139   :  { %789 = vmatprep.subr.bf16.mxu0 %v380_v57  ;;  %3281 = vmatprep.subr.bf16.mxu1 %v380_v57  ;;  %v3356_v57 = vld [vmem:[#allocation2 + $0x158] sm:$0xff]  }
 0x13c   :  { %790 = vmatpush1.bf16.msra.mxu0 %v3506_v19  ;;  %3289 = vmatpush1.bf16.msra.mxu1 %v3506_v19  ;;  %v3347_v19 = vld [vmem:[#allocation2 + $0x110] sm:$0xff]  }
 0x13d   :  { %791 = vmatprep.subr.bf16.mxu0 %v378_v58  ;;  %3282 = vmatprep.subr.bf16.mxu1 %v378_v58 }
 0x140   :  { %792 = vmatpush1.bf16.msra.mxu0 %v3502_v14  ;;  %3290 = vmatpush1.bf16.msra.mxu1 %v3502_v14  ;;  %v3328_v14 = vld [vmem:[#allocation2 + $0x78] sm:$0xff]  }
 0x143   :  { %810 = vmatmul.mubr.bf16.vlgmr.msra.gmra.mxu0 %v3313_v59  ;;  %1100 = vmatmul.mubr.bf16.vlgmr.msra.gmra.mxu1 %v3342_v9 }
 0x144   :  { %819 = vmatprep.mubr.bf16.mxu0 %v7520_v0  ;;  %1109 = vmatprep.mubr.bf16.mxu1 %v7520_v0 }
 0x14b   :  { %820 = vmatmul.mubr.bf16.gmra.mxu0 %v3314_v60  ;;  %1110 = vmatmul.mubr.bf16.gmra.mxu1 %v3343_v11 }
 0x14c   :  { %829 = vmatprep.mubr.bf16.mxu0 %v7520_v0  ;;  %1119 = vmatprep.mubr.bf16.mxu1 %v7520_v0 }
 0x153   :  { %830 = vmatmul.mubr.bf16.gmra.mxu0 %v3315_v61  ;;  %1120 = vmatmul.mubr.bf16.gmra.mxu1 %v3344_v13 }
 0x154   :  { %839 = vmatprep.mubr.bf16.mxu0 %v7520_v0  ;;  %1129 = vmatprep.mubr.bf16.mxu1 %v7520_v0 }
 0x15b   :  { %840 = vmatmul.mubr.bf16.gmra.mxu0 %v3316_v62  ;;  %1130 = vmatmul.mubr.bf16.gmra.mxu1 %v3345_v15 }
 0x15c   :  { %849 = vmatprep.mubr.bf16.mxu0 %v7520_v0  ;;  %1139 = vmatprep.mubr.bf16.mxu1 %v7520_v0 }
 0x163   :  { %850 = vmatmul.mubr.bf16.gmra.mxu0 %v3317_v63  ;;  %1140 = vmatmul.mubr.bf16.gmra.mxu1 %v3346_v17  ;;  %v3340_v63 = vld [vmem:[#allocation2 + $0xd8] sm:$0xff]  }
 0x164   :  { %859 = vmatprep.mubr.bf16.mxu0 %v7520_v0  ;;  %1149 = vmatprep.mubr.bf16.mxu1 %v7520_v0 }
 0x16b   :  { %860 = vmatmul.mubr.bf16.gmra.mxu0 %v3318_v1  ;;  %1150 = vmatmul.mubr.bf16.gmra.mxu1 %v3347_v19 }
 0x16c   :  { %869 = vmatprep.mubr.bf16.mxu0 %v7520_v0  ;;  %1159 = vmatprep.mubr.bf16.mxu1 %v7520_v0 }
 0x173   :  { %870 = vmatmul.mubr.bf16.gmra.mxu0 %v3319_v2  ;;  %1160 = vmatmul.mubr.bf16.gmra.mxu1 %v3348_v21 }
 0x174   :  { %879 = vmatprep.mubr.bf16.mxu0 %v7520_v0  ;;  %1169 = vmatprep.mubr.bf16.mxu1 %v7520_v0 }
 0x17b   :  { %880 = vmatmul.mubr.bf16.gmra.mxu0 %v3320_v3  ;;  %1170 = vmatmul.mubr.bf16.gmra.mxu1 %v3349_v23 }
 0x17c   :  { %889 = vmatprep.mubr.bf16.mxu0 %v7520_v0  ;;  %1179 = vmatprep.mubr.bf16.mxu1 %v7520_v0 }
 0x183   :  { %890 = vmatmul.mubr.bf16.gmra.mxu0 %v3321_v4  ;;  %1180 = vmatmul.mubr.bf16.gmra.mxu1 %v3350_v25 }
 0x184   :  { %899 = vmatprep.mubr.bf16.mxu0 %v7520_v0  ;;  %1189 = vmatprep.mubr.bf16.mxu1 %v7520_v0 }
 0x18b   :  { %900 = vmatmul.mubr.bf16.gmra.mxu0 %v3322_v5  ;;  %1190 = vmatmul.mubr.bf16.gmra.mxu1 %v3351_v27 }
 0x18c   :  { %909 = vmatprep.mubr.bf16.mxu0 %v7520_v0  ;;  %1199 = vmatprep.mubr.bf16.mxu1 %v7520_v0 }
 0x193   :  { %910 = vmatmul.mubr.bf16.gmra.mxu0 %v3323_v6  ;;  %1200 = vmatmul.mubr.bf16.gmra.mxu1 %v3352_v29  ;;  %v3357_v6 = vld [vmem:[#allocation2 + $0x160] sm:$0xff]   ;;  %v3359_v29 = vld [vmem:[#allocation2 + $0x170] sm:$0xff]  }
 0x194   :  { %919 = vmatprep.mubr.bf16.mxu0 %v7520_v0  ;;  %1209 = vmatprep.mubr.bf16.mxu1 %v7520_v0 }
 0x19b   :  { %920 = vmatmul.mubr.bf16.gmra.mxu0 %v3324_v7  ;;  %1210 = vmatmul.mubr.bf16.gmra.mxu1 %v3353_v31 }
 0x19c   :  { %929 = vmatprep.mubr.bf16.mxu0 %v7520_v0  ;;  %1219 = vmatprep.mubr.bf16.mxu1 %v7520_v0 }
 0x1a3   :  { %930 = vmatmul.mubr.bf16.gmra.mxu0 %v3325_v8  ;;  %1220 = vmatmul.mubr.bf16.gmra.mxu1 %v3354_v34 }
 0x1a4   :  { %939 = vmatprep.mubr.bf16.mxu0 %v7520_v0  ;;  %1229 = vmatprep.mubr.bf16.mxu1 %v7520_v0 }
 0x1ab   :  { %940 = vmatmul.mubr.bf16.gmra.mxu0 %v3326_v10  ;;  %1230 = vmatmul.mubr.bf16.gmra.mxu1 %v3355_v45  ;;  %v3360_v45 = vld [vmem:[#allocation2 + $0x178] sm:$0xff]  }
 0x1ac   :  { %949 = vmatprep.mubr.bf16.mxu0 %v7520_v0  ;;  %1239 = vmatprep.mubr.bf16.mxu1 %v7520_v0 }
 0x1b3   :  { %950 = vmatmul.mubr.bf16.gmra.mxu0 %v3327_v12  ;;  %1240 = vmatmul.mubr.bf16.gmra.mxu1 %v3356_v57  ;;  %v3341_v12 = vld [vmem:[#allocation2 + $0xe0] sm:$0xff]  }
 0x1b4   :  { %959 = vmatprep.mubr.bf16.mxu0 %v7520_v0  ;;  %1249 = vmatprep.mubr.bf16.mxu1 %v7520_v0 }
 0x1bb   :  { %960 = vmatmul.mubr.bf16.gmra.mxu0 %v3328_v14  ;;  %1250 = vmatmul.mubr.bf16.gmra.mxu1 %v3357_v6 }
 0x1bc   :  { %969 = vmatprep.mubr.bf16.mxu0 %v7520_v0  ;;  %1259 = vmatprep.mubr.bf16.mxu1 %v7520_v0 }
 0x1c3   :  { %970 = vmatmul.mubr.bf16.gmra.mxu0 %v3329_v16 }
 0x1c4   :  { %979 = vmatprep.mubr.bf16.mxu0 %v7520_v0 }
 0x1cb   :  { %980 = vmatmul.mubr.bf16.gmra.mxu0 %v3330_v18  ;;  %v3358_v18 = vld [vmem:[#allocation2 + $0x168] sm:$0xff]  }
 0x1cc   :  { %989 = vmatprep.mubr.bf16.mxu0 %v7520_v0  ;;  %1260 = vmatmul.mubr.bf16.gmra.mxu1 %v3358_v18 }
 0x1cd   :  { %1269 = vmatprep.mubr.bf16.mxu1 %v7520_v0 }
 0x1d3   :  { %990 = vmatmul.mubr.bf16.gmra.mxu0 %v3331_v20 }
 0x1d4   :  { %999 = vmatprep.mubr.bf16.mxu0 %v7520_v0  ;;  %1270 = vmatmul.mubr.bf16.gmra.mxu1 %v3359_v29 }
 0x1d5   :  { %1279 = vmatprep.mubr.bf16.mxu1 %v7520_v0 }
 0x1db   :  { %1000 = vmatmul.mubr.bf16.gmra.mxu0 %v3332_v22 }
 0x1dc   :  { %1009 = vmatprep.mubr.bf16.mxu0 %v7520_v0  ;;  %1280 = vmatmul.mubr.bf16.gmra.mxu1 %v3360_v45 }
 0x1dd   :  { %1289 = vmatprep.mubr.bf16.mxu1 %v7520_v0 }
 0x1e3   :  { %1010 = vmatmul.mubr.bf16.gmra.mxu0 %v3333_v24 }
 0x1e4   :  { %1019 = vmatprep.mubr.bf16.mxu0 %v7520_v0 }
 0x1eb   :  { %1020 = vmatmul.mubr.bf16.gmra.mxu0 %v3334_v26 }
 0x1ec   :  { %1029 = vmatprep.mubr.bf16.mxu0 %v7520_v0 }
 0x1f3   :  { %1030 = vmatmul.mubr.bf16.gmra.mxu0 %v3335_v28 }
 0x1f4   :  { %1039 = vmatprep.mubr.bf16.mxu0 %v7520_v0 }
 0x1fb   :  { %1040 = vmatmul.mubr.bf16.gmra.mxu0 %v3336_v30 }
 0x1fc   :  { %1049 = vmatprep.mubr.bf16.mxu0 %v7520_v0 }
 0x203   :  { %v3550_v33 = vpop.f32.mrf.mxu0  ;;  %1050 = vmatmul.mubr.bf16.gmra.mxu0 %v3337_v32 }
 0x204   :  { %7975 = vst [vmem:[#allocation8_spill] sm:$0xff] %v3550_v33  ;;  %1059 = vmatprep.mubr.bf16.mxu0 %v7520_v0 }
 0x205   :  { %v3553_v35 = vpop.f32.mrf.mxu0 }
 0x206   :  { %7976 = vst [vmem:[#allocation9_spill] sm:$0xff] %v3553_v35  ;;  %v1451_v36 = vsel %vm1450_vm1, %v3553_v35, 0.0  ;;  %v3371_v35 = vld [vmem:[#allocation2 + $0x1d0] sm:$0xff]  }
 0x207   :  { %v1452_v37 = vadd.f32 %v1451_v36, %v3550_v33  ;;  %v3559_v38 = vpop.f32.mrf.mxu0 }
 0x208   :  { %7977 = vst [vmem:[#allocation10_spill] sm:$0xff] %v3559_v38 }
 0x209   :  { %v1453_v40 = vadd.f32 %v1452_v37, %v3559_v38  ;;  %v3562_v41 = vpop.f32.mrf.mxu0 }
 0x20a   :  { %7978 = vst [vmem:[#allocation11_spill] sm:$0xff] %v3562_v41  ;;  %v1454_v42 = vsel %vm1450_vm1, %v3562_v41, 0.0 }
 0x20b   :  { %v1455_v43 = vadd.f32 %v1454_v42, %v1453_v40  ;;  %v3566_v44 = vpop.f32.mrf.mxu0  ;;  %1060 = vmatmul.mubr.bf16.gmra.mxu0 %v3338_v39 }
 0x20c   :  { %7979 = vst [vmem:[#allocation12_spill] sm:$0xff] %v3566_v44  ;;  %1069 = vmatprep.mubr.bf16.mxu0 %v7520_v0 }
 0x20d   :  { %v1456_v46 = vadd.f32 %v1455_v43, %v3566_v44  ;;  %v3570_v47 = vpop.f32.mrf.mxu0 }
 0x20e   :  { %7980 = vst [vmem:[#allocation13_spill] sm:$0xff] %v3570_v47  ;;  %v1457_v48 = vsel %vm1450_vm1, %v3570_v47, 0.0 }
 0x20f   :  { %v1458_v49 = vadd.f32 %v1457_v48, %v1456_v46  ;;  %v3575_v50 = vpop.f32.mrf.mxu0 }
 0x210   :  { %7981 = vst [vmem:[#allocation14_spill] sm:$0xff] %v3575_v50 }
 0x211   :  { %v1459_v52 = vadd.f32 %v1458_v49, %v3575_v50  ;;  %v3578_v53 = vpop.f32.mrf.mxu0 }
 0x212   :  { %7982 = vst [vmem:[#allocation15_spill] sm:$0xff] %v3578_v53  ;;  %v1460_v54 = vsel %vm1450_vm1, %v3578_v53, 0.0 }
 0x213   :  { %v1461_v55 = vadd.f32 %v1460_v54, %v1459_v52  ;;  %v3582_v56 = vpop.f32.mrf.mxu0  ;;  %1070 = vmatmul.mubr.bf16.gmra.mxu0 %v3339_v51 }
 0x214   :  { %7983 = vst [vmem:[#allocation16_spill] sm:$0xff] %v3582_v56  ;;  %1079 = vmatprep.mubr.bf16.mxu0 %v7520_v0 }
 0x215   :  { %v1462_v58 = vadd.f32 %v1461_v55, %v3582_v56  ;;  %v3586_v59 = vpop.f32.mrf.mxu0 }
 0x216   :  { %7984 = vst [vmem:[#allocation17_spill] sm:$0xff] %v3586_v59  ;;  %v1463_v60 = vsel %vm1450_vm1, %v3586_v59, 0.0  ;;  %v3370_v59 = vld [vmem:[#allocation2 + $0x1c8] sm:$0xff]  }
 0x217   :  { %v1464_v61 = vadd.f32 %v1463_v60, %v1462_v58  ;;  %v3591_v62 = vpop.f32.mrf.mxu0 }
 0x218   :  { %7985 = vst [vmem:[#allocation18_spill] sm:$0xff] %v3591_v62 }
 0x219   :  { %v1465_v1 = vadd.f32 %v1464_v61, %v3591_v62  ;;  %v3594_v2 = vpop.f32.mrf.mxu0  ;;  %v3361_v61 = vld [vmem:[#allocation2 + $0x180] sm:$0xff]  }
 0x21a   :  { %7986 = vst [vmem:[#allocation19_spill] sm:$0xff] %v3594_v2  ;;  %v1466_v3 = vsel %vm1450_vm1, %v3594_v2, 0.0  ;;  %1290 = vmatmul.mubr.bf16.gmra.mxu1 %v3361_v61 }
 0x21b   :  { %v1467_v4 = vadd.f32 %v1466_v3, %v1465_v1  ;;  %v3598_v5 = vpop.f32.mrf.mxu0  ;;  %1080 = vmatmul.mubr.bf16.gmra.mxu0 %v3340_v63  ;;  %1299 = vmatprep.mubr.bf16.mxu1 %v7520_v0 }
 0x21c   :  { %7987 = vst [vmem:[#allocation20_spill] sm:$0xff] %v3598_v5  ;;  %1089 = vmatprep.mubr.bf16.mxu0 %v7520_v0 }
 0x21d   :  { %v1468_v7 = vadd.f32 %v1467_v4, %v3598_v5  ;;  %v3602_v8 = vpop.f32.mrf.mxu0 }
 0x21e   :  { %7988 = vst [vmem:[#allocation21_spill] sm:$0xff] %v3602_v8  ;;  %v1469_v9 = vsel %vm1450_vm1, %v3602_v8, 0.0 }
 0x21f   :  { %v1470_v10 = vadd.f32 %v1469_v9, %v1468_v7  ;;  %v3607_v11 = vpop.f32.mrf.mxu0 }
 0x220   :  { %7989 = vst [vmem:[#allocation22_spill] sm:$0xff] %v3607_v11 }
 0x221   :  { %v1471_v13 = vadd.f32 %v1470_v10, %v3607_v11  ;;  %v3610_v14 = vpop.f32.mrf.mxu0 }
 0x222   :  { %7990 = vst [vmem:[#allocation23_spill] sm:$0xff] %v3610_v14  ;;  %v1472_v15 = vsel %vm1450_vm1, %v3610_v14, 0.0 }
 0x223   :  { %v1473_v16 = vadd.f32 %v1472_v15, %v1471_v13  ;;  %v3614_v17 = vpop.f32.mrf.mxu0  ;;  %1090 = vmatmul.mubr.bf16.gmra.mxu0 %v3341_v12  ;;  %v3362_v15 = vld [vmem:[#allocation2 + $0x188] sm:$0xff]  }
 0x224   :  { %7991 = vst [vmem:[#allocation24_spill] sm:$0xff] %v3614_v17  ;;  %1300 = vmatmul.mubr.bf16.gmra.mxu1 %v3362_v15 }
 0x225   :  { %v1474_v19 = vadd.f32 %v1473_v16, %v3614_v17  ;;  %v3617_v20 = vpop.f32.mrf.mxu0  ;;  %1309 = vmatprep.mubr.bf16.mxu1 %v7520_v0 }
 0x226   :  { %7992 = vst [vmem:[#allocation25_spill] sm:$0xff] %v3617_v20  ;;  %v1475_v21 = vsel %vm1450_vm1, %v3617_v20, 0.0  ;;  %v3369_v20 = vld [vmem:[#allocation2 + $0x1c0] sm:$0xff]  }
 0x227   :  { %v1476_v22 = vadd.f32 %v1475_v21, %v1474_v19  ;;  %v3622_v23 = vpop.f32.mrf.mxu0 }
 0x228   :  { %7993 = vst [vmem:[#allocation26_spill] sm:$0xff] %v3622_v23 }
 0x229   :  { %v1477_v24 = vadd.f32 %v1476_v22, %v3622_v23  ;;  %v3625_v25 = vpop.f32.mrf.mxu0 }
 0x22a   :  { %7994 = vst [vmem:[#allocation27_spill] sm:$0xff] %v3625_v25  ;;  %v1478_v26 = vsel %vm1450_vm1, %v3625_v25, 0.0 }
 0x22b   :  { %v1479_v27 = vadd.f32 %v1478_v26, %v1477_v24  ;;  %v3629_v28 = vpop.f32.mrf.mxu0 }
 0x22c   :  { %7995 = vst [vmem:[#allocation28_spill] sm:$0xff] %v3629_v28 }
 0x22d   :  { %v1480_v30 = vadd.f32 %v1479_v27, %v3629_v28  ;;  %v3632_v31 = vpop.f32.mrf.mxu0 }
 0x22e   :  { %7996 = vst [vmem:[#allocation29_spill] sm:$0xff] %v3632_v31  ;;  %v1481_v32 = vsel %vm1450_vm1, %v3632_v31, 0.0 }
 0x22f   :  { %v1482_v34 = vadd.f32 %v1481_v32, %v1480_v30  ;;  %v3637_v36 = vpop.f32.mrf.mxu0  ;;  %v3363_v32 = vld [vmem:[#allocation2 + $0x190] sm:$0xff]  }
 0x230   :  { %7997 = vst [vmem:[#allocation30_spill] sm:$0xff] %v3637_v36  ;;  %1310 = vmatmul.mubr.bf16.gmra.mxu1 %v3363_v32 }
 0x231   :  { %v1483_v37 = vadd.f32 %v1482_v34, %v3637_v36  ;;  %v3640_v39 = vpop.f32.mrf.mxu0  ;;  %1319 = vmatprep.mubr.bf16.mxu1 %v7520_v0 }
 0x232   :  { %7998 = vst [vmem:[#allocation31_spill] sm:$0xff] %v3640_v39  ;;  %v1484_v40 = vsel %vm1450_vm1, %v3640_v39, 0.0 }
 0x233   :  { %v1485_v42 = vadd.f32 %v1484_v40, %v1483_v37  ;;  %v3644_v43 = vpop.f32.mrf.mxu0 }
 0x234   :  { %7999 = vst [vmem:[#allocation32_spill] sm:$0xff] %v3644_v43 }
 0x235   :  { %v1486_v46 = vadd.f32 %v1485_v42, %v3644_v43  ;;  %v3647_v48 = vpop.f32.mrf.mxu0 }
 0x236   :  { %8000 = vst [vmem:[#allocation33_spill] sm:$0xff] %v3647_v48  ;;  %v1487_v49 = vsel %vm1450_vm1, %v3647_v48, 0.0  ;;  %v3368_v48 = vld [vmem:[#allocation2 + $0x1b8] sm:$0xff]  }
 0x237   :  { %v1488_v51 = vadd.f32 %v1487_v49, %v1486_v46  ;;  %v3652_v52 = vpop.f32.mrf.mxu0 }
 0x238   :  { %8001 = vst [vmem:[#allocation34_spill] sm:$0xff] %v3652_v52 }
 0x239   :  { %v1489_v54 = vadd.f32 %v1488_v51, %v3652_v52  ;;  %v3655_v55 = vpop.f32.mrf.mxu0 }
 0x23a   :  { %8002 = vst [vmem:[#allocation35_spill] sm:$0xff] %v3655_v55  ;;  %v1490_v57 = vsel %vm1450_vm1, %v3655_v55, 0.0 }
 0x23b   :  { %v1491_v58 = vadd.f32 %v1490_v57, %v1489_v54  ;;  %v3659_v60 = vpop.f32.mrf.mxu0 }
 0x23c   :  { %8003 = vst [vmem:[#allocation36_spill] sm:$0xff] %v3659_v60 }
 0x23d   :  { %v1492_v63 = vadd.f32 %v1491_v58, %v3659_v60  ;;  %v3662_v1 = vpop.f32.mrf.mxu0  ;;  %v3364_v58 = vld [vmem:[#allocation2 + $0x198] sm:$0xff]  }
 0x23e   :  { %8004 = vst [vmem:[#allocation37_spill] sm:$0xff] %v3662_v1  ;;  %v1493_v3 = vsel %vm1450_vm1, %v3662_v1, 0.0  ;;  %1320 = vmatmul.mubr.bf16.gmra.mxu1 %v3364_v58  ;;  %v3366_v58 = vld [vmem:[#allocation2 + $0x1a8] sm:$0xff]  }
 0x23f   :  { %v1494_v4 = vadd.f32 %v1493_v3, %v1492_v63  ;;  %v3667_v6 = vpop.f32.mrf.mxu0  ;;  %1329 = vmatprep.mubr.bf16.mxu1 %v7520_v0 }
 0x240   :  { %8005 = vst [vmem:[#allocation38_spill] sm:$0xff] %v3667_v6 }
 0x241   :  { %v1495_v7 = vadd.f32 %v1494_v4, %v3667_v6  ;;  %v3670_v9 = vpop.f32.mrf.mxu0  ;;  %v8034_v6 = vmov 0  }
 0x242   :  { %8006 = vst [vmem:[#allocation39_spill] sm:$0xff] %v3670_v9  ;;  %v1496_v10 = vsel %vm1450_vm1, %v3670_v9, 0.0 }
 0x243   :  { %v1497_v12 = vadd.f32 %v1496_v10, %v1495_v7  ;;  %v3674_v13 = vpop.f32.mrf.mxu0 }
 0x244   :  { %8007 = vst [vmem:[#allocation40_spill] sm:$0xff] %v3674_v13 }
 0x245   :  { %v1498_v16 = vadd.f32 %v1497_v12, %v3674_v13  ;;  %v3677_v18 = vpop.f32.mrf.mxu0 }
 0x246   :  { %8008 = vst [vmem:[#allocation41_spill] sm:$0xff] %v3677_v18  ;;  %v1499_v19 = vsel %vm1450_vm1, %v3677_v18, 0.0 }
 0x247   :  { %v1500_v21 = vadd.f32 %v1499_v19, %v1498_v16  ;;  %v3682_v22 = vpop.f32.mrf.mxu0 }
 0x248   :  { %8009 = vst [vmem:[#allocation42_spill] sm:$0xff] %v3682_v22 }
 0x249   :  { %v1501_v24 = vadd.f32 %v1500_v21, %v3682_v22  ;;  %v3685_v26 = vpop.f32.mrf.mxu0  ;;  %v3365_v21 = vld [vmem:[#allocation2 + $0x1a0] sm:$0xff]  }
 0x24a   :  { %8010 = vst [vmem:[#allocation43_spill] sm:$0xff] %v3685_v26  ;;  %v1502_v27 = vsel %vm1450_vm1, %v3685_v26, 0.0  ;;  %1330 = vmatmul.mubr.bf16.gmra.mxu1 %v3365_v21 }
 0x24b   :  { %v1503_v29 = vadd.f32 %v1502_v27, %v1501_v24  ;;  %v3689_v30 = vpop.f32.mrf.mxu0  ;;  %1339 = vmatprep.mubr.bf16.mxu1 %v7520_v0 }
 0x24c   :  { %8011 = vst [vmem:[#allocation44_spill] sm:$0xff] %v3689_v30 }
 0x24d   :  { %v1504_v34 = vadd.f32 %v1503_v29, %v3689_v30  ;;  %v3692_v37 = vpop.f32.mrf.mxu0 }
 0x24e   :  { %8012 = vst [vmem:[#allocation45_spill] sm:$0xff] %v3692_v37  ;;  %v1505_v40 = vsel %vm1450_vm1, %v3692_v37, 0.0 }
 0x24f   :  { %v1506_v42 = vadd.f32 %v1505_v40, %v1504_v34  ;;  %v3697_v45 = vpop.f32.mrf.mxu0 }
 0x250   :  { %8013 = vst [vmem:[#allocation46_spill] sm:$0xff] %v3697_v45 }
 0x251   :  { %v1507_v46 = vadd.f32 %v1506_v42, %v3697_v45  ;;  %v3700_v49 = vpop.f32.mrf.mxu0 }
 0x252   :  { %8014 = vst [vmem:[#allocation47_spill] sm:$0xff] %v3700_v49  ;;  %v1508_v51 = vsel %vm1450_vm1, %v3700_v49, 0.0  ;;  %1340 = vmatmul.mubr.bf16.gmra.mxu1 %v3366_v58 }
 0x253   :  { %v1509_v54 = vadd.f32 %v1508_v51, %v1507_v46  ;;  %v3704_v57 = vpop.f32.mrf.mxu0  ;;  %1349 = vmatprep.mubr.bf16.mxu1 %v7520_v0  ;;  %v3367_v0 = vld [vmem:[#allocation2 + $0x1b0] sm:$0xff]  }
 0x254   :  { %8015 = vst [vmem:[#allocation48_spill] sm:$0xff] %v3704_v57 }
 0x255   :  { %v1510_v61 = vadd.f32 %v1509_v54, %v3704_v57  ;;  %v3707_v63 = vpop.f32.mrf.mxu0 }
 0x256   :  { %8016 = vst [vmem:[#allocation49_spill] sm:$0xff] %v3707_v63  ;;  %v1511_v3 = vsel %vm1450_vm1, %v3707_v63, 0.0 }
 0x257   :  { %v1512_v4 = vadd.f32 %v1511_v3, %v1510_v61  ;;  %v3712_v7 = vpop.f32.mrf.mxu0 }
 0x258   :  { %8017 = vst [vmem:[#allocation50_spill] sm:$0xff] %v3712_v7 }
 0x259   :  { %v1513_v10 = vadd.f32 %v1512_v4, %v3712_v7  ;;  %v3715_v12 = vpop.f32.mrf.mxu0  ;;  %v3739_v4 = vpop.f32.mrf.mxu1 }
 0x25a   :  { %8018 = vst [vmem:[#allocation51_spill] sm:$0xff] %v3715_v12  ;;  %v1514_v15 = vsel %vm1450_vm1, %v3715_v12, 0.0  ;;  %8025 = vst [vmem:[#allocation58_spill] sm:$0xff] %v3739_v4  ;;  %1350 = vmatmul.mubr.bf16.gmra.mxu1 %v3367_v0 }
 0x25b   :  { %v1515_v16 = vadd.f32 %v1514_v15, %v1513_v10  ;;  %v3719_v19 = vpop.f32.mrf.mxu0  ;;  %v3746_v21 = vpop.f32.mrf.mxu1  ;;  %1359 = vmatprep.mubr.bf16.mxu1 %v8034_v6 }
 0x25c   :  { %8019 = vst [vmem:[#allocation52_spill] sm:$0xff] %v3719_v19  ;;  %8027 = vst [vmem:[#allocation60_spill] sm:$0xff] %v3746_v21 }
 0x25d   :  { %v1516_v24 = vadd.f32 %v1515_v16, %v3719_v19  ;;  %v3722_v27 = vpop.f32.mrf.mxu0 }
 0x25e   :  { %8020 = vst [vmem:[#allocation53_spill] sm:$0xff] %v3722_v27  ;;  %v1517_v29 = vsel %vm1450_vm1, %v3722_v27, 0.0 }
 0x25f   :  { %v1518_v32 = vadd.f32 %v1517_v29, %v1516_v24  ;;  %v3727_v34 = vpop.f32.mrf.mxu0 }
 0x260   :  { %8021 = vst [vmem:[#allocation54_spill] sm:$0xff] %v3727_v34 }
 0x261   :  { %v1519_v40 = vadd.f32 %v1518_v32, %v3727_v34  ;;  %v3730_v42 = vpop.f32.mrf.mxu0  ;;  %v3751_v32 = vpop.f32.mrf.mxu1 }
 0x262   :  { %8022 = vst [vmem:[#allocation55_spill] sm:$0xff] %v3730_v42  ;;  %v1520_v46 = vsel %vm1450_vm1, %v3730_v42, 0.0  ;;  %8029 = vst [vmem:[#allocation62_spill] sm:$0xff] %v3751_v32  ;;  %1360 = vmatmul.mubr.bf16.gmra.mxu1 %v3368_v48 }
 0x263   :  { %v1521_v51 = vadd.f32 %v1520_v46, %v1519_v40  ;;  %v3734_v54 = vpop.f32.mrf.mxu0  ;;  %v3757_v58 = vpop.f32.mrf.mxu1  ;;  %1369 = vmatprep.mubr.bf16.mxu1 %v8034_v6 }
 0x264   :  { %8023 = vst [vmem:[#allocation56_spill] sm:$0xff] %v3734_v54  ;;  %8031 = vst [vmem:[#allocation64_spill] sm:$0xff] %v3757_v58 }
 0x265   :  { %v1522_v61 = vadd.f32 %v1521_v51, %v3734_v54  ;;  %v3737_v3 = vpop.f32.mrf.mxu0  ;;  %v3762_v13 = vpop.f32.mrf.mxu1 }
 0x266   :  { %8024 = vst [vmem:[#allocation57_spill] sm:$0xff] %v3737_v3  ;;  %v1523_v10 = vsel %vm1450_vm1, %v3737_v3, 0.0  ;;  %8033 = vst [vmem:[#allocation66_spill] sm:$0xff] %v3762_v13 }
 0x267   :  { %v1524_v15 = vadd.f32 %v1523_v10, %v1522_v61  ;;  %v3744_v16 = vpop.f32.mrf.mxu0 }
 0x268   :  { %8026 = vst [vmem:[#allocation59_spill] sm:$0xff] %v3744_v16 }
 0x269   :  { %v1525_v24 = vadd.f32 %v1524_v15, %v3744_v16  ;;  %v3749_v29 = vpop.f32.mrf.mxu0  ;;  %v3375_v16 = vld [vmem:[#allocation2 + $0x1f0] sm:$0xff]  }
 0x26a   :  { %8028 = vst [vmem:[#allocation61_spill] sm:$0xff] %v3749_v29  ;;  %v1526_v40 = vsel %vm1450_vm1, %v3749_v29, 0.0  ;;  %1370 = vmatmul.mubr.bf16.gmra.mxu1 %v3369_v20 }
 0x26b   :  { %v1527_v46 = vadd.f32 %v1526_v40, %v1525_v24  ;;  %v3755_v51 = vpop.f32.mrf.mxu0  ;;  %v3769_v24 = vpop.f32.mrf.mxu1  ;;  %1379 = vmatprep.mubr.bf16.mxu1 %v8034_v6 }
 0x26c   :  { %8030 = vst [vmem:[#allocation63_spill] sm:$0xff] %v3755_v51 }
 0x26d   :  { %v1528_v61 = vadd.f32 %v1527_v46, %v3755_v51  ;;  %v3760_v10 = vpop.f32.mrf.mxu0  ;;  %v3774_v46 = vpop.f32.mrf.mxu1 }
 0x26e   :  { %8032 = vst [vmem:[#allocation65_spill] sm:$0xff] %v3760_v10  ;;  %v1529_v15 = vsel %vm1450_vm1, %v3760_v10, 0.0  ;;  %8037 = vst [vmem:[#allocation69_spill] sm:$0xff] %v3774_v46 }
 0x26f   :  { %v1530_v9 = vadd.f32 %v1529_v15, %v1528_v61  ;;  %v3767_v60 = vpop.f32.mrf.mxu0  ;;  %v3780_v43 = vpop.f32.mrf.mxu1 }
 0x270   :  { %8035 = vst [vmem:[#allocation67_spill] sm:$0xff] %v3767_v60 }
 0x271   :  { %v1531_v40 = vadd.f32 %v1530_v9, %v3767_v60  ;;  %v3772_v1 = vpop.f32.mrf.mxu0  ;;  %v3785_v36 = vpop.f32.mrf.mxu1  ;;  %v3374_v60 = vld [vmem:[#allocation2 + $0x1e8] sm:$0xff]  }
 0x272   :  { %8036 = vst [vmem:[#allocation68_spill] sm:$0xff] %v3772_v1  ;;  %v1532_v52 = vsel %vm1450_vm1, %v3772_v1, 0.0  ;;  %8040 = vst [vmem:[#allocation72_spill] sm:$0xff] %v3785_v36  ;;  %1380 = vmatmul.mubr.bf16.gmra.mxu1 %v3370_v59 }
 0x273   :  { %v1533_v0 = vadd.f32 %v1532_v52, %v1531_v40  ;;  %v3778_v55 = vpop.f32.mrf.mxu0  ;;  %v3792_v52 = vpop.f32.mrf.mxu1  ;;  %1389 = vmatprep.mubr.bf16.mxu1 %v8034_v6 }
 0x274   :  { %8038 = vst [vmem:[#allocation70_spill] sm:$0xff] %v3778_v55 }
 0x275   :  { %v1534_v61 = vadd.f32 %v1533_v0, %v3778_v55  ;;  %v3783_v15 = vpop.f32.mrf.mxu0  ;;  %v3797_v0 = vpop.f32.mrf.mxu1 }
 0x276   :  { %8039 = vst [vmem:[#allocation71_spill] sm:$0xff] %v3783_v15  ;;  %v1535_v9 = vsel %vm1450_vm1, %v3783_v15, 0.0  ;;  %8043 = vst [vmem:[#allocation75_spill] sm:$0xff] %v3797_v0 }
 0x277   :  { %v1536_v39 = vadd.f32 %v1535_v9, %v1534_v61  ;;  %v3790_v28 = vpop.f32.mrf.mxu0  ;;  %v3803_v17 = vpop.f32.mrf.mxu1 }
 0x278   :  { %8041 = vst [vmem:[#allocation73_spill] sm:$0xff] %v3790_v28 }
 0x279   :  { %v1537_v40 = vadd.f32 %v1536_v39, %v3790_v28  ;;  %v3795_v31 = vpop.f32.mrf.mxu0  ;;  %v3808_v11 = vpop.f32.mrf.mxu1  ;;  %v3373_v28 = vld [vmem:[#allocation2 + $0x1e0] sm:$0xff]  }
 0x27a   :  { %8042 = vst [vmem:[#allocation74_spill] sm:$0xff] %v3795_v31  ;;  %v1538_v23 = vsel %vm1450_vm1, %v3795_v31, 0.0  ;;  %8046 = vst [vmem:[#allocation78_spill] sm:$0xff] %v3808_v11  ;;  %1390 = vmatmul.mubr.bf16.gmra.mxu1 %v3371_v35 }
 0x27b   :  { %v1539_v48 = vadd.f32 %v1538_v23, %v1537_v40  ;;  %v3801_v25 = vpop.f32.mrf.mxu0  ;;  %v3815_v23 = vpop.f32.mrf.mxu1  ;;  %1399 = vmatprep.mubr.bf16.mxu1 %v8034_v6 }
 0x27c   :  { %8044 = vst [vmem:[#allocation76_spill] sm:$0xff] %v3801_v25  ;;  %8048 = vst [vmem:[#allocation80_spill] sm:$0xff] %v3815_v23 }
 0x27d   :  { %v1540_v61 = vadd.f32 %v1539_v48, %v3801_v25  ;;  %v3806_v9 = vpop.f32.mrf.mxu0  ;;  %v3820_v48 = vpop.f32.mrf.mxu1 }
 0x27e   :  { %8045 = vst [vmem:[#allocation77_spill] sm:$0xff] %v3806_v9  ;;  %v1541_v39 = vsel %vm1450_vm1, %v3806_v9, 0.0  ;;  %8050 = vst [vmem:[#allocation82_spill] sm:$0xff] %v3820_v48 }
 0x27f   :  { %v1542_v14 = vadd.f32 %v1541_v39, %v1540_v61  ;;  %v3813_v5 = vpop.f32.mrf.mxu0  ;;  %v3826_v56 = vpop.f32.mrf.mxu1 }
 0x280   :  { %8047 = vst [vmem:[#allocation79_spill] sm:$0xff] %v3813_v5  ;;  %8052 = vst [vmem:[#allocation84_spill] sm:$0xff] %v3826_v56 }
 0x281   :  { %v1543_v40 = vadd.f32 %v1542_v14, %v3813_v5  ;;  %v3818_v8 = vpop.f32.mrf.mxu0  ;;  %v3831_v50 = vpop.f32.mrf.mxu1  ;;  %v3372_v5 = vld [vmem:[#allocation2 + $0x1d8] sm:$0xff]  }
 0x282   :  { %8049 = vst [vmem:[#allocation81_spill] sm:$0xff] %v3818_v8  ;;  %v1544_v62 = vsel %vm1450_vm1, %v3818_v8, 0.0  ;;  %8054 = vst [vmem:[#allocation86_spill] sm:$0xff] %v3831_v50  ;;  %1400 = vmatmul.mubr.bf16.gmra.mxu1 %v3372_v5 }
 0x283   :  { %v1545_v20 = vadd.f32 %v1544_v62, %v1543_v40  ;;  %v3824_v2 = vpop.f32.mrf.mxu0  ;;  %v3838_v62 = vpop.f32.mrf.mxu1  ;;  %1409 = vmatprep.mubr.bf16.mxu1 %v8034_v6 }
 0x284   :  { %8051 = vst [vmem:[#allocation83_spill] sm:$0xff] %v3824_v2  ;;  %8056 = vst [vmem:[#allocation88_spill] sm:$0xff] %v3838_v62 }
 0x285   :  { %v1546_v61 = vadd.f32 %v1545_v20, %v3824_v2  ;;  %v3829_v39 = vpop.f32.mrf.mxu0  ;;  %v3843_v20 = vpop.f32.mrf.mxu1 }
 0x286   :  { %8053 = vst [vmem:[#allocation85_spill] sm:$0xff] %v3829_v39  ;;  %v1547_v14 = vsel %vm1450_vm1, %v3829_v39, 0.0  ;;  %8058 = vst [vmem:[#allocation90_spill] sm:$0xff] %v3843_v20 }
 0x287   :  { %v1548_v53 = vadd.f32 %v1547_v14, %v1546_v61  ;;  %v3836_v44 = vpop.f32.mrf.mxu0  ;;  %v3849_v33 = vpop.f32.mrf.mxu1 }
 0x288   :  { %8055 = vst [vmem:[#allocation87_spill] sm:$0xff] %v3836_v44  ;;  %8060 = vst [vmem:[#allocation92_spill] sm:$0xff] %v3849_v33 }
 0x289   :  { %v1549_v40 = vadd.f32 %v1548_v53, %v3836_v44  ;;  %v3841_v47 = vpop.f32.mrf.mxu0  ;;  %v3854_v39 = vpop.f32.mrf.mxu1 }
 0x28a   :  { %8057 = vst [vmem:[#allocation89_spill] sm:$0xff] %v3841_v47  ;;  %v1550_v38 = vsel %vm1450_vm1, %v3841_v47, 0.0  ;;  %8062 = vst [vmem:[#allocation94_spill] sm:$0xff] %v3854_v39  ;;  %1410 = vmatmul.mubr.bf16.gmra.mxu1 %v3373_v28 }
 0x28b   :  { %v1551_v59 = vadd.f32 %v1550_v38, %v1549_v40  ;;  %v3847_v41 = vpop.f32.mrf.mxu0  ;;  %v3861_v38 = vpop.f32.mrf.mxu1  ;;  %1419 = vmatprep.mubr.bf16.mxu1 %v8034_v6 }
 0x28c   :  { %8059 = vst [vmem:[#allocation91_spill] sm:$0xff] %v3847_v41  ;;  %8064 = vst [vmem:[#allocation96_spill] sm:$0xff] %v3861_v38 }
 0x28d   :  { %v1552_v61 = vadd.f32 %v1551_v59, %v3847_v41  ;;  %v3852_v14 = vpop.f32.mrf.mxu0  ;;  %v3866_v59 = vpop.f32.mrf.mxu1 }
 0x28e   :  { %8061 = vst [vmem:[#allocation93_spill] sm:$0xff] %v3852_v14  ;;  %v1553_v53 = vsel %vm1450_vm1, %v3852_v14, 0.0  ;;  %8066 = vst [vmem:[#allocation98_spill] sm:$0xff] %v3866_v59 }
 0x28f   :  { %v1554_v44 = vadd.f32 %v1553_v53, %v1552_v61  ;;  %v3859_v47 = vpop.f32.mrf.mxu0  ;;  %v3872_v14 = vpop.f32.mrf.mxu1 }
 0x290   :  { %8063 = vst [vmem:[#allocation95_spill] sm:$0xff] %v3859_v47  ;;  %8068 = vst [vmem:[#allocation100_spill] sm:$0xff] %v3872_v14 }
 0x291   :  { %v1555_v40 = vadd.f32 %v1554_v44, %v3859_v47  ;;  %v3864_v2 = vpop.f32.mrf.mxu0  ;;  %v3877_v9 = vpop.f32.mrf.mxu1 }
 0x292   :  { %8065 = vst [vmem:[#allocation97_spill] sm:$0xff] %v3864_v2  ;;  %v1556_v41 = vsel %vm1450_vm1, %v3864_v2, 0.0  ;;  %8070 = vst [vmem:[#allocation102_spill] sm:$0xff] %v3877_v9  ;;  %1420 = vmatmul.mubr.bf16.gmra.mxu1 %v3374_v60 }
 0x293   :  { %v1557_v35 = vadd.f32 %v1556_v41, %v1555_v40  ;;  %v3870_v8 = vpop.f32.mrf.mxu0  ;;  %v3884_v41 = vpop.f32.mrf.mxu1  ;;  %1429 = vmatprep.mubr.bf16.mxu1 %v8034_v6 }
 0x294   :  { %8067 = vst [vmem:[#allocation99_spill] sm:$0xff] %v3870_v8  ;;  %8072 = vst [vmem:[#allocation104_spill] sm:$0xff] %v3884_v41 }
 0x295   :  { %v1558_v61 = vadd.f32 %v1557_v35, %v3870_v8  ;;  %v3875_v53 = vpop.f32.mrf.mxu0  ;;  %v3889_v35 = vpop.f32.mrf.mxu1 }
 0x296   :  { %8069 = vst [vmem:[#allocation101_spill] sm:$0xff] %v3875_v53  ;;  %v1559_v44 = vsel %vm1450_vm1, %v3875_v53, 0.0  ;;  %8074 = vst [vmem:[#allocation106_spill] sm:$0xff] %v3889_v35 }
 0x297   :  { %v1560_v47 = vadd.f32 %v1559_v44, %v1558_v61  ;;  %v3882_v2 = vpop.f32.mrf.mxu0  ;;  %v3895_v53 = vpop.f32.mrf.mxu1 }
 0x298   :  { %8071 = vst [vmem:[#allocation103_spill] sm:$0xff] %v3882_v2  ;;  %8076 = vst [vmem:[#allocation108_spill] sm:$0xff] %v3895_v53 }
 0x299   :  { %v1561_v40 = vadd.f32 %v1560_v47, %v3882_v2  ;;  %v3887_v25 = vpop.f32.mrf.mxu0  ;;  %v3900_v15 = vpop.f32.mrf.mxu1 }
 0x29a   :  { %8073 = vst [vmem:[#allocation105_spill] sm:$0xff] %v3887_v25  ;;  %v1562_v8 = vsel %vm1450_vm1, %v3887_v25, 0.0  ;;  %8078 = vst [vmem:[#allocation110_spill] sm:$0xff] %v3900_v15  ;;  %1430 = vmatmul.mubr.bf16.gmra.mxu1 %v3375_v16 }
 0x29b   :  { %v1563_v5 = vadd.f32 %v1562_v8, %v1561_v40  ;;  %v3893_v31 = vpop.f32.mrf.mxu0  ;;  %v3907_v8 = vpop.f32.mrf.mxu1  ;;  %1439 = vmatprep.mubr.bf16.mxu1 %v8034_v6  ;;  %v3376_v6 = vld [vmem:[#allocation2 + $0x1f8] sm:$0xff]  }
 0x29c   :  { %8075 = vst [vmem:[#allocation107_spill] sm:$0xff] %v3893_v31  ;;  %8080 = vst [vmem:[#allocation112_spill] sm:$0xff] %v3907_v8 }
 0x29d   :  { %v1564_v61 = vadd.f32 %v1563_v5, %v3893_v31  ;;  %v3898_v44 = vpop.f32.mrf.mxu0  ;;  %v3912_v5 = vpop.f32.mrf.mxu1 }
 0x29e   :  { %8077 = vst [vmem:[#allocation109_spill] sm:$0xff] %v3898_v44  ;;  %v1565_v47 = vsel %vm1450_vm1, %v3898_v44, 0.0  ;;  %8082 = vst [vmem:[#allocation114_spill] sm:$0xff] %v3912_v5 }
 0x29f   :  { %v1566_v2 = vadd.f32 %v1565_v47, %v1564_v61  ;;  %v3905_v25 = vpop.f32.mrf.mxu0  ;;  %v3918_v44 = vpop.f32.mrf.mxu1 }
 0x2a0   :  { %8079 = vst [vmem:[#allocation111_spill] sm:$0xff] %v3905_v25  ;;  %8084 = vst [vmem:[#allocation116_spill] sm:$0xff] %v3918_v44 }
 0x2a1   :  { %v1567_v40 = vadd.f32 %v1566_v2, %v3905_v25  ;;  %v3910_v55 = vpop.f32.mrf.mxu0  ;;  %v3923_v10 = vpop.f32.mrf.mxu1 }
 0x2a2   :  { %8081 = vst [vmem:[#allocation113_spill] sm:$0xff] %v3910_v55  ;;  %v1568_v31 = vsel %vm1450_vm1, %v3910_v55, 0.0  ;;  %8086 = vst [vmem:[#allocation118_spill] sm:$0xff] %v3923_v10  ;;  %1440 = vmatmul.mubr.bf16.gmra.mxu1 %v3376_v6 }
 0x2a3   :  { %v1569_v28 = vadd.f32 %v1568_v31, %v1567_v40  ;;  %v3916_v1 = vpop.f32.mrf.mxu0  ;;  %v3930_v31 = vpop.f32.mrf.mxu1 }
 0x2a4   :  { %8083 = vst [vmem:[#allocation115_spill] sm:$0xff] %v3916_v1  ;;  %8088 = vst [vmem:[#allocation120_spill] sm:$0xff] %v3930_v31 }
 0x2a5   :  { %v1570_v61 = vadd.f32 %v1569_v28, %v3916_v1  ;;  %v3921_v47 = vpop.f32.mrf.mxu0  ;;  %v3935_v28 = vpop.f32.mrf.mxu1 }
 0x2a6   :  { %8085 = vst [vmem:[#allocation117_spill] sm:$0xff] %v3921_v47  ;;  %v1571_v2 = vsel %vm1450_vm1, %v3921_v47, 0.0  ;;  %8090 = vst [vmem:[#allocation122_spill] sm:$0xff] %v3935_v28 }
 0x2a7   :  { %v1572_v25 = vadd.f32 %v1571_v2, %v1570_v61  ;;  %v3928_v55 = vpop.f32.mrf.mxu0  ;;  %v3941_v47 = vpop.f32.mrf.mxu1 }
 0x2a8   :  { %8087 = vst [vmem:[#allocation119_spill] sm:$0xff] %v3928_v55  ;;  %8092 = vst [vmem:[#allocation124_spill] sm:$0xff] %v3941_v47 }
 0x2a9   :  { %v1573_v40 = vadd.f32 %v1572_v25, %v3928_v55  ;;  %v3933_v51 = vpop.f32.mrf.mxu0  ;;  %v3946_v3 = vpop.f32.mrf.mxu1 }
 0x2aa   :  { %8089 = vst [vmem:[#allocation121_spill] sm:$0xff] %v3933_v51  ;;  %v1574_v1 = vsel %vm1450_vm1, %v3933_v51, 0.0  ;;  %8094 = vst [vmem:[#allocation126_spill] sm:$0xff] %v3946_v3 }
 0x2ab   :  { %v1575_v60 = vadd.f32 %v1574_v1, %v1573_v40  ;;  %v3939_v29 = vpop.f32.mrf.mxu0  ;;  %v3953_v1 = vpop.f32.mrf.mxu1 }
 0x2ac   :  { %8091 = vst [vmem:[#allocation123_spill] sm:$0xff] %v3939_v29  ;;  %8096 = vst [vmem:[#allocation128_spill] sm:$0xff] %v3953_v1 }
 0x2ad   :  { %v1576_v61 = vadd.f32 %v1575_v60, %v3939_v29  ;;  %v3944_v2 = vpop.f32.mrf.mxu0  ;;  %v3958_v60 = vpop.f32.mrf.mxu1 }
 0x2ae   :  { %8093 = vst [vmem:[#allocation125_spill] sm:$0xff] %v3944_v2  ;;  %v1577_v25 = vsel %vm1450_vm1, %v3944_v2, 0.0  ;;  %8098 = vst [vmem:[#allocation130_spill] sm:$0xff] %v3958_v60 }
 0x2af   :  { %v1578_v55 = vadd.f32 %v1577_v25, %v1576_v61  ;;  %v3951_v51 = vpop.f32.mrf.mxu0  ;;  %v3964_v2 = vpop.f32.mrf.mxu1 }
 0x2b0   :  { %8095 = vst [vmem:[#allocation127_spill] sm:$0xff] %v3951_v51  ;;  %8100 = vst [vmem:[#allocation132_spill] sm:$0xff] %v3964_v2 }
 0x2b1   :  { %v1579_v40 = vadd.f32 %v1578_v55, %v3951_v51  ;;  %v3956_v54 = vpop.f32.mrf.mxu0  ;;  %v3969_v34 = vpop.f32.mrf.mxu1 }
 0x2b2   :  { %8097 = vst [vmem:[#allocation129_spill] sm:$0xff] %v3956_v54  ;;  %v1580_v29 = vsel %vm1450_vm1, %v3956_v54, 0.0  ;;  %8102 = vst [vmem:[#allocation134_spill] sm:$0xff] %v3969_v34 }
 0x2b3   :  { %v1581_v16 = vadd.f32 %v1580_v29, %v1579_v40  ;;  %v3962_v42 = vpop.f32.mrf.mxu0  ;;  %v3975_v54 = vpop.f32.mrf.mxu1 }
 0x2b4   :  { %8099 = vst [vmem:[#allocation131_spill] sm:$0xff] %v3962_v42  ;;  %8104 = vst [vmem:[#allocation136_spill] sm:$0xff] %v3975_v54 }
 0x2b5   :  { %v1582_v61 = vadd.f32 %v1581_v16, %v3962_v42  ;;  %v3967_v25 = vpop.f32.mrf.mxu0  ;;  %v3980_v19 = vpop.f32.mrf.mxu1 }
 0x2b6   :  { %8101 = vst [vmem:[#allocation133_spill] sm:$0xff] %v3967_v25  ;;  %v1583_v55 = vsel %vm1450_vm1, %v3967_v25, 0.0  ;;  %8106 = vst [vmem:[#allocation138_spill] sm:$0xff] %v3980_v19 }
 0x2b7   :  { %v1584_v51 = vadd.f32 %v1583_v55, %v1582_v61  ;;  %v3973_v27 = vpop.f32.mrf.mxu0  ;;  %v3986_v6 = vpop.f32.mrf.mxu1 }
 0x2b8   :  { %8103 = vst [vmem:[#allocation135_spill] sm:$0xff] %v3973_v27  ;;  %8108 = vst [vmem:[#allocation140_spill] sm:$0xff] %v3986_v6 }
 0x2b9   :  { %v1585_v29 = vadd.f32 %v1584_v51, %v3973_v27  ;;  %v3978_v40 = vpop.f32.mrf.mxu0  ;;  %v3991_v25 = vpop.f32.mrf.mxu1 }
 0x2ba   :  { %8105 = vst [vmem:[#allocation137_spill] sm:$0xff] %v3978_v40  ;;  %v1586_v16 = vsel %vm1450_vm1, %v3978_v40, 0.0 }
 0x2bb   :  { %v1587_v42 = vadd.f32 %v1586_v16, %v1585_v29  ;;  %v3984_v12 = vpop.f32.mrf.mxu0  ;;  %v3997_v63 = vpop.f32.mrf.mxu1 }
 0x2bc   :  { %8107 = vst [vmem:[#allocation139_spill] sm:$0xff] %v3984_v12 }
 0x2bd   :  { %v1588_v61 = vadd.f32 %v1587_v42, %v3984_v12  ;;  %v3989_v55 = vpop.f32.mrf.mxu0  ;;  %v4002_v40 = vpop.f32.mrf.mxu1 }
 0x2be   :  { %8109 = vst [vmem:[#allocation141_spill] sm:$0xff] %v3989_v55  ;;  %v1589_v51 = vsel %vm1450_vm1, %v3989_v55, 0.0  ;;  %8112 = vst [vmem:[#allocation144_spill] sm:$0xff] %v4002_v40 }
 0x2bf   :  { %v1590_v27 = vadd.f32 %v1589_v51, %v1588_v61  ;;  %v3995_v7 = vpop.f32.mrf.mxu0  ;;  %v4008_v49 = vpop.f32.mrf.mxu1 }
 0x2c0   :  { %8110 = vst [vmem:[#allocation142_spill] sm:$0xff] %v3995_v7  ;;  %8114 = vst [vmem:[#allocation146_spill] sm:$0xff] %v4008_v49 }
 0x2c1   :  { %v1591_v29 = vadd.f32 %v1590_v27, %v3995_v7  ;;  %v4000_v16 = vpop.f32.mrf.mxu0  ;;  %v4013_v55 = vpop.f32.mrf.mxu1 }
 0x2c2   :  { %8111 = vst [vmem:[#allocation143_spill] sm:$0xff] %v4000_v16  ;;  %v1592_v42 = vsel %vm1450_vm1, %v4000_v16, 0.0  ;;  %8116 = vst [vmem:[#allocation148_spill] sm:$0xff] %v4013_v55 }
 0x2c3   :  { %v1593_v12 = vadd.f32 %v1592_v42, %v1591_v29  ;;  %v4006_v57 = vpop.f32.mrf.mxu0  ;;  %v4019_v37 = vpop.f32.mrf.mxu1 }
 0x2c4   :  { %8113 = vst [vmem:[#allocation145_spill] sm:$0xff] %v4006_v57  ;;  %8118 = vst [vmem:[#allocation150_spill] sm:$0xff] %v4019_v37 }
 0x2c5   :  { %v1594_v61 = vadd.f32 %v1593_v12, %v4006_v57  ;;  %v4011_v51 = vpop.f32.mrf.mxu0  ;;  %v4024_v16 = vpop.f32.mrf.mxu1 }
 0x2c6   :  { %8115 = vst [vmem:[#allocation147_spill] sm:$0xff] %v4011_v51  ;;  %v1595_v27 = vsel %vm1450_vm1, %v4011_v51, 0.0  ;;  %8120 = vst [vmem:[#allocation152_spill] sm:$0xff] %v4024_v16 }
 0x2c7   :  { %v1596_v7 = vadd.f32 %v1595_v27, %v1594_v61  ;;  %v4017_v45 = vpop.f32.mrf.mxu0  ;;  %v4030_v26 = vpop.f32.mrf.mxu1 }
 0x2c8   :  { %8117 = vst [vmem:[#allocation149_spill] sm:$0xff] %v4017_v45  ;;  %8122 = vst [vmem:[#allocation154_spill] sm:$0xff] %v4030_v26 }
 0x2c9   :  { %v1597_v29 = vadd.f32 %v1596_v7, %v4017_v45  ;;  %v4022_v42 = vpop.f32.mrf.mxu0  ;;  %v4035_v51 = vpop.f32.mrf.mxu1 }
 0x2ca   :  { %8119 = vst [vmem:[#allocation151_spill] sm:$0xff] %v4022_v42  ;;  %v1598_v12 = vsel %vm1450_vm1, %v4022_v42, 0.0  ;;  %8124 = vst [vmem:[#allocation156_spill] sm:$0xff] %v4035_v51 }
 0x2cb   :  { %v1599_v57 = vadd.f32 %v1598_v12, %v1597_v29  ;;  %v4028_v30 = vpop.f32.mrf.mxu0  ;;  %v4041_v18 = vpop.f32.mrf.mxu1 }
 0x2cc   :  { %8121 = vst [vmem:[#allocation153_spill] sm:$0xff] %v4028_v30  ;;  %8126 = vst [vmem:[#allocation158_spill] sm:$0xff] %v4041_v18 }
 0x2cd   :  { %v1600_v61 = vadd.f32 %v1599_v57, %v4028_v30  ;;  %v4033_v27 = vpop.f32.mrf.mxu0  ;;  %v4046_v42 = vpop.f32.mrf.mxu1 }
 0x2ce   :  { %8123 = vst [vmem:[#allocation155_spill] sm:$0xff] %v4033_v27  ;;  %v1601_v7 = vsel %vm1450_vm1, %v4033_v27, 0.0  ;;  %8128 = vst [vmem:[#allocation160_spill] sm:$0xff] %v4046_v42 }
 0x2cf   :  { %v1602_v45 = vadd.f32 %v1601_v7, %v1600_v61  ;;  %v4039_v22 = vpop.f32.mrf.mxu0  ;;  %v4052_v51 = vpop.f32.mrf.mxu1 }
 0x2d0   :  { %8125 = vst [vmem:[#allocation157_spill] sm:$0xff] %v4039_v22  ;;  %8130 = vst [vmem:[#allocation162_spill] sm:$0xff] %v4052_v51 }
 0x2d1   :  { %v1603_v29 = vadd.f32 %v1602_v45, %v4039_v22  ;;  %v4044_v12 = vpop.f32.mrf.mxu0  ;;  %v4057_v27 = vpop.f32.mrf.mxu1 }
 0x2d2   :  { %8127 = vst [vmem:[#allocation159_spill] sm:$0xff] %v4044_v12  ;;  %v1604_v57 = vsel %vm1450_vm1, %v4044_v12, 0.0  ;;  %8132 = vst [vmem:[#allocation164_spill] sm:$0xff] %v4057_v27 }
 0x2d3   :  { %v1605_v30 = vadd.f32 %v1604_v57, %v1603_v29  ;;  %v4050_v26 = vpop.f32.mrf.mxu0  ;;  %v4063_v42 = vpop.f32.mrf.mxu1 }
 0x2d4   :  { %8129 = vst [vmem:[#allocation161_spill] sm:$0xff] %v4050_v26  ;;  %8134 = vst [vmem:[#allocation166_spill] sm:$0xff] %v4063_v42 }
 0x2d5   :  { %v1606_v61 = vadd.f32 %v1605_v30, %v4050_v26  ;;  %v4055_v7 = vpop.f32.mrf.mxu0  ;;  %v4068_v12 = vpop.f32.mrf.mxu1 }
 0x2d6   :  { %8131 = vst [vmem:[#allocation163_spill] sm:$0xff] %v4055_v7  ;;  %v1607_v45 = vsel %vm1450_vm1, %v4055_v7, 0.0  ;;  %8136 = vst [vmem:[#allocation168_spill] sm:$0xff] %v4068_v12 }
 0x2d7   :  { %v1608_v22 = vadd.f32 %v1607_v45, %v1606_v61  ;;  %v4061_v18 = vpop.f32.mrf.mxu0  ;;  %v4074_v27 = vpop.f32.mrf.mxu1 }
 0x2d8   :  { %8133 = vst [vmem:[#allocation165_spill] sm:$0xff] %v4061_v18  ;;  %8138 = vst [vmem:[#allocation170_spill] sm:$0xff] %v4074_v27 }
 0x2d9   :  { %v1609_v29 = vadd.f32 %v1608_v22, %v4061_v18  ;;  %v4066_v57 = vpop.f32.mrf.mxu0  ;;  %v4079_v7 = vpop.f32.mrf.mxu1 }
 0x2da   :  { %8135 = vst [vmem:[#allocation167_spill] sm:$0xff] %v4066_v57  ;;  %v1610_v30 = vsel %vm1450_vm1, %v4066_v57, 0.0  ;;  %8140 = vst [vmem:[#allocation172_spill] sm:$0xff] %v4079_v7 }
 0x2db   :  { %v1611_v26 = vadd.f32 %v1610_v30, %v1609_v29  ;;  %v4072_v51 = vpop.f32.mrf.mxu0  ;;  %v4085_v12 = vpop.f32.mrf.mxu1 }
 0x2dc   :  { %8137 = vst [vmem:[#allocation169_spill] sm:$0xff] %v4072_v51  ;;  %8142 = vst [vmem:[#allocation174_spill] sm:$0xff] %v4085_v12 }
 0x2dd   :  { %v1612_v61 = vadd.f32 %v1611_v26, %v4072_v51  ;;  %v4077_v45 = vpop.f32.mrf.mxu0  ;;  %v4090_v57 = vpop.f32.mrf.mxu1 }
 0x2de   :  { %8139 = vst [vmem:[#allocation171_spill] sm:$0xff] %v4077_v45  ;;  %v1613_v22 = vsel %vm1450_vm1, %v4077_v45, 0.0  ;;  %8144 = vst [vmem:[#allocation176_spill] sm:$0xff] %v4090_v57 }
 0x2df   :  { %v1614_v18 = vadd.f32 %v1613_v22, %v1612_v61  ;;  %v4083_v42 = vpop.f32.mrf.mxu0  ;;  %v4096_v7 = vpop.f32.mrf.mxu1 }
 0x2e0   :  { %8141 = vst [vmem:[#allocation173_spill] sm:$0xff] %v4083_v42  ;;  %8146 = vst [vmem:[#allocation178_spill] sm:$0xff] %v4096_v7 }
 0x2e1   :  { %v1615_v29 = vadd.f32 %v1614_v18, %v4083_v42  ;;  %v4088_v30 = vpop.f32.mrf.mxu0  ;;  %v4101_v45 = vpop.f32.mrf.mxu1 }
 0x2e2   :  { %8143 = vst [vmem:[#allocation175_spill] sm:$0xff] %v4088_v30  ;;  %v1616_v26 = vsel %vm1450_vm1, %v4088_v30, 0.0  ;;  %8148 = vst [vmem:[#allocation180_spill] sm:$0xff] %v4101_v45 }
 0x2e3   :  { %v1617_v51 = vadd.f32 %v1616_v26, %v1615_v29  ;;  %v4094_v27 = vpop.f32.mrf.mxu0  ;;  %v4107_v57 = vpop.f32.mrf.mxu1 }
 0x2e4   :  { %8145 = vst [vmem:[#allocation177_spill] sm:$0xff] %v4094_v27  ;;  %8150 = vst [vmem:[#allocation182_spill] sm:$0xff] %v4107_v57 }
 0x2e5   :  { %v1618_v61 = vadd.f32 %v1617_v51, %v4094_v27  ;;  %v4099_v22 = vpop.f32.mrf.mxu0  ;;  %v4112_v30 = vpop.f32.mrf.mxu1 }
 0x2e6   :  { %8147 = vst [vmem:[#allocation179_spill] sm:$0xff] %v4099_v22  ;;  %v1619_v18 = vsel %vm1450_vm1, %v4099_v22, 0.0  ;;  %8152 = vst [vmem:[#allocation184_spill] sm:$0xff] %v4112_v30 }
 0x2e7   :  { %v1620_v42 = vadd.f32 %v1619_v18, %v1618_v61  ;;  %v4105_v12 = vpop.f32.mrf.mxu0  ;;  %v4116_v7 = vpop.f32.mrf.mxu1  ;;  %v1625_v61 = vsel %vm1450_vm1, %v3746_v21, 0.0  ;;  %v1631_v21 = vsel %vm1450_vm1, %v3769_v24, 0.0 }
 0x2e8   :  { %8149 = vst [vmem:[#allocation181_spill] sm:$0xff] %v4105_v12  ;;  %8153 = vst [vmem:[#allocation185_spill] sm:$0xff] %v4116_v7 }
 0x2e9   :  { %v1621_v29 = vadd.f32 %v1620_v42, %v4105_v12  ;;  %v4110_v26 = vpop.f32.mrf.mxu0  ;;  %v4119_v22 = vpop.f32.mrf.mxu1 }
 0x2ea   :  { %8151 = vst [vmem:[#allocation183_spill] sm:$0xff] %v4110_v26  ;;  %v1622_v51 = vsel %vm1450_vm1, %v4110_v26, 0.0  ;;  %8154 = vst [vmem:[#allocation186_spill] sm:$0xff] %v4119_v22  ;;  %v1628_v26 = vsel %vm1450_vm1, %v3757_v58, 0.0 }
 0x2eb   :  { %v1623_v27 = vadd.f32 %v1622_v51, %v1621_v29  ;;  %v4123_v57 = vpop.f32.mrf.mxu1 }
 0x2ec   :  { %8155 = vst [vmem:[#allocation187_spill] sm:$0xff] %v4123_v57 }
 0x2ed   :  { %v1624_v45 = vadd.f32 %v1623_v27, %v3739_v4  ;;  %v4126_v12 = vpop.f32.mrf.mxu1 }
 0x2ee   :  { %8156 = vst [vmem:[#allocation188_spill] sm:$0xff] %v4126_v12 }
 0x2ef   :  { %v1626_v18 = vadd.f32 %v1625_v61, %v1624_v45  ;;  %v4130_v51 = vpop.f32.mrf.mxu1 }
 0x2f0   :  { %8157 = vst [vmem:[#allocation189_spill] sm:$0xff] %v4130_v51 }
 0x2f1   :  { %v1627_v42 = vadd.f32 %v1626_v18, %v3751_v32  ;;  %v4133_v4 = vpop.f32.mrf.mxu1  ;;  %v1634_v32 = vsel %vm1450_vm1, %v3780_v43, 0.0 }
 0x2f2   :  { %8158 = vst [vmem:[#allocation190_spill] sm:$0xff] %v4133_v4 }
 0x2f3   :  { %v1629_v29 = vadd.f32 %v1628_v26, %v1627_v42  ;;  %v4137_v61 = vpop.f32.mrf.mxu1  ;;  %v1637_v42 = vsel %vm1450_vm1, %v3792_v52, 0.0 }
 0x2f4   :  { %8159 = vst [vmem:[#allocation191_spill] sm:$0xff] %v4137_v61 }
 0x2f5   :  { %v1630_v27 = vadd.f32 %v1629_v29, %v3762_v13  ;;  %v4142_v58 = vpop.f32.mrf.mxu1 }
 0x2f6   :  { %8160 = vst [vmem:[#allocation192_spill] sm:$0xff] %v4142_v58 }
 0x2f7   :  { %v1632_v45 = vadd.f32 %v1631_v21, %v1630_v27  ;;  %v4147_v13 = vpop.f32.mrf.mxu1  ;;  %v1640_v27 = vsel %vm1450_vm1, %v3803_v17, 0.0 }
 0x2f8   :  { %8161 = vst [vmem:[#allocation193_spill] sm:$0xff] %v4147_v13 }
 0x2f9   :  { %v1633_v18 = vadd.f32 %v1632_v45, %v3774_v46  ;;  %v4152_v46 = vpop.f32.mrf.mxu1 }
 0x2fa   :  { %8162 = vst [vmem:[#allocation194_spill] sm:$0xff] %v4152_v46 }
 0x2fb   :  { %v1635_v12 = vadd.f32 %v1634_v32, %v1633_v18  ;;  %v1643_v18 = vsel %vm1450_vm1, %v3815_v23, 0.0  ;;  %v8196_v23 = vld [vmem:[#allocation172_spill] sm:$0xff] }
 0x2fd   :  { %v1636_v26 = vadd.f32 %v1635_v12, %v3785_v36  ;;  %v4157_v36 = vpop.f32.mrf.mxu1 }
 0x2fe   :  { %8163 = vst [vmem:[#allocation195_spill] sm:$0xff] %v4157_v36 }
 0x2ff   :  { %v1638_v29 = vadd.f32 %v1637_v42, %v1636_v26  ;;  %v1646_v42 = vsel %vm1450_vm1, %v3826_v56, 0.0 }
 0x301   :  { %v1639_v21 = vadd.f32 %v1638_v29, %v3797_v0  ;;  %v4162_v0 = vpop.f32.mrf.mxu1 }
 0x302   :  { %8164 = vst [vmem:[#allocation196_spill] sm:$0xff] %v4162_v0 }
 0x303   :  { %v1641_v45 = vadd.f32 %v1640_v27, %v1639_v21  ;;  %v1649_v27 = vsel %vm1450_vm1, %v3838_v62, 0.0 }
 0x305   :  { %v1642_v32 = vadd.f32 %v1641_v45, %v3808_v11  ;;  %v4167_v11 = vpop.f32.mrf.mxu1 }
 0x306   :  { %8165 = vst [vmem:[#allocation197_spill] sm:$0xff] %v4167_v11 }
 0x307   :  { %v1644_v12 = vadd.f32 %v1643_v18, %v1642_v32  ;;  %v1652_v18 = vsel %vm1450_vm1, %v3849_v33, 0.0  ;;  %v8193_v33 = vld [vmem:[#allocation168_spill] sm:$0xff] }
 0x309   :  { %v1645_v26 = vadd.f32 %v1644_v12, %v3820_v48  ;;  %v4172_v48 = vpop.f32.mrf.mxu1 }
 0x30a   :  { %8166 = vst [vmem:[#allocation198_spill] sm:$0xff] %v4172_v48 }
 0x30b   :  { %v1647_v29 = vadd.f32 %v1646_v42, %v1645_v26  ;;  %v1655_v42 = vsel %vm1450_vm1, %v3861_v38, 0.0 }
 0x30d   :  { %v1648_v21 = vadd.f32 %v1647_v29, %v3831_v50  ;;  %v4177_v50 = vpop.f32.mrf.mxu1 }
 0x30e   :  { %8167 = vst [vmem:[#allocation199_spill] sm:$0xff] %v4177_v50 }
 0x30f   :  { %v1650_v45 = vadd.f32 %v1649_v27, %v1648_v21  ;;  %v1658_v27 = vsel %vm1450_vm1, %v3872_v14, 0.0 }
 0x311   :  { %v1651_v32 = vadd.f32 %v1650_v45, %v3843_v20  ;;  %v4182_v20 = vpop.f32.mrf.mxu1 }
 0x312   :  { %8168 = vst [vmem:[#allocation200_spill] sm:$0xff] %v4182_v20 }
 0x313   :  { %v1653_v12 = vadd.f32 %v1652_v18, %v1651_v32  ;;  %v1661_v18 = vsel %vm1450_vm1, %v3884_v41, 0.0  ;;  %v8190_v41 = vld [vmem:[#allocation164_spill] sm:$0xff] }
 0x315   :  { %v1654_v26 = vadd.f32 %v1653_v12, %v3854_v39  ;;  %v4187_v39 = vpop.f32.mrf.mxu1 }
 0x316   :  { %8169 = vst [vmem:[#allocation201_spill] sm:$0xff] %v4187_v39 }
 0x317   :  { %v1656_v29 = vadd.f32 %v1655_v42, %v1654_v26  ;;  %v1664_v42 = vsel %vm1450_vm1, %v3895_v53, 0.0 }
 0x319   :  { %v1657_v21 = vadd.f32 %v1656_v29, %v3866_v59  ;;  %v4192_v59 = vpop.f32.mrf.mxu1 }
 0x31a   :  { %8170 = vst [vmem:[#allocation202_spill] sm:$0xff] %v4192_v59 }
 0x31b   :  { %v1659_v45 = vadd.f32 %v1658_v27, %v1657_v21  ;;  %v1667_v27 = vsel %vm1450_vm1, %v3907_v8, 0.0 }
 0x31d   :  { %v1660_v32 = vadd.f32 %v1659_v45, %v3877_v9  ;;  %v4197_v9 = vpop.f32.mrf.mxu1 }
 0x31e   :  { %8171 = vst [vmem:[#allocation203_spill] sm:$0xff] %v4197_v9 }
 0x31f   :  { %v1662_v12 = vadd.f32 %v1661_v18, %v1660_v32  ;;  %v1670_v18 = vsel %vm1450_vm1, %v3918_v44, 0.0  ;;  %v8187_v44 = vld [vmem:[#allocation160_spill] sm:$0xff] }
 0x321   :  { %v1663_v26 = vadd.f32 %v1662_v12, %v3889_v35  ;;  %v4202_v35 = vpop.f32.mrf.mxu1 }
 0x322   :  { %8172 = vst [vmem:[#allocation204_spill] sm:$0xff] %v4202_v35 }
 0x323   :  { %v1665_v29 = vadd.f32 %v1664_v42, %v1663_v26  ;;  %v1673_v42 = vsel %vm1450_vm1, %v3930_v31, 0.0 }
 0x325   :  { %v1666_v21 = vadd.f32 %v1665_v29, %v3900_v15  ;;  %v4207_v15 = vpop.f32.mrf.mxu1 }
 0x326   :  { %8173 = vst [vmem:[#allocation205_spill] sm:$0xff] %v4207_v15 }
 0x327   :  { %v1668_v45 = vadd.f32 %v1667_v27, %v1666_v21  ;;  %v1676_v27 = vsel %vm1450_vm1, %v3941_v47, 0.0 }
 0x329   :  { %v1669_v32 = vadd.f32 %v1668_v45, %v3912_v5  ;;  %v4212_v5 = vpop.f32.mrf.mxu1 }
 0x32a   :  { %8174 = vst [vmem:[#allocation206_spill] sm:$0xff] %v4212_v5 }
 0x32b   :  { %v1671_v12 = vadd.f32 %v1670_v18, %v1669_v32  ;;  %v1679_v18 = vsel %vm1450_vm1, %v3953_v1, 0.0  ;;  %v8184_v1 = vld [vmem:[#allocation156_spill] sm:$0xff] }
 0x32d   :  { %v1672_v26 = vadd.f32 %v1671_v12, %v3923_v10  ;;  %v4217_v10 = vpop.f32.mrf.mxu1 }
 0x32e   :  { %8175 = vst [vmem:[#allocation207_spill] sm:$0xff] %v4217_v10 }
 0x32f   :  { %v1674_v29 = vadd.f32 %v1673_v42, %v1672_v26  ;;  %v1682_v42 = vsel %vm1450_vm1, %v3964_v2, 0.0 }
 0x331   :  { %v1675_v21 = vadd.f32 %v1674_v29, %v3935_v28  ;;  %v4222_v28 = vpop.f32.mrf.mxu1 }
 0x332   :  { %8176 = vst [vmem:[#allocation208_spill] sm:$0xff] %v4222_v28 }
 0x333   :  { %v1677_v45 = vadd.f32 %v1676_v27, %v1675_v21  ;;  %v1685_v27 = vsel %vm1450_vm1, %v3975_v54, 0.0 }
 0x335   :  { %v1678_v32 = vadd.f32 %v1677_v45, %v3946_v3  ;;  %v4227_v3 = vpop.f32.mrf.mxu1 }
 0x336   :  { %8177 = vst [vmem:[#allocation209_spill] sm:$0xff] %v4227_v3 }
 0x337   :  { %v1680_v12 = vadd.f32 %v1679_v18, %v1678_v32  ;;  %v1688_v18 = vsel %vm1450_vm1, %v3986_v6, 0.0 }
 0x339   :  { %v1681_v26 = vadd.f32 %v1680_v12, %v3958_v60  ;;  %v4232_v60 = vpop.f32.mrf.mxu1 }
 0x33a   :  { %8178 = vst [vmem:[#allocation210_spill] sm:$0xff] %v4232_v60 }
 0x33b   :  { %v1683_v29 = vadd.f32 %v1682_v42, %v1681_v26  ;;  %v1691_v42 = vsel %vm1450_vm1, %v3997_v63, 0.0 }
 0x33d   :  { %v1684_v21 = vadd.f32 %v1683_v29, %v3969_v34  ;;  %v4237_v34 = vpop.f32.mrf.mxu1 }
 0x33e   :  { %8179 = vst [vmem:[#allocation211_spill] sm:$0xff] %v4237_v34 }
 0x33f   :  { %v1686_v45 = vadd.f32 %v1685_v27, %v1684_v21  ;;  %v1694_v27 = vsel %vm1450_vm1, %v4008_v49, 0.0  ;;  %v8344_v49 = vld [vmem:[#allocation192_spill] sm:$0xff] }
 0x341   :  { %v1687_v32 = vadd.f32 %v1686_v45, %v3980_v19  ;;  %v4242_v19 = vpop.f32.mrf.mxu1 }
 0x342   :  { %8180 = vst [vmem:[#allocation212_spill] sm:$0xff] %v4242_v19 }
 0x343   :  { %v1689_v12 = vadd.f32 %v1688_v18, %v1687_v32  ;;  %v1697_v18 = vsel %vm1450_vm1, %v4019_v37, 0.0  ;;  %v4247_v6 = vpop.f32.mrf.mxu1  ;;  %v8346_v37 = vld [vmem:[#allocation196_spill] sm:$0xff] }
 0x344   :  { %8181 = vst [vmem:[#allocation213_spill] sm:$0xff] %v4247_v6 }
 0x345   :  { %v1690_v26 = vadd.f32 %v1689_v12, %v3991_v25  ;;  %v4252_v2 = vpop.f32.mrf.mxu1 }
 0x346   :  { %8183 = vst [vmem:[#allocation214_spill] sm:$0xff] %v4252_v2 }
 0x347   :  { %v1692_v29 = vadd.f32 %v1691_v42, %v1690_v26  ;;  %v8182_v42 = vld [vmem:[#allocation154_spill] sm:$0xff]  ;;  %v4257_v31 = vpop.f32.mrf.mxu1 }
 0x348   :  { %v1700_v54 = vsel %vm1450_vm1, %v8182_v42, 0.0  ;;  %8186 = vst [vmem:[#allocation215_spill] sm:$0xff] %v4257_v31  ;;  %v8338_v42 = vld [vmem:[#allocation180_spill] sm:$0xff] }
 0x349   :  { %v1693_v21 = vadd.f32 %v1692_v29, %v4002_v40  ;;  %v4262_v53 = vpop.f32.mrf.mxu1  ;;  %v8347_v40 = vld [vmem:[#allocation198_spill] sm:$0xff] }
 0x34a   :  { %8189 = vst [vmem:[#allocation216_spill] sm:$0xff] %v4262_v53 }
 0x34b   :  { %v1695_v45 = vadd.f32 %v1694_v27, %v1693_v21  ;;  %v8185_v27 = vld [vmem:[#allocation158_spill] sm:$0xff]  ;;  %v4267_v38 = vpop.f32.mrf.mxu1 }
 0x34c   :  { %v1703_v47 = vsel %vm1450_vm1, %v8185_v27, 0.0  ;;  %8192 = vst [vmem:[#allocation217_spill] sm:$0xff] %v4267_v38 }
 0x34d   :  { %v1696_v32 = vadd.f32 %v1695_v45, %v4013_v55  ;;  %v4272_v56 = vpop.f32.mrf.mxu1  ;;  %v8348_v55 = vld [vmem:[#allocation200_spill] sm:$0xff] }
 0x34e   :  { %8195 = vst [vmem:[#allocation218_spill] sm:$0xff] %v4272_v56 }
 0x34f   :  { %v1698_v12 = vadd.f32 %v1697_v18, %v1696_v32  ;;  %v8188_v18 = vld [vmem:[#allocation162_spill] sm:$0xff] }
 0x350   :  { %v1706_v8 = vsel %vm1450_vm1, %v8188_v18, 0.0 }
 0x351   :  { %v1699_v26 = vadd.f32 %v1698_v12, %v4024_v16  ;;  %v8342_v16 = vld [vmem:[#allocation188_spill] sm:$0xff] }
 0x353   :  { %v1701_v29 = vadd.f32 %v1700_v54, %v1699_v26  ;;  %v8191_v26 = vld [vmem:[#allocation166_spill] sm:$0xff] }
 0x354   :  { %v1709_v14 = vsel %vm1450_vm1, %v8191_v26, 0.0  ;;  %v8198_v26 = vld [vmem:[#allocation176_spill] sm:$0xff] }
 0x355   :  { %v1702_v21 = vadd.f32 %v1701_v29, %v8184_v1  ;;  %v8350_v1 = vld [vmem:[#allocation204_spill] sm:$0xff] }
 0x357   :  { %v1704_v45 = vadd.f32 %v1703_v47, %v1702_v21  ;;  %v8194_v21 = vld [vmem:[#allocation170_spill] sm:$0xff] }
 0x358   :  { %v1712_v62 = vsel %vm1450_vm1, %v8194_v21, 0.0  ;;  %v8201_v21 = vld [vmem:[#allocation180_spill] sm:$0xff] }
 0x359   :  { %v1705_v32 = vadd.f32 %v1704_v45, %v8187_v44 }
 0x35b   :  { %v1707_v12 = vadd.f32 %v1706_v8, %v1705_v32  ;;  %v8197_v32 = vld [vmem:[#allocation174_spill] sm:$0xff] }
 0x35c   :  { %v1715_v18 = vsel %vm1450_vm1, %v8197_v32, 0.0  ;;  %v8345_v32 = vld [vmem:[#allocation194_spill] sm:$0xff] }
 0x35d   :  { %v1708_v54 = vadd.f32 %v1707_v12, %v8190_v41  ;;  %v4277_v41 = vpop.f32.mrf.mxu1 }
 0x35f   :  { %v1710_v29 = vadd.f32 %v1709_v14, %v1708_v54  ;;  %v8199_v54 = vld [vmem:[#allocation178_spill] sm:$0xff] }
 0x360   :  { %v1718_v44 = vsel %vm1450_vm1, %v8199_v54, 0.0  ;;  %v8349_v54 = vld [vmem:[#allocation202_spill] sm:$0xff] }
 0x361   :  { %v1711_v47 = vadd.f32 %v1710_v29, %v8193_v33  ;;  %v4282_v33 = vpop.f32.mrf.mxu1 }
 0x362   :  { %8200 = vst [vmem:[#allocation219_spill] sm:$0xff] %v4282_v33 }
 0x363   :  { %v1713_v45 = vadd.f32 %v1712_v62, %v1711_v47  ;;  %v8202_v47 = vld [vmem:[#allocation182_spill] sm:$0xff] }
 0x364   :  { %v1721_v27 = vsel %vm1450_vm1, %v8202_v47, 0.0  ;;  %v8204_v47 = vld [vmem:[#allocation188_spill] sm:$0xff] }
 0x365   :  { %v1714_v8 = vadd.f32 %v1713_v45, %v8196_v23  ;;  %v4287_v23 = vpop.f32.mrf.mxu1 }
 0x367   :  { %v1716_v12 = vadd.f32 %v1715_v18, %v1714_v8  ;;  %v1724_v8 = vsel %vm1450_vm1, %v4116_v7, 0.0  ;;  %v8351_v7 = vld [vmem:[#allocation206_spill] sm:$0xff] }
 0x369   :  { %v1717_v14 = vadd.f32 %v1716_v12, %v8198_v26  ;;  %v4292_v26 = vpop.f32.mrf.mxu1 }
 0x36a   :  { %8203 = vst [vmem:[#allocation220_spill] sm:$0xff] %v4292_v26 }
 0x36b   :  { %v1719_v29 = vadd.f32 %v1718_v44, %v1717_v14  ;;  %v1727_v14 = vsel %vm1450_vm1, %v4123_v57, 0.0  ;;  %v8352_v57 = vld [vmem:[#allocation208_spill] sm:$0xff] }
 0x36d   :  { %v1720_v62 = vadd.f32 %v1719_v29, %v8201_v21  ;;  %v4297_v21 = vpop.f32.mrf.mxu1 }
 0x36f   :  { %v1722_v45 = vadd.f32 %v1721_v27, %v1720_v62  ;;  %v1730_v62 = vsel %vm1450_vm1, %v4130_v51, 0.0  ;;  %v8353_v51 = vld [vmem:[#allocation210_spill] sm:$0xff] }
 0x371   :  { %v1723_v18 = vadd.f32 %v1722_v45, %v4112_v30  ;;  %v4302_v30 = vpop.f32.mrf.mxu1 }
 0x372   :  { %8205 = vst [vmem:[#allocation221_spill] sm:$0xff] %v4302_v30 }
 0x373   :  { %v1725_v12 = vadd.f32 %v1724_v8, %v1723_v18  ;;  %v1733_v8 = vsel %vm1450_vm1, %v4137_v61, 0.0  ;;  %v8354_v61 = vld [vmem:[#allocation212_spill] sm:$0xff] }
 0x375   :  { %v1726_v44 = vadd.f32 %v1725_v12, %v4119_v22  ;;  %v4307_v22 = vpop.f32.mrf.mxu1 }
 0x377   :  { %v1728_v29 = vadd.f32 %v1727_v14, %v1726_v44  ;;  %v1736_v14 = vsel %vm1450_vm1, %v4147_v13, 0.0  ;;  %v8355_v13 = vld [vmem:[#allocation214_spill] sm:$0xff] }
 0x379   :  { %v1729_v27 = vadd.f32 %v1728_v29, %v8204_v47  ;;  %v4312_v47 = vpop.f32.mrf.mxu1 }
 0x37a   :  { %8206 = vst [vmem:[#allocation222_spill] sm:$0xff] %v4312_v47 }
 0x37b   :  { %v1731_v45 = vadd.f32 %v1730_v62, %v1729_v27  ;;  %v1739_v62 = vsel %vm1450_vm1, %v4157_v36, 0.0  ;;  %v8356_v36 = vld [vmem:[#allocation216_spill] sm:$0xff] }
 0x37d   :  { %v1732_v18 = vadd.f32 %v1731_v45, %v4133_v4  ;;  %v4317_v4 = vpop.f32.mrf.mxu1 }
 0x37e   :  { %8207 = vst [vmem:[#allocation223_spill] sm:$0xff] %v4317_v4 }
 0x37f   :  { %v1734_v12 = vadd.f32 %v1733_v8, %v1732_v18  ;;  %v1742_v8 = vsel %vm1450_vm1, %v4167_v11, 0.0  ;;  %v8357_v11 = vld [vmem:[#allocation218_spill] sm:$0xff] }
 0x381   :  { %v1735_v44 = vadd.f32 %v1734_v12, %v4142_v58  ;;  %v4322_v58 = vpop.f32.mrf.mxu1 }
 0x382   :  { %8208 = vst [vmem:[#allocation224_spill] sm:$0xff] %v4322_v58 }
 0x383   :  { %v1737_v29 = vadd.f32 %v1736_v14, %v1735_v44  ;;  %v1745_v14 = vsel %vm1450_vm1, %v4177_v50, 0.0  ;;  %v8358_v50 = vld [vmem:[#allocation219_spill] sm:$0xff] }
 0x385   :  { %v1738_v27 = vadd.f32 %v1737_v29, %v4152_v46  ;;  %v4327_v46 = vpop.f32.mrf.mxu1 }
 0x386   :  { %8209 = vst [vmem:[#allocation225_spill] sm:$0xff] %v4327_v46 }
 0x387   :  { %v1740_v45 = vadd.f32 %v1739_v62, %v1738_v27  ;;  %v1748_v62 = vsel %vm1450_vm1, %v4187_v39, 0.0  ;;  %v8359_v39 = vld [vmem:[#allocation220_spill] sm:$0xff] }
 0x389   :  { %v1741_v18 = vadd.f32 %v1740_v45, %v4162_v0  ;;  %v4332_v0 = vpop.f32.mrf.mxu1 }
 0x38a   :  { %8210 = vst [vmem:[#allocation226_spill] sm:$0xff] %v4332_v0 }
 0x38b   :  { %v1743_v12 = vadd.f32 %v1742_v8, %v1741_v18  ;;  %v1751_v8 = vsel %vm1450_vm1, %v4197_v9, 0.0  ;;  %v8360_v9 = vld [vmem:[#allocation221_spill] sm:$0xff] }
 0x38d   :  { %v1744_v44 = vadd.f32 %v1743_v12, %v4172_v48  ;;  %v4337_v48 = vpop.f32.mrf.mxu1 }
 0x38e   :  { %8211 = vst [vmem:[#allocation227_spill] sm:$0xff] %v4337_v48 }
 0x38f   :  { %v1746_v29 = vadd.f32 %v1745_v14, %v1744_v44  ;;  %v1754_v14 = vsel %vm1450_vm1, %v4207_v15, 0.0 }
 0x391   :  { %v1747_v27 = vadd.f32 %v1746_v29, %v4182_v20  ;;  %v4342_v20 = vpop.f32.mrf.mxu1 }
 0x392   :  { %8212 = vst [vmem:[#allocation228_spill] sm:$0xff] %v4342_v20 }
 0x393   :  { %v1749_v45 = vadd.f32 %v1748_v62, %v1747_v27  ;;  %v1757_v62 = vsel %vm1450_vm1, %v4217_v10, 0.0 }
 0x395   :  { %v1750_v18 = vadd.f32 %v1749_v45, %v4192_v59  ;;  %v4347_v59 = vpop.f32.mrf.mxu1 }
 0x396   :  { %8213 = vst [vmem:[#allocation229_spill] sm:$0xff] %v4347_v59 }
 0x397   :  { %v1752_v12 = vadd.f32 %v1751_v8, %v1750_v18  ;;  %v1760_v8 = vsel %vm1450_vm1, %v4227_v3, 0.0  ;;  %v8383_v3 = vld [vmem:[#allocation52_spill] sm:$0xff] }
 0x399   :  { %v1753_v44 = vadd.f32 %v1752_v12, %v4202_v35  ;;  %v4352_v35 = vpop.f32.mrf.mxu1 }
 0x39a   :  { %8214 = vst [vmem:[#allocation230_spill] sm:$0xff] %v4352_v35 }
 0x39b   :  { %v1755_v29 = vadd.f32 %v1754_v14, %v1753_v44  ;;  %v1763_v14 = vsel %vm1450_vm1, %v4237_v34, 0.0 }
 0x39d   :  { %v1756_v27 = vadd.f32 %v1755_v29, %v4212_v5  ;;  %v4357_v5 = vpop.f32.mrf.mxu1 }
 0x39e   :  { %8215 = vst [vmem:[#allocation231_spill] sm:$0xff] %v4357_v5 }
 0x39f   :  { %v1758_v45 = vadd.f32 %v1757_v62, %v1756_v27  ;;  %v1766_v62 = vsel %vm1450_vm1, %v4247_v6, 0.0 }
 0x3a1   :  { %v1759_v18 = vadd.f32 %v1758_v45, %v4222_v28  ;;  %v4362_v28 = vpop.f32.mrf.mxu1 }
 0x3a2   :  { %8216 = vst [vmem:[#allocation232_spill] sm:$0xff] %v4362_v28 }
 0x3a3   :  { %v1761_v12 = vadd.f32 %v1760_v8, %v1759_v18  ;;  %v1769_v8 = vsel %vm1450_vm1, %v4257_v31, 0.0 }
 0x3a5   :  { %v1762_v44 = vadd.f32 %v1761_v12, %v4232_v60  ;;  %v4367_v60 = vpop.f32.mrf.mxu1 }
 0x3a6   :  { %8217 = vst [vmem:[#allocation233_spill] sm:$0xff] %v4367_v60 }
 0x3a7   :  { %v1764_v29 = vadd.f32 %v1763_v14, %v1762_v44  ;;  %v1772_v14 = vsel %vm1450_vm1, %v4267_v38, 0.0 }
 0x3a9   :  { %v1765_v27 = vadd.f32 %v1764_v29, %v4242_v19  ;;  %v4372_v19 = vpop.f32.mrf.mxu1 }
 0x3aa   :  { %8218 = vst [vmem:[#allocation234_spill] sm:$0xff] %v4372_v19 }
 0x3ab   :  { %v1767_v45 = vadd.f32 %v1766_v62, %v1765_v27  ;;  %v1775_v62 = vsel %vm1450_vm1, %v4277_v41, 0.0 }
 0x3ad   :  { %v1768_v18 = vadd.f32 %v1767_v45, %v4252_v2  ;;  %v4377_v2 = vpop.f32.mrf.mxu1 }
 0x3ae   :  { %8219 = vst [vmem:[#allocation235_spill] sm:$0xff] %v4377_v2 }
 0x3af   :  { %v1770_v12 = vadd.f32 %v1769_v8, %v1768_v18  ;;  %v1778_v8 = vsel %vm1450_vm1, %v4287_v23, 0.0 }
 0x3b1   :  { %v1771_v44 = vadd.f32 %v1770_v12, %v4262_v53  ;;  %v4382_v53 = vpop.f32.mrf.mxu1 }
 0x3b2   :  { %8220 = vst [vmem:[#allocation236_spill] sm:$0xff] %v4382_v53 }
 0x3b3   :  { %v1773_v29 = vadd.f32 %v1772_v14, %v1771_v44  ;;  %v1781_v14 = vsel %vm1450_vm1, %v4297_v21, 0.0 }
 0x3b5   :  { %v1774_v27 = vadd.f32 %v1773_v29, %v4272_v56  ;;  %v4387_v56 = vpop.f32.mrf.mxu1 }
 0x3b6   :  { %8221 = vst [vmem:[#allocation237_spill] sm:$0xff] %v4387_v56 }
 0x3b7   :  { %v1776_v45 = vadd.f32 %v1775_v62, %v1774_v27  ;;  %v1784_v62 = vsel %vm1450_vm1, %v4307_v22, 0.0 }
 0x3b9   :  { %v1777_v18 = vadd.f32 %v1776_v45, %v4282_v33  ;;  %v4392_v33 = vpop.f32.mrf.mxu1 }
 0x3ba   :  { %8222 = vst [vmem:[#allocation238_spill] sm:$0xff] %v4392_v33 }
 0x3bb   :  { %v1779_v12 = vadd.f32 %v1778_v8, %v1777_v18  ;;  %v1787_v8 = vsel %vm1450_vm1, %v4317_v4, 0.0  ;;  %v8333_v4 = vld [vmem:[#allocation166_spill] sm:$0xff] }
 0x3bd   :  { %v1780_v44 = vadd.f32 %v1779_v12, %v4292_v26  ;;  %v4397_v26 = vpop.f32.mrf.mxu1 }
 0x3be   :  { %8223 = vst [vmem:[#allocation239_spill] sm:$0xff] %v4397_v26 }
 0x3bf   :  { %v1782_v29 = vadd.f32 %v1781_v14, %v1780_v44  ;;  %v1790_v14 = vsel %vm1450_vm1, %v4327_v46, 0.0  ;;  %v8328_v46 = vld [vmem:[#allocation75_spill] sm:$0xff] }
 0x3c1   :  { %v1783_v27 = vadd.f32 %v1782_v29, %v4302_v30  ;;  %v4402_v30 = vpop.f32.mrf.mxu1 }
 0x3c2   :  { %8224 = vst [vmem:[#allocation240_spill] sm:$0xff] %v4402_v30 }
 0x3c3   :  { %v1785_v45 = vadd.f32 %v1784_v62, %v1783_v27  ;;  %v1793_v62 = vsel %vm1450_vm1, %v4337_v48, 0.0  ;;  %v8341_v48 = vld [vmem:[#allocation186_spill] sm:$0xff] }
 0x3c5   :  { %v1786_v18 = vadd.f32 %v1785_v45, %v4312_v47  ;;  %v4407_v47 = vpop.f32.mrf.mxu1 }
 0x3c6   :  { %8225 = vst [vmem:[#allocation241_spill] sm:$0xff] %v4407_v47 }
 0x3c7   :  { %v1788_v12 = vadd.f32 %v1787_v8, %v1786_v18  ;;  %v1796_v8 = vsel %vm1450_vm1, %v4347_v59, 0.0  ;;  %v8327_v59 = vld [vmem:[#allocation72_spill] sm:$0xff] }
 0x3c9   :  { %v1789_v44 = vadd.f32 %v1788_v12, %v4322_v58  ;;  %v4412_v58 = vpop.f32.mrf.mxu1 }
 0x3ca   :  { %8226 = vst [vmem:[#allocation242_spill] sm:$0xff] %v4412_v58 }
 0x3cb   :  { %v1791_v29 = vadd.f32 %v1790_v14, %v1789_v44  ;;  %v1799_v14 = vsel %vm1450_vm1, %v4357_v5, 0.0  ;;  %v8340_v5 = vld [vmem:[#allocation184_spill] sm:$0xff] }
 0x3cd   :  { %v1792_v27 = vadd.f32 %v1791_v29, %v4332_v0  ;;  %v4417_v0 = vpop.f32.mrf.mxu1 }
 0x3ce   :  { %8227 = vst [vmem:[#allocation243_spill] sm:$0xff] %v4417_v0 }
 0x3cf   :  { %v1794_v45 = vadd.f32 %v1793_v62, %v1792_v27  ;;  %v1802_v62 = vsel %vm1450_vm1, %v4367_v60, 0.0  ;;  %v8326_v60 = vld [vmem:[#allocation69_spill] sm:$0xff] }
 0x3d1   :  { %v1795_v18 = vadd.f32 %v1794_v45, %v4342_v20  ;;  %v4422_v20 = vpop.f32.mrf.mxu1 }
 0x3d2   :  { %8228 = vst [vmem:[#allocation244_spill] sm:$0xff] %v4422_v20 }
 0x3d3   :  { %v1797_v12 = vadd.f32 %v1796_v8, %v1795_v18  ;;  %v1805_v8 = vsel %vm1450_vm1, %v4377_v2, 0.0  ;;  %v8334_v2 = vld [vmem:[#allocation168_spill] sm:$0xff] }
 0x3d5   :  { %v1798_v44 = vadd.f32 %v1797_v12, %v4352_v35  ;;  %v4427_v35 = vpop.f32.mrf.mxu1 }
 0x3d6   :  { %8229 = vst [vmem:[#allocation245_spill] sm:$0xff] %v4427_v35 }
 0x3d7   :  { %v1800_v29 = vadd.f32 %v1799_v14, %v1798_v44  ;;  %v1808_v14 = vsel %vm1450_vm1, %v4387_v56, 0.0  ;;  %v8325_v56 = vld [vmem:[#allocation66_spill] sm:$0xff] }
 0x3d9   :  { %v1801_v27 = vadd.f32 %v1800_v29, %v4362_v28  ;;  %v4432_v28 = vpop.f32.mrf.mxu1 }
 0x3da   :  { %8230 = vst [vmem:[#allocation246_spill] sm:$0xff] %v4432_v28 }
 0x3db   :  { %v1803_v45 = vadd.f32 %v1802_v62, %v1801_v27  ;;  %v1811_v62 = vsel %vm1450_vm1, %v4397_v26, 0.0  ;;  %v8332_v26 = vld [vmem:[#allocation164_spill] sm:$0xff] }
 0x3dd   :  { %v1804_v18 = vadd.f32 %v1803_v45, %v4372_v19  ;;  %v4437_v19 = vpop.f32.mrf.mxu1 }
 0x3de   :  { %8231 = vst [vmem:[#allocation247_spill] sm:$0xff] %v4437_v19 }
 0x3df   :  { %v1806_v12 = vadd.f32 %v1805_v8, %v1804_v18  ;;  %v1814_v8 = vsel %vm1450_vm1, %v4407_v47, 0.0  ;;  %v8323_v47 = vld [vmem:[#allocation62_spill] sm:$0xff] }
 0x3e1   :  { %v1807_v44 = vadd.f32 %v1806_v12, %v4382_v53  ;;  %v4442_v53 = vpop.f32.mrf.mxu1 }
 0x3e2   :  { %8232 = vst [vmem:[#allocation248_spill] sm:$0xff] %v4442_v53 }
 0x3e3   :  { %v1809_v29 = vadd.f32 %v1808_v14, %v1807_v44  ;;  %v1817_v14 = vsel %vm1450_vm1, %v4417_v0, 0.0  ;;  %v8330_v0 = vld [vmem:[#allocation160_spill] sm:$0xff] }
 0x3e5   :  { %v1810_v27 = vadd.f32 %v1809_v29, %v4392_v33  ;;  %v4447_v33 = vpop.f32.mrf.mxu1 }
 0x3e6   :  { %8233 = vst [vmem:[#allocation249_spill] sm:$0xff] %v4447_v33 }
 0x3e7   :  { %v1812_v45 = vadd.f32 %v1811_v62, %v1810_v27  ;;  %v1820_v62 = vsel %vm1450_vm1, %v4427_v35, 0.0 }
 0x3e9   :  { %v1813_v18 = vadd.f32 %v1812_v45, %v4402_v30  ;;  %v4452_v30 = vpop.f32.mrf.mxu1 }
 0x3ea   :  { %8234 = vst [vmem:[#allocation250_spill] sm:$0xff] %v4452_v30 }
 0x3eb   :  { %v1815_v12 = vadd.f32 %v1814_v8, %v1813_v18  ;;  %v1823_v8 = vsel %vm1450_vm1, %v4437_v19, 0.0 }
 0x3ed   :  { %v1816_v44 = vadd.f32 %v1815_v12, %v4412_v58  ;;  %v4457_v58 = vpop.f32.mrf.mxu1 }
 0x3ee   :  { %8235 = vst [vmem:[#allocation251_spill] sm:$0xff] %v4457_v58 }
 0x3ef   :  { %v1818_v29 = vadd.f32 %v1817_v14, %v1816_v44  ;;  %v1826_v14 = vsel %vm1450_vm1, %v4447_v33, 0.0 }
 0x3f1   :  { %v1819_v27 = vadd.f32 %v1818_v29, %v4422_v20  ;;  %v4462_v20 = vpop.f32.mrf.mxu1 }
 0x3f2   :  { %8236 = vst [vmem:[#allocation252_spill] sm:$0xff] %v4462_v20 }
 0x3f3   :  { %v1821_v45 = vadd.f32 %v1820_v62, %v1819_v27  ;;  %v1829_v62 = vsel %vm1450_vm1, %v4457_v58, 0.0  ;;  %v1845_v58 = vlaneseq }
 0x3f5   :  { %v1822_v18 = vadd.f32 %v1821_v45, %v4432_v28  ;;  %v4467_v28 = vpop.f32.mrf.mxu1 }
 0x3f6   :  { %8237 = vst [vmem:[#allocation253_spill] sm:$0xff] %v4467_v28 }
 0x3f7   :  { %v1824_v12 = vadd.f32 %v1823_v8, %v1822_v18  ;;  %v1832_v8 = vsel %vm1450_vm1, %v4467_v28, 0.0  ;;  %v8244_v28 = vld [vmem:[#allocation47_spill] sm:$0xff] }
 0x3f9   :  { %v1825_v44 = vadd.f32 %v1824_v12, %v4442_v53 }
 0x3fb   :  { %v1827_v29 = vadd.f32 %v1826_v14, %v1825_v44 }
 0x3fd   :  { %v1828_v27 = vadd.f32 %v1827_v29, %v4452_v30 }
 0x3ff   :  { %v1830_v45 = vadd.f32 %v1829_v62, %v1828_v27  ;;  %v4472_v62 = vand.u32 127, %v1845_v58  ;;  %v8242_v58 = vld [vmem:[#allocation45_spill] sm:$0xff] }
 0x401   :  { %v1831_v18 = vadd.f32 %v1830_v45, %v4462_v20  ;;  %v4477_v45 = vadd.s32 128, %v4472_v62  ;;  %v8321_v20 = vld [vmem:[#allocation58_spill] sm:$0xff]  ;;  %vm1848_vm2 = vcmp.ge.s32.totalorder %v4472_v62, 10 }
 0x403   :  { %v1833_v12 = vadd.f32 %v1832_v8, %v1831_v18  ;;  %v8238_v18 = vld [vmem:[#allocation41_spill] sm:$0xff]  ;;  %v8245_v8 = vld [vmem:[#allocation48_spill] sm:$0xff]  ;;  %vm1851_vm3 = vcmp.lt.s32.totalorder %v4477_v45, 138 }
 0x405   :  { %1834 = vadd.xlane.f32.xlu0 %v1833_v12  ;;  %v8240_v12 = vld [vmem:[#allocation43_spill] sm:$0xff] }
 0x48e   :  { %v1835_v53 = vpop.xlane.xlu0 %1834 }
 0x48f   :  { %v1836_v33 = vrot.slane %v1835_v53, 4 }
 0x491   :  { %v1837_v44 = vadd.f32 %v1836_v33, %v1835_v53  ;;  %v8239_v33 = vld [vmem:[#allocation42_spill] sm:$0xff]  ;;  %v8246_v53 = vld [vmem:[#allocation49_spill] sm:$0xff] }
 0x493   :  { %v1838_v14 = vrot.slane %v1837_v44, 2 }
 0x495   :  { %v1839_v19 = vadd.f32 %v1838_v14, %v1837_v44  ;;  %v8248_v44 = vld [vmem:[#allocation51_spill] sm:$0xff]  ;;  %v8319_v14 = vld [vmem:[#allocation181_spill] sm:$0xff] }
 0x497   :  { %v1840_v35 = vrot.slane %v1839_v19, 1 }
 0x499   :  { %v1841_v29 = vadd.f32 %v1840_v35, %v1839_v19  ;;  %v8241_v35 = vld [vmem:[#allocation44_spill] sm:$0xff]  ;;  %v8247_v19 = vld [vmem:[#allocation50_spill] sm:$0xff] }
 0x49b   :  { %3291 = vpush %v1841_v29  ;;  %v8243_v29 = vld [vmem:[#allocation46_spill] sm:$0xff] }
 0x4cc   :  { %s3292_s2 = spop %3291 }
 0x4cd   :  { %v1843_v27 = vstv %s3292_s2 }
 0x4ce   :  { %v4474_v30 = vmul.f32 7.6293945e-06, %v1843_v27  ;;  %v8343_v27 = vld [vmem:[#allocation190_spill] sm:$0xff] }
 0x4d0   :  { %v8361_v15 = vsub.f32 %v8238_v18, %v4474_v30  ;;  %v8363_v10 = vsub.f32 %v8239_v33, %v4474_v30  ;;  %v8365_v38 = vsub.f32 %v8240_v12, %v4474_v30  ;;  %v8367_v18 = vsub.f32 %v8241_v35, %v4474_v30 }
 0x4d1   :  { %v8369_v33 = vsub.f32 %v8242_v58, %v4474_v30  ;;  %v8371_v12 = vsub.f32 %v8243_v29, %v4474_v30  ;;  %v8373_v35 = vsub.f32 %v8244_v28, %v4474_v30  ;;  %v8375_v58 = vsub.f32 %v8245_v8, %v4474_v30 }
 0x4d2   :  { %v4804_v6 = vsel %vm1851_vm3, %v8361_v15, 0.0  ;;  %v4811_v31 = vsel %vm1848_vm2, %v8363_v10, 0.0  ;;  %v4818_v34 = vsel %vm1851_vm3, %v8365_v38, 0.0  ;;  %v4825_v15 = vsel %vm1848_vm2, %v8367_v18, 0.0 }
 0x4d3   :  { %8362 = vst [vmem:[#allocation41_spill] sm:$0xff] %v4804_v6  ;;  %8364 = vst [vmem:[#allocation42_spill] sm:$0xff] %v4811_v31  ;;  %v4832_v10 = vsel %vm1851_vm3, %v8369_v33, 0.0  ;;  %v4839_v38 = vsel %vm1848_vm2, %v8371_v12, 0.0  ;;  %v4846_v18 = vsel %vm1851_vm3, %v8373_v35, 0.0  ;;  %v4853_v33 = vsel %vm1848_vm2, %v8375_v58, 0.0 }
 0x4d4   :  { %8366 = vst [vmem:[#allocation43_spill] sm:$0xff] %v4818_v34  ;;  %8368 = vst [vmem:[#allocation44_spill] sm:$0xff] %v4825_v15  ;;  %v8377_v29 = vsub.f32 %v8246_v53, %v4474_v30  ;;  %v8379_v28 = vsub.f32 %v8247_v19, %v4474_v30  ;;  %v8381_v8 = vsub.f32 %v8248_v44, %v4474_v30  ;;  %v8650_v31 = vld [vmem:[#allocation248_spill] sm:$0xff]  ;;  %v8651_v34 = vld [vmem:[#allocation249_spill] sm:$0xff] }
 0x4d5   :  { %8370 = vst [vmem:[#allocation45_spill] sm:$0xff] %v4832_v10  ;;  %8372 = vst [vmem:[#allocation46_spill] sm:$0xff] %v4839_v38  ;;  %v8384_v53 = vsub.f32 %v8383_v3, %v4474_v30  ;;  %v8649_v10 = vld [vmem:[#allocation247_spill] sm:$0xff]  ;;  %v8652_v6 = vld [vmem:[#allocation250_spill] sm:$0xff] }
 0x4d6   :  { %8374 = vst [vmem:[#allocation47_spill] sm:$0xff] %v4846_v18  ;;  %8376 = vst [vmem:[#allocation48_spill] sm:$0xff] %v4853_v33  ;;  %v4860_v12 = vsel %vm1851_vm3, %v8377_v29, 0.0  ;;  %v4867_v35 = vsel %vm1848_vm2, %v8379_v28, 0.0  ;;  %v4874_v58 = vsel %vm1851_vm3, %v8381_v8, 0.0  ;;  %v8386_v33 = vld [vmem:[#allocation53_spill] sm:$0xff] }
 0x4d7   :  { %8378 = vst [vmem:[#allocation49_spill] sm:$0xff] %v4860_v12  ;;  %8380 = vst [vmem:[#allocation50_spill] sm:$0xff] %v4867_v35  ;;  %v4881_v29 = vsel %vm1848_vm2, %v8384_v53, 0.0  ;;  %v8387_v19 = vsub.f32 %v8386_v33, %v4474_v30  ;;  %v8389_v35 = vld [vmem:[#allocation54_spill] sm:$0xff]  ;;  %v8660_v38 = vld [vmem:[#allocation144_spill] sm:$0xff] }
 0x4d8   :  { %8382 = vst [vmem:[#allocation51_spill] sm:$0xff] %v4874_v58  ;;  %8385 = vst [vmem:[#allocation181_spill] sm:$0xff] %v4881_v29  ;;  %v8390_v44 = vsub.f32 %v8389_v35, %v4474_v30  ;;  %v8392_v58 = vld [vmem:[#allocation55_spill] sm:$0xff]  ;;  %v8395_v29 = vld [vmem:[#allocation56_spill] sm:$0xff]  ;;  %v8661_v18 = vsub.f32 %v8660_v38, %v4474_v30 }
 0x4d9   :  { %v4888_v28 = vsel %vm1851_vm3, %v8387_v19, 0.0  ;;  %v8393_v3 = vsub.f32 %v8392_v58, %v4474_v30  ;;  %v8396_v33 = vsub.f32 %v8395_v29, %v4474_v30 }
 0x4da   :  { %8388 = vst [vmem:[#allocation58_spill] sm:$0xff] %v4888_v28  ;;  %v4895_v8 = vsel %vm1848_vm2, %v8390_v44, 0.0  ;;  %v8398_v28 = vld [vmem:[#allocation57_spill] sm:$0xff]  ;;  %v5547_v15 = vsel %vm1848_vm2, %v8661_v18, 0.0 }
 0x4db   :  { %8391 = vst [vmem:[#allocation62_spill] sm:$0xff] %v4895_v8  ;;  %v4902_v53 = vsel %vm1851_vm3, %v8393_v3, 0.0  ;;  %v4909_v19 = vsel %vm1848_vm2, %v8396_v33, 0.0  ;;  %v8399_v35 = vsub.f32 %v8398_v28, %v4474_v30  ;;  %v8401_v8 = vld [vmem:[#allocation59_spill] sm:$0xff] }
 0x4dc   :  { %8394 = vst [vmem:[#allocation66_spill] sm:$0xff] %v4902_v53  ;;  %8397 = vst [vmem:[#allocation69_spill] sm:$0xff] %v4909_v19  ;;  %v8402_v58 = vsub.f32 %v8401_v8, %v4474_v30  ;;  %v8404_v53 = vld [vmem:[#allocation61_spill] sm:$0xff]  ;;  %v8407_v19 = vld [vmem:[#allocation63_spill] sm:$0xff] }
 0x4dd   :  { %v4916_v44 = vsel %vm1851_vm3, %v8399_v35, 0.0  ;;  %v8405_v29 = vsub.f32 %v8404_v53, %v4474_v30  ;;  %v8408_v28 = vsub.f32 %v8407_v19, %v4474_v30 }
 0x4de   :  { %8400 = vst [vmem:[#allocation72_spill] sm:$0xff] %v4916_v44  ;;  %v4923_v3 = vsel %vm1848_vm2, %v8402_v58, 0.0  ;;  %v8410_v44 = vld [vmem:[#allocation65_spill] sm:$0xff] }
 0x4df   :  { %8403 = vst [vmem:[#allocation75_spill] sm:$0xff] %v4923_v3  ;;  %v4930_v33 = vsel %vm1851_vm3, %v8405_v29, 0.0  ;;  %v4937_v35 = vsel %vm1848_vm2, %v8408_v28, 0.0  ;;  %v8411_v8 = vsub.f32 %v8410_v44, %v4474_v30  ;;  %v8413_v3 = vld [vmem:[#allocation67_spill] sm:$0xff] }
 0x4e0   :  { %8406 = vst [vmem:[#allocation160_spill] sm:$0xff] %v4930_v33  ;;  %8409 = vst [vmem:[#allocation164_spill] sm:$0xff] %v4937_v35  ;;  %v8414_v53 = vsub.f32 %v8413_v3, %v4474_v30  ;;  %v8416_v33 = vld [vmem:[#allocation68_spill] sm:$0xff]  ;;  %v8419_v35 = vld [vmem:[#allocation70_spill] sm:$0xff] }
 0x4e1   :  { %v4944_v58 = vsel %vm1851_vm3, %v8411_v8, 0.0  ;;  %v8417_v19 = vsub.f32 %v8416_v33, %v4474_v30  ;;  %v8420_v44 = vsub.f32 %v8419_v35, %v4474_v30 }
 0x4e2   :  { %8412 = vst [vmem:[#allocation166_spill] sm:$0xff] %v4944_v58  ;;  %v4951_v29 = vsel %vm1848_vm2, %v8414_v53, 0.0  ;;  %v8422_v58 = vld [vmem:[#allocation71_spill] sm:$0xff] }
 0x4e3   :  { %8415 = vst [vmem:[#allocation168_spill] sm:$0xff] %v4951_v29  ;;  %v4958_v28 = vsel %vm1851_vm3, %v8417_v19, 0.0  ;;  %v4965_v8 = vsel %vm1848_vm2, %v8420_v44, 0.0  ;;  %v8423_v3 = vsub.f32 %v8422_v58, %v4474_v30  ;;  %v8425_v29 = vld [vmem:[#allocation73_spill] sm:$0xff] }
 0x4e4   :  { %8418 = vst [vmem:[#allocation180_spill] sm:$0xff] %v4958_v28  ;;  %8421 = vst [vmem:[#allocation184_spill] sm:$0xff] %v4965_v8  ;;  %v8426_v33 = vsub.f32 %v8425_v29, %v4474_v30  ;;  %v8428_v28 = vld [vmem:[#allocation74_spill] sm:$0xff]  ;;  %v8431_v8 = vld [vmem:[#allocation76_spill] sm:$0xff] }
 0x4e5   :  { %v4972_v53 = vsel %vm1851_vm3, %v8423_v3, 0.0  ;;  %v8429_v35 = vsub.f32 %v8428_v28, %v4474_v30  ;;  %v8432_v58 = vsub.f32 %v8431_v8, %v4474_v30 }
 0x4e6   :  { %8424 = vst [vmem:[#allocation186_spill] sm:$0xff] %v4972_v53  ;;  %v4979_v19 = vsel %vm1848_vm2, %v8426_v33, 0.0  ;;  %v8434_v53 = vld [vmem:[#allocation77_spill] sm:$0xff] }
 0x4e7   :  { %8427 = vst [vmem:[#allocation188_spill] sm:$0xff] %v4979_v19  ;;  %v4986_v44 = vsel %vm1851_vm3, %v8429_v35, 0.0  ;;  %v4993_v3 = vsel %vm1848_vm2, %v8432_v58, 0.0  ;;  %v8435_v29 = vsub.f32 %v8434_v53, %v4474_v30  ;;  %v8437_v19 = vld [vmem:[#allocation79_spill] sm:$0xff] }
 0x4e8   :  { %8430 = vst [vmem:[#allocation190_spill] sm:$0xff] %v4986_v44  ;;  %8433 = vst [vmem:[#allocation192_spill] sm:$0xff] %v4993_v3  ;;  %v8438_v28 = vsub.f32 %v8437_v19, %v4474_v30  ;;  %v8440_v44 = vld [vmem:[#allocation81_spill] sm:$0xff]  ;;  %v8443_v3 = vld [vmem:[#allocation83_spill] sm:$0xff] }
 0x4e9   :  { %v5000_v33 = vsel %vm1851_vm3, %v8435_v29, 0.0  ;;  %v8441_v8 = vsub.f32 %v8440_v44, %v4474_v30  ;;  %v8444_v53 = vsub.f32 %v8443_v3, %v4474_v30 }
 0x4ea   :  { %8436 = vst [vmem:[#allocation194_spill] sm:$0xff] %v5000_v33  ;;  %v5007_v35 = vsel %vm1848_vm2, %v8438_v28, 0.0  ;;  %v8446_v33 = vld [vmem:[#allocation85_spill] sm:$0xff] }
 0x4eb   :  { %8439 = vst [vmem:[#allocation196_spill] sm:$0xff] %v5007_v35  ;;  %v5014_v58 = vsel %vm1851_vm3, %v8441_v8, 0.0  ;;  %v5021_v29 = vsel %vm1848_vm2, %v8444_v53, 0.0  ;;  %v8447_v19 = vsub.f32 %v8446_v33, %v4474_v30  ;;  %v8449_v35 = vld [vmem:[#allocation87_spill] sm:$0xff] }
 0x4ec   :  { %8442 = vst [vmem:[#allocation198_spill] sm:$0xff] %v5014_v58  ;;  %8445 = vst [vmem:[#allocation200_spill] sm:$0xff] %v5021_v29  ;;  %v8450_v44 = vsub.f32 %v8449_v35, %v4474_v30  ;;  %v8452_v58 = vld [vmem:[#allocation89_spill] sm:$0xff]  ;;  %v8455_v29 = vld [vmem:[#allocation91_spill] sm:$0xff] }
 0x4ed   :  { %v5028_v28 = vsel %vm1851_vm3, %v8447_v19, 0.0  ;;  %v8453_v3 = vsub.f32 %v8452_v58, %v4474_v30  ;;  %v8456_v33 = vsub.f32 %v8455_v29, %v4474_v30 }
 0x4ee   :  { %8448 = vst [vmem:[#allocation202_spill] sm:$0xff] %v5028_v28  ;;  %v5035_v8 = vsel %vm1848_vm2, %v8450_v44, 0.0  ;;  %v8458_v28 = vld [vmem:[#allocation93_spill] sm:$0xff] }
 0x4ef   :  { %8451 = vst [vmem:[#allocation204_spill] sm:$0xff] %v5035_v8  ;;  %v5042_v53 = vsel %vm1851_vm3, %v8453_v3, 0.0  ;;  %v5049_v19 = vsel %vm1848_vm2, %v8456_v33, 0.0  ;;  %v8459_v35 = vsub.f32 %v8458_v28, %v4474_v30  ;;  %v8461_v8 = vld [vmem:[#allocation95_spill] sm:$0xff] }
 0x4f0   :  { %8454 = vst [vmem:[#allocation206_spill] sm:$0xff] %v5042_v53  ;;  %8457 = vst [vmem:[#allocation208_spill] sm:$0xff] %v5049_v19  ;;  %v8462_v58 = vsub.f32 %v8461_v8, %v4474_v30  ;;  %v8464_v53 = vld [vmem:[#allocation97_spill] sm:$0xff]  ;;  %v8467_v19 = vld [vmem:[#allocation99_spill] sm:$0xff] }
 0x4f1   :  { %v5056_v44 = vsel %vm1851_vm3, %v8459_v35, 0.0  ;;  %v8465_v29 = vsub.f32 %v8464_v53, %v4474_v30  ;;  %v8468_v28 = vsub.f32 %v8467_v19, %v4474_v30 }
 0x4f2   :  { %8460 = vst [vmem:[#allocation210_spill] sm:$0xff] %v5056_v44  ;;  %v5063_v3 = vsel %vm1848_vm2, %v8462_v58, 0.0  ;;  %v8470_v44 = vld [vmem:[#allocation101_spill] sm:$0xff] }
 0x4f3   :  { %8463 = vst [vmem:[#allocation212_spill] sm:$0xff] %v5063_v3  ;;  %v5070_v33 = vsel %vm1851_vm3, %v8465_v29, 0.0  ;;  %v5077_v35 = vsel %vm1848_vm2, %v8468_v28, 0.0  ;;  %v8471_v8 = vsub.f32 %v8470_v44, %v4474_v30  ;;  %v8473_v3 = vld [vmem:[#allocation103_spill] sm:$0xff] }
 0x4f4   :  { %8466 = vst [vmem:[#allocation214_spill] sm:$0xff] %v5070_v33  ;;  %8469 = vst [vmem:[#allocation216_spill] sm:$0xff] %v5077_v35  ;;  %v8474_v53 = vsub.f32 %v8473_v3, %v4474_v30  ;;  %v8476_v33 = vld [vmem:[#allocation105_spill] sm:$0xff]  ;;  %v8479_v35 = vld [vmem:[#allocation107_spill] sm:$0xff] }
 0x4f5   :  { %v5084_v58 = vsel %vm1851_vm3, %v8471_v8, 0.0  ;;  %v8477_v19 = vsub.f32 %v8476_v33, %v4474_v30  ;;  %v8480_v44 = vsub.f32 %v8479_v35, %v4474_v30 }
 0x4f6   :  { %8472 = vst [vmem:[#allocation218_spill] sm:$0xff] %v5084_v58  ;;  %v5091_v29 = vsel %vm1848_vm2, %v8474_v53, 0.0  ;;  %v8482_v58 = vld [vmem:[#allocation109_spill] sm:$0xff] }
 0x4f7   :  { %8475 = vst [vmem:[#allocation219_spill] sm:$0xff] %v5091_v29  ;;  %v5098_v28 = vsel %vm1851_vm3, %v8477_v19, 0.0  ;;  %v5105_v8 = vsel %vm1848_vm2, %v8480_v44, 0.0  ;;  %v8483_v3 = vsub.f32 %v8482_v58, %v4474_v30  ;;  %v8485_v29 = vld [vmem:[#allocation111_spill] sm:$0xff] }
 0x4f8   :  { %8478 = vst [vmem:[#allocation220_spill] sm:$0xff] %v5098_v28  ;;  %8481 = vst [vmem:[#allocation221_spill] sm:$0xff] %v5105_v8  ;;  %v8486_v33 = vsub.f32 %v8485_v29, %v4474_v30  ;;  %v8488_v28 = vld [vmem:[#allocation113_spill] sm:$0xff]  ;;  %v8491_v8 = vld [vmem:[#allocation115_spill] sm:$0xff] }
 0x4f9   :  { %v5112_v53 = vsel %vm1851_vm3, %v8483_v3, 0.0  ;;  %v8489_v35 = vsub.f32 %v8488_v28, %v4474_v30  ;;  %v8492_v58 = vsub.f32 %v8491_v8, %v4474_v30 }
 0x4fa   :  { %8484 = vst [vmem:[#allocation52_spill] sm:$0xff] %v5112_v53  ;;  %v5119_v19 = vsel %vm1848_vm2, %v8486_v33, 0.0  ;;  %v8494_v53 = vld [vmem:[#allocation117_spill] sm:$0xff] }
 0x4fb   :  { %8487 = vst [vmem:[#allocation53_spill] sm:$0xff] %v5119_v19  ;;  %v5126_v44 = vsel %vm1851_vm3, %v8489_v35, 0.0  ;;  %v5133_v3 = vsel %vm1848_vm2, %v8492_v58, 0.0  ;;  %v8495_v29 = vsub.f32 %v8494_v53, %v4474_v30  ;;  %v8497_v19 = vld [vmem:[#allocation119_spill] sm:$0xff] }
 0x4fc   :  { %8490 = vst [vmem:[#allocation54_spill] sm:$0xff] %v5126_v44  ;;  %8493 = vst [vmem:[#allocation55_spill] sm:$0xff] %v5133_v3  ;;  %v8498_v28 = vsub.f32 %v8497_v19, %v4474_v30  ;;  %v8500_v44 = vld [vmem:[#allocation121_spill] sm:$0xff]  ;;  %v8503_v3 = vld [vmem:[#allocation123_spill] sm:$0xff] }
 0x4fd   :  { %v5140_v33 = vsel %vm1851_vm3, %v8495_v29, 0.0  ;;  %v8501_v8 = vsub.f32 %v8500_v44, %v4474_v30  ;;  %v8504_v53 = vsub.f32 %v8503_v3, %v4474_v30 }
 0x4fe   :  { %8496 = vst [vmem:[#allocation56_spill] sm:$0xff] %v5140_v33  ;;  %v5147_v35 = vsel %vm1848_vm2, %v8498_v28, 0.0  ;;  %v8506_v33 = vld [vmem:[#allocation125_spill] sm:$0xff] }
 0x4ff   :  { %8499 = vst [vmem:[#allocation57_spill] sm:$0xff] %v5147_v35  ;;  %v5154_v58 = vsel %vm1851_vm3, %v8501_v8, 0.0  ;;  %v5161_v29 = vsel %vm1848_vm2, %v8504_v53, 0.0  ;;  %v8507_v19 = vsub.f32 %v8506_v33, %v4474_v30  ;;  %v8509_v35 = vld [vmem:[#allocation127_spill] sm:$0xff] }
 0x500   :  { %8502 = vst [vmem:[#allocation59_spill] sm:$0xff] %v5154_v58  ;;  %8505 = vst [vmem:[#allocation61_spill] sm:$0xff] %v5161_v29  ;;  %v8510_v44 = vsub.f32 %v8509_v35, %v4474_v30  ;;  %v8512_v58 = vld [vmem:[#allocation129_spill] sm:$0xff]  ;;  %v8515_v29 = vld [vmem:[#allocation131_spill] sm:$0xff] }
 0x501   :  { %v5168_v28 = vsel %vm1851_vm3, %v8507_v19, 0.0  ;;  %v8513_v3 = vsub.f32 %v8512_v58, %v4474_v30  ;;  %v8516_v33 = vsub.f32 %v8515_v29, %v4474_v30 }
 0x502   :  { %8508 = vst [vmem:[#allocation63_spill] sm:$0xff] %v5168_v28  ;;  %v5175_v8 = vsel %vm1848_vm2, %v8510_v44, 0.0  ;;  %v8518_v28 = vld [vmem:[#allocation133_spill] sm:$0xff] }
 0x503   :  { %8511 = vst [vmem:[#allocation65_spill] sm:$0xff] %v5175_v8  ;;  %v5182_v53 = vsel %vm1851_vm3, %v8513_v3, 0.0  ;;  %v5189_v19 = vsel %vm1848_vm2, %v8516_v33, 0.0  ;;  %v8519_v35 = vsub.f32 %v8518_v28, %v4474_v30  ;;  %v8521_v8 = vld [vmem:[#allocation135_spill] sm:$0xff] }
 0x504   :  { %8514 = vst [vmem:[#allocation67_spill] sm:$0xff] %v5182_v53  ;;  %8517 = vst [vmem:[#allocation68_spill] sm:$0xff] %v5189_v19  ;;  %v8522_v58 = vsub.f32 %v8521_v8, %v4474_v30  ;;  %v8524_v53 = vld [vmem:[#allocation137_spill] sm:$0xff]  ;;  %v8527_v19 = vld [vmem:[#allocation139_spill] sm:$0xff] }
 0x505   :  { %v5196_v44 = vsel %vm1851_vm3, %v8519_v35, 0.0  ;;  %v8525_v29 = vsub.f32 %v8524_v53, %v4474_v30  ;;  %v8528_v28 = vsub.f32 %v8527_v19, %v4474_v30 }
 0x506   :  { %8520 = vst [vmem:[#allocation70_spill] sm:$0xff] %v5196_v44  ;;  %v5203_v3 = vsel %vm1848_vm2, %v8522_v58, 0.0  ;;  %v8530_v44 = vld [vmem:[#allocation141_spill] sm:$0xff] }
 0x507   :  { %8523 = vst [vmem:[#allocation71_spill] sm:$0xff] %v5203_v3  ;;  %v5210_v33 = vsel %vm1851_vm3, %v8525_v29, 0.0  ;;  %v5217_v35 = vsel %vm1848_vm2, %v8528_v28, 0.0  ;;  %v8531_v8 = vsub.f32 %v8530_v44, %v4474_v30  ;;  %v8533_v3 = vld [vmem:[#allocation142_spill] sm:$0xff] }
 0x508   :  { %8526 = vst [vmem:[#allocation73_spill] sm:$0xff] %v5210_v33  ;;  %8529 = vst [vmem:[#allocation74_spill] sm:$0xff] %v5217_v35  ;;  %v8534_v53 = vsub.f32 %v8533_v3, %v4474_v30  ;;  %v8536_v33 = vld [vmem:[#allocation143_spill] sm:$0xff]  ;;  %v8539_v35 = vld [vmem:[#allocation145_spill] sm:$0xff] }
 0x509   :  { %v5224_v58 = vsel %vm1851_vm3, %v8531_v8, 0.0  ;;  %v8537_v19 = vsub.f32 %v8536_v33, %v4474_v30  ;;  %v8540_v44 = vsub.f32 %v8539_v35, %v4474_v30 }
 0x50a   :  { %8532 = vst [vmem:[#allocation76_spill] sm:$0xff] %v5224_v58  ;;  %v5231_v29 = vsel %vm1848_vm2, %v8534_v53, 0.0  ;;  %v8542_v58 = vld [vmem:[#allocation147_spill] sm:$0xff] }
 0x50b   :  { %8535 = vst [vmem:[#allocation77_spill] sm:$0xff] %v5231_v29  ;;  %v5238_v28 = vsel %vm1851_vm3, %v8537_v19, 0.0  ;;  %v5245_v8 = vsel %vm1848_vm2, %v8540_v44, 0.0  ;;  %v8543_v3 = vsub.f32 %v8542_v58, %v4474_v30  ;;  %v8545_v29 = vld [vmem:[#allocation149_spill] sm:$0xff]  ;;  %8662 = vst [vmem:[#allocation147_spill] sm:$0xff] %v5547_v15  ;;  %v8672_v15 = vld [vmem:[#allocation152_spill] sm:$0xff] }
 0x50c   :  { %8538 = vst [vmem:[#allocation79_spill] sm:$0xff] %v5238_v28  ;;  %8541 = vst [vmem:[#allocation81_spill] sm:$0xff] %v5245_v8  ;;  %v8546_v33 = vsub.f32 %v8545_v29, %v4474_v30  ;;  %v8548_v28 = vld [vmem:[#allocation151_spill] sm:$0xff]  ;;  %v8551_v8 = vld [vmem:[#allocation153_spill] sm:$0xff] }
 0x50d   :  { %v5252_v53 = vsel %vm1851_vm3, %v8543_v3, 0.0  ;;  %v8549_v35 = vsub.f32 %v8548_v28, %v4474_v30  ;;  %v8552_v58 = vsub.f32 %v8551_v8, %v4474_v30 }
 0x50e   :  { %8544 = vst [vmem:[#allocation83_spill] sm:$0xff] %v5252_v53  ;;  %v5259_v19 = vsel %vm1848_vm2, %v8546_v33, 0.0  ;;  %v8554_v53 = vld [vmem:[#allocation155_spill] sm:$0xff] }
 0x50f   :  { %8547 = vst [vmem:[#allocation85_spill] sm:$0xff] %v5259_v19  ;;  %v5266_v44 = vsel %vm1851_vm3, %v8549_v35, 0.0  ;;  %v5273_v3 = vsel %vm1848_vm2, %v8552_v58, 0.0  ;;  %v8555_v29 = vsub.f32 %v8554_v53, %v4474_v30  ;;  %v8557_v19 = vld [vmem:[#allocation157_spill] sm:$0xff] }
 0x510   :  { %8550 = vst [vmem:[#allocation87_spill] sm:$0xff] %v5266_v44  ;;  %8553 = vst [vmem:[#allocation89_spill] sm:$0xff] %v5273_v3  ;;  %v8558_v28 = vsub.f32 %v8557_v19, %v4474_v30  ;;  %v8560_v44 = vld [vmem:[#allocation159_spill] sm:$0xff]  ;;  %v8563_v3 = vld [vmem:[#allocation161_spill] sm:$0xff] }
 0x511   :  { %v5280_v33 = vsel %vm1851_vm3, %v8555_v29, 0.0  ;;  %v8561_v8 = vsub.f32 %v8560_v44, %v4474_v30  ;;  %v8564_v53 = vsub.f32 %v8563_v3, %v4474_v30 }
 0x512   :  { %8556 = vst [vmem:[#allocation91_spill] sm:$0xff] %v5280_v33  ;;  %v5287_v35 = vsel %vm1848_vm2, %v8558_v28, 0.0  ;;  %v8566_v33 = vld [vmem:[#allocation163_spill] sm:$0xff] }
 0x513   :  { %8559 = vst [vmem:[#allocation93_spill] sm:$0xff] %v5287_v35  ;;  %v5294_v58 = vsel %vm1851_vm3, %v8561_v8, 0.0  ;;  %v5301_v29 = vsel %vm1848_vm2, %v8564_v53, 0.0  ;;  %v8567_v19 = vsub.f32 %v8566_v33, %v4474_v30  ;;  %v8569_v35 = vld [vmem:[#allocation165_spill] sm:$0xff] }
 0x514   :  { %8562 = vst [vmem:[#allocation95_spill] sm:$0xff] %v5294_v58  ;;  %8565 = vst [vmem:[#allocation97_spill] sm:$0xff] %v5301_v29  ;;  %v8570_v44 = vsub.f32 %v8569_v35, %v4474_v30  ;;  %v8572_v58 = vld [vmem:[#allocation167_spill] sm:$0xff]  ;;  %v8575_v29 = vld [vmem:[#allocation169_spill] sm:$0xff] }
 0x515   :  { %v5308_v28 = vsel %vm1851_vm3, %v8567_v19, 0.0  ;;  %v8573_v3 = vsub.f32 %v8572_v58, %v4474_v30  ;;  %v8576_v33 = vsub.f32 %v8575_v29, %v4474_v30 }
 0x516   :  { %8568 = vst [vmem:[#allocation99_spill] sm:$0xff] %v5308_v28  ;;  %v5315_v8 = vsel %vm1848_vm2, %v8570_v44, 0.0  ;;  %v8578_v28 = vld [vmem:[#allocation171_spill] sm:$0xff] }
 0x517   :  { %8571 = vst [vmem:[#allocation101_spill] sm:$0xff] %v5315_v8  ;;  %v5322_v53 = vsel %vm1851_vm3, %v8573_v3, 0.0  ;;  %v5329_v19 = vsel %vm1848_vm2, %v8576_v33, 0.0  ;;  %v8579_v35 = vsub.f32 %v8578_v28, %v4474_v30  ;;  %v8581_v8 = vld [vmem:[#allocation173_spill] sm:$0xff] }
 0x518   :  { %8574 = vst [vmem:[#allocation103_spill] sm:$0xff] %v5322_v53  ;;  %8577 = vst [vmem:[#allocation105_spill] sm:$0xff] %v5329_v19  ;;  %v8582_v58 = vsub.f32 %v8581_v8, %v4474_v30  ;;  %v8584_v53 = vld [vmem:[#allocation175_spill] sm:$0xff]  ;;  %v8587_v19 = vld [vmem:[#allocation177_spill] sm:$0xff] }
 0x519   :  { %v5336_v44 = vsel %vm1851_vm3, %v8579_v35, 0.0  ;;  %v8585_v29 = vsub.f32 %v8584_v53, %v4474_v30  ;;  %v8588_v28 = vsub.f32 %v8587_v19, %v4474_v30  ;;  %v8593_v53 = vsub.f32 %v8319_v14, %v4474_v30 }
 0x51a   :  { %8580 = vst [vmem:[#allocation107_spill] sm:$0xff] %v5336_v44  ;;  %v5343_v3 = vsel %vm1848_vm2, %v8582_v58, 0.0  ;;  %v8590_v44 = vld [vmem:[#allocation179_spill] sm:$0xff] }
 0x51b   :  { %8583 = vst [vmem:[#allocation109_spill] sm:$0xff] %v5343_v3  ;;  %v5350_v33 = vsel %vm1851_vm3, %v8585_v29, 0.0  ;;  %v5357_v35 = vsel %vm1848_vm2, %v8588_v28, 0.0  ;;  %v8591_v8 = vsub.f32 %v8590_v44, %v4474_v30  ;;  %v5371_v29 = vsel %vm1848_vm2, %v8593_v53, 0.0  ;;  %v8595_v3 = vld [vmem:[#allocation183_spill] sm:$0xff] }
 0x51c   :  { %8586 = vst [vmem:[#allocation111_spill] sm:$0xff] %v5350_v33  ;;  %8589 = vst [vmem:[#allocation113_spill] sm:$0xff] %v5357_v35  ;;  %v8596_v19 = vsub.f32 %v8595_v3, %v4474_v30  ;;  %v8598_v44 = vsub.f32 %v8321_v20, %v4474_v30  ;;  %v8600_v35 = vld [vmem:[#allocation60_spill] sm:$0xff]  ;;  %v8603_v3 = vsub.f32 %v8323_v47, %v4474_v30 }
 0x51d   :  { %v5364_v58 = vsel %vm1851_vm3, %v8591_v8, 0.0  ;;  %8594 = vst [vmem:[#allocation117_spill] sm:$0xff] %v5371_v29  ;;  %v8601_v14 = vsub.f32 %v8600_v35, %v4474_v30  ;;  %v8605_v29 = vld [vmem:[#allocation64_spill] sm:$0xff]  ;;  %v8608_v35 = vsub.f32 %v8325_v56, %v4474_v30  ;;  %v8610_v47 = vsub.f32 %v3769_v24, %v4474_v30 }
 0x51e   :  { %8592 = vst [vmem:[#allocation115_spill] sm:$0xff] %v5364_v58  ;;  %v5378_v28 = vsel %vm1851_vm3, %v8596_v19, 0.0  ;;  %v5385_v8 = vsel %vm1848_vm2, %v8598_v44, 0.0  ;;  %v5399_v19 = vsel %vm1848_vm2, %v8603_v3, 0.0  ;;  %v8606_v20 = vsub.f32 %v8605_v29, %v4474_v30 }
 0x51f   :  { %8597 = vst [vmem:[#allocation119_spill] sm:$0xff] %v5378_v28  ;;  %8599 = vst [vmem:[#allocation121_spill] sm:$0xff] %v5385_v8  ;;  %v5392_v53 = vsel %vm1851_vm3, %v8601_v14, 0.0  ;;  %v5413_v14 = vsel %vm1848_vm2, %v8608_v35, 0.0  ;;  %v5420_v3 = vsel %vm1851_vm3, %v8610_v47, 0.0  ;;  %v8612_v29 = vsub.f32 %v8326_v60, %v4474_v30  ;;  %v8654_v8 = vld [vmem:[#allocation252_spill] sm:$0xff] }
 0x520   :  { %8602 = vst [vmem:[#allocation123_spill] sm:$0xff] %v5392_v53  ;;  %8604 = vst [vmem:[#allocation125_spill] sm:$0xff] %v5399_v19  ;;  %v5406_v44 = vsel %vm1851_vm3, %v8606_v20, 0.0  ;;  %v8614_v56 = vsub.f32 %v3780_v43, %v4474_v30  ;;  %v8616_v24 = vsub.f32 %v8327_v59, %v4474_v30  ;;  %v8618_v60 = vsub.f32 %v3792_v52, %v4474_v30  ;;  %v8624_v52 = vld [vmem:[#allocation222_spill] sm:$0xff]  ;;  %v8638_v19 = vld [vmem:[#allocation236_spill] sm:$0xff] }
 0x521   :  { %8607 = vst [vmem:[#allocation127_spill] sm:$0xff] %v5406_v44  ;;  %8609 = vst [vmem:[#allocation129_spill] sm:$0xff] %v5413_v14  ;;  %v5427_v20 = vsel %vm1848_vm2, %v8612_v29, 0.0  ;;  %v8620_v43 = vsub.f32 %v8328_v46, %v4474_v30  ;;  %v8622_v59 = vsub.f32 %v3803_v17, %v4474_v30  ;;  %v8629_v17 = vld [vmem:[#allocation227_spill] sm:$0xff]  ;;  %v8635_v14 = vld [vmem:[#allocation233_spill] sm:$0xff]  ;;  %v8656_v28 = vsub.f32 %v3991_v25, %v4474_v30 }
 0x522   :  { %8611 = vst [vmem:[#allocation131_spill] sm:$0xff] %v5420_v3  ;;  %8613 = vst [vmem:[#allocation133_spill] sm:$0xff] %v5427_v20  ;;  %v5434_v35 = vsel %vm1851_vm3, %v8614_v56, 0.0  ;;  %v5441_v47 = vsel %vm1848_vm2, %v8616_v24, 0.0  ;;  %v5448_v29 = vsel %vm1851_vm3, %v8618_v60, 0.0  ;;  %v8625_v60 = vld [vmem:[#allocation223_spill] sm:$0xff]  ;;  %v8658_v33 = vsub.f32 %v3997_v63, %v4474_v30 }
 0x523   :  { %8615 = vst [vmem:[#allocation135_spill] sm:$0xff] %v5434_v35  ;;  %8617 = vst [vmem:[#allocation137_spill] sm:$0xff] %v5441_v47  ;;  %v5455_v56 = vsel %vm1848_vm2, %v8620_v43, 0.0  ;;  %v5462_v24 = vsel %vm1851_vm3, %v8622_v59, 0.0  ;;  %v8626_v20 = vld [vmem:[#allocation224_spill] sm:$0xff]  ;;  %v8627_v35 = vld [vmem:[#allocation225_spill] sm:$0xff] }
 0x524   :  { %8619 = vst [vmem:[#allocation139_spill] sm:$0xff] %v5448_v29  ;;  %8621 = vst [vmem:[#allocation141_spill] sm:$0xff] %v5455_v56  ;;  %v8628_v56 = vld [vmem:[#allocation226_spill] sm:$0xff]  ;;  %v8630_v59 = vld [vmem:[#allocation228_spill] sm:$0xff]  ;;  %v5533_v58 = vsel %vm1848_vm2, %v8656_v28, 0.0  ;;  %v5540_v12 = vsel %vm1851_vm3, %v8658_v33, 0.0 }
 0x525   :  { %8623 = vst [vmem:[#allocation142_spill] sm:$0xff] %v5462_v24  ;;  %v8631_v47 = vld [vmem:[#allocation229_spill] sm:$0xff]  ;;  %v8632_v29 = vld [vmem:[#allocation230_spill] sm:$0xff]  ;;  %v8633_v46 = vld [vmem:[#allocation231_spill] sm:$0xff] }
 0x526   :  { %v8634_v43 = vld [vmem:[#allocation232_spill] sm:$0xff]  ;;  %v8636_v3 = vld [vmem:[#allocation234_spill] sm:$0xff]  ;;  %v8637_v24 = vld [vmem:[#allocation235_spill] sm:$0xff]  ;;  %8657 = vst [vmem:[#allocation143_spill] sm:$0xff] %v5533_v58 }
 0x527   :  { %v8653_v44 = vld [vmem:[#allocation251_spill] sm:$0xff]  ;;  %8659 = vst [vmem:[#allocation145_spill] sm:$0xff] %v5540_v12  ;;  %v8663_v53 = vld [vmem:[#allocation146_spill] sm:$0xff]  ;;  %v8666_v58 = vld [vmem:[#allocation148_spill] sm:$0xff] }
 0x528   :  { %v8664_v25 = vsub.f32 %v8663_v53, %v4474_v30  ;;  %v8667_v63 = vsub.f32 %v8666_v58, %v4474_v30  ;;  %v8669_v12 = vld [vmem:[#allocation150_spill] sm:$0xff]  ;;  %v8673_v53 = vsub.f32 %v8672_v15, %v4474_v30 }
 0x529   :  { %v8670_v38 = vsub.f32 %v8669_v12, %v4474_v30 }
 0x52a   :  { %v5554_v28 = vsel %vm1851_vm3, %v8664_v25, 0.0  ;;  %v5561_v33 = vsel %vm1848_vm2, %v8667_v63, 0.0  ;;  %v5575_v25 = vsel %vm1848_vm2, %v8673_v53, 0.0 }
 0x52b   :  { %8665 = vst [vmem:[#allocation149_spill] sm:$0xff] %v5554_v28  ;;  %8668 = vst [vmem:[#allocation151_spill] sm:$0xff] %v5561_v33  ;;  %v5568_v18 = vsel %vm1851_vm3, %v8670_v38, 0.0  ;;  %v8675_v28 = vld [vmem:[#allocation154_spill] sm:$0xff]  ;;  %v8677_v33 = vld [vmem:[#allocation156_spill] sm:$0xff] }
 0x52c   :  { %8671 = vst [vmem:[#allocation153_spill] sm:$0xff] %v5568_v18  ;;  %8674 = vst [vmem:[#allocation155_spill] sm:$0xff] %v5575_v25  ;;  %v8676_v58 = vsub.f32 %v8675_v28, %v4474_v30  ;;  %v8678_v12 = vsub.f32 %v8677_v33, %v4474_v30  ;;  %v8679_v18 = vld [vmem:[#allocation158_spill] sm:$0xff]  ;;  %v8681_v28 = vsub.f32 %v8330_v0, %v4474_v30 }
 0x52d   :  { %v8680_v15 = vsub.f32 %v8679_v18, %v4474_v30  ;;  %v8683_v25 = vld [vmem:[#allocation162_spill] sm:$0xff]  ;;  %v8685_v18 = vsub.f32 %v8332_v26, %v4474_v30  ;;  %v8687_v0 = vsub.f32 %v8333_v4, %v4474_v30  ;;  %v9072_v45 = vld [vmem:[#allocation143_spill] sm:$0xff] }
 0x52e   :  { %v5582_v63 = vsel %vm1851_vm3, %v8676_v58, 0.0  ;;  %v5589_v38 = vsel %vm1848_vm2, %v8678_v12, 0.0  ;;  %v5603_v58 = vsel %vm1848_vm2, %v8681_v28, 0.0  ;;  %v8684_v33 = vsub.f32 %v8683_v25, %v4474_v30 }
 0x52f   :  { %v5596_v53 = vsel %vm1851_vm3, %v8680_v15, 0.0  ;;  %8682 = vst [vmem:[#allocation157_spill] sm:$0xff] %v5603_v58  ;;  %v5617_v15 = vsel %vm1848_vm2, %v8685_v18, 0.0  ;;  %v5624_v28 = vsel %vm1851_vm3, %v8687_v0, 0.0  ;;  %v8689_v25 = vsub.f32 %v8334_v2, %v4474_v30  ;;  %v8691_v58 = vld [vmem:[#allocation170_spill] sm:$0xff] }
 0x530   :  { %v5610_v12 = vsel %vm1851_vm3, %v8684_v33, 0.0  ;;  %8686 = vst [vmem:[#allocation159_spill] sm:$0xff] %v5617_v15  ;;  %8688 = vst [vmem:[#allocation161_spill] sm:$0xff] %v5624_v28  ;;  %v8692_v26 = vsub.f32 %v8691_v58, %v4474_v30  ;;  %v8694_v15 = vld [vmem:[#allocation172_spill] sm:$0xff]  ;;  %v8697_v28 = vld [vmem:[#allocation174_spill] sm:$0xff] }
 0x531   :  { %v5631_v33 = vsel %vm1848_vm2, %v8689_v25, 0.0  ;;  %v8695_v4 = vsub.f32 %v8694_v15, %v4474_v30  ;;  %v8698_v2 = vsub.f32 %v8697_v28, %v4474_v30  ;;  %v8704_v28 = vsub.f32 %v8338_v42, %v4474_v30 }
 0x532   :  { %8690 = vst [vmem:[#allocation163_spill] sm:$0xff] %v5631_v33  ;;  %v5638_v18 = vsel %vm1851_vm3, %v8692_v26, 0.0  ;;  %v8699_v33 = vld [vmem:[#allocation176_spill] sm:$0xff] }
 0x533   :  { %8693 = vst [vmem:[#allocation165_spill] sm:$0xff] %v5638_v18  ;;  %v5645_v0 = vsel %vm1848_vm2, %v8695_v4, 0.0  ;;  %v5652_v25 = vsel %vm1851_vm3, %v8698_v2, 0.0  ;;  %v8700_v58 = vsub.f32 %v8699_v33, %v4474_v30  ;;  %v8702_v18 = vld [vmem:[#allocation178_spill] sm:$0xff]  ;;  %v5673_v2 = vsel %vm1848_vm2, %v8704_v28, 0.0 }
 0x534   :  { %8696 = vst [vmem:[#allocation167_spill] sm:$0xff] %v5645_v0  ;;  %v8703_v15 = vsub.f32 %v8702_v18, %v4474_v30  ;;  %8705 = vst [vmem:[#allocation171_spill] sm:$0xff] %v5673_v2  ;;  %v8706_v0 = vld [vmem:[#allocation182_spill] sm:$0xff]  ;;  %v8708_v18 = vsub.f32 %v8340_v5, %v4474_v30  ;;  %v8714_v2 = vld [vmem:[#allocation187_spill] sm:$0xff] }
 0x535   :  { %v5659_v26 = vsel %vm1848_vm2, %v8700_v58, 0.0  ;;  %v8707_v33 = vsub.f32 %v8706_v0, %v4474_v30  ;;  %v8712_v0 = vsub.f32 %v8341_v48, %v4474_v30  ;;  %v8715_v5 = vsub.f32 %v8714_v2, %v4474_v30 }
 0x536   :  { %8701 = vst [vmem:[#allocation169_spill] sm:$0xff] %v5659_v26  ;;  %v5666_v4 = vsel %vm1851_vm3, %v8703_v15, 0.0  ;;  %v5687_v15 = vsel %vm1848_vm2, %v8708_v18, 0.0  ;;  %v8710_v26 = vld [vmem:[#allocation185_spill] sm:$0xff]  ;;  %v8720_v2 = vsub.f32 %v8343_v27, %v4474_v30 }
 0x537   :  { %v5680_v58 = vsel %vm1851_vm3, %v8707_v33, 0.0  ;;  %8709 = vst [vmem:[#allocation173_spill] sm:$0xff] %v5687_v15  ;;  %v8711_v42 = vsub.f32 %v8710_v26, %v4474_v30  ;;  %v5701_v33 = vsel %vm1848_vm2, %v8712_v0, 0.0  ;;  %v5708_v18 = vsel %vm1851_vm3, %v8715_v5, 0.0  ;;  %v8718_v15 = vld [vmem:[#allocation189_spill] sm:$0xff] }
 0x538   :  { %8713 = vst [vmem:[#allocation175_spill] sm:$0xff] %v5701_v33  ;;  %v8716_v26 = vsub.f32 %v8342_v16, %v4474_v30  ;;  %v8719_v48 = vsub.f32 %v8718_v15, %v4474_v30  ;;  %v5729_v5 = vsel %vm1848_vm2, %v8720_v2, 0.0  ;;  %v8722_v33 = vld [vmem:[#allocation191_spill] sm:$0xff]  ;;  %v8724_v15 = vsub.f32 %v8344_v49, %v4474_v30 }
 0x539   :  { %v5694_v28 = vsel %vm1851_vm3, %v8711_v42, 0.0  ;;  %8721 = vst [vmem:[#allocation179_spill] sm:$0xff] %v5729_v5  ;;  %v8723_v16 = vsub.f32 %v8722_v33, %v4474_v30  ;;  %v8728_v33 = vsub.f32 %v8345_v32, %v4474_v30  ;;  %v8730_v5 = vld [vmem:[#allocation195_spill] sm:$0xff] }
 0x53a   :  { %v5715_v42 = vsel %vm1848_vm2, %v8716_v26, 0.0  ;;  %v5722_v0 = vsel %vm1851_vm3, %v8719_v48, 0.0  ;;  %v5743_v48 = vsel %vm1848_vm2, %v8724_v15, 0.0  ;;  %v8731_v49 = vsub.f32 %v8730_v5, %v4474_v30 }
 0x53b   :  { %8717 = vst [vmem:[#allocation177_spill] sm:$0xff] %v5715_v42  ;;  %v5736_v26 = vsel %vm1851_vm3, %v8723_v16, 0.0  ;;  %8725 = vst [vmem:[#allocation183_spill] sm:$0xff] %v5743_v48  ;;  %v8726_v42 = vld [vmem:[#allocation193_spill] sm:$0xff]  ;;  %v5757_v16 = vsel %vm1848_vm2, %v8728_v33, 0.0  ;;  %v8736_v5 = vsub.f32 %v8347_v40, %v4474_v30 }
 0x53c   :  { %v8727_v27 = vsub.f32 %v8726_v42, %v4474_v30  ;;  %8729 = vst [vmem:[#allocation60_spill] sm:$0xff] %v5757_v16  ;;  %v5764_v15 = vsel %vm1851_vm3, %v8731_v49, 0.0  ;;  %v8732_v42 = vsub.f32 %v8346_v37, %v4474_v30  ;;  %v8734_v48 = vld [vmem:[#allocation197_spill] sm:$0xff]  ;;  %v8738_v16 = vld [vmem:[#allocation199_spill] sm:$0xff] }
 0x53d   :  { %v8735_v32 = vsub.f32 %v8734_v48, %v4474_v30  ;;  %v5785_v49 = vsel %vm1848_vm2, %v8736_v5, 0.0  ;;  %v8739_v37 = vsub.f32 %v8738_v16, %v4474_v30  ;;  %v8740_v48 = vsub.f32 %v8348_v55, %v4474_v30 }
 0x53e   :  { %v5750_v2 = vsel %vm1851_vm3, %v8727_v27, 0.0  ;;  %v5771_v27 = vsel %vm1848_vm2, %v8732_v42, 0.0  ;;  %8737 = vst [vmem:[#allocation222_spill] sm:$0xff] %v5785_v49  ;;  %v8744_v16 = vsub.f32 %v8349_v54, %v4474_v30  ;;  %v8746_v49 = vld [vmem:[#allocation203_spill] sm:$0xff] }
 0x53f   :  { %8733 = vst [vmem:[#allocation64_spill] sm:$0xff] %v5771_v27  ;;  %v5778_v33 = vsel %vm1851_vm3, %v8735_v32, 0.0  ;;  %v5792_v42 = vsel %vm1851_vm3, %v8739_v37, 0.0  ;;  %v5799_v32 = vsel %vm1848_vm2, %v8740_v48, 0.0  ;;  %v8742_v27 = vld [vmem:[#allocation201_spill] sm:$0xff]  ;;  %v8747_v55 = vsub.f32 %v8746_v49, %v4474_v30 }
 0x540   :  { %8741 = vst [vmem:[#allocation223_spill] sm:$0xff] %v5799_v32  ;;  %v8743_v40 = vsub.f32 %v8742_v27, %v4474_v30  ;;  %v5813_v37 = vsel %vm1848_vm2, %v8744_v16, 0.0  ;;  %v8748_v27 = vsub.f32 %v8350_v1, %v4474_v30  ;;  %v8750_v32 = vld [vmem:[#allocation205_spill] sm:$0xff]  ;;  %v8752_v49 = vsub.f32 %v8351_v7, %v4474_v30 }
 0x541   :  { %8745 = vst [vmem:[#allocation224_spill] sm:$0xff] %v5813_v37  ;;  %v5820_v48 = vsel %vm1851_vm3, %v8747_v55, 0.0  ;;  %v8751_v54 = vsub.f32 %v8750_v32, %v4474_v30  ;;  %v8754_v37 = vld [vmem:[#allocation207_spill] sm:$0xff]  ;;  %v8756_v32 = vsub.f32 %v8352_v57, %v4474_v30 }
 0x542   :  { %v5806_v5 = vsel %vm1851_vm3, %v8743_v40, 0.0  ;;  %v5827_v40 = vsel %vm1848_vm2, %v8748_v27, 0.0  ;;  %v5841_v55 = vsel %vm1848_vm2, %v8752_v49, 0.0  ;;  %v8755_v1 = vsub.f32 %v8754_v37, %v4474_v30 }
 0x543   :  { %8749 = vst [vmem:[#allocation225_spill] sm:$0xff] %v5827_v40  ;;  %v5834_v16 = vsel %vm1851_vm3, %v8751_v54, 0.0  ;;  %8753 = vst [vmem:[#allocation226_spill] sm:$0xff] %v5841_v55  ;;  %v5855_v54 = vsel %vm1848_vm2, %v8756_v32, 0.0  ;;  %v8758_v40 = vld [vmem:[#allocation209_spill] sm:$0xff]  ;;  %v8760_v37 = vsub.f32 %v8353_v51, %v4474_v30  ;;  %v8762_v55 = vld [vmem:[#allocation211_spill] sm:$0xff] }
 0x544   :  { %v5848_v27 = vsel %vm1851_vm3, %v8755_v1, 0.0  ;;  %8757 = vst [vmem:[#allocation227_spill] sm:$0xff] %v5855_v54  ;;  %v8759_v7 = vsub.f32 %v8758_v40, %v4474_v30  ;;  %v8763_v57 = vsub.f32 %v8762_v55, %v4474_v30  ;;  %v8764_v40 = vsub.f32 %v8354_v61, %v4474_v30  ;;  %v8766_v54 = vld [vmem:[#allocation213_spill] sm:$0xff] }
 0x545   :  { %v5869_v1 = vsel %vm1848_vm2, %v8760_v37, 0.0  ;;  %v8767_v51 = vsub.f32 %v8766_v54, %v4474_v30  ;;  %v8768_v55 = vsub.f32 %v8355_v13, %v4474_v30  ;;  %v8771_v54 = vsub.f32 %v8356_v36, %v4474_v30 }
 0x546   :  { %v5862_v49 = vsel %vm1851_vm3, %v8759_v7, 0.0  ;;  %8761 = vst [vmem:[#allocation228_spill] sm:$0xff] %v5869_v1  ;;  %v5876_v32 = vsel %vm1851_vm3, %v8763_v57, 0.0  ;;  %v5883_v7 = vsel %vm1848_vm2, %v8764_v40, 0.0  ;;  %v8769_v1 = vld [vmem:[#allocation215_spill] sm:$0xff]  ;;  %v8775_v36 = vsub.f32 %v4277_v41, %v4474_v30 }
 0x547   :  { %8765 = vst [vmem:[#allocation229_spill] sm:$0xff] %v5883_v7  ;;  %v5890_v37 = vsel %vm1851_vm3, %v8767_v51, 0.0  ;;  %v5897_v57 = vsel %vm1848_vm2, %v8768_v55, 0.0  ;;  %v8770_v61 = vsub.f32 %v8769_v1, %v4474_v30  ;;  %v5911_v51 = vsel %vm1848_vm2, %v8771_v54, 0.0  ;;  %v8772_v7 = vld [vmem:[#allocation217_spill] sm:$0xff] }
 0x548   :  { %v8773_v13 = vsub.f32 %v8772_v7, %v4474_v30  ;;  %v8774_v1 = vsub.f32 %v8357_v11, %v4474_v30  ;;  %v5932_v54 = vsel %vm1851_vm3, %v8775_v36, 0.0  ;;  %v8776_v7 = vsub.f32 %v8358_v50, %v4474_v30 }
 0x549   :  { %v5904_v40 = vsel %vm1851_vm3, %v8770_v61, 0.0  ;;  %v8777_v11 = vsub.f32 %v4287_v23, %v4474_v30  ;;  %v8778_v41 = vsub.f32 %v8359_v39, %v4474_v30  ;;  %v8779_v50 = vsub.f32 %v4297_v21, %v4474_v30 }
 0x54a   :  { %v5918_v55 = vsel %vm1851_vm3, %v8773_v13, 0.0  ;;  %v5925_v61 = vsel %vm1848_vm2, %v8774_v1, 0.0  ;;  %v5939_v13 = vsel %vm1848_vm2, %v8776_v7, 0.0  ;;  %v8780_v23 = vsub.f32 %v8360_v9, %v4474_v30 }
 0x54b   :  { %v5946_v1 = vsel %vm1851_vm3, %v8777_v11, 0.0  ;;  %v5953_v36 = vsel %vm1848_vm2, %v8778_v41, 0.0  ;;  %v5960_v7 = vsel %vm1851_vm3, %v8779_v50, 0.0  ;;  %v8781_v39 = vsub.f32 %v4307_v22, %v4474_v30 }
 0x54c   :  { %v5967_v11 = vsel %vm1848_vm2, %v8780_v23, 0.0  ;;  %v8782_v21 = vsub.f32 %v8624_v52, %v4474_v30  ;;  %v8783_v9 = vsub.f32 %v8625_v60, %v4474_v30  ;;  %v8784_v22 = vsub.f32 %v8626_v20, %v4474_v30 }
 0x54d   :  { %v5974_v41 = vsel %vm1851_vm3, %v8781_v39, 0.0  ;;  %v8785_v52 = vsub.f32 %v8627_v35, %v4474_v30  ;;  %v8786_v60 = vsub.f32 %v8628_v56, %v4474_v30  ;;  %v8787_v20 = vsub.f32 %v8629_v17, %v4474_v30 }
 0x54e   :  { %v5981_v50 = vsel %vm1848_vm2, %v8782_v21, 0.0  ;;  %v5988_v23 = vsel %vm1851_vm3, %v8783_v9, 0.0  ;;  %v5995_v39 = vsel %vm1848_vm2, %v8784_v22, 0.0  ;;  %v8788_v35 = vsub.f32 %v8630_v59, %v4474_v30 }
 0x54f   :  { %v6002_v21 = vsel %vm1851_vm3, %v8785_v52, 0.0  ;;  %v6009_v9 = vsel %vm1848_vm2, %v8786_v60, 0.0  ;;  %v6016_v22 = vsel %vm1851_vm3, %v8787_v20, 0.0  ;;  %v8790_v56 = vsub.f32 %v8631_v47, %v4474_v30 }
 0x550   :  { %v6023_v52 = vsel %vm1848_vm2, %v8788_v35, 0.0  ;;  %v8792_v17 = vsub.f32 %v8632_v29, %v4474_v30  ;;  %v8794_v59 = vsub.f32 %v8633_v46, %v4474_v30  ;;  %v8796_v47 = vsub.f32 %v8634_v43, %v4474_v30 }
 0x551   :  { %8789 = vst [vmem:[#allocation230_spill] sm:$0xff] %v6023_v52  ;;  %v6030_v60 = vsel %vm1851_vm3, %v8790_v56, 0.0  ;;  %v8798_v29 = vsub.f32 %v8635_v14, %v4474_v30  ;;  %v8800_v46 = vsub.f32 %v8636_v3, %v4474_v30  ;;  %v8802_v43 = vsub.f32 %v8637_v24, %v4474_v30 }
 0x552   :  { %8791 = vst [vmem:[#allocation231_spill] sm:$0xff] %v6030_v60  ;;  %v6037_v20 = vsel %vm1848_vm2, %v8792_v17, 0.0  ;;  %v6044_v35 = vsel %vm1851_vm3, %v8794_v59, 0.0  ;;  %v6051_v56 = vsel %vm1848_vm2, %v8796_v47, 0.0  ;;  %v8804_v14 = vsub.f32 %v8638_v19, %v4474_v30  ;;  %v8916_v60 = vld [vmem:[#allocation43_spill] sm:$0xff] }
 0x553   :  { %8793 = vst [vmem:[#allocation232_spill] sm:$0xff] %v6037_v20  ;;  %8795 = vst [vmem:[#allocation233_spill] sm:$0xff] %v6044_v35  ;;  %v6058_v17 = vsel %vm1851_vm3, %v8798_v29, 0.0  ;;  %v6065_v59 = vsel %vm1848_vm2, %v8800_v46, 0.0  ;;  %v6072_v47 = vsel %vm1851_vm3, %v8802_v43, 0.0 }
 0x554   :  { %8797 = vst [vmem:[#allocation234_spill] sm:$0xff] %v6051_v56  ;;  %8799 = vst [vmem:[#allocation235_spill] sm:$0xff] %v6058_v17  ;;  %v6079_v29 = vsel %vm1848_vm2, %v8804_v14, 0.0  ;;  %v8806_v56 = vld [vmem:[#allocation237_spill] sm:$0xff] }
 0x555   :  { %8801 = vst [vmem:[#allocation236_spill] sm:$0xff] %v6065_v59  ;;  %8803 = vst [vmem:[#allocation247_spill] sm:$0xff] %v6072_v47  ;;  %v8807_v3 = vsub.f32 %v8806_v56, %v4474_v30  ;;  %v8809_v59 = vld [vmem:[#allocation238_spill] sm:$0xff]  ;;  %v8812_v47 = vld [vmem:[#allocation239_spill] sm:$0xff] }
 0x556   :  { %8805 = vst [vmem:[#allocation248_spill] sm:$0xff] %v6079_v29  ;;  %v8810_v24 = vsub.f32 %v8809_v59, %v4474_v30  ;;  %v8813_v19 = vsub.f32 %v8812_v47, %v4474_v30  ;;  %v8815_v29 = vld [vmem:[#allocation240_spill] sm:$0xff] }
 0x557   :  { %v6086_v46 = vsel %vm1851_vm3, %v8807_v3, 0.0  ;;  %v8816_v56 = vsub.f32 %v8815_v29, %v4474_v30 }
 0x558   :  { %8808 = vst [vmem:[#allocation249_spill] sm:$0xff] %v6086_v46  ;;  %v6093_v43 = vsel %vm1848_vm2, %v8810_v24, 0.0  ;;  %v6100_v14 = vsel %vm1851_vm3, %v8813_v19, 0.0  ;;  %v8818_v46 = vld [vmem:[#allocation241_spill] sm:$0xff] }
 0x559   :  { %8811 = vst [vmem:[#allocation250_spill] sm:$0xff] %v6093_v43  ;;  %8814 = vst [vmem:[#allocation251_spill] sm:$0xff] %v6100_v14  ;;  %v6107_v3 = vsel %vm1848_vm2, %v8816_v56, 0.0  ;;  %v8819_v59 = vsub.f32 %v8818_v46, %v4474_v30  ;;  %v8821_v43 = vld [vmem:[#allocation242_spill] sm:$0xff]  ;;  %v8824_v14 = vld [vmem:[#allocation243_spill] sm:$0xff] }
 0x55a   :  { %8817 = vst [vmem:[#allocation252_spill] sm:$0xff] %v6107_v3  ;;  %v8822_v47 = vsub.f32 %v8821_v43, %v4474_v30  ;;  %v8825_v29 = vsub.f32 %v8824_v14, %v4474_v30  ;;  %v8827_v3 = vld [vmem:[#allocation244_spill] sm:$0xff] }
 0x55b   :  { %v6114_v24 = vsel %vm1851_vm3, %v8819_v59, 0.0  ;;  %v8828_v46 = vsub.f32 %v8827_v3, %v4474_v30  ;;  %v8836_v3 = vsub.f32 %v8649_v10, %v4474_v30  ;;  %v8842_v10 = vsub.f32 %v8652_v6, %v4474_v30 }
 0x55c   :  { %8820 = vst [vmem:[#allocation144_spill] sm:$0xff] %v6114_v24  ;;  %v6121_v19 = vsel %vm1848_vm2, %v8822_v47, 0.0  ;;  %v6128_v56 = vsel %vm1851_vm3, %v8825_v29, 0.0  ;;  %v8830_v24 = vld [vmem:[#allocation245_spill] sm:$0xff] }
 0x55d   :  { %8823 = vst [vmem:[#allocation146_spill] sm:$0xff] %v6121_v19  ;;  %8826 = vst [vmem:[#allocation148_spill] sm:$0xff] %v6128_v56  ;;  %v6135_v59 = vsel %vm1848_vm2, %v8828_v46, 0.0  ;;  %v8831_v43 = vsub.f32 %v8830_v24, %v4474_v30  ;;  %v8833_v19 = vld [vmem:[#allocation246_spill] sm:$0xff]  ;;  %v6156_v46 = vsel %vm1851_vm3, %v8836_v3, 0.0  ;;  %v8838_v24 = vsub.f32 %v8650_v31, %v4474_v30 }
 0x55e   :  { %8829 = vst [vmem:[#allocation150_spill] sm:$0xff] %v6135_v59  ;;  %v8834_v14 = vsub.f32 %v8833_v19, %v4474_v30  ;;  %8837 = vst [vmem:[#allocation156_spill] sm:$0xff] %v6156_v46  ;;  %v8840_v19 = vsub.f32 %v8651_v34, %v4474_v30  ;;  %v6177_v3 = vsel %vm1848_vm2, %v8842_v10, 0.0  ;;  %v8844_v31 = vsub.f32 %v8653_v44, %v4474_v30  ;;  %v8851_v44 = vld [vmem:[#allocation9_spill] sm:$0xff] }
 0x55f   :  { %v6142_v47 = vsel %vm1851_vm3, %v8831_v43, 0.0  ;;  %v6163_v43 = vsel %vm1848_vm2, %v8838_v24, 0.0  ;;  %8843 = vst [vmem:[#allocation170_spill] sm:$0xff] %v6177_v3  ;;  %v8846_v34 = vsub.f32 %v8654_v8, %v4474_v30  ;;  %v6202_v3 = vsub.f32 %v8851_v44, %v4474_v30  ;;  %v8855_v8 = vld [vmem:[#allocation11_spill] sm:$0xff] }
 0x560   :  { %8832 = vst [vmem:[#allocation152_spill] sm:$0xff] %v6142_v47  ;;  %v6149_v29 = vsel %vm1848_vm2, %v8834_v14, 0.0  ;;  %8839 = vst [vmem:[#allocation158_spill] sm:$0xff] %v6163_v43  ;;  %v6170_v14 = vsel %vm1851_vm3, %v8840_v19, 0.0  ;;  %v6184_v24 = vsel %vm1851_vm3, %v8844_v31, 0.0  ;;  %v8848_v43 = vld [vmem:[#allocation253_spill] sm:$0xff] }
 0x561   :  { %8835 = vst [vmem:[#allocation154_spill] sm:$0xff] %v6149_v29  ;;  %8841 = vst [vmem:[#allocation162_spill] sm:$0xff] %v6170_v14  ;;  %v6191_v19 = vsel %vm1848_vm2, %v8846_v34, 0.0  ;;  %v8849_v6 = vsub.f32 %v8848_v43, %v4474_v30  ;;  %v8853_v31 = vld [vmem:[#allocation8_spill] sm:$0xff]  ;;  %v6210_v14 = vsub.f32 %v8855_v8, %v4474_v30  ;;  %v2111_v43 = vsel %vm1851_vm3, %v6202_v3, 0.0  ;;  %v8857_v34 = vld [vmem:[#allocation10_spill] sm:$0xff] }
 0x562   :  { %8845 = vst [vmem:[#allocation172_spill] sm:$0xff] %v6184_v24  ;;  %8847 = vst [vmem:[#allocation174_spill] sm:$0xff] %v6191_v19  ;;  %v6206_v24 = vsub.f32 %v8853_v31, %v4474_v30  ;;  %v2367_v19 = vmul.f32 %v2111_v43, %v2111_v43  ;;  %v8859_v31 = vld [vmem:[#allocation13_spill] sm:$0xff] }
 0x563   :  { %v6198_v10 = vsel %vm1851_vm3, %v8849_v6, 0.0  ;;  %8852 = vst [vmem:[#allocation178_spill] sm:$0xff] %v6202_v3  ;;  %8856 = vst [vmem:[#allocation185_spill] sm:$0xff] %v6210_v14  ;;  %v6217_v6 = vsub.f32 %v8857_v34, %v4474_v30  ;;  %v2113_v8 = vsel %vm1851_vm3, %v6210_v14, 0.0  ;;  %v8861_v3 = vld [vmem:[#allocation12_spill] sm:$0xff] }
 0x564   :  { %8850 = vst [vmem:[#allocation176_spill] sm:$0xff] %v6198_v10  ;;  %8854 = vst [vmem:[#allocation182_spill] sm:$0xff] %v6206_v24  ;;  %v2110_v44 = vsel %vm1848_vm2, %v6206_v24, 0.0  ;;  %v6224_v10 = vsub.f32 %v8859_v31, %v4474_v30  ;;  %v6231_v46 = vsub.f32 %v8861_v3, %v4474_v30  ;;  %v2369_v59 = vmul.f32 %v2113_v8, %v2113_v8  ;;  %v8863_v24 = vld [vmem:[#allocation15_spill] sm:$0xff]  ;;  %v8865_v3 = vld [vmem:[#allocation14_spill] sm:$0xff] }
 0x565   :  { %8858 = vst [vmem:[#allocation187_spill] sm:$0xff] %v6217_v6  ;;  %v2366_v29 = vmul.f32 %v2110_v44, %v2110_v44  ;;  %v2112_v34 = vsel %vm1848_vm2, %v6217_v6, 0.0  ;;  %v2622_v43 = vsel %vm1450_vm1, %v2367_v19, 0.0  ;;  %v6239_v31 = vsub.f32 %v8863_v24, %v4474_v30  ;;  %v8867_v24 = vld [vmem:[#allocation17_spill] sm:$0xff] }
 0x566   :  { %8860 = vst [vmem:[#allocation189_spill] sm:$0xff] %v6224_v10  ;;  %8862 = vst [vmem:[#allocation191_spill] sm:$0xff] %v6231_v46  ;;  %v2115_v14 = vsel %vm1851_vm3, %v6224_v10, 0.0  ;;  %v2368_v44 = vmul.f32 %v2112_v34, %v2112_v34  ;;  %v6246_v56 = vsub.f32 %v8865_v3, %v4474_v30  ;;  %v2114_v8 = vsel %vm1848_vm2, %v6231_v46, 0.0  ;;  %v8869_v3 = vld [vmem:[#allocation16_spill] sm:$0xff] }
 0x567   :  { %8864 = vst [vmem:[#allocation193_spill] sm:$0xff] %v6239_v31  ;;  %v2623_v47 = vadd.f32 %v2622_v43, %v2366_v29  ;;  %v2371_v19 = vmul.f32 %v2115_v14, %v2115_v14  ;;  %v2625_v17 = vsel %vm1450_vm1, %v2369_v59, 0.0  ;;  %v6254_v20 = vsub.f32 %v8867_v24, %v4474_v30  ;;  %v8871_v24 = vld [vmem:[#allocation19_spill] sm:$0xff] }
 0x568   :  { %8866 = vst [vmem:[#allocation195_spill] sm:$0xff] %v6246_v56  ;;  %v2117_v29 = vsel %vm1851_vm3, %v6239_v31, 0.0  ;;  %v2370_v34 = vmul.f32 %v2114_v8, %v2114_v8  ;;  %v6261_v10 = vsub.f32 %v8869_v3, %v4474_v30  ;;  %v6269_v46 = vsub.f32 %v8871_v24, %v4474_v30  ;;  %v8873_v3 = vld [vmem:[#allocation18_spill] sm:$0xff]  ;;  %v8875_v24 = vld [vmem:[#allocation21_spill] sm:$0xff] }
 0x569   :  { %v2624_v6 = vadd.f32 %v2623_v47, %v2368_v44  ;;  %8868 = vst [vmem:[#allocation197_spill] sm:$0xff] %v6254_v20  ;;  %v2116_v47 = vsel %vm1848_vm2, %v6246_v56, 0.0  ;;  %v2373_v59 = vmul.f32 %v2117_v29, %v2117_v29  ;;  %v2628_v44 = vsel %vm1450_vm1, %v2371_v19, 0.0 }
 0x56a   :  { %8870 = vst [vmem:[#allocation199_spill] sm:$0xff] %v6261_v10  ;;  %8872 = vst [vmem:[#allocation201_spill] sm:$0xff] %v6269_v46  ;;  %v6276_v31 = vsub.f32 %v8873_v3, %v4474_v30  ;;  %v2118_v29 = vsel %vm1848_vm2, %v6261_v10, 0.0  ;;  %v6284_v56 = vsub.f32 %v8875_v24, %v4474_v30  ;;  %v8877_v3 = vld [vmem:[#allocation20_spill] sm:$0xff]  ;;  %v8879_v24 = vld [vmem:[#allocation23_spill] sm:$0xff] }
 0x56b   :  { %v2626_v43 = vadd.f32 %v2625_v17, %v2624_v6  ;;  %v2119_v17 = vsel %vm1851_vm3, %v6254_v20, 0.0  ;;  %v2372_v6 = vmul.f32 %v2116_v47, %v2116_v47  ;;  %v2121_v47 = vsel %vm1851_vm3, %v6269_v46, 0.0 }
 0x56c   :  { %8874 = vst [vmem:[#allocation203_spill] sm:$0xff] %v6276_v31  ;;  %v2375_v19 = vmul.f32 %v2119_v17, %v2119_v17  ;;  %8876 = vst [vmem:[#allocation205_spill] sm:$0xff] %v6284_v56  ;;  %v6291_v20 = vsub.f32 %v8877_v3, %v4474_v30  ;;  %v2120_v17 = vsel %vm1848_vm2, %v6276_v31, 0.0  ;;  %v6299_v10 = vsub.f32 %v8879_v24, %v4474_v30  ;;  %v8881_v3 = vld [vmem:[#allocation22_spill] sm:$0xff]  ;;  %v8883_v24 = vld [vmem:[#allocation25_spill] sm:$0xff] }
 0x56d   :  { %v2627_v14 = vadd.f32 %v2626_v43, %v2370_v34  ;;  %v2631_v43 = vsel %vm1450_vm1, %v2373_v59, 0.0  ;;  %v2377_v59 = vmul.f32 %v2121_v47, %v2121_v47  ;;  %v6306_v46 = vsub.f32 %v8881_v3, %v4474_v30  ;;  %v8885_v3 = vld [vmem:[#allocation24_spill] sm:$0xff] }
 0x56e   :  { %8878 = vst [vmem:[#allocation207_spill] sm:$0xff] %v6291_v20  ;;  %8880 = vst [vmem:[#allocation209_spill] sm:$0xff] %v6299_v10  ;;  %v2122_v47 = vsel %vm1848_vm2, %v6291_v20, 0.0  ;;  %v6314_v31 = vsub.f32 %v8883_v24, %v4474_v30  ;;  %v8887_v24 = vld [vmem:[#allocation27_spill] sm:$0xff] }
 0x56f   :  { %v2629_v8 = vadd.f32 %v2628_v44, %v2627_v14  ;;  %v2374_v14 = vmul.f32 %v2118_v29, %v2118_v29  ;;  %v2123_v29 = vsel %vm1851_vm3, %v6284_v56, 0.0  ;;  %8882 = vst [vmem:[#allocation211_spill] sm:$0xff] %v6306_v46  ;;  %v6321_v56 = vsub.f32 %v8885_v3, %v4474_v30  ;;  %v8889_v3 = vld [vmem:[#allocation26_spill] sm:$0xff] }
 0x570   :  { %8884 = vst [vmem:[#allocation213_spill] sm:$0xff] %v6314_v31  ;;  %v6329_v20 = vsub.f32 %v8887_v24, %v4474_v30  ;;  %v8891_v24 = vld [vmem:[#allocation29_spill] sm:$0xff] }
 0x571   :  { %v2630_v34 = vadd.f32 %v2629_v8, %v2372_v6  ;;  %v2634_v8 = vsel %vm1450_vm1, %v2375_v19, 0.0  ;;  %v2379_v19 = vmul.f32 %v2123_v29, %v2123_v29  ;;  %8886 = vst [vmem:[#allocation215_spill] sm:$0xff] %v6321_v56  ;;  %v2124_v29 = vsel %vm1848_vm2, %v6306_v46, 0.0 }
 0x572   :  { %8888 = vst [vmem:[#allocation217_spill] sm:$0xff] %v6329_v20  ;;  %v6344_v46 = vsub.f32 %v8891_v24, %v4474_v30  ;;  %v8895_v24 = vld [vmem:[#allocation31_spill] sm:$0xff] }
 0x573   :  { %v2632_v44 = vadd.f32 %v2631_v43, %v2630_v34  ;;  %v2376_v34 = vmul.f32 %v2120_v17, %v2120_v17  ;;  %v2125_v17 = vsel %vm1851_vm3, %v6299_v10, 0.0  ;;  %v6336_v10 = vsub.f32 %v8889_v3, %v4474_v30  ;;  %v8893_v3 = vld [vmem:[#allocation28_spill] sm:$0xff] }
 0x574   :  { %8892 = vst [vmem:[#allocation238_spill] sm:$0xff] %v6344_v46 }
 0x575   :  { %v2633_v6 = vadd.f32 %v2632_v44, %v2374_v14  ;;  %v2637_v44 = vsel %vm1450_vm1, %v2377_v59, 0.0  ;;  %v2381_v59 = vmul.f32 %v2125_v17, %v2125_v17  ;;  %8890 = vst [vmem:[#allocation237_spill] sm:$0xff] %v6336_v10  ;;  %v2126_v17 = vsel %vm1848_vm2, %v6321_v56, 0.0 }
 0x576   :  { %v6359_v56 = vsub.f32 %v8895_v24, %v4474_v30  ;;  %v8899_v24 = vld [vmem:[#allocation33_spill] sm:$0xff] }
 0x577   :  { %v2635_v43 = vadd.f32 %v2634_v8, %v2633_v6  ;;  %v2378_v6 = vmul.f32 %v2122_v47, %v2122_v47  ;;  %v2127_v47 = vsel %vm1851_vm3, %v6314_v31, 0.0  ;;  %v6351_v31 = vsub.f32 %v8893_v3, %v4474_v30  ;;  %v8897_v3 = vld [vmem:[#allocation30_spill] sm:$0xff] }
 0x578   :  { %8896 = vst [vmem:[#allocation240_spill] sm:$0xff] %v6359_v56 }
 0x579   :  { %v2636_v14 = vadd.f32 %v2635_v43, %v2376_v34  ;;  %v2640_v43 = vsel %vm1450_vm1, %v2379_v19, 0.0  ;;  %v2383_v19 = vmul.f32 %v2127_v47, %v2127_v47  ;;  %8894 = vst [vmem:[#allocation239_spill] sm:$0xff] %v6351_v31  ;;  %v2128_v47 = vsel %vm1848_vm2, %v6336_v10, 0.0 }
 0x57a   :  { %v6374_v10 = vsub.f32 %v8899_v24, %v4474_v30  ;;  %v8903_v24 = vld [vmem:[#allocation35_spill] sm:$0xff] }
 0x57b   :  { %v2638_v8 = vadd.f32 %v2637_v44, %v2636_v14  ;;  %v2380_v14 = vmul.f32 %v2124_v29, %v2124_v29  ;;  %v2129_v29 = vsel %vm1851_vm3, %v6329_v20, 0.0  ;;  %v6366_v20 = vsub.f32 %v8897_v3, %v4474_v30  ;;  %v8901_v3 = vld [vmem:[#allocation32_spill] sm:$0xff] }
 0x57c   :  { %8900 = vst [vmem:[#allocation242_spill] sm:$0xff] %v6374_v10 }
 0x57d   :  { %v2639_v34 = vadd.f32 %v2638_v8, %v2378_v6  ;;  %v2643_v8 = vsel %vm1450_vm1, %v2381_v59, 0.0  ;;  %v2385_v59 = vmul.f32 %v2129_v29, %v2129_v29  ;;  %8898 = vst [vmem:[#allocation241_spill] sm:$0xff] %v6366_v20  ;;  %v2130_v29 = vsel %vm1848_vm2, %v6351_v31, 0.0 }
 0x57e   :  { %v6389_v31 = vsub.f32 %v8903_v24, %v4474_v30  ;;  %v8907_v24 = vld [vmem:[#allocation37_spill] sm:$0xff] }
 0x57f   :  { %v2641_v44 = vadd.f32 %v2640_v43, %v2639_v34  ;;  %v2382_v34 = vmul.f32 %v2126_v17, %v2126_v17  ;;  %v2131_v17 = vsel %vm1851_vm3, %v6344_v46, 0.0  ;;  %v6381_v46 = vsub.f32 %v8901_v3, %v4474_v30  ;;  %v8905_v3 = vld [vmem:[#allocation34_spill] sm:$0xff] }
 0x580   :  { %8904 = vst [vmem:[#allocation244_spill] sm:$0xff] %v6389_v31 }
 0x581   :  { %v2642_v6 = vadd.f32 %v2641_v44, %v2380_v14  ;;  %v2646_v44 = vsel %vm1450_vm1, %v2383_v19, 0.0  ;;  %v2387_v19 = vmul.f32 %v2131_v17, %v2131_v17  ;;  %8902 = vst [vmem:[#allocation243_spill] sm:$0xff] %v6381_v46  ;;  %v2132_v17 = vsel %vm1848_vm2, %v6366_v20, 0.0 }
 0x582   :  { %v6404_v20 = vsub.f32 %v8907_v24, %v4474_v30  ;;  %v8911_v24 = vld [vmem:[#allocation39_spill] sm:$0xff] }
 0x583   :  { %v2644_v43 = vadd.f32 %v2643_v8, %v2642_v6  ;;  %v2384_v6 = vmul.f32 %v2128_v47, %v2128_v47  ;;  %v2133_v47 = vsel %vm1851_vm3, %v6359_v56, 0.0  ;;  %v6396_v56 = vsub.f32 %v8905_v3, %v4474_v30  ;;  %v8909_v3 = vld [vmem:[#allocation36_spill] sm:$0xff] }
 0x584   :  { %8908 = vst [vmem:[#allocation246_spill] sm:$0xff] %v6404_v20 }
 0x585   :  { %v2645_v14 = vadd.f32 %v2644_v43, %v2382_v34  ;;  %v2649_v43 = vsel %vm1450_vm1, %v2385_v59, 0.0  ;;  %v2389_v59 = vmul.f32 %v2133_v47, %v2133_v47  ;;  %8906 = vst [vmem:[#allocation245_spill] sm:$0xff] %v6396_v56  ;;  %v2134_v47 = vsel %vm1848_vm2, %v6381_v46, 0.0 }
 0x586   :  { %v6419_v46 = vsub.f32 %v8911_v24, %v4474_v30 }
 0x587   :  { %v2647_v8 = vadd.f32 %v2646_v44, %v2645_v14  ;;  %v2386_v14 = vmul.f32 %v2130_v29, %v2130_v29  ;;  %v2135_v29 = vsel %vm1851_vm3, %v6374_v10, 0.0  ;;  %v6411_v10 = vsub.f32 %v8909_v3, %v4474_v30  ;;  %v8913_v3 = vld [vmem:[#allocation38_spill] sm:$0xff] }
 0x588   :  { %8912 = vst [vmem:[#allocation9_spill] sm:$0xff] %v6419_v46  ;;  %v2141_v24 = vsel %vm1851_vm3, %v6419_v46, 0.0  ;;  %v8915_v46 = vld [vmem:[#allocation41_spill] sm:$0xff] }
 0x589   :  { %v2648_v34 = vadd.f32 %v2647_v8, %v2384_v6  ;;  %v2652_v8 = vsel %vm1450_vm1, %v2387_v19, 0.0  ;;  %v2391_v19 = vmul.f32 %v2135_v29, %v2135_v29  ;;  %8910 = vst [vmem:[#allocation253_spill] sm:$0xff] %v6411_v10  ;;  %v2136_v29 = vsel %vm1848_vm2, %v6396_v56, 0.0 }
 0x58a   :  { %v2397_v35 = vmul.f32 %v2141_v24, %v2141_v24 }
 0x58b   :  { %v2650_v44 = vadd.f32 %v2649_v43, %v2648_v34  ;;  %v2388_v34 = vmul.f32 %v2132_v17, %v2132_v17  ;;  %v2137_v17 = vsel %vm1851_vm3, %v6389_v31, 0.0  ;;  %v6426_v31 = vsub.f32 %v8913_v3, %v4474_v30 }
 0x58d   :  { %v2651_v6 = vadd.f32 %v2650_v44, %v2386_v14  ;;  %v2655_v44 = vsel %vm1450_vm1, %v2389_v59, 0.0  ;;  %v2393_v59 = vmul.f32 %v2137_v17, %v2137_v17  ;;  %v2138_v17 = vsel %vm1848_vm2, %v6411_v10, 0.0 }
 0x58e   :  { %v2394_v56 = vmul.f32 %v2138_v17, %v2138_v17  ;;  %v2399_v17 = vmul.f32 %v8915_v46, %v8915_v46 }
 0x58f   :  { %v2653_v43 = vadd.f32 %v2652_v8, %v2651_v6  ;;  %v2390_v6 = vmul.f32 %v2134_v47, %v2134_v47  ;;  %v2139_v47 = vsel %vm1851_vm3, %v6404_v20, 0.0 }
 0x591   :  { %v2654_v14 = vadd.f32 %v2653_v43, %v2388_v34  ;;  %v2658_v43 = vsel %vm1450_vm1, %v2391_v19, 0.0  ;;  %v2395_v19 = vmul.f32 %v2139_v47, %v2139_v47 }
 0x593   :  { %v2656_v8 = vadd.f32 %v2655_v44, %v2654_v14  ;;  %v2392_v14 = vmul.f32 %v2136_v29, %v2136_v29  ;;  %v8914_v29 = vld [vmem:[#allocation40_spill] sm:$0xff] }
 0x595   :  { %v2657_v34 = vadd.f32 %v2656_v8, %v2390_v6  ;;  %v2661_v8 = vsel %vm1450_vm1, %v2393_v59, 0.0 }
 0x597   :  { %v2659_v44 = vadd.f32 %v2658_v43, %v2657_v34  ;;  %v1886_v34 = vsub.f32 %v8914_v29, %v4474_v30  ;;  %v2140_v43 = vsel %vm1848_vm2, %v6426_v31, 0.0 }
 0x598   :  { %v2396_v47 = vmul.f32 %v2140_v43, %v2140_v43 }
 0x599   :  { %v2660_v6 = vadd.f32 %v2659_v44, %v2392_v14  ;;  %v2664_v14 = vsel %vm1450_vm1, %v2395_v19, 0.0  ;;  %v2142_v59 = vsel %vm1848_vm2, %v1886_v34, 0.0  ;;  %v8917_v19 = vld [vmem:[#allocation42_spill] sm:$0xff]  ;;  %v8918_v34 = vld [vmem:[#allocation45_spill] sm:$0xff] }
 0x59a   :  { %v2400_v24 = vmul.f32 %v8917_v19, %v8917_v19 }
 0x59b   :  { %v2662_v20 = vadd.f32 %v2661_v8, %v2660_v6  ;;  %v2667_v6 = vsel %vm1450_vm1, %v2397_v35, 0.0  ;;  %v2398_v8 = vmul.f32 %v2142_v59, %v2142_v59  ;;  %v8920_v59 = vld [vmem:[#allocation47_spill] sm:$0xff] }
 0x59d   :  { %v2663_v3 = vadd.f32 %v2662_v20, %v2394_v56  ;;  %v2401_v20 = vmul.f32 %v8916_v60, %v8916_v60  ;;  %v2670_v56 = vsel %vm1450_vm1, %v2399_v17, 0.0  ;;  %v2405_v60 = vmul.f32 %v8920_v59, %v8920_v59 }
 0x59f   :  { %v2665_v44 = vadd.f32 %v2664_v14, %v2663_v3  ;;  %v2403_v14 = vmul.f32 %v8918_v34, %v8918_v34  ;;  %v2673_v46 = vsel %vm1450_vm1, %v2401_v20, 0.0  ;;  %v2679_v20 = vsel %vm1450_vm1, %v2405_v60, 0.0 }
 0x5a1   :  { %v2666_v10 = vadd.f32 %v2665_v44, %v2396_v47  ;;  %v8919_v47 = vld [vmem:[#allocation44_spill] sm:$0xff]  ;;  %v2676_v17 = vsel %vm1450_vm1, %v2403_v14, 0.0 }
 0x5a2   :  { %v2402_v35 = vmul.f32 %v8919_v47, %v8919_v47 }
 0x5a3   :  { %v2668_v29 = vadd.f32 %v2667_v6, %v2666_v10  ;;  %v8921_v6 = vld [vmem:[#allocation46_spill] sm:$0xff] }
 0x5a5   :  { %v2669_v52 = vadd.f32 %v2668_v29, %v2398_v8  ;;  %v2404_v8 = vmul.f32 %v8921_v6, %v8921_v6 }
 0x5a7   :  { %v2671_v43 = vadd.f32 %v2670_v56, %v2669_v52  ;;  %v8922_v56 = vld [vmem:[#allocation49_spill] sm:$0xff] }
 0x5a8   :  { %v2407_v19 = vmul.f32 %v8922_v56, %v8922_v56 }
 0x5a9   :  { %v2672_v3 = vadd.f32 %v2671_v43, %v2400_v24  ;;  %v8923_v24 = vld [vmem:[#allocation48_spill] sm:$0xff] }
 0x5aa   :  { %v2406_v43 = vmul.f32 %v8923_v24, %v8923_v24  ;;  %v2682_v14 = vsel %vm1450_vm1, %v2407_v19, 0.0 }
 0x5ab   :  { %v2674_v10 = vadd.f32 %v2673_v46, %v2672_v3  ;;  %v8924_v46 = vld [vmem:[#allocation51_spill] sm:$0xff] }
 0x5ac   :  { %v2409_v47 = vmul.f32 %v8924_v46, %v8924_v46 }
 0x5ad   :  { %v2675_v44 = vadd.f32 %v2674_v10, %v2402_v35  ;;  %v8925_v35 = vld [vmem:[#allocation50_spill] sm:$0xff] }
 0x5ae   :  { %v2408_v10 = vmul.f32 %v8925_v35, %v8925_v35  ;;  %v2685_v60 = vsel %vm1450_vm1, %v2409_v47, 0.0 }
 0x5af   :  { %v2677_v52 = vadd.f32 %v2676_v17, %v2675_v44  ;;  %v8926_v17 = vld [vmem:[#allocation58_spill] sm:$0xff] }
 0x5b0   :  { %v2411_v6 = vmul.f32 %v8926_v17, %v8926_v17 }
 0x5b1   :  { %v2678_v29 = vadd.f32 %v2677_v52, %v2404_v8  ;;  %v8927_v8 = vld [vmem:[#allocation181_spill] sm:$0xff] }
 0x5b2   :  { %v2410_v52 = vmul.f32 %v8927_v8, %v8927_v8  ;;  %v2688_v19 = vsel %vm1450_vm1, %v2411_v6, 0.0 }
 0x5b3   :  { %v2680_v3 = vadd.f32 %v2679_v20, %v2678_v29  ;;  %v8928_v20 = vld [vmem:[#allocation66_spill] sm:$0xff] }
 0x5b4   :  { %v2413_v24 = vmul.f32 %v8928_v20, %v8928_v20 }
 0x5b5   :  { %v2681_v34 = vadd.f32 %v2680_v3, %v2406_v43  ;;  %v8929_v43 = vld [vmem:[#allocation62_spill] sm:$0xff] }
 0x5b6   :  { %v2412_v3 = vmul.f32 %v8929_v43, %v8929_v43  ;;  %v2691_v47 = vsel %vm1450_vm1, %v2413_v24, 0.0 }
 0x5b7   :  { %v2683_v44 = vadd.f32 %v2682_v14, %v2681_v34  ;;  %v8930_v14 = vld [vmem:[#allocation72_spill] sm:$0xff] }
 0x5b8   :  { %v2415_v35 = vmul.f32 %v8930_v14, %v8930_v14 }
 0x5b9   :  { %v2684_v59 = vadd.f32 %v2683_v44, %v2408_v10  ;;  %v8931_v10 = vld [vmem:[#allocation69_spill] sm:$0xff] }
 0x5ba   :  { %v2414_v44 = vmul.f32 %v8931_v10, %v8931_v10  ;;  %v2694_v6 = vsel %vm1450_vm1, %v2415_v35, 0.0 }
 0x5bb   :  { %v2686_v29 = vadd.f32 %v2685_v60, %v2684_v59  ;;  %v8932_v60 = vld [vmem:[#allocation160_spill] sm:$0xff] }
 0x5bc   :  { %v2417_v8 = vmul.f32 %v8932_v60, %v8932_v60 }
 0x5bd   :  { %v2687_v56 = vadd.f32 %v2686_v29, %v2410_v52  ;;  %v8933_v52 = vld [vmem:[#allocation75_spill] sm:$0xff] }
 0x5be   :  { %v2416_v29 = vmul.f32 %v8933_v52, %v8933_v52  ;;  %v2697_v24 = vsel %vm1450_vm1, %v2417_v8, 0.0 }
 0x5bf   :  { %v2689_v34 = vadd.f32 %v2688_v19, %v2687_v56  ;;  %v8934_v19 = vld [vmem:[#allocation166_spill] sm:$0xff] }
 0x5c0   :  { %v2419_v43 = vmul.f32 %v8934_v19, %v8934_v19 }
 0x5c1   :  { %v2690_v46 = vadd.f32 %v2689_v34, %v2412_v3  ;;  %v8935_v3 = vld [vmem:[#allocation164_spill] sm:$0xff] }
 0x5c2   :  { %v2418_v34 = vmul.f32 %v8935_v3, %v8935_v3  ;;  %v2700_v35 = vsel %vm1450_vm1, %v2419_v43, 0.0 }
 0x5c3   :  { %v2692_v59 = vadd.f32 %v2691_v47, %v2690_v46  ;;  %v8936_v47 = vld [vmem:[#allocation180_spill] sm:$0xff] }
 0x5c4   :  { %v2421_v10 = vmul.f32 %v8936_v47, %v8936_v47 }
 0x5c5   :  { %v2693_v17 = vadd.f32 %v2692_v59, %v2414_v44  ;;  %v8937_v44 = vld [vmem:[#allocation168_spill] sm:$0xff] }
 0x5c6   :  { %v2420_v59 = vmul.f32 %v8937_v44, %v8937_v44  ;;  %v2703_v8 = vsel %vm1450_vm1, %v2421_v10, 0.0 }
 0x5c7   :  { %v2695_v56 = vadd.f32 %v2694_v6, %v2693_v17  ;;  %v8938_v6 = vld [vmem:[#allocation186_spill] sm:$0xff] }
 0x5c8   :  { %v2423_v52 = vmul.f32 %v8938_v6, %v8938_v6 }
 0x5c9   :  { %v2696_v20 = vadd.f32 %v2695_v56, %v2416_v29  ;;  %v8939_v29 = vld [vmem:[#allocation184_spill] sm:$0xff] }
 0x5ca   :  { %v2422_v56 = vmul.f32 %v8939_v29, %v8939_v29  ;;  %v2706_v43 = vsel %vm1450_vm1, %v2423_v52, 0.0 }
 0x5cb   :  { %v2698_v46 = vadd.f32 %v2697_v24, %v2696_v20  ;;  %v8940_v24 = vld [vmem:[#allocation190_spill] sm:$0xff] }
 0x5cc   :  { %v2425_v3 = vmul.f32 %v8940_v24, %v8940_v24 }
 0x5cd   :  { %v2699_v14 = vadd.f32 %v2698_v46, %v2418_v34  ;;  %v8941_v34 = vld [vmem:[#allocation188_spill] sm:$0xff] }
 0x5ce   :  { %v2424_v46 = vmul.f32 %v8941_v34, %v8941_v34  ;;  %v2709_v10 = vsel %vm1450_vm1, %v2425_v3, 0.0 }
 0x5cf   :  { %v2701_v17 = vadd.f32 %v2700_v35, %v2699_v14  ;;  %v8942_v35 = vld [vmem:[#allocation194_spill] sm:$0xff] }
 0x5d0   :  { %v2427_v44 = vmul.f32 %v8942_v35, %v8942_v35 }
 0x5d1   :  { %v2702_v60 = vadd.f32 %v2701_v17, %v2420_v59  ;;  %v8943_v59 = vld [vmem:[#allocation192_spill] sm:$0xff] }
 0x5d2   :  { %v2426_v17 = vmul.f32 %v8943_v59, %v8943_v59  ;;  %v2712_v52 = vsel %vm1450_vm1, %v2427_v44, 0.0 }
 0x5d3   :  { %v2704_v20 = vadd.f32 %v2703_v8, %v2702_v60  ;;  %v8944_v8 = vld [vmem:[#allocation198_spill] sm:$0xff] }
 0x5d4   :  { %v2429_v29 = vmul.f32 %v8944_v8, %v8944_v8 }
 0x5d5   :  { %v2705_v19 = vadd.f32 %v2704_v20, %v2422_v56  ;;  %v8945_v56 = vld [vmem:[#allocation196_spill] sm:$0xff] }
 0x5d6   :  { %v2428_v20 = vmul.f32 %v8945_v56, %v8945_v56  ;;  %v2715_v3 = vsel %vm1450_vm1, %v2429_v29, 0.0 }
 0x5d7   :  { %v2707_v14 = vadd.f32 %v2706_v43, %v2705_v19  ;;  %v8946_v43 = vld [vmem:[#allocation202_spill] sm:$0xff] }
 0x5d8   :  { %v2431_v34 = vmul.f32 %v8946_v43, %v8946_v43 }
 0x5d9   :  { %v2708_v47 = vadd.f32 %v2707_v14, %v2424_v46  ;;  %v8947_v46 = vld [vmem:[#allocation200_spill] sm:$0xff] }
 0x5da   :  { %v2430_v14 = vmul.f32 %v8947_v46, %v8947_v46  ;;  %v2718_v44 = vsel %vm1450_vm1, %v2431_v34, 0.0 }
 0x5db   :  { %v2710_v60 = vadd.f32 %v2709_v10, %v2708_v47  ;;  %v8948_v10 = vld [vmem:[#allocation206_spill] sm:$0xff] }
 0x5dc   :  { %v2433_v59 = vmul.f32 %v8948_v10, %v8948_v10 }
 0x5dd   :  { %v2711_v6 = vadd.f32 %v2710_v60, %v2426_v17  ;;  %v8949_v17 = vld [vmem:[#allocation204_spill] sm:$0xff] }
 0x5de   :  { %v2432_v60 = vmul.f32 %v8949_v17, %v8949_v17  ;;  %v2721_v29 = vsel %vm1450_vm1, %v2433_v59, 0.0 }
 0x5df   :  { %v2713_v19 = vadd.f32 %v2712_v52, %v2711_v6  ;;  %v8950_v52 = vld [vmem:[#allocation210_spill] sm:$0xff] }
 0x5e0   :  { %v2435_v56 = vmul.f32 %v8950_v52, %v8950_v52 }
 0x5e1   :  { %v2714_v24 = vadd.f32 %v2713_v19, %v2428_v20  ;;  %v8951_v20 = vld [vmem:[#allocation208_spill] sm:$0xff] }
 0x5e2   :  { %v2434_v19 = vmul.f32 %v8951_v20, %v8951_v20  ;;  %v2724_v34 = vsel %vm1450_vm1, %v2435_v56, 0.0 }
 0x5e3   :  { %v2716_v47 = vadd.f32 %v2715_v3, %v2714_v24  ;;  %v8952_v3 = vld [vmem:[#allocation214_spill] sm:$0xff] }
 0x5e4   :  { %v2437_v46 = vmul.f32 %v8952_v3, %v8952_v3 }
 0x5e5   :  { %v2717_v35 = vadd.f32 %v2716_v47, %v2430_v14  ;;  %v8953_v14 = vld [vmem:[#allocation212_spill] sm:$0xff] }
 0x5e6   :  { %v2436_v47 = vmul.f32 %v8953_v14, %v8953_v14  ;;  %v2727_v59 = vsel %vm1450_vm1, %v2437_v46, 0.0 }
 0x5e7   :  { %v2719_v6 = vadd.f32 %v2718_v44, %v2717_v35  ;;  %v8954_v44 = vld [vmem:[#allocation218_spill] sm:$0xff] }
 0x5e8   :  { %v2439_v17 = vmul.f32 %v8954_v44, %v8954_v44 }
 0x5e9   :  { %v2720_v8 = vadd.f32 %v2719_v6, %v2432_v60  ;;  %v8955_v60 = vld [vmem:[#allocation216_spill] sm:$0xff] }
 0x5ea   :  { %v2438_v6 = vmul.f32 %v8955_v60, %v8955_v60  ;;  %v2730_v56 = vsel %vm1450_vm1, %v2439_v17, 0.0 }
 0x5eb   :  { %v2722_v24 = vadd.f32 %v2721_v29, %v2720_v8  ;;  %v8956_v29 = vld [vmem:[#allocation220_spill] sm:$0xff] }
 0x5ec   :  { %v2441_v20 = vmul.f32 %v8956_v29, %v8956_v29 }
 0x5ed   :  { %v2723_v43 = vadd.f32 %v2722_v24, %v2434_v19  ;;  %v8957_v19 = vld [vmem:[#allocation219_spill] sm:$0xff] }
 0x5ee   :  { %v2440_v24 = vmul.f32 %v8957_v19, %v8957_v19  ;;  %v2733_v46 = vsel %vm1450_vm1, %v2441_v20, 0.0 }
 0x5ef   :  { %v2725_v35 = vadd.f32 %v2724_v34, %v2723_v43  ;;  %v8958_v34 = vld [vmem:[#allocation52_spill] sm:$0xff] }
 0x5f0   :  { %v2443_v14 = vmul.f32 %v8958_v34, %v8958_v34 }
 0x5f1   :  { %v2726_v10 = vadd.f32 %v2725_v35, %v2436_v47  ;;  %v8959_v47 = vld [vmem:[#allocation221_spill] sm:$0xff] }
 0x5f2   :  { %v2442_v35 = vmul.f32 %v8959_v47, %v8959_v47  ;;  %v2736_v17 = vsel %vm1450_vm1, %v2443_v14, 0.0 }
 0x5f3   :  { %v2728_v8 = vadd.f32 %v2727_v59, %v2726_v10  ;;  %v8960_v59 = vld [vmem:[#allocation54_spill] sm:$0xff] }
 0x5f4   :  { %v2445_v60 = vmul.f32 %v8960_v59, %v8960_v59 }
 0x5f5   :  { %v2729_v52 = vadd.f32 %v2728_v8, %v2438_v6  ;;  %v8961_v6 = vld [vmem:[#allocation53_spill] sm:$0xff] }
 0x5f6   :  { %v2444_v8 = vmul.f32 %v8961_v6, %v8961_v6  ;;  %v2739_v20 = vsel %vm1450_vm1, %v2445_v60, 0.0 }
 0x5f7   :  { %v2731_v43 = vadd.f32 %v2730_v56, %v2729_v52  ;;  %v8962_v56 = vld [vmem:[#allocation56_spill] sm:$0xff] }
 0x5f8   :  { %v2447_v19 = vmul.f32 %v8962_v56, %v8962_v56 }
 0x5f9   :  { %v2732_v3 = vadd.f32 %v2731_v43, %v2440_v24  ;;  %v8963_v24 = vld [vmem:[#allocation55_spill] sm:$0xff] }
 0x5fa   :  { %v2446_v43 = vmul.f32 %v8963_v24, %v8963_v24  ;;  %v2742_v14 = vsel %vm1450_vm1, %v2447_v19, 0.0 }
 0x5fb   :  { %v2734_v10 = vadd.f32 %v2733_v46, %v2732_v3  ;;  %v8964_v46 = vld [vmem:[#allocation59_spill] sm:$0xff] }
 0x5fc   :  { %v2449_v47 = vmul.f32 %v8964_v46, %v8964_v46 }
 0x5fd   :  { %v2735_v44 = vadd.f32 %v2734_v10, %v2442_v35  ;;  %v8965_v35 = vld [vmem:[#allocation57_spill] sm:$0xff] }
 0x5fe   :  { %v2448_v10 = vmul.f32 %v8965_v35, %v8965_v35  ;;  %v2745_v60 = vsel %vm1450_vm1, %v2449_v47, 0.0 }
 0x5ff   :  { %v2737_v52 = vadd.f32 %v2736_v17, %v2735_v44  ;;  %v8966_v17 = vld [vmem:[#allocation63_spill] sm:$0xff] }
 0x600   :  { %v2451_v6 = vmul.f32 %v8966_v17, %v8966_v17 }
 0x601   :  { %v2738_v29 = vadd.f32 %v2737_v52, %v2444_v8  ;;  %v8967_v8 = vld [vmem:[#allocation61_spill] sm:$0xff] }
 0x602   :  { %v2450_v52 = vmul.f32 %v8967_v8, %v8967_v8  ;;  %v2748_v19 = vsel %vm1450_vm1, %v2451_v6, 0.0 }
 0x603   :  { %v2740_v3 = vadd.f32 %v2739_v20, %v2738_v29  ;;  %v8968_v20 = vld [vmem:[#allocation67_spill] sm:$0xff] }
 0x604   :  { %v2453_v24 = vmul.f32 %v8968_v20, %v8968_v20 }
 0x605   :  { %v2741_v34 = vadd.f32 %v2740_v3, %v2446_v43  ;;  %v8969_v43 = vld [vmem:[#allocation65_spill] sm:$0xff] }
 0x606   :  { %v2452_v3 = vmul.f32 %v8969_v43, %v8969_v43  ;;  %v2751_v47 = vsel %vm1450_vm1, %v2453_v24, 0.0 }
 0x607   :  { %v2743_v44 = vadd.f32 %v2742_v14, %v2741_v34  ;;  %v8970_v14 = vld [vmem:[#allocation70_spill] sm:$0xff] }
 0x608   :  { %v2455_v35 = vmul.f32 %v8970_v14, %v8970_v14 }
 0x609   :  { %v2744_v59 = vadd.f32 %v2743_v44, %v2448_v10  ;;  %v8971_v10 = vld [vmem:[#allocation68_spill] sm:$0xff] }
 0x60a   :  { %v2454_v44 = vmul.f32 %v8971_v10, %v8971_v10  ;;  %v2754_v6 = vsel %vm1450_vm1, %v2455_v35, 0.0 }
 0x60b   :  { %v2746_v29 = vadd.f32 %v2745_v60, %v2744_v59  ;;  %v8972_v60 = vld [vmem:[#allocation73_spill] sm:$0xff] }
 0x60c   :  { %v2457_v8 = vmul.f32 %v8972_v60, %v8972_v60 }
 0x60d   :  { %v2747_v56 = vadd.f32 %v2746_v29, %v2450_v52  ;;  %v8973_v52 = vld [vmem:[#allocation71_spill] sm:$0xff] }
 0x60e   :  { %v2456_v29 = vmul.f32 %v8973_v52, %v8973_v52  ;;  %v2757_v24 = vsel %vm1450_vm1, %v2457_v8, 0.0 }
 0x60f   :  { %v2749_v34 = vadd.f32 %v2748_v19, %v2747_v56  ;;  %v8974_v19 = vld [vmem:[#allocation76_spill] sm:$0xff] }
 0x610   :  { %v2459_v43 = vmul.f32 %v8974_v19, %v8974_v19 }
 0x611   :  { %v2750_v46 = vadd.f32 %v2749_v34, %v2452_v3  ;;  %v8975_v3 = vld [vmem:[#allocation74_spill] sm:$0xff] }
 0x612   :  { %v2458_v34 = vmul.f32 %v8975_v3, %v8975_v3  ;;  %v2760_v35 = vsel %vm1450_vm1, %v2459_v43, 0.0 }
 0x613   :  { %v2752_v59 = vadd.f32 %v2751_v47, %v2750_v46  ;;  %v8976_v47 = vld [vmem:[#allocation79_spill] sm:$0xff] }
 0x614   :  { %v2461_v10 = vmul.f32 %v8976_v47, %v8976_v47 }
 0x615   :  { %v2753_v17 = vadd.f32 %v2752_v59, %v2454_v44  ;;  %v8977_v44 = vld [vmem:[#allocation77_spill] sm:$0xff] }
 0x616   :  { %v2460_v59 = vmul.f32 %v8977_v44, %v8977_v44  ;;  %v2763_v8 = vsel %vm1450_vm1, %v2461_v10, 0.0 }
 0x617   :  { %v2755_v56 = vadd.f32 %v2754_v6, %v2753_v17  ;;  %v8978_v6 = vld [vmem:[#allocation83_spill] sm:$0xff] }
 0x618   :  { %v2463_v52 = vmul.f32 %v8978_v6, %v8978_v6 }
 0x619   :  { %v2756_v20 = vadd.f32 %v2755_v56, %v2456_v29  ;;  %v8979_v29 = vld [vmem:[#allocation81_spill] sm:$0xff] }
 0x61a   :  { %v2462_v56 = vmul.f32 %v8979_v29, %v8979_v29  ;;  %v2766_v43 = vsel %vm1450_vm1, %v2463_v52, 0.0 }
 0x61b   :  { %v2758_v46 = vadd.f32 %v2757_v24, %v2756_v20  ;;  %v8980_v24 = vld [vmem:[#allocation87_spill] sm:$0xff] }
 0x61c   :  { %v2465_v3 = vmul.f32 %v8980_v24, %v8980_v24 }
 0x61d   :  { %v2759_v14 = vadd.f32 %v2758_v46, %v2458_v34  ;;  %v8981_v34 = vld [vmem:[#allocation85_spill] sm:$0xff] }
 0x61e   :  { %v2464_v46 = vmul.f32 %v8981_v34, %v8981_v34  ;;  %v2769_v10 = vsel %vm1450_vm1, %v2465_v3, 0.0 }
 0x61f   :  { %v2761_v17 = vadd.f32 %v2760_v35, %v2759_v14  ;;  %v8982_v35 = vld [vmem:[#allocation91_spill] sm:$0xff] }
 0x620   :  { %v2467_v44 = vmul.f32 %v8982_v35, %v8982_v35 }
 0x621   :  { %v2762_v60 = vadd.f32 %v2761_v17, %v2460_v59  ;;  %v8983_v59 = vld [vmem:[#allocation89_spill] sm:$0xff] }
 0x622   :  { %v2466_v17 = vmul.f32 %v8983_v59, %v8983_v59  ;;  %v2772_v52 = vsel %vm1450_vm1, %v2467_v44, 0.0 }
 0x623   :  { %v2764_v20 = vadd.f32 %v2763_v8, %v2762_v60  ;;  %v8984_v8 = vld [vmem:[#allocation95_spill] sm:$0xff] }
 0x624   :  { %v2469_v29 = vmul.f32 %v8984_v8, %v8984_v8 }
 0x625   :  { %v2765_v19 = vadd.f32 %v2764_v20, %v2462_v56  ;;  %v8985_v56 = vld [vmem:[#allocation93_spill] sm:$0xff] }
 0x626   :  { %v2468_v20 = vmul.f32 %v8985_v56, %v8985_v56  ;;  %v2775_v3 = vsel %vm1450_vm1, %v2469_v29, 0.0 }
 0x627   :  { %v2767_v14 = vadd.f32 %v2766_v43, %v2765_v19  ;;  %v8986_v43 = vld [vmem:[#allocation99_spill] sm:$0xff] }
 0x628   :  { %v2471_v34 = vmul.f32 %v8986_v43, %v8986_v43 }
 0x629   :  { %v2768_v47 = vadd.f32 %v2767_v14, %v2464_v46  ;;  %v8987_v46 = vld [vmem:[#allocation97_spill] sm:$0xff] }
 0x62a   :  { %v2470_v14 = vmul.f32 %v8987_v46, %v8987_v46  ;;  %v2778_v44 = vsel %vm1450_vm1, %v2471_v34, 0.0 }
 0x62b   :  { %v2770_v60 = vadd.f32 %v2769_v10, %v2768_v47  ;;  %v8988_v10 = vld [vmem:[#allocation103_spill] sm:$0xff] }
 0x62c   :  { %v2473_v59 = vmul.f32 %v8988_v10, %v8988_v10 }
 0x62d   :  { %v2771_v6 = vadd.f32 %v2770_v60, %v2466_v17  ;;  %v8989_v17 = vld [vmem:[#allocation101_spill] sm:$0xff] }
 0x62e   :  { %v2472_v60 = vmul.f32 %v8989_v17, %v8989_v17  ;;  %v2781_v29 = vsel %vm1450_vm1, %v2473_v59, 0.0 }
 0x62f   :  { %v2773_v19 = vadd.f32 %v2772_v52, %v2771_v6  ;;  %v8990_v52 = vld [vmem:[#allocation107_spill] sm:$0xff] }
 0x630   :  { %v2475_v56 = vmul.f32 %v8990_v52, %v8990_v52 }
 0x631   :  { %v2774_v24 = vadd.f32 %v2773_v19, %v2468_v20  ;;  %v8991_v20 = vld [vmem:[#allocation105_spill] sm:$0xff] }
 0x632   :  { %v2474_v19 = vmul.f32 %v8991_v20, %v8991_v20  ;;  %v2784_v34 = vsel %vm1450_vm1, %v2475_v56, 0.0 }
 0x633   :  { %v2776_v47 = vadd.f32 %v2775_v3, %v2774_v24  ;;  %v8992_v3 = vld [vmem:[#allocation111_spill] sm:$0xff] }
 0x634   :  { %v2477_v46 = vmul.f32 %v8992_v3, %v8992_v3 }
 0x635   :  { %v2777_v35 = vadd.f32 %v2776_v47, %v2470_v14  ;;  %v8993_v14 = vld [vmem:[#allocation109_spill] sm:$0xff] }
 0x636   :  { %v2476_v47 = vmul.f32 %v8993_v14, %v8993_v14  ;;  %v2787_v59 = vsel %vm1450_vm1, %v2477_v46, 0.0 }
 0x637   :  { %v2779_v6 = vadd.f32 %v2778_v44, %v2777_v35  ;;  %v8994_v44 = vld [vmem:[#allocation115_spill] sm:$0xff] }
 0x638   :  { %v2479_v17 = vmul.f32 %v8994_v44, %v8994_v44 }
 0x639   :  { %v2780_v8 = vadd.f32 %v2779_v6, %v2472_v60  ;;  %v8995_v60 = vld [vmem:[#allocation113_spill] sm:$0xff] }
 0x63a   :  { %v2478_v6 = vmul.f32 %v8995_v60, %v8995_v60  ;;  %v2790_v56 = vsel %vm1450_vm1, %v2479_v17, 0.0 }
 0x63b   :  { %v2782_v24 = vadd.f32 %v2781_v29, %v2780_v8  ;;  %v8996_v29 = vld [vmem:[#allocation119_spill] sm:$0xff] }
 0x63c   :  { %v2481_v20 = vmul.f32 %v8996_v29, %v8996_v29 }
 0x63d   :  { %v2783_v43 = vadd.f32 %v2782_v24, %v2474_v19  ;;  %v8997_v19 = vld [vmem:[#allocation117_spill] sm:$0xff] }
 0x63e   :  { %v2480_v24 = vmul.f32 %v8997_v19, %v8997_v19  ;;  %v2793_v46 = vsel %vm1450_vm1, %v2481_v20, 0.0 }
 0x63f   :  { %v2785_v35 = vadd.f32 %v2784_v34, %v2783_v43  ;;  %v8998_v34 = vld [vmem:[#allocation123_spill] sm:$0xff] }
 0x640   :  { %v2483_v14 = vmul.f32 %v8998_v34, %v8998_v34 }
 0x641   :  { %v2786_v10 = vadd.f32 %v2785_v35, %v2476_v47  ;;  %v8999_v47 = vld [vmem:[#allocation121_spill] sm:$0xff] }
 0x642   :  { %v2482_v35 = vmul.f32 %v8999_v47, %v8999_v47  ;;  %v2796_v17 = vsel %vm1450_vm1, %v2483_v14, 0.0 }
 0x643   :  { %v2788_v8 = vadd.f32 %v2787_v59, %v2786_v10  ;;  %v9000_v59 = vld [vmem:[#allocation127_spill] sm:$0xff] }
 0x644   :  { %v2485_v60 = vmul.f32 %v9000_v59, %v9000_v59 }
 0x645   :  { %v2789_v52 = vadd.f32 %v2788_v8, %v2478_v6  ;;  %v9001_v6 = vld [vmem:[#allocation125_spill] sm:$0xff] }
 0x646   :  { %v2484_v8 = vmul.f32 %v9001_v6, %v9001_v6  ;;  %v2799_v20 = vsel %vm1450_vm1, %v2485_v60, 0.0 }
 0x647   :  { %v2791_v43 = vadd.f32 %v2790_v56, %v2789_v52  ;;  %v9002_v56 = vld [vmem:[#allocation131_spill] sm:$0xff] }
 0x648   :  { %v2487_v19 = vmul.f32 %v9002_v56, %v9002_v56 }
 0x649   :  { %v2792_v3 = vadd.f32 %v2791_v43, %v2480_v24  ;;  %v9003_v24 = vld [vmem:[#allocation129_spill] sm:$0xff] }
 0x64a   :  { %v2486_v43 = vmul.f32 %v9003_v24, %v9003_v24  ;;  %v2802_v14 = vsel %vm1450_vm1, %v2487_v19, 0.0  ;;  %v9009_v19 = vld [vmem:[#allocation78_spill] sm:$0xff] }
 0x64b   :  { %v2794_v10 = vadd.f32 %v2793_v46, %v2792_v3  ;;  %v9004_v46 = vld [vmem:[#allocation135_spill] sm:$0xff]  ;;  %v6682_v24 = vsub.f32 %v9009_v19, %v4474_v30 }
 0x64c   :  { %v2489_v47 = vmul.f32 %v9004_v46, %v9004_v46 }
 0x64d   :  { %v2795_v44 = vadd.f32 %v2794_v10, %v2482_v35  ;;  %v9005_v35 = vld [vmem:[#allocation133_spill] sm:$0xff] }
 0x64e   :  { %v2488_v10 = vmul.f32 %v9005_v35, %v9005_v35  ;;  %v2805_v60 = vsel %vm1450_vm1, %v2489_v47, 0.0  ;;  %v9011_v47 = vld [vmem:[#allocation84_spill] sm:$0xff] }
 0x64f   :  { %v2797_v52 = vadd.f32 %v2796_v17, %v2795_v44  ;;  %v9006_v17 = vld [vmem:[#allocation139_spill] sm:$0xff] }
 0x650   :  { %v2491_v6 = vmul.f32 %v9006_v17, %v9006_v17  ;;  %v9014_v17 = vld [vmem:[#allocation82_spill] sm:$0xff] }
 0x651   :  { %v2798_v29 = vadd.f32 %v2797_v52, %v2484_v8  ;;  %v9007_v8 = vld [vmem:[#allocation80_spill] sm:$0xff] }
 0x652   :  { %v6676_v52 = vsub.f32 %v9007_v8, %v4474_v30  ;;  %v2808_v46 = vsel %vm1450_vm1, %v2491_v6, 0.0  ;;  %v2238_v6 = vsel %vm1848_vm2, %v6682_v24, 0.0 }
 0x653   :  { %v2800_v3 = vadd.f32 %v2799_v20, %v2798_v29  ;;  %v9008_v29 = vld [vmem:[#allocation137_spill] sm:$0xff] }
 0x654   :  { %v2490_v56 = vmul.f32 %v9008_v29, %v9008_v29  ;;  %v2239_v35 = vsel %vm1851_vm3, %v6676_v52, 0.0 }
 0x655   :  { %v2801_v34 = vadd.f32 %v2800_v3, %v2486_v43  ;;  %v9010_v3 = vld [vmem:[#allocation142_spill] sm:$0xff]  ;;  %v2495_v29 = vmul.f32 %v2239_v35, %v2239_v35 }
 0x657   :  { %v2803_v44 = vadd.f32 %v2802_v14, %v2801_v34  ;;  %v2493_v34 = vmul.f32 %v9010_v3, %v9010_v3  ;;  %v6689_v14 = vsub.f32 %v9011_v47, %v4474_v30  ;;  %v2494_v3 = vmul.f32 %v2238_v6, %v2238_v6  ;;  %v9018_v47 = vld [vmem:[#allocation86_spill] sm:$0xff] }
 0x659   :  { %v2804_v59 = vadd.f32 %v2803_v44, %v2488_v10  ;;  %9012 = vst [vmem:[#allocation8_spill] sm:$0xff] %v6689_v14  ;;  %v9013_v10 = vld [vmem:[#allocation141_spill] sm:$0xff] }
 0x65a   :  { %v2492_v44 = vmul.f32 %v9013_v10, %v9013_v10  ;;  %v6713_v10 = vsub.f32 %v9018_v47, %v4474_v30  ;;  %v9022_v47 = vld [vmem:[#allocation90_spill] sm:$0xff] }
 0x65b   :  { %v2806_v20 = vadd.f32 %v2805_v60, %v2804_v59  ;;  %v6698_v60 = vsub.f32 %v9014_v17, %v4474_v30  ;;  %v9020_v17 = vld [vmem:[#allocation92_spill] sm:$0xff] }
 0x65c   :  { %9019 = vst [vmem:[#allocation13_spill] sm:$0xff] %v6713_v10 }
 0x65d   :  { %v2807_v43 = vadd.f32 %v2806_v20, %v2490_v56  ;;  %9015 = vst [vmem:[#allocation11_spill] sm:$0xff] %v6698_v60  ;;  %v2811_v56 = vsel %vm1450_vm1, %v2493_v34, 0.0  ;;  %v9016_v20 = vld [vmem:[#allocation88_spill] sm:$0xff]  ;;  %v2240_v35 = vsel %vm1848_vm2, %v6698_v60, 0.0 }
 0x65e   :  { %v6706_v19 = vsub.f32 %v9016_v20, %v4474_v30  ;;  %v6721_v20 = vsub.f32 %v9020_v17, %v4474_v30  ;;  %v9024_v17 = vld [vmem:[#allocation96_spill] sm:$0xff] }
 0x65f   :  { %v2809_v59 = vadd.f32 %v2808_v46, %v2807_v43  ;;  %v2241_v43 = vsel %vm1851_vm3, %v6689_v14, 0.0  ;;  %v6728_v14 = vsub.f32 %v9022_v47, %v4474_v30  ;;  %v6736_v60 = vsub.f32 %v9024_v17, %v4474_v30  ;;  %v9026_v47 = vld [vmem:[#allocation94_spill] sm:$0xff]  ;;  %v9028_v17 = vld [vmem:[#allocation100_spill] sm:$0xff] }
 0x660   :  { %9017 = vst [vmem:[#allocation10_spill] sm:$0xff] %v6706_v19  ;;  %v2497_v34 = vmul.f32 %v2241_v43, %v2241_v43  ;;  %9021 = vst [vmem:[#allocation12_spill] sm:$0xff] %v6721_v20  ;;  %v2243_v6 = vsel %vm1851_vm3, %v6706_v19, 0.0  ;;  %v2242_v43 = vsel %vm1848_vm2, %v6713_v10, 0.0  ;;  %v6743_v19 = vsub.f32 %v9026_v47, %v4474_v30  ;;  %v9030_v47 = vld [vmem:[#allocation98_spill] sm:$0xff] }
 0x661   :  { %v2810_v8 = vadd.f32 %v2809_v59, %v2492_v44  ;;  %v2814_v59 = vsel %vm1450_vm1, %v2495_v29, 0.0  ;;  %9023 = vst [vmem:[#allocation15_spill] sm:$0xff] %v6728_v14  ;;  %v2499_v29 = vmul.f32 %v2243_v6, %v2243_v6  ;;  %9025 = vst [vmem:[#allocation14_spill] sm:$0xff] %v6736_v60  ;;  %v2244_v6 = vsel %vm1848_vm2, %v6728_v14, 0.0 }
 0x662   :  { %9027 = vst [vmem:[#allocation17_spill] sm:$0xff] %v6743_v19  ;;  %v6751_v10 = vsub.f32 %v9028_v17, %v4474_v30  ;;  %v9032_v17 = vld [vmem:[#allocation104_spill] sm:$0xff] }
 0x663   :  { %v2812_v46 = vadd.f32 %v2811_v56, %v2810_v8  ;;  %v2496_v8 = vmul.f32 %v2240_v35, %v2240_v35  ;;  %v2245_v35 = vsel %vm1851_vm3, %v6721_v20, 0.0  ;;  %v6758_v20 = vsub.f32 %v9030_v47, %v4474_v30  ;;  %v9034_v47 = vld [vmem:[#allocation102_spill] sm:$0xff] }
 0x664   :  { %9029 = vst [vmem:[#allocation16_spill] sm:$0xff] %v6751_v10  ;;  %v6766_v14 = vsub.f32 %v9032_v17, %v4474_v30  ;;  %v9036_v17 = vld [vmem:[#allocation108_spill] sm:$0xff] }
 0x665   :  { %v2813_v44 = vadd.f32 %v2812_v46, %v2494_v3  ;;  %v2817_v46 = vsel %vm1450_vm1, %v2497_v34, 0.0  ;;  %v2501_v34 = vmul.f32 %v2245_v35, %v2245_v35  ;;  %9031 = vst [vmem:[#allocation19_spill] sm:$0xff] %v6758_v20  ;;  %v2246_v35 = vsel %vm1848_vm2, %v6743_v19, 0.0 }
 0x666   :  { %9033 = vst [vmem:[#allocation18_spill] sm:$0xff] %v6766_v14  ;;  %v6781_v19 = vsub.f32 %v9036_v17, %v4474_v30  ;;  %v9040_v17 = vld [vmem:[#allocation112_spill] sm:$0xff] }
 0x667   :  { %v2815_v56 = vadd.f32 %v2814_v59, %v2813_v44  ;;  %v2498_v44 = vmul.f32 %v2242_v43, %v2242_v43  ;;  %v2247_v43 = vsel %vm1851_vm3, %v6736_v60, 0.0  ;;  %v6773_v60 = vsub.f32 %v9034_v47, %v4474_v30  ;;  %v9038_v47 = vld [vmem:[#allocation106_spill] sm:$0xff] }
 0x668   :  { %9037 = vst [vmem:[#allocation20_spill] sm:$0xff] %v6781_v19 }
 0x669   :  { %v2816_v3 = vadd.f32 %v2815_v56, %v2496_v8  ;;  %v2820_v56 = vsel %vm1450_vm1, %v2499_v29, 0.0  ;;  %v2503_v29 = vmul.f32 %v2247_v43, %v2247_v43  ;;  %9035 = vst [vmem:[#allocation21_spill] sm:$0xff] %v6773_v60  ;;  %v2248_v43 = vsel %vm1848_vm2, %v6758_v20, 0.0 }
 0x66a   :  { %v6796_v20 = vsub.f32 %v9040_v17, %v4474_v30  ;;  %v9044_v17 = vld [vmem:[#allocation116_spill] sm:$0xff] }
 0x66b   :  { %v2818_v59 = vadd.f32 %v2817_v46, %v2816_v3  ;;  %v2500_v3 = vmul.f32 %v2244_v6, %v2244_v6  ;;  %v2249_v6 = vsel %vm1851_vm3, %v6751_v10, 0.0  ;;  %v6788_v10 = vsub.f32 %v9038_v47, %v4474_v30  ;;  %v9042_v47 = vld [vmem:[#allocation110_spill] sm:$0xff] }
 0x66c   :  { %9041 = vst [vmem:[#allocation22_spill] sm:$0xff] %v6796_v20 }
 0x66d   :  { %v2819_v8 = vadd.f32 %v2818_v59, %v2498_v44  ;;  %v2823_v59 = vsel %vm1450_vm1, %v2501_v34, 0.0  ;;  %v2505_v34 = vmul.f32 %v2249_v6, %v2249_v6  ;;  %9039 = vst [vmem:[#allocation23_spill] sm:$0xff] %v6788_v10  ;;  %v2250_v6 = vsel %vm1848_vm2, %v6773_v60, 0.0 }
 0x66e   :  { %v6811_v60 = vsub.f32 %v9044_v17, %v4474_v30  ;;  %v9048_v17 = vld [vmem:[#allocation120_spill] sm:$0xff] }
 0x66f   :  { %v2821_v46 = vadd.f32 %v2820_v56, %v2819_v8  ;;  %v2502_v8 = vmul.f32 %v2246_v35, %v2246_v35  ;;  %v2251_v35 = vsel %vm1851_vm3, %v6766_v14, 0.0  ;;  %v6803_v14 = vsub.f32 %v9042_v47, %v4474_v30  ;;  %v9046_v47 = vld [vmem:[#allocation114_spill] sm:$0xff] }
 0x670   :  { %9045 = vst [vmem:[#allocation24_spill] sm:$0xff] %v6811_v60 }
 0x671   :  { %v2822_v44 = vadd.f32 %v2821_v46, %v2500_v3  ;;  %v2826_v46 = vsel %vm1450_vm1, %v2503_v29, 0.0  ;;  %v2507_v29 = vmul.f32 %v2251_v35, %v2251_v35  ;;  %9043 = vst [vmem:[#allocation25_spill] sm:$0xff] %v6803_v14  ;;  %v2252_v35 = vsel %vm1848_vm2, %v6788_v10, 0.0 }
 0x672   :  { %v6826_v10 = vsub.f32 %v9048_v17, %v4474_v30  ;;  %v9052_v17 = vld [vmem:[#allocation124_spill] sm:$0xff] }
 0x673   :  { %v2824_v56 = vadd.f32 %v2823_v59, %v2822_v44  ;;  %v2504_v44 = vmul.f32 %v2248_v43, %v2248_v43  ;;  %v2253_v43 = vsel %vm1851_vm3, %v6781_v19, 0.0  ;;  %v6818_v19 = vsub.f32 %v9046_v47, %v4474_v30  ;;  %v9050_v47 = vld [vmem:[#allocation118_spill] sm:$0xff] }
 0x674   :  { %9049 = vst [vmem:[#allocation26_spill] sm:$0xff] %v6826_v10 }
 0x675   :  { %v2825_v3 = vadd.f32 %v2824_v56, %v2502_v8  ;;  %v2829_v56 = vsel %vm1450_vm1, %v2505_v34, 0.0  ;;  %v2509_v34 = vmul.f32 %v2253_v43, %v2253_v43  ;;  %9047 = vst [vmem:[#allocation27_spill] sm:$0xff] %v6818_v19  ;;  %v2254_v43 = vsel %vm1848_vm2, %v6803_v14, 0.0 }
 0x676   :  { %v6841_v14 = vsub.f32 %v9052_v17, %v4474_v30  ;;  %v9056_v17 = vld [vmem:[#allocation128_spill] sm:$0xff] }
 0x677   :  { %v2827_v59 = vadd.f32 %v2826_v46, %v2825_v3  ;;  %v2506_v3 = vmul.f32 %v2250_v6, %v2250_v6  ;;  %v2255_v6 = vsel %vm1851_vm3, %v6796_v20, 0.0  ;;  %v6833_v20 = vsub.f32 %v9050_v47, %v4474_v30  ;;  %v9054_v47 = vld [vmem:[#allocation122_spill] sm:$0xff] }
 0x678   :  { %9053 = vst [vmem:[#allocation28_spill] sm:$0xff] %v6841_v14 }
 0x679   :  { %v2828_v8 = vadd.f32 %v2827_v59, %v2504_v44  ;;  %v2832_v59 = vsel %vm1450_vm1, %v2507_v29, 0.0  ;;  %v2511_v29 = vmul.f32 %v2255_v6, %v2255_v6  ;;  %9051 = vst [vmem:[#allocation29_spill] sm:$0xff] %v6833_v20  ;;  %v2256_v6 = vsel %vm1848_vm2, %v6818_v19, 0.0 }
 0x67a   :  { %v6856_v19 = vsub.f32 %v9056_v17, %v4474_v30  ;;  %v9060_v17 = vld [vmem:[#allocation132_spill] sm:$0xff] }
 0x67b   :  { %v2830_v46 = vadd.f32 %v2829_v56, %v2828_v8  ;;  %v2508_v8 = vmul.f32 %v2252_v35, %v2252_v35  ;;  %v2257_v35 = vsel %vm1851_vm3, %v6811_v60, 0.0  ;;  %v6848_v60 = vsub.f32 %v9054_v47, %v4474_v30  ;;  %v9058_v47 = vld [vmem:[#allocation126_spill] sm:$0xff] }
 0x67c   :  { %9057 = vst [vmem:[#allocation30_spill] sm:$0xff] %v6856_v19 }
 0x67d   :  { %v2831_v44 = vadd.f32 %v2830_v46, %v2506_v3  ;;  %v2835_v46 = vsel %vm1450_vm1, %v2509_v34, 0.0  ;;  %v2513_v34 = vmul.f32 %v2257_v35, %v2257_v35  ;;  %9055 = vst [vmem:[#allocation31_spill] sm:$0xff] %v6848_v60  ;;  %v2258_v35 = vsel %vm1848_vm2, %v6833_v20, 0.0 }
 0x67e   :  { %v6871_v20 = vsub.f32 %v9060_v17, %v4474_v30  ;;  %v9064_v17 = vld [vmem:[#allocation136_spill] sm:$0xff] }
 0x67f   :  { %v2833_v56 = vadd.f32 %v2832_v59, %v2831_v44  ;;  %v2510_v44 = vmul.f32 %v2254_v43, %v2254_v43  ;;  %v2259_v43 = vsel %vm1851_vm3, %v6826_v10, 0.0  ;;  %v6863_v10 = vsub.f32 %v9058_v47, %v4474_v30  ;;  %v9062_v47 = vld [vmem:[#allocation130_spill] sm:$0xff] }
 0x680   :  { %9061 = vst [vmem:[#allocation32_spill] sm:$0xff] %v6871_v20 }
 0x681   :  { %v2834_v3 = vadd.f32 %v2833_v56, %v2508_v8  ;;  %v2838_v56 = vsel %vm1450_vm1, %v2511_v29, 0.0  ;;  %v2515_v29 = vmul.f32 %v2259_v43, %v2259_v43  ;;  %9059 = vst [vmem:[#allocation33_spill] sm:$0xff] %v6863_v10  ;;  %v2260_v43 = vsel %vm1848_vm2, %v6848_v60, 0.0 }
 0x682   :  { %v6886_v60 = vsub.f32 %v9064_v17, %v4474_v30  ;;  %v9068_v17 = vld [vmem:[#allocation140_spill] sm:$0xff] }
 0x683   :  { %v2836_v59 = vadd.f32 %v2835_v46, %v2834_v3  ;;  %v2512_v3 = vmul.f32 %v2256_v6, %v2256_v6  ;;  %v2261_v6 = vsel %vm1851_vm3, %v6841_v14, 0.0  ;;  %v6878_v14 = vsub.f32 %v9062_v47, %v4474_v30  ;;  %v9066_v47 = vld [vmem:[#allocation134_spill] sm:$0xff] }
 0x684   :  { %9065 = vst [vmem:[#allocation34_spill] sm:$0xff] %v6886_v60 }
 0x685   :  { %v2837_v8 = vadd.f32 %v2836_v59, %v2510_v44  ;;  %v2841_v59 = vsel %vm1450_vm1, %v2513_v34, 0.0  ;;  %v2517_v34 = vmul.f32 %v2261_v6, %v2261_v6  ;;  %9063 = vst [vmem:[#allocation35_spill] sm:$0xff] %v6878_v14  ;;  %v2262_v6 = vsel %vm1848_vm2, %v6863_v10, 0.0 }
 0x686   :  { %v6901_v10 = vsub.f32 %v9068_v17, %v4474_v30 }
 0x687   :  { %v2839_v46 = vadd.f32 %v2838_v56, %v2837_v8  ;;  %v2514_v8 = vmul.f32 %v2258_v35, %v2258_v35  ;;  %v2263_v35 = vsel %vm1851_vm3, %v6856_v19, 0.0  ;;  %v6893_v19 = vsub.f32 %v9066_v47, %v4474_v30  ;;  %v9070_v47 = vld [vmem:[#allocation138_spill] sm:$0xff] }
 0x688   :  { %9069 = vst [vmem:[#allocation36_spill] sm:$0xff] %v6901_v10  ;;  %v2269_v17 = vsel %vm1851_vm3, %v6901_v10, 0.0  ;;  %v9073_v10 = vld [vmem:[#allocation149_spill] sm:$0xff] }
 0x689   :  { %v2840_v44 = vadd.f32 %v2839_v46, %v2512_v3  ;;  %v2844_v46 = vsel %vm1450_vm1, %v2515_v29, 0.0  ;;  %v2519_v29 = vmul.f32 %v2263_v35, %v2263_v35  ;;  %9067 = vst [vmem:[#allocation37_spill] sm:$0xff] %v6893_v19  ;;  %v2264_v35 = vsel %vm1848_vm2, %v6878_v14, 0.0 }
 0x68a   :  { %v2529_v62 = vmul.f32 %v9073_v10, %v9073_v10  ;;  %v2533_v10 = vmul.f32 %v5582_v63, %v5582_v63  ;;  %v2537_v63 = vmul.f32 %v5610_v12, %v5610_v12 }
 0x68b   :  { %v2842_v56 = vadd.f32 %v2841_v59, %v2840_v44  ;;  %v2516_v44 = vmul.f32 %v2260_v43, %v2260_v43  ;;  %v2265_v43 = vsel %vm1851_vm3, %v6871_v20, 0.0  ;;  %v6908_v20 = vsub.f32 %v9070_v47, %v4474_v30 }
 0x68d   :  { %v2843_v3 = vadd.f32 %v2842_v56, %v2514_v8  ;;  %v2847_v56 = vsel %vm1450_vm1, %v2517_v34, 0.0  ;;  %v2521_v34 = vmul.f32 %v2265_v43, %v2265_v43  ;;  %v2266_v43 = vsel %vm1848_vm2, %v6893_v19, 0.0 }
 0x68e   :  { %v2522_v14 = vmul.f32 %v2266_v43, %v2266_v43  ;;  %v2526_v43 = vmul.f32 %v9072_v45, %v9072_v45 }
 0x68f   :  { %v2845_v59 = vadd.f32 %v2844_v46, %v2843_v3  ;;  %v2518_v3 = vmul.f32 %v2262_v6, %v2262_v6  ;;  %v2267_v6 = vsel %vm1851_vm3, %v6886_v60, 0.0 }
 0x691   :  { %v2846_v8 = vadd.f32 %v2845_v59, %v2516_v44  ;;  %v2850_v59 = vsel %vm1450_vm1, %v2519_v29, 0.0  ;;  %v2523_v29 = vmul.f32 %v2267_v6, %v2267_v6  ;;  %v9071_v6 = vld [vmem:[#allocation145_spill] sm:$0xff] }
 0x693   :  { %v2848_v46 = vadd.f32 %v2847_v56, %v2846_v8  ;;  %v2520_v8 = vmul.f32 %v2264_v35, %v2264_v35  ;;  %v2268_v35 = vsel %vm1848_vm2, %v6908_v20, 0.0 }
 0x694   :  { %v2524_v47 = vmul.f32 %v2268_v35, %v2268_v35  ;;  %v9075_v35 = vld [vmem:[#allocation153_spill] sm:$0xff] }
 0x695   :  { %v2849_v44 = vadd.f32 %v2848_v46, %v2518_v3  ;;  %v2853_v46 = vsel %vm1450_vm1, %v2521_v34, 0.0  ;;  %v2527_v34 = vmul.f32 %v9071_v6, %v9071_v6 }
 0x697   :  { %v2851_v56 = vadd.f32 %v2850_v59, %v2849_v44  ;;  %v2525_v44 = vmul.f32 %v2269_v17, %v2269_v17  ;;  %v2856_v59 = vsel %vm1450_vm1, %v2523_v29, 0.0 }
 0x699   :  { %v2852_v3 = vadd.f32 %v2851_v56, %v2520_v8  ;;  %v2859_v56 = vsel %vm1450_vm1, %v2525_v44, 0.0  ;;  %v2865_v44 = vsel %vm1450_vm1, %v2529_v62, 0.0  ;;  %v2871_v62 = vsel %vm1450_vm1, %v2533_v10, 0.0 }
 0x69b   :  { %v2854_v60 = vadd.f32 %v2853_v46, %v2852_v3 }
 0x69d   :  { %v2855_v30 = vadd.f32 %v2854_v60, %v2522_v14  ;;  %v2862_v14 = vsel %vm1450_vm1, %v2527_v34, 0.0  ;;  %v9074_v60 = vld [vmem:[#allocation147_spill] sm:$0xff] }
 0x69e   :  { %v2528_v29 = vmul.f32 %v9074_v60, %v9074_v60 }
 0x69f   :  { %v2857_v19 = vadd.f32 %v2856_v59, %v2855_v30  ;;  %v2531_v30 = vmul.f32 %v9075_v35, %v9075_v35  ;;  %v9076_v59 = vld [vmem:[#allocation151_spill] sm:$0xff] }
 0x6a1   :  { %v2858_v8 = vadd.f32 %v2857_v19, %v2524_v47  ;;  %v2530_v47 = vmul.f32 %v9076_v59, %v9076_v59  ;;  %v2868_v34 = vsel %vm1450_vm1, %v2531_v30, 0.0  ;;  %v9079_v59 = vld [vmem:[#allocation161_spill] sm:$0xff] }
 0x6a3   :  { %v2860_v3 = vadd.f32 %v2859_v56, %v2858_v8  ;;  %v9077_v56 = vld [vmem:[#allocation155_spill] sm:$0xff] }
 0x6a4   :  { %v2532_v45 = vmul.f32 %v9077_v56, %v9077_v56 }
 0x6a5   :  { %v2861_v46 = vadd.f32 %v2860_v3, %v2526_v43 }
 0x6a7   :  { %v2863_v17 = vadd.f32 %v2862_v14, %v2861_v46  ;;  %v2535_v46 = vmul.f32 %v5596_v53, %v5596_v53  ;;  %v2534_v14 = vmul.f32 %v5589_v38, %v5589_v38  ;;  %v2539_v53 = vmul.f32 %v9079_v59, %v9079_v59 }
 0x6a9   :  { %v2864_v19 = vadd.f32 %v2863_v17, %v2528_v29  ;;  %v2874_v17 = vsel %vm1450_vm1, %v2535_v46, 0.0  ;;  %v2880_v56 = vsel %vm1450_vm1, %v2539_v53, 0.0 }
 0x6ab   :  { %v2866_v8 = vadd.f32 %v2865_v44, %v2864_v19  ;;  %v9078_v19 = vld [vmem:[#allocation157_spill] sm:$0xff] }
 0x6ac   :  { %v2536_v35 = vmul.f32 %v9078_v19, %v9078_v19  ;;  %v2545_v19 = vmul.f32 %v5666_v4, %v5666_v4  ;;  %v2549_v4 = vmul.f32 %v5694_v28, %v5694_v28  ;;  %v2553_v28 = vmul.f32 %v5722_v0, %v5722_v0 }
 0x6ad   :  { %v2867_v6 = vadd.f32 %v2866_v8, %v2530_v47  ;;  %v2877_v47 = vsel %vm1450_vm1, %v2537_v63, 0.0  ;;  %v9080_v8 = vld [vmem:[#allocation159_spill] sm:$0xff]  ;;  %v2557_v0 = vmul.f32 %v5750_v2, %v5750_v2  ;;  %v2561_v2 = vmul.f32 %v5778_v33, %v5778_v33 }
 0x6ae   :  { %v2538_v38 = vmul.f32 %v9080_v8, %v9080_v8  ;;  %v9085_v8 = vld [vmem:[#allocation171_spill] sm:$0xff]  ;;  %v2565_v33 = vmul.f32 %v5806_v5, %v5806_v5  ;;  %v2569_v5 = vmul.f32 %v5834_v16, %v5834_v16  ;;  %v2573_v16 = vmul.f32 %v5862_v49, %v5862_v49 }
 0x6af   :  { %v2869_v43 = vadd.f32 %v2868_v34, %v2867_v6  ;;  %v9081_v34 = vld [vmem:[#allocation165_spill] sm:$0xff]  ;;  %v2577_v49 = vmul.f32 %v5890_v37, %v5890_v37  ;;  %v2581_v37 = vmul.f32 %v5918_v55, %v5918_v55  ;;  %v2585_v55 = vmul.f32 %v5946_v1, %v5946_v1 }
 0x6b0   :  { %v2541_v12 = vmul.f32 %v9081_v34, %v9081_v34  ;;  %v2589_v1 = vmul.f32 %v5974_v41, %v5974_v41  ;;  %v2593_v41 = vmul.f32 %v6002_v21, %v6002_v21 }
 0x6b1   :  { %v2870_v3 = vadd.f32 %v2869_v43, %v2532_v45  ;;  %v9082_v45 = vld [vmem:[#allocation163_spill] sm:$0xff] }
 0x6b2   :  { %v2540_v43 = vmul.f32 %v9082_v45, %v9082_v45 }
 0x6b3   :  { %v2872_v60 = vadd.f32 %v2871_v62, %v2870_v3  ;;  %v2543_v62 = vmul.f32 %v5652_v25, %v5652_v25  ;;  %v2547_v25 = vmul.f32 %v5680_v58, %v5680_v58  ;;  %v2551_v58 = vmul.f32 %v5708_v18, %v5708_v18 }
 0x6b4   :  { %v2555_v18 = vmul.f32 %v5736_v26, %v5736_v26  ;;  %v2559_v26 = vmul.f32 %v5764_v15, %v5764_v15  ;;  %v2563_v15 = vmul.f32 %v5792_v42, %v5792_v42  ;;  %v2567_v42 = vmul.f32 %v5820_v48, %v5820_v48 }
 0x6b5   :  { %v2873_v29 = vadd.f32 %v2872_v60, %v2534_v14  ;;  %v2883_v14 = vsel %vm1450_vm1, %v2541_v12, 0.0  ;;  %v9083_v60 = vld [vmem:[#allocation167_spill] sm:$0xff]  ;;  %v2892_v34 = vsel %vm1450_vm1, %v2547_v25, 0.0  ;;  %v9086_v12 = vld [vmem:[#allocation173_spill] sm:$0xff]  ;;  %v2571_v48 = vmul.f32 %v5848_v27, %v5848_v27 }
 0x6b6   :  { %v2575_v27 = vmul.f32 %v5876_v32, %v5876_v32  ;;  %v2579_v32 = vmul.f32 %v5904_v40, %v5904_v40  ;;  %v2583_v40 = vmul.f32 %v5932_v54, %v5932_v54  ;;  %v2587_v54 = vmul.f32 %v5960_v7, %v5960_v7 }
 0x6b7   :  { %v2875_v30 = vadd.f32 %v2874_v17, %v2873_v29  ;;  %v2542_v29 = vmul.f32 %v9083_v60, %v9083_v60  ;;  %v2591_v7 = vmul.f32 %v5988_v23, %v5988_v23  ;;  %v2595_v23 = vmul.f32 %v6016_v22, %v6016_v22 }
 0x6b9   :  { %v2876_v44 = vadd.f32 %v2875_v30, %v2536_v35  ;;  %v2886_v35 = vsel %vm1450_vm1, %v2543_v62, 0.0  ;;  %v9084_v30 = vld [vmem:[#allocation169_spill] sm:$0xff] }
 0x6bb   :  { %v2878_v6 = vadd.f32 %v2877_v47, %v2876_v44  ;;  %v2544_v44 = vmul.f32 %v9084_v30, %v9084_v30  ;;  %v2889_v47 = vsel %vm1450_vm1, %v2545_v19, 0.0  ;;  %v2901_v30 = vsel %vm1450_vm1, %v2553_v28, 0.0 }
 0x6bd   :  { %v2879_v10 = vadd.f32 %v2878_v6, %v2538_v38  ;;  %v2546_v38 = vmul.f32 %v9085_v8, %v9085_v8  ;;  %v9090_v8 = vld [vmem:[#allocation183_spill] sm:$0xff] }
 0x6bf   :  { %v2881_v3 = vadd.f32 %v2880_v56, %v2879_v10  ;;  %v2548_v56 = vmul.f32 %v9086_v12, %v9086_v12 }
 0x6c1   :  { %v2882_v46 = vadd.f32 %v2881_v3, %v2540_v43  ;;  %v2895_v3 = vsel %vm1450_vm1, %v2549_v4, 0.0  ;;  %v2907_v4 = vsel %vm1450_vm1, %v2557_v0, 0.0 }
 0x6c3   :  { %v2884_v63 = vadd.f32 %v2883_v14, %v2882_v46  ;;  %v9087_v46 = vld [vmem:[#allocation175_spill] sm:$0xff] }
 0x6c4   :  { %v2550_v62 = vmul.f32 %v9087_v46, %v9087_v46 }
 0x6c5   :  { %v2885_v17 = vadd.f32 %v2884_v63, %v2542_v29  ;;  %v2898_v29 = vsel %vm1450_vm1, %v2551_v58, 0.0  ;;  %v9088_v63 = vld [vmem:[#allocation177_spill] sm:$0xff]  ;;  %v9092_v58 = vld [vmem:[#allocation64_spill] sm:$0xff] }
 0x6c7   :  { %v2887_v59 = vadd.f32 %v2886_v35, %v2885_v17  ;;  %v2552_v17 = vmul.f32 %v9088_v63, %v9088_v63 }
 0x6c9   :  { %v2888_v53 = vadd.f32 %v2887_v59, %v2544_v44  ;;  %v9089_v44 = vld [vmem:[#allocation179_spill] sm:$0xff] }
 0x6ca   :  { %v2554_v59 = vmul.f32 %v9089_v44, %v9089_v44  ;;  %v2919_v44 = vsel %vm1450_vm1, %v2565_v33, 0.0 }
 0x6cb   :  { %v2890_v6 = vadd.f32 %v2889_v47, %v2888_v53  ;;  %v2904_v47 = vsel %vm1450_vm1, %v2555_v18, 0.0 }
 0x6cd   :  { %v2891_v10 = vadd.f32 %v2890_v6, %v2546_v38  ;;  %v2556_v38 = vmul.f32 %v9090_v8, %v9090_v8  ;;  %v9096_v8 = vld [vmem:[#allocation225_spill] sm:$0xff] }
 0x6cf   :  { %v2893_v45 = vadd.f32 %v2892_v34, %v2891_v10  ;;  %v9091_v34 = vld [vmem:[#allocation60_spill] sm:$0xff] }
 0x6d0   :  { %v2558_v12 = vmul.f32 %v9091_v34, %v9091_v34 }
 0x6d1   :  { %v2894_v43 = vadd.f32 %v2893_v45, %v2548_v56 }
 0x6d3   :  { %v2896_v14 = vadd.f32 %v2895_v3, %v2894_v43  ;;  %v2910_v43 = vsel %vm1450_vm1, %v2559_v26, 0.0  ;;  %v2560_v3 = vmul.f32 %v9092_v58, %v9092_v58  ;;  %v2925_v26 = vsel %vm1450_vm1, %v2569_v5, 0.0 }
 0x6d5   :  { %v2897_v60 = vadd.f32 %v2896_v14, %v2550_v62  ;;  %v2913_v14 = vsel %vm1450_vm1, %v2561_v2, 0.0  ;;  %v9098_v2 = vld [vmem:[#allocation227_spill] sm:$0xff] }
 0x6d7   :  { %v2899_v19 = vadd.f32 %v2898_v29, %v2897_v60  ;;  %v9093_v60 = vld [vmem:[#allocation222_spill] sm:$0xff] }
 0x6d8   :  { %v2562_v28 = vmul.f32 %v9093_v60, %v9093_v60 }
 0x6d9   :  { %v2900_v35 = vadd.f32 %v2899_v19, %v2552_v17  ;;  %v2916_v17 = vsel %vm1450_vm1, %v2563_v15, 0.0  ;;  %v9094_v19 = vld [vmem:[#allocation223_spill] sm:$0xff] }
 0x6db   :  { %v2902_v53 = vadd.f32 %v2901_v30, %v2900_v35  ;;  %v2564_v35 = vmul.f32 %v9094_v19, %v9094_v19  ;;  %v2937_v19 = vsel %vm1450_vm1, %v2577_v49, 0.0  ;;  %v9103_v49 = vld [vmem:[#allocation233_spill] sm:$0xff] }
 0x6dc   :  { %v2599_v22 = vmul.f32 %v9103_v49, %v9103_v49 }
 0x6dd   :  { %v2903_v25 = vadd.f32 %v2902_v53, %v2554_v59  ;;  %v9095_v59 = vld [vmem:[#allocation224_spill] sm:$0xff] }
 0x6de   :  { %v2566_v53 = vmul.f32 %v9095_v59, %v9095_v59 }
 0x6df   :  { %v2905_v6 = vadd.f32 %v2904_v47, %v2903_v25  ;;  %v2922_v47 = vsel %vm1450_vm1, %v2567_v42, 0.0  ;;  %v2940_v42 = vsel %vm1450_vm1, %v2579_v32, 0.0 }
 0x6e1   :  { %v2906_v10 = vadd.f32 %v2905_v6, %v2556_v38  ;;  %v2568_v38 = vmul.f32 %v9096_v8, %v9096_v8 }
 0x6e3   :  { %v2908_v56 = vadd.f32 %v2907_v4, %v2906_v10  ;;  %v9097_v4 = vld [vmem:[#allocation226_spill] sm:$0xff] }
 0x6e4   :  { %v2570_v34 = vmul.f32 %v9097_v4, %v9097_v4 }
 0x6e5   :  { %v2909_v45 = vadd.f32 %v2908_v56, %v2558_v12 }
 0x6e7   :  { %v2911_v46 = vadd.f32 %v2910_v43, %v2909_v45  ;;  %v2928_v45 = vsel %vm1450_vm1, %v2571_v48, 0.0  ;;  %v2572_v43 = vmul.f32 %v9098_v2, %v9098_v2 }
 0x6e9   :  { %v2912_v62 = vadd.f32 %v2911_v46, %v2560_v3  ;;  %v2931_v46 = vsel %vm1450_vm1, %v2573_v16, 0.0 }
 0x6eb   :  { %v2914_v29 = vadd.f32 %v2913_v14, %v2912_v62  ;;  %v9099_v62 = vld [vmem:[#allocation228_spill] sm:$0xff] }
 0x6ec   :  { %v2574_v15 = vmul.f32 %v9099_v62, %v9099_v62  ;;  %v2964_v62 = vsel %vm1450_vm1, %v2595_v23, 0.0 }
 0x6ed   :  { %v2915_v63 = vadd.f32 %v2914_v29, %v2562_v28  ;;  %v2934_v28 = vsel %vm1450_vm1, %v2575_v27, 0.0  ;;  %v9100_v29 = vld [vmem:[#allocation229_spill] sm:$0xff] }
 0x6ef   :  { %v2917_v18 = vadd.f32 %v2916_v17, %v2915_v63  ;;  %v2576_v63 = vmul.f32 %v9100_v29, %v9100_v29  ;;  %v9104_v29 = vld [vmem:[#allocation232_spill] sm:$0xff] }
 0x6f1   :  { %v2918_v30 = vadd.f32 %v2917_v18, %v2564_v35  ;;  %v2578_v35 = vmul.f32 %v5897_v57, %v5897_v57  ;;  %v2582_v57 = vmul.f32 %v5925_v61, %v5925_v61  ;;  %v2586_v61 = vmul.f32 %v5953_v36, %v5953_v36 }
 0x6f2   :  { %v2590_v36 = vmul.f32 %v5981_v50, %v5981_v50  ;;  %v2594_v50 = vmul.f32 %v6009_v9, %v6009_v9  ;;  %v2598_v9 = vmul.f32 %v9104_v29, %v9104_v29  ;;  %v9121_v29 = vld [vmem:[#allocation162_spill] sm:$0xff] }
 0x6f3   :  { %v2920_v25 = vadd.f32 %v2919_v44, %v2918_v30  ;;  %v2580_v44 = vmul.f32 %v5911_v51, %v5911_v51  ;;  %v2584_v51 = vmul.f32 %v5939_v13, %v5939_v13  ;;  %v2588_v13 = vmul.f32 %v5967_v11, %v5967_v11 }
 0x6f4   :  { %v2592_v11 = vmul.f32 %v5995_v39, %v5995_v39 }
 0x6f5   :  { %v2921_v0 = vadd.f32 %v2920_v25, %v2566_v53  ;;  %v2943_v25 = vsel %vm1450_vm1, %v2581_v37, 0.0 }
 0x6f7   :  { %v2923_v6 = vadd.f32 %v2922_v47, %v2921_v0  ;;  %v2946_v47 = vsel %vm1450_vm1, %v2583_v40, 0.0 }
 0x6f9   :  { %v2924_v10 = vadd.f32 %v2923_v6, %v2568_v38  ;;  %v2949_v6 = vsel %vm1450_vm1, %v2585_v55, 0.0 }
 0x6fb   :  { %v2926_v12 = vadd.f32 %v2925_v26, %v2924_v10  ;;  %v2952_v26 = vsel %vm1450_vm1, %v2587_v54, 0.0  ;;  %v9111_v54 = vld [vmem:[#allocation251_spill] sm:$0xff] }
 0x6fd   :  { %v2927_v56 = vadd.f32 %v2926_v12, %v2570_v34  ;;  %v2955_v12 = vsel %vm1450_vm1, %v2589_v1, 0.0 }
 0x6ff   :  { %v2929_v58 = vadd.f32 %v2928_v45, %v2927_v56  ;;  %v2958_v45 = vsel %vm1450_vm1, %v2591_v7, 0.0  ;;  %v9114_v7 = vld [vmem:[#allocation252_spill] sm:$0xff] }
 0x701   :  { %v2930_v3 = vadd.f32 %v2929_v58, %v2572_v43  ;;  %v2961_v58 = vsel %vm1450_vm1, %v2593_v41, 0.0 }
 0x703   :  { %v2932_v14 = vadd.f32 %v2931_v46, %v2930_v3  ;;  %v9101_v46 = vld [vmem:[#allocation231_spill] sm:$0xff] }
 0x704   :  { %v2597_v21 = vmul.f32 %v9101_v46, %v9101_v46 }
 0x705   :  { %v2933_v60 = vadd.f32 %v2932_v14, %v2574_v15  ;;  %v9102_v15 = vld [vmem:[#allocation230_spill] sm:$0xff] }
 0x706   :  { %v2596_v39 = vmul.f32 %v9102_v15, %v9102_v15  ;;  %v9119_v15 = vld [vmem:[#allocation156_spill] sm:$0xff] }
 0x707   :  { %v2935_v33 = vadd.f32 %v2934_v28, %v2933_v60  ;;  %v2967_v28 = vsel %vm1450_vm1, %v2597_v21, 0.0 }
 0x709   :  { %v2936_v17 = vadd.f32 %v2935_v33, %v2576_v63 }
 0x70b   :  { %v2938_v18 = vadd.f32 %v2937_v19, %v2936_v17  ;;  %v9105_v17 = vld [vmem:[#allocation235_spill] sm:$0xff]  ;;  %v2970_v19 = vsel %vm1450_vm1, %v2599_v22, 0.0 }
 0x70c   :  { %v2601_v32 = vmul.f32 %v9105_v17, %v9105_v17 }
 0x70d   :  { %v2939_v30 = vadd.f32 %v2938_v18, %v2578_v35  ;;  %v9106_v35 = vld [vmem:[#allocation234_spill] sm:$0xff] }
 0x70e   :  { %v2600_v18 = vmul.f32 %v9106_v35, %v9106_v35  ;;  %v9123_v35 = vld [vmem:[#allocation172_spill] sm:$0xff] }
 0x70f   :  { %v2941_v59 = vadd.f32 %v2940_v42, %v2939_v30  ;;  %v9107_v42 = vld [vmem:[#allocation247_spill] sm:$0xff] }
 0x711   :  { %v2942_v53 = vadd.f32 %v2941_v59, %v2580_v44  ;;  %v2603_v44 = vmul.f32 %v9107_v42, %v9107_v42  ;;  %v2973_v59 = vsel %vm1450_vm1, %v2601_v32, 0.0 }
 0x713   :  { %v2944_v0 = vadd.f32 %v2943_v25, %v2942_v53  ;;  %v9108_v53 = vld [vmem:[#allocation236_spill] sm:$0xff]  ;;  %v2976_v55 = vsel %vm1450_vm1, %v2603_v44, 0.0 }
 0x714   :  { %v2602_v40 = vmul.f32 %v9108_v53, %v9108_v53  ;;  %v9125_v53 = vld [vmem:[#allocation176_spill] sm:$0xff] }
 0x715   :  { %v2945_v5 = vadd.f32 %v2944_v0, %v2582_v57  ;;  %v9109_v0 = vld [vmem:[#allocation249_spill] sm:$0xff] }
 0x717   :  { %v2947_v8 = vadd.f32 %v2946_v47, %v2945_v5  ;;  %v2605_v5 = vmul.f32 %v9109_v0, %v9109_v0  ;;  %v9110_v47 = vld [vmem:[#allocation248_spill] sm:$0xff] }
 0x719   :  { %v2948_v38 = vadd.f32 %v2947_v8, %v2584_v51  ;;  %v2604_v51 = vmul.f32 %v9110_v47, %v9110_v47 }
 0x71b   :  { %v2950_v10 = vadd.f32 %v2949_v6, %v2948_v38  ;;  %v2607_v6 = vmul.f32 %v9111_v54, %v9111_v54 }
 0x71d   :  { %v2951_v48 = vadd.f32 %v2950_v10, %v2586_v61  ;;  %v2979_v61 = vsel %vm1450_vm1, %v2605_v5, 0.0  ;;  %v9112_v10 = vld [vmem:[#allocation250_spill] sm:$0xff] }
 0x71f   :  { %v2953_v4 = vadd.f32 %v2952_v26, %v2951_v48  ;;  %v2606_v48 = vmul.f32 %v9112_v10, %v9112_v10 }
 0x721   :  { %v2954_v34 = vadd.f32 %v2953_v4, %v2588_v13  ;;  %v9113_v13 = vld [vmem:[#allocation144_spill] sm:$0xff] }
 0x722   :  { %v2609_v4 = vmul.f32 %v9113_v13, %v9113_v13 }
 0x723   :  { %v2956_v56 = vadd.f32 %v2955_v12, %v2954_v34  ;;  %v2982_v34 = vsel %vm1450_vm1, %v2607_v6, 0.0  ;;  %v2608_v12 = vmul.f32 %v9114_v7, %v9114_v7 }
 0x725   :  { %v2957_v16 = vadd.f32 %v2956_v56, %v2590_v36 }
 0x727   :  { %v2959_v2 = vadd.f32 %v2958_v45, %v2957_v16  ;;  %v9115_v16 = vld [vmem:[#allocation148_spill] sm:$0xff]  ;;  %v2985_v45 = vsel %vm1450_vm1, %v2609_v4, 0.0 }
 0x728   :  { %v2611_v41 = vmul.f32 %v9115_v16, %v9115_v16  ;;  %v9127_v16 = vld [vmem:[#allocation182_spill] sm:$0xff] }
 0x729   :  { %v2960_v43 = vadd.f32 %v2959_v2, %v2592_v11  ;;  %v9116_v11 = vld [vmem:[#allocation146_spill] sm:$0xff] }
 0x72a   :  { %v2610_v2 = vmul.f32 %v9116_v11, %v9116_v11 }
 0x72b   :  { %v2962_v3 = vadd.f32 %v2961_v58, %v2960_v43  ;;  %v9117_v58 = vld [vmem:[#allocation152_spill] sm:$0xff] }
 0x72d   :  { %v2963_v27 = vadd.f32 %v2962_v3, %v2594_v50  ;;  %v2613_v50 = vmul.f32 %v9117_v58, %v9117_v58  ;;  %v2988_v3 = vsel %vm1450_vm1, %v2611_v41, 0.0 }
 0x72f   :  { %v2965_v14 = vadd.f32 %v2964_v62, %v2963_v27  ;;  %v9118_v27 = vld [vmem:[#allocation150_spill] sm:$0xff] }
 0x730   :  { %v2612_v46 = vmul.f32 %v9118_v27, %v9118_v27  ;;  %v9132_v27 = vld [vmem:[#allocation189_spill] sm:$0xff] }
 0x731   :  { %v2966_v60 = vadd.f32 %v2965_v14, %v2596_v39  ;;  %v2615_v39 = vmul.f32 %v9119_v15, %v9119_v15  ;;  %v2991_v14 = vsel %vm1450_vm1, %v2613_v50, 0.0  ;;  %v9131_v50 = vld [vmem:[#allocation191_spill] sm:$0xff]  ;;  %v9134_v15 = vld [vmem:[#allocation193_spill] sm:$0xff] }
 0x733   :  { %v2968_v63 = vadd.f32 %v2967_v28, %v2966_v60  ;;  %v9120_v60 = vld [vmem:[#allocation154_spill] sm:$0xff] }
 0x734   :  { %v2614_v49 = vmul.f32 %v9120_v60, %v9120_v60 }
 0x735   :  { %v2969_v33 = vadd.f32 %v2968_v63, %v2598_v9  ;;  %v2617_v9 = vmul.f32 %v9121_v29, %v9121_v29  ;;  %v2994_v63 = vsel %vm1450_vm1, %v2615_v39, 0.0 }
 0x737   :  { %v2971_v30 = vadd.f32 %v2970_v19, %v2969_v33  ;;  %v9122_v33 = vld [vmem:[#allocation158_spill] sm:$0xff] }
 0x738   :  { %v2616_v17 = vmul.f32 %v9122_v33, %v9122_v33  ;;  %v9139_v33 = vld [vmem:[#allocation207_spill] sm:$0xff] }
 0x739   :  { %v2972_v37 = vadd.f32 %v2971_v30, %v2600_v18  ;;  %v2619_v18 = vmul.f32 %v9123_v35, %v9123_v35  ;;  %v2997_v30 = vsel %vm1450_vm1, %v2617_v9, 0.0  ;;  %v9138_v9 = vld [vmem:[#allocation201_spill] sm:$0xff]  ;;  %v9141_v35 = vld [vmem:[#allocation211_spill] sm:$0xff] }
 0x73b   :  { %v2974_v25 = vadd.f32 %v2973_v59, %v2972_v37  ;;  %v9124_v37 = vld [vmem:[#allocation170_spill] sm:$0xff] }
 0x73c   :  { %v2618_v42 = vmul.f32 %v9124_v37, %v9124_v37 }
 0x73d   :  { %v2975_v57 = vadd.f32 %v2974_v25, %v2602_v40  ;;  %v2621_v40 = vmul.f32 %v9125_v53, %v9125_v53  ;;  %v3000_v25 = vsel %vm1450_vm1, %v2619_v18, 0.0 }
 0x73f   :  { %v2977_v8 = vadd.f32 %v2976_v55, %v2975_v57  ;;  %v9126_v57 = vld [vmem:[#allocation174_spill] sm:$0xff]  ;;  %v3003_v47 = vsel %vm1450_vm1, %v2621_v40, 0.0  ;;  %v9145_v40 = vld [vmem:[#allocation237_spill] sm:$0xff] }
 0x740   :  { %v2620_v0 = vmul.f32 %v9126_v57, %v9126_v57  ;;  %v9146_v57 = vld [vmem:[#allocation217_spill] sm:$0xff] }
 0x741   :  { %v2978_v38 = vadd.f32 %v2977_v8, %v2604_v51 }
 0x743   :  { %v2980_v1 = vadd.f32 %v2979_v61, %v2978_v38 }
 0x745   :  { %v2981_v26 = vadd.f32 %v2980_v1, %v2606_v48 }
 0x747   :  { %v2983_v36 = vadd.f32 %v2982_v34, %v2981_v26 }
 0x749   :  { %v2984_v56 = vadd.f32 %v2983_v36, %v2608_v12 }
 0x74b   :  { %v2986_v43 = vadd.f32 %v2985_v45, %v2984_v56  ;;  %v9128_v45 = vld [vmem:[#allocation178_spill] sm:$0xff] }
 0x74d   :  { %v2987_v23 = vadd.f32 %v2986_v43, %v2610_v2  ;;  %v9129_v2 = vld [vmem:[#allocation187_spill] sm:$0xff] }
 0x74f   :  { %v2989_v21 = vadd.f32 %v2988_v3, %v2987_v23  ;;  %v9130_v23 = vld [vmem:[#allocation185_spill] sm:$0xff] }
 0x751   :  { %v2990_v62 = vadd.f32 %v2989_v21, %v2612_v46  ;;  %v9133_v21 = vld [vmem:[#allocation195_spill] sm:$0xff] }
 0x753   :  { %v2992_v22 = vadd.f32 %v2991_v14, %v2990_v62  ;;  %v9135_v14 = vld [vmem:[#allocation199_spill] sm:$0xff] }
 0x755   :  { %v2993_v28 = vadd.f32 %v2992_v22, %v2614_v49  ;;  %v9136_v49 = vld [vmem:[#allocation197_spill] sm:$0xff] }
 0x757   :  { %v2995_v32 = vadd.f32 %v2994_v63, %v2993_v28  ;;  %v9137_v28 = vld [vmem:[#allocation203_spill] sm:$0xff] }
 0x759   :  { %v2996_v19 = vadd.f32 %v2995_v32, %v2616_v17  ;;  %v9140_v32 = vld [vmem:[#allocation205_spill] sm:$0xff] }
 0x75b   :  { %v2998_v44 = vadd.f32 %v2997_v30, %v2996_v19  ;;  %v9142_v30 = vld [vmem:[#allocation209_spill] sm:$0xff] }
 0x75d   :  { %v2999_v59 = vadd.f32 %v2998_v44, %v2618_v42  ;;  %v9143_v42 = vld [vmem:[#allocation215_spill] sm:$0xff] }
 0x75f   :  { %v3001_v5 = vadd.f32 %v3000_v25, %v2999_v59  ;;  %v9144_v59 = vld [vmem:[#allocation213_spill] sm:$0xff] }
 0x761   :  { %v3002_v55 = vadd.f32 %v3001_v5, %v2620_v0  ;;  %v9147_v5 = vld [vmem:[#allocation239_spill] sm:$0xff] }
 0x763   :  { %v3004_v51 = vadd.f32 %v3003_v47, %v3002_v55  ;;  %v9148_v47 = vld [vmem:[#allocation238_spill] sm:$0xff] }
 0x765   :  { %3005 = vadd.xlane.f32.xlu0 %v3004_v51 }
 0x7ee   :  { %v3006_v8 = vpop.xlane.xlu0 %3005 }
 0x7ef   :  { %v3007_v38 = vrot.slane %v3006_v8, 4 }
 0x7f1   :  { %v3008_v54 = vadd.f32 %v3007_v38, %v3006_v8  ;;  %v9149_v8 = vld [vmem:[#allocation241_spill] sm:$0xff] }
 0x7f3   :  { %v3009_v6 = vrot.slane %v3008_v54, 2 }
 0x7f5   :  { %v3010_v61 = vadd.f32 %v3009_v6, %v3008_v54  ;;  %v9150_v54 = vld [vmem:[#allocation240_spill] sm:$0xff] }
 0x7f7   :  { %v3011_v10 = vrot.slane %v3010_v61, 1 }
 0x7f9   :  { %v3012_v48 = vadd.f32 %v3011_v10, %v3010_v61  ;;  %v9151_v61 = vld [vmem:[#allocation243_spill] sm:$0xff] }
 0x7fb   :  { %3293 = vpush %v3012_v48  ;;  %v9152_v48 = vld [vmem:[#allocation242_spill] sm:$0xff] }
 0x82c   :  { %s3294_s13 = spop %3293 }
 0x82d   :  { %v3014_v1 = vstv %s3294_s13 }
 0x82e   :  { %v3015_v26 = vmul.f32 7.629453e-06, %v3014_v1 }
 0x830   :  { %3377 = vrsqrt.f32 %v3015_v26  ;;  %vm3018_vm4 = vcmp.eq.f32.partialorder %v3015_v26, inf  ;;  %v3021_v34 = vand.u32 2147483648, %v3015_v26  ;;  %vm3020_vm5 = vcmp.eq.f32.partialorder %v3015_v26, 0.0 }
 0x83d   :  { %v3378_v13 = vpop.eup %3377 }
 0x83e   :  { %v3017_v4 = vmul.f32 %v3378_v13, %v3015_v26 }
 0x840   :  { %v3019_v7 = vsel %vm3018_vm4, %v3015_v26, %v3017_v4  ;;  %v9153_v26 = vld [vmem:[#allocation245_spill] sm:$0xff]  ;;  %v9154_v4 = vld [vmem:[#allocation244_spill] sm:$0xff] }
 0x841   :  { %v3022_v12 = vsel %vm3020_vm5, %v3021_v34, %v3019_v7  ;;  %v9155_v7 = vld [vmem:[#allocation253_spill] sm:$0xff] }
 0x842   :  { %v3023_v36 = vadd.f32 1e-05, %v3022_v12 }
 0x844   :  { %3379 = vrcp.f32 %v3023_v36  ;;  %v9156_v36 = vld [vmem:[#allocation246_spill] sm:$0xff] }
 0x851   :  { %v7162_v56 = vpop.eup %3379 }
 0x852   :  { %v3026_v41 = vmul.f32 %v7162_v56, %v9127_v16  ;;  %v3027_v11 = vmul.f32 %v7162_v56, %v9128_v45  ;;  %v3028_v43 = vmul.f32 %v7162_v56, %v9129_v2  ;;  %v3029_v58 = vmul.f32 %v7162_v56, %v9130_v23  ;;  %v9157_v45 = vld [vmem:[#allocation9_spill] sm:$0xff] }
 0x853   :  { %v3030_v3 = vmul.f32 %v7162_v56, %v9131_v50  ;;  %v3031_v46 = vmul.f32 %v7162_v56, %v9132_v27  ;;  %v3032_v62 = vmul.f32 %v7162_v56, %v9133_v21  ;;  %v3033_v39 = vmul.f32 %v7162_v56, %v9134_v15 }
 0x854   :  { %v3034_v60 = vmul.f32 %v7162_v56, %v9135_v14  ;;  %v3035_v22 = vmul.f32 %v7162_v56, %v9136_v49  ;;  %v3036_v29 = vmul.f32 %v7162_v56, %v9137_v28  ;;  %v3037_v63 = vmul.f32 %v7162_v56, %v9138_v9  ;;  %3058 = vst [vmem:[%s7519_s3] sm:$0xff] %v3026_v41 }
 0x855   :  { %3059 = vst.msk [vmem:[%s7519_s3 + $0x8] sm:$0xff] %vm1450_vm1, %v3027_v11  ;;  %3060 = vst [vmem:[%s7519_s3 + $0x10] sm:$0xff] %v3028_v43  ;;  %v3038_v17 = vmul.f32 %v7162_v56, %v9139_v33  ;;  %v3039_v19 = vmul.f32 %v7162_v56, %v9140_v32  ;;  %v3040_v18 = vmul.f32 %v7162_v56, %v9141_v35  ;;  %v9158_v43 = vld [vmem:[#allocation11_spill] sm:$0xff] }
 0x856   :  { %3061 = vst.msk [vmem:[%s7519_s3 + $0x18] sm:$0xff] %vm1450_vm1, %v3029_v58  ;;  %v3041_v37 = vmul.f32 %v7162_v56, %v9142_v30  ;;  %3062 = vst [vmem:[%s7519_s3 + $0x20] sm:$0xff] %v3030_v3  ;;  %v3042_v44 = vmul.f32 %v7162_v56, %v9143_v42  ;;  %v3043_v53 = vmul.f32 %v7162_v56, %v9144_v59  ;;  %v9159_v58 = vld [vmem:[#allocation8_spill] sm:$0xff]  ;;  %v9161_v3 = vld [vmem:[#allocation10_spill] sm:$0xff] }
 0x857   :  { %3063 = vst.msk [vmem:[%s7519_s3 + $0x28] sm:$0xff] %vm1450_vm1, %v3031_v46  ;;  %3064 = vst [vmem:[%s7519_s3 + $0x30] sm:$0xff] %v3032_v62  ;;  %v3044_v25 = vmul.f32 %v7162_v56, %v9145_v40  ;;  %v3045_v0 = vmul.f32 %v7162_v56, %v9146_v57  ;;  %v3046_v55 = vmul.f32 %v7162_v56, %v9147_v5  ;;  %v9162_v46 = vld [vmem:[#allocation15_spill] sm:$0xff]  ;;  %v9163_v62 = vld [vmem:[#allocation12_spill] sm:$0xff] }
 0x858   :  { %3065 = vst.msk [vmem:[%s7519_s3 + $0x38] sm:$0xff] %vm1450_vm1, %v3033_v39  ;;  %3066 = vst [vmem:[%s7519_s3 + $0x40] sm:$0xff] %v3034_v60  ;;  %v3047_v51 = vmul.f32 %v7162_v56, %v9148_v47  ;;  %v3048_v38 = vmul.f32 %v7162_v56, %v9149_v8  ;;  %v3049_v6 = vmul.f32 %v7162_v56, %v9150_v54  ;;  %v9164_v39 = vld [vmem:[#allocation17_spill] sm:$0xff]  ;;  %v9165_v60 = vld [vmem:[#allocation14_spill] sm:$0xff] }
 0x859   :  { %3067 = vst.msk [vmem:[%s7519_s3 + $0x48] sm:$0xff] %vm1450_vm1, %v3035_v22  ;;  %3068 = vst [vmem:[%s7519_s3 + $0x50] sm:$0xff] %v3036_v29  ;;  %v3050_v10 = vmul.f32 %v7162_v56, %v9151_v61  ;;  %v3051_v1 = vmul.f32 %v7162_v56, %v9152_v48  ;;  %v3052_v13 = vmul.f32 %v7162_v56, %v9153_v26  ;;  %v9166_v22 = vld [vmem:[#allocation19_spill] sm:$0xff]  ;;  %v9167_v29 = vld [vmem:[#allocation16_spill] sm:$0xff] }
 0x85a   :  { %3069 = vst.msk [vmem:[%s7519_s3 + $0x58] sm:$0xff] %vm1450_vm1, %v3037_v63  ;;  %3070 = vst [vmem:[%s7519_s3 + $0x60] sm:$0xff] %v3038_v17  ;;  %v3053_v34 = vmul.f32 %v7162_v56, %v9154_v4  ;;  %v3054_v12 = vmul.f32 %v7162_v56, %v9155_v7  ;;  %v3055_v16 = vmul.f32 %v7162_v56, %v9156_v36  ;;  %v9168_v63 = vld [vmem:[#allocation21_spill] sm:$0xff]  ;;  %v9169_v17 = vld [vmem:[#allocation18_spill] sm:$0xff] }
 0x85b   :  { %3071 = vst.msk [vmem:[%s7519_s3 + $0x68] sm:$0xff] %vm1450_vm1, %v3039_v19  ;;  %3072 = vst [vmem:[%s7519_s3 + $0x70] sm:$0xff] %v3040_v18  ;;  %v3056_v41 = vmul.f32 %v7162_v56, %v6426_v31  ;;  %v3057_v11 = vmul.f32 %v7162_v56, %v9157_v45  ;;  %v3090_v31 = vmul.f32 %v7162_v56, %v6682_v24  ;;  %v9170_v19 = vld [vmem:[#allocation23_spill] sm:$0xff]  ;;  %v9171_v18 = vld [vmem:[#allocation20_spill] sm:$0xff] }
 0x85c   :  { %3073 = vst.msk [vmem:[%s7519_s3 + $0x78] sm:$0xff] %vm1450_vm1, %v3041_v37  ;;  %3074 = vst [vmem:[%s7519_s3 + $0x80] sm:$0xff] %v3042_v44  ;;  %v3091_v2 = vmul.f32 %v7162_v56, %v6676_v52  ;;  %v3092_v23 = vmul.f32 %v7162_v56, %v9158_v43  ;;  %v3093_v50 = vmul.f32 %v7162_v56, %v9159_v58  ;;  %v9160_v52 = vld [vmem:[#allocation13_spill] sm:$0xff]  ;;  %v9173_v44 = vld [vmem:[#allocation22_spill] sm:$0xff] }
 0x85d   :  { %3075 = vst.msk [vmem:[%s7519_s3 + $0x88] sm:$0xff] %vm1450_vm1, %v3043_v53  ;;  %3076 = vst [vmem:[%s7519_s3 + $0x90] sm:$0xff] %v3044_v25  ;;  %v3094_v24 = vmul.f32 %v7162_v56, %v9160_v52  ;;  %v3095_v27 = vmul.f32 %v7162_v56, %v9161_v3  ;;  %v3096_v21 = vmul.f32 %v7162_v56, %v9162_v46  ;;  %v9172_v37 = vld [vmem:[#allocation25_spill] sm:$0xff]  ;;  %v9174_v53 = vld [vmem:[#allocation27_spill] sm:$0xff] }
 0x85e   :  { %3077 = vst.msk [vmem:[%s7519_s3 + $0x98] sm:$0xff] %vm1450_vm1, %v3045_v0  ;;  %3078 = vst [vmem:[%s7519_s3 + $0xa0] sm:$0xff] %v3046_v55  ;;  %v3097_v15 = vmul.f32 %v7162_v56, %v9163_v62  ;;  %v3098_v14 = vmul.f32 %v7162_v56, %v9164_v39  ;;  %v3099_v49 = vmul.f32 %v7162_v56, %v9165_v60  ;;  %v9175_v25 = vld [vmem:[#allocation24_spill] sm:$0xff]  ;;  %v9176_v0 = vld [vmem:[#allocation29_spill] sm:$0xff] }
 0x85f   :  { %3079 = vst.msk [vmem:[%s7519_s3 + $0xa8] sm:$0xff] %vm1450_vm1, %v3047_v51  ;;  %3080 = vst [vmem:[%s7519_s3 + $0xb0] sm:$0xff] %v3048_v38  ;;  %v3100_v28 = vmul.f32 %v7162_v56, %v9166_v22  ;;  %v3101_v9 = vmul.f32 %v7162_v56, %v9167_v29  ;;  %v3102_v33 = vmul.f32 %v7162_v56, %v9168_v63  ;;  %v9177_v55 = vld [vmem:[#allocation26_spill] sm:$0xff]  ;;  %v9178_v51 = vld [vmem:[#allocation31_spill] sm:$0xff] }
 0x860   :  { %3081 = vst.msk [vmem:[%s7519_s3 + $0xb8] sm:$0xff] %vm1450_vm1, %v3049_v6  ;;  %3082 = vst [vmem:[%s7519_s3 + $0xc0] sm:$0xff] %v3050_v10  ;;  %v3103_v32 = vmul.f32 %v7162_v56, %v9169_v17  ;;  %v3104_v35 = vmul.f32 %v7162_v56, %v9170_v19  ;;  %v3105_v30 = vmul.f32 %v7162_v56, %v9171_v18  ;;  %v9179_v38 = vld [vmem:[#allocation28_spill] sm:$0xff]  ;;  %v9180_v6 = vld [vmem:[#allocation33_spill] sm:$0xff] }
 0x861   :  { %3083 = vst.msk [vmem:[%s7519_s3 + $0xc8] sm:$0xff] %vm1450_vm1, %v3051_v1  ;;  %3084 = vst [vmem:[%s7519_s3 + $0xd0] sm:$0xff] %v3052_v13  ;;  %v3106_v42 = vmul.f32 %v7162_v56, %v9172_v37  ;;  %v3107_v59 = vmul.f32 %v7162_v56, %v9173_v44  ;;  %v3108_v40 = vmul.f32 %v7162_v56, %v9174_v53  ;;  %v9181_v10 = vld [vmem:[#allocation30_spill] sm:$0xff]  ;;  %v9182_v1 = vld [vmem:[#allocation35_spill] sm:$0xff] }
 0x862   :  { %3085 = vst.msk [vmem:[%s7519_s3 + $0xd8] sm:$0xff] %vm1450_vm1, %v3053_v34  ;;  %3086 = vst [vmem:[%s7519_s3 + $0xe0] sm:$0xff] %v3054_v12  ;;  %v3109_v57 = vmul.f32 %v7162_v56, %v9175_v25  ;;  %v3110_v5 = vmul.f32 %v7162_v56, %v9176_v0  ;;  %v3111_v47 = vmul.f32 %v7162_v56, %v9177_v55  ;;  %v9183_v13 = vld [vmem:[#allocation32_spill] sm:$0xff]  ;;  %v9184_v34 = vld [vmem:[#allocation37_spill] sm:$0xff] }
 0x863   :  { %3087 = vst.msk [vmem:[%s7519_s3 + $0xe8] sm:$0xff] %vm1450_vm1, %v3055_v16  ;;  %3088 = vst [vmem:[%s7519_s3 + $0xf0] sm:$0xff] %v3056_v41  ;;  %v3112_v8 = vmul.f32 %v7162_v56, %v9178_v51  ;;  %v3113_v54 = vmul.f32 %v7162_v56, %v9179_v38  ;;  %v3114_v61 = vmul.f32 %v7162_v56, %v9180_v6  ;;  %v9185_v12 = vld [vmem:[#allocation34_spill] sm:$0xff]  ;;  %v9186_v41 = vld [vmem:[#allocation36_spill] sm:$0xff] }
 0x864   :  { %3089 = vst.msk [vmem:[%s7519_s3 + $0xf8] sm:$0xff] %vm1450_vm1, %v3057_v11  ;;  %3243 = vst [vmem:[%s7519_s3 + $0x100] sm:$0xff] %v3090_v31  ;;  %v3115_v48 = vmul.f32 %v7162_v56, %v9181_v10  ;;  %v3116_v26 = vmul.f32 %v7162_v56, %v9182_v1  ;;  %v3117_v4 = vmul.f32 %v7162_v56, %v9183_v13 }
 0x865   :  { %3244 = vst.msk [vmem:[%s7519_s3 + $0x108] sm:$0xff] %vm1450_vm1, %v3091_v2  ;;  %3245 = vst [vmem:[%s7519_s3 + $0x110] sm:$0xff] %v3092_v23  ;;  %v3118_v7 = vmul.f32 %v7162_v56, %v9184_v34  ;;  %v3119_v36 = vmul.f32 %v7162_v56, %v9185_v12  ;;  %v3120_v16 = vmul.f32 %v7162_v56, %v6908_v20 }
 0x866   :  { %3246 = vst.msk [vmem:[%s7519_s3 + $0x118] sm:$0xff] %vm1450_vm1, %v3093_v50  ;;  %3247 = vst [vmem:[%s7519_s3 + $0x120] sm:$0xff] %v3094_v24  ;;  %v3121_v45 = vmul.f32 %v7162_v56, %v9186_v41 }
 0x867   :  { %3248 = vst.msk [vmem:[%s7519_s3 + $0x128] sm:$0xff] %vm1450_vm1, %v3095_v27  ;;  %3249 = vst [vmem:[%s7519_s3 + $0x130] sm:$0xff] %v3096_v21 }
 0x868   :  { %3250 = vst.msk [vmem:[%s7519_s3 + $0x138] sm:$0xff] %vm1450_vm1, %v3097_v15  ;;  %3251 = vst [vmem:[%s7519_s3 + $0x140] sm:$0xff] %v3098_v14 }
 0x869   :  { %3252 = vst.msk [vmem:[%s7519_s3 + $0x148] sm:$0xff] %vm1450_vm1, %v3099_v49  ;;  %3253 = vst [vmem:[%s7519_s3 + $0x150] sm:$0xff] %v3100_v28 }
 0x86a   :  { %3254 = vst.msk [vmem:[%s7519_s3 + $0x158] sm:$0xff] %vm1450_vm1, %v3101_v9  ;;  %3255 = vst [vmem:[%s7519_s3 + $0x160] sm:$0xff] %v3102_v33 }
 0x86b   :  { %3256 = vst.msk [vmem:[%s7519_s3 + $0x168] sm:$0xff] %vm1450_vm1, %v3103_v32  ;;  %3257 = vst [vmem:[%s7519_s3 + $0x170] sm:$0xff] %v3104_v35 }
 0x86c   :  { %3258 = vst.msk [vmem:[%s7519_s3 + $0x178] sm:$0xff] %vm1450_vm1, %v3105_v30  ;;  %3259 = vst [vmem:[%s7519_s3 + $0x180] sm:$0xff] %v3106_v42 }
 0x86d   :  { %3260 = vst.msk [vmem:[%s7519_s3 + $0x188] sm:$0xff] %vm1450_vm1, %v3107_v59  ;;  %3261 = vst [vmem:[%s7519_s3 + $0x190] sm:$0xff] %v3108_v40 }
 0x86e   :  { %3262 = vst.msk [vmem:[%s7519_s3 + $0x198] sm:$0xff] %vm1450_vm1, %v3109_v57  ;;  %3263 = vst [vmem:[%s7519_s3 + $0x1a0] sm:$0xff] %v3110_v5 }
 0x86f   :  { %3264 = vst.msk [vmem:[%s7519_s3 + $0x1a8] sm:$0xff] %vm1450_vm1, %v3111_v47  ;;  %3265 = vst [vmem:[%s7519_s3 + $0x1b0] sm:$0xff] %v3112_v8 }
 0x870   :  { %3266 = vst.msk [vmem:[%s7519_s3 + $0x1b8] sm:$0xff] %vm1450_vm1, %v3113_v54  ;;  %3267 = vst [vmem:[%s7519_s3 + $0x1c0] sm:$0xff] %v3114_v61 }
 0x871   :  { %3268 = vst.msk [vmem:[%s7519_s3 + $0x1c8] sm:$0xff] %vm1450_vm1, %v3115_v48  ;;  %3269 = vst [vmem:[%s7519_s3 + $0x1d0] sm:$0xff] %v3116_v26 }
 0x872   :  { %3270 = vst.msk [vmem:[%s7519_s3 + $0x1d8] sm:$0xff] %vm1450_vm1, %v3117_v4  ;;  %3271 = vst [vmem:[%s7519_s3 + $0x1e0] sm:$0xff] %v3118_v7 }
 0x873   :  { %3272 = vst.msk [vmem:[%s7519_s3 + $0x1e8] sm:$0xff] %vm1450_vm1, %v3119_v36  ;;  %3273 = vst [vmem:[%s7519_s3 + $0x1f0] sm:$0xff] %v3120_v16 }
 0x874   :  { %3274 = vst.msk [vmem:[%s7519_s3 + $0x1f8] sm:$0xff] %vm1450_vm1, %v3121_v45 }
 0x875   :  { %3159 = vsyncpa [#allocation3], 1 }
 0x876   :  { %3160 = vsyncpa [#allocation5], 1 }

</bundles_post_ra>
